<compile_context>
chip_gen: v5e
topology: v5e:2x2
jax: 0.10.0
libtpu: 0.0.40
codegen_flags: <defaults>
</compile_context>

<pallas_src>
import functools

import jax
import jax.numpy as jnp
from jax import lax
from jax.experimental import pallas as pl
from jax.experimental.pallas import tpu as pltpu

EPS = 1e-5


# ----------------------------------------------------------------------------
# Fused Pallas kernel: whole Bottleneck for `batch_tile` images per grid step.
# ----------------------------------------------------------------------------
def _bottleneck_kernel(x_ref, w1_ref, b1_ref, w2_ref, b2_ref, w3_ref, b3_ref,
                       o_ref, im2col_ref, *, H, W, planes, batch_tile,
                       matmul_dtype):
    P = planes
    HW = H * W
    M = batch_tile * HW              # rows handled per grid step
    PAD = W + 1                      # max |flat spatial shift| of a 3x3 tap
    K2 = 9 * P
    mm = matmul_dtype

    # ---------------- conv1 (1x1) + folded BN1 + ReLU ----------------------
    h1 = jnp.dot(x_ref[...].astype(mm), w1_ref[...],
                 preferred_element_type=jnp.float32)
    h1 = jnp.maximum(h1 + b1_ref[...], 0.0)          # (M, P) f32
    h1m = h1.astype(mm)

    # ---------------- boundary masks in *source* coordinates ---------------
    # H, W are powers of two, so % / // reduce to bitwise and / shifts.
    lin = lax.broadcasted_iota(jnp.int32, (M, 1), 0)
    xs = lin & (W - 1)               # x coordinate of the source row
    rs = lin & (HW - 1)              # y*W + x within the source image
    all_ok = xs >= 0
    row_ok = (rs < HW - W, all_ok, rs >= W)          # dy = 0, 1, 2
    col_ok = (xs < W - 1, all_ok, xs > 0)            # dx = 0, 1, 2

    # ---------------- scatter-im2col into the VMEM scratch -----------------
    # Column window k = dy*3+dx of the centre block [PAD, PAD+M) holds the tap
    # h1[y+dy-1, x+dx-1] (0 outside the image).  Each tap is ONE shifted store
    # of the full h1; the few centre rows a shifted store cannot reach are
    # pre-zeroed by two (PAD, 9P) edge strips.  Everything read below is
    # written this very step, so no stale data and no full-buffer zeroing.
    edge = jnp.zeros((PAD, K2), mm)
    im2col_ref[PAD:PAD + PAD, :] = edge
    im2col_ref[M:PAD + M, :] = edge
    zero = jnp.zeros_like(h1m)
    for k in range(9):                               # static unroll (9 stores)
        dy, dx = divmod(k, 3)
        s = (dy - 1) * W + (dx - 1)                  # flat spatial shift
        tap = jnp.where(row_ok[dy] & col_ok[dx], h1m, zero)
        im2col_ref[PAD - s:PAD - s + M, k * P:(k + 1) * P] = tap

    # ---------------- conv2 (3x3, pad=1) as ONE K=9P matmul ----------------
    h2 = jnp.dot(im2col_ref[PAD:PAD + M, :], w2_ref[...],
                 preferred_element_type=jnp.float32)
    h2 = jnp.maximum(h2 + b2_ref[...], 0.0)          # (M, P) f32

    # ---------------- conv3 (1x1) + folded BN3 + residual + ReLU -----------
    out = jnp.dot(h2.astype(mm), w3_ref[...],
                  preferred_element_type=jnp.float32)
    out = out + b3_ref[...] + x_ref[...]             # residual re-read (f32)
    o_ref[...] = jnp.maximum(out, 0.0).astype(o_ref.dtype)


# ----------------------------------------------------------------------------
# Parameter construction (shapes from Bottleneck.__init__, OIHW conv weights)
# ----------------------------------------------------------------------------
def make_params(key, inplanes, planes):
    expansion = 4
    keys = jax.random.split(key, 15)

    def conv_w(k, shape):
        return 0.1 * jax.random.normal(k, shape, dtype=jnp.float32)

    def bn_params(kg, kb, km, kv, c):
        gamma = 1.0 + 0.1 * jax.random.normal(kg, (c,), dtype=jnp.float32)
        beta = 0.1 * jax.random.normal(kb, (c,), dtype=jnp.float32)
        r_mean = 0.1 * jax.random.normal(km, (c,), dtype=jnp.float32)
        r_var = 1.0 + 0.1 * jnp.abs(jax.random.normal(kv, (c,), dtype=jnp.float32))
        return gamma, beta, r_mean, r_var

    p = {}
    p["w1"] = conv_w(keys[0], (planes, inplanes, 1, 1))
    p["w2"] = conv_w(keys[1], (planes, planes, 3, 3))
    p["w3"] = conv_w(keys[2], (planes * expansion, planes, 1, 1))
    p["bn1"] = bn_params(keys[3], keys[4], keys[5], keys[6], planes)
    p["bn2"] = bn_params(keys[7], keys[8], keys[9], keys[10], planes)
    p["bn3"] = bn_params(keys[11], keys[12], keys[13], keys[14], planes * expansion)
    return p


def _fold_bn(bn):
    gamma, beta, mean, var = bn
    scale = gamma / jnp.sqrt(var + EPS)
    return scale, beta - mean * scale


def _prep_weights(params, matmul_dtype):
    """Fold eval-mode BN into the weight columns; pre-cast to the MXU dtype."""
    planes = params["w1"].shape[0]
    s1, b1 = _fold_bn(params["bn1"])
    s2, b2 = _fold_bn(params["bn2"])
    s3, b3 = _fold_bn(params["bn3"])
    w1 = (params["w1"][:, :, 0, 0].T * s1[None, :]).astype(matmul_dtype)
    # (O, I, 3, 3) -> (dy, dx, in, out) -> (9P, P); row index = (dy*3+dx)*P + in
    w2 = (jnp.transpose(params["w2"], (2, 3, 1, 0)).reshape(9 * planes, planes)
          * s2[None, :]).astype(matmul_dtype)
    w3 = (params["w3"][:, :, 0, 0].T * s3[None, :]).astype(matmul_dtype)
    return (w1, b1.reshape(1, -1), w2, b2.reshape(1, -1),
            w3, b3.reshape(1, -1))


# ----------------------------------------------------------------------------
# Bottleneck forward (stride=1, downsample=None) using the fused Pallas kernel
# ----------------------------------------------------------------------------
def bottleneck_forward(x_nchw, params, *, matmul_dtype=jnp.bfloat16,
                       batch_tile=None):
    N, Cin, H, W = x_nchw.shape
    planes = params["w1"].shape[0]
    Cout = params["w3"].shape[0]
    assert Cin == Cout, "downsample=None requires inplanes == planes * 4"
    assert (H & (H - 1)) == 0 and (W & (W - 1)) == 0, \
        "in-kernel boundary masks assume power-of-two H, W"
    HW = H * W

    # Rows per grid step (cap M at 512 to keep vreg/VMEM pressure modest).
    if batch_tile is None:
        batch_tile = 1
        while batch_tile * 2 * HW <= 512 and N % (batch_tile * 2) == 0:
            batch_tile *= 2
    assert N % batch_tile == 0
    M = batch_tile * HW
    steps = N // batch_tile

    # NCHW -> NHWC -> (N*H*W, C) rows (lane-dense: C = 128).
    x_rows = jnp.transpose(x_nchw, (0, 2, 3, 1)).reshape(N * HW, Cin)
    w1, b1, w2, b2, w3, b3 = _prep_weights(params, matmul_dtype)

    kernel = functools.partial(
        _bottleneck_kernel, H=H, W=W, planes=planes, batch_tile=batch_tile,
        matmul_dtype=matmul_dtype)

    wbytes = ((w1.size + w2.size + w3.size) * jnp.dtype(matmul_dtype).itemsize
              + 4 * (b1.size + b2.size + b3.size))
    flops = 2 * N * HW * (Cin * planes + 9 * planes * planes + planes * Cout)
    bytes_accessed = 4 * (x_rows.size + N * HW * Cout) + steps * wbytes

    out_rows = pl.pallas_call(
        kernel,
        out_shape=jax.ShapeDtypeStruct((N * HW, Cout), jnp.float32),
        grid=(steps,),
        in_specs=[
            pl.BlockSpec((M, Cin), lambda n: (n, 0)),            # x rows
            pl.BlockSpec((Cin, planes), lambda n: (0, 0)),       # w1 (BN folded)
            pl.BlockSpec((1, planes), lambda n: (0, 0)),         # b1
            pl.BlockSpec((9 * planes, planes), lambda n: (0, 0)),  # w2 (BN folded)
            pl.BlockSpec((1, planes), lambda n: (0, 0)),         # b2
            pl.BlockSpec((planes, Cout), lambda n: (0, 0)),      # w3 (BN folded)
            pl.BlockSpec((1, Cout), lambda n: (0, 0)),           # b3
        ],
        out_specs=pl.BlockSpec((M, Cout), lambda n: (n, 0)),
        scratch_shapes=[
            pltpu.VMEM((M + 2 * (W + 1), 9 * planes), matmul_dtype)],
        compiler_params=pltpu.CompilerParams(
            dimension_semantics=("parallel",)),
        cost_estimate=pl.CostEstimate(flops=flops, transcendentals=0,
                                      bytes_accessed=int(bytes_accessed)),
    )(x_rows, w1, b1, w2, b2, w3, b3)

    return jnp.transpose(out_rows.reshape(N, H, W, Cout), (0, 3, 1, 2))


# ----------------------------------------------------------------------------
# Pure-JAX reference (lax.conv, NCHW, eval-mode BN) for validation
# ----------------------------------------------------------------------------
def _ref_conv(x, w, padding):
    return lax.conv_general_dilated(
        x, w, (1, 1), padding, dimension_numbers=("NCHW", "OIHW", "NCHW"))


def _ref_bn(x, bn):
    gamma, beta, mean, var = bn
    inv = gamma / jnp.sqrt(var + EPS)
    return (x - mean[None, :, None, None]) * inv[None, :, None, None] \
        + beta[None, :, None, None]


def bottleneck_reference(x, p):
    out = jax.nn.relu(_ref_bn(_ref_conv(x, p["w1"], "VALID"), p["bn1"]))
    out = jax.nn.relu(_ref_bn(_ref_conv(out, p["w2"], [(1, 1), (1, 1)]), p["bn2"]))
    out = _ref_bn(_ref_conv(out, p["w3"], "VALID"), p["bn3"])
    return jax.nn.relu(out + x)


# ----------------------------------------------------------------------------
if __name__ == "__main__":
    # inplanes == planes * expansion (downsample=None); lane-dense Cin/Cout=128.
    inplanes, planes = 128, 32
    N, H, W = 4, 16, 16

    key = jax.random.PRNGKey(0)
    kx, kp = jax.random.split(key)
    x = jax.random.normal(kx, (N, inplanes, H, W), dtype=jnp.float32)
    params = make_params(kp, inplanes, planes)

    ref = jax.block_until_ready(bottleneck_reference(x, params))

    # Exact-math check of the fused kernel (f32 matmul path).
    out_f32 = jax.block_until_ready(
        jax.jit(functools.partial(bottleneck_forward,
                                  matmul_dtype=jnp.float32))(x, params))
    assert out_f32.shape == ref.shape == (N, planes * 4, H, W)
    err_f32 = jnp.max(jnp.abs(out_f32 - ref))
    assert jnp.allclose(out_f32, ref, atol=1e-3, rtol=1e-3), \
        f"f32 path max abs err = {err_f32}"

    # Default fast path: bf16 MXU operands, f32 accumulation.
    out_bf16 = jax.block_until_ready(jax.jit(bottleneck_forward)(x, params))
    err_bf16 = jnp.max(jnp.abs(out_bf16 - ref))
    assert jnp.allclose(out_bf16, ref, atol=2.5e-1, rtol=5e-2), \
        f"bf16 path max abs err = {err_bf16}"

    print("KERNEL_OK")
</pallas_src>

<mosaic_0001>
module attributes {stable_mosaic.version = 11 : i64} {
  func.func @_bottleneck_kernel(%arg0: i32, %arg1: memref<512x128xf32, #tpu.memory_space<vmem>>, %arg2: memref<128x32xf32, #tpu.memory_space<vmem>>, %arg3: memref<1x32xf32, #tpu.memory_space<vmem>>, %arg4: memref<288x32xf32, #tpu.memory_space<vmem>>, %arg5: memref<1x32xf32, #tpu.memory_space<vmem>>, %arg6: memref<32x128xf32, #tpu.memory_space<vmem>>, %arg7: memref<1x128xf32, #tpu.memory_space<vmem>>, %arg8: memref<512x128xf32, #tpu.memory_space<vmem>>, %arg9: memref<546x288xf32, #tpu.memory_space<vmem>>) attributes {dimension_semantics = [#tpu.dimension_semantics<parallel>], iteration_bounds = array<i64: 2>, scalar_prefetch = 0 : i64, scratch_operands = 1 : i64, tpu.core_type = #tpu.core_type<tc>, window_params = [{transform_indices = @transform_0, window_bounds = array<i64: 512, 128>}, {pipeline_mode = #tpu.pipeline_mode<synchronous>, transform_indices = @transform_1, window_bounds = array<i64: 128, 32>}, {pipeline_mode = #tpu.pipeline_mode<synchronous>, transform_indices = @transform_2, window_bounds = array<i64: 1, 32>}, {pipeline_mode = #tpu.pipeline_mode<synchronous>, transform_indices = @transform_3, window_bounds = array<i64: 288, 32>}, {pipeline_mode = #tpu.pipeline_mode<synchronous>, transform_indices = @transform_4, window_bounds = array<i64: 1, 32>}, {pipeline_mode = #tpu.pipeline_mode<synchronous>, transform_indices = @transform_5, window_bounds = array<i64: 32, 128>}, {pipeline_mode = #tpu.pipeline_mode<synchronous>, transform_indices = @transform_6, window_bounds = array<i64: 1, 128>}, {transform_indices = @transform_7, window_bounds = array<i64: 512, 128>}]} {
    %c0 = arith.constant 0 : index
    %c0_0 = arith.constant 0 : index
    %0 = vector.load %arg1[%c0, %c0_0] : memref<512x128xf32, #tpu.memory_space<vmem>>, vector<512x128xf32>
    %c0_1 = arith.constant 0 : index
    %c0_2 = arith.constant 0 : index
    %1 = vector.load %arg2[%c0_1, %c0_2] : memref<128x32xf32, #tpu.memory_space<vmem>>, vector<128x32xf32>
    %cst = arith.constant dense<0.000000e+00> : vector<512x32xf32>
    %2 = tpu.matmul %0, %1, %cst {dimension_numbers = #tpu.dot_dimension_numbers<[1], [0], [0], [1], [0, 0, 1, 1], [], []>} : vector<512x128xf32>, vector<128x32xf32>, vector<512x32xf32> -> vector<512x32xf32>
    %c0_3 = arith.constant 0 : index
    %c0_4 = arith.constant 0 : index
    %3 = vector.load %arg3[%c0_3, %c0_4] : memref<1x32xf32, #tpu.memory_space<vmem>>, vector<1x32xf32>
    %4 = vector.broadcast %3 : vector<1x32xf32> to vector<512x32xf32>
    %5 = arith.addf %2, %4 : vector<512x32xf32>
    %cst_5 = arith.constant 0.000000e+00 : f32
    %6 = vector.broadcast %cst_5 : f32 to vector<512x32xf32>
    %7 = arith.maximumf %5, %6 : vector<512x32xf32>
    %8 = tpu.iota {dimensions = array<i32: 0>} : vector<512x1xi32>
    %c15_i32 = arith.constant 15 : i32
    %9 = vector.broadcast %c15_i32 : i32 to vector<512x1xi32>
    %10 = arith.andi %8, %9 : vector<512x1xi32>
    %c255_i32 = arith.constant 255 : i32
    %11 = vector.broadcast %c255_i32 : i32 to vector<512x1xi32>
    %12 = arith.andi %8, %11 : vector<512x1xi32>
    %c0_i32 = arith.constant 0 : i32
    %13 = vector.broadcast %c0_i32 : i32 to vector<512x1xi32>
    %14 = arith.cmpi sge, %10, %13 : vector<512x1xi32>
    %c240_i32 = arith.constant 240 : i32
    %15 = vector.broadcast %c240_i32 : i32 to vector<512x1xi32>
    %16 = arith.cmpi slt, %12, %15 : vector<512x1xi32>
    %c16_i32 = arith.constant 16 : i32
    %17 = vector.broadcast %c16_i32 : i32 to vector<512x1xi32>
    %18 = arith.cmpi sge, %12, %17 : vector<512x1xi32>
    %c15_i32_6 = arith.constant 15 : i32
    %19 = vector.broadcast %c15_i32_6 : i32 to vector<512x1xi32>
    %20 = arith.cmpi slt, %10, %19 : vector<512x1xi32>
    %c0_i32_7 = arith.constant 0 : i32
    %21 = vector.broadcast %c0_i32_7 : i32 to vector<512x1xi32>
    %22 = arith.cmpi sgt, %10, %21 : vector<512x1xi32>
    %cst_8 = arith.constant 0.000000e+00 : f32
    %23 = vector.broadcast %cst_8 : f32 to vector<17x288xf32>
    %c17 = arith.constant 17 : index
    %c0_9 = arith.constant 0 : index
    %24 = vector.load %arg9[%c17, %c0_9] : memref<546x288xf32, #tpu.memory_space<vmem>>, vector<17x288xf32>
    tpu.vector_store %arg9[%c17, %c0_9], %23 {strides = array<i32>} : memref<546x288xf32, #tpu.memory_space<vmem>>, vector<17x288xf32>,
    %c512 = arith.constant 512 : index
    %c0_10 = arith.constant 0 : index
    %25 = vector.load %arg9[%c512, %c0_10] : memref<546x288xf32, #tpu.memory_space<vmem>>, vector<17x288xf32>
    tpu.vector_store %arg9[%c512, %c0_10], %23 {strides = array<i32>} : memref<546x288xf32, #tpu.memory_space<vmem>>, vector<17x288xf32>,
    %cst_11 = arith.constant 0.000000e+00 : f32
    %26 = vector.broadcast %cst_11 : f32 to vector<512x32xf32>
    %27 = arith.andi %16, %20 : vector<512x1xi1>
    %28 = vector.shape_cast %27 : vector<512x1xi1> to vector<512x1xi1>
    %29 = vector.broadcast %28 : vector<512x1xi1> to vector<512x32xi1>
    %30 = arith.select %29, %7, %26 : vector<512x32xi1>, vector<512x32xf32>
    %c34 = arith.constant 34 : index
    %c0_12 = arith.constant 0 : index
    %31 = vector.load %arg9[%c34, %c0_12] : memref<546x288xf32, #tpu.memory_space<vmem>>, vector<512x32xf32>
    tpu.vector_store %arg9[%c34, %c0_12], %30 {strides = array<i32>} : memref<546x288xf32, #tpu.memory_space<vmem>>, vector<512x32xf32>,
    %32 = arith.andi %16, %14 : vector<512x1xi1>
    %33 = vector.shape_cast %32 : vector<512x1xi1> to vector<512x1xi1>
    %34 = vector.broadcast %33 : vector<512x1xi1> to vector<512x32xi1>
    %35 = arith.select %34, %7, %26 : vector<512x32xi1>, vector<512x32xf32>
    %c33 = arith.constant 33 : index
    %c32 = arith.constant 32 : index
    %36 = vector.load %arg9[%c33, %c32] : memref<546x288xf32, #tpu.memory_space<vmem>>, vector<512x32xf32>
    tpu.vector_store %arg9[%c33, %c32], %35 {strides = array<i32>} : memref<546x288xf32, #tpu.memory_space<vmem>>, vector<512x32xf32>,
    %37 = arith.andi %16, %22 : vector<512x1xi1>
    %38 = vector.shape_cast %37 : vector<512x1xi1> to vector<512x1xi1>
    %39 = vector.broadcast %38 : vector<512x1xi1> to vector<512x32xi1>
    %40 = arith.select %39, %7, %26 : vector<512x32xi1>, vector<512x32xf32>
    %c32_13 = arith.constant 32 : index
    %c64 = arith.constant 64 : index
    %41 = vector.load %arg9[%c32_13, %c64] : memref<546x288xf32, #tpu.memory_space<vmem>>, vector<512x32xf32>
    tpu.vector_store %arg9[%c32_13, %c64], %40 {strides = array<i32>} : memref<546x288xf32, #tpu.memory_space<vmem>>, vector<512x32xf32>,
    %42 = arith.andi %14, %20 : vector<512x1xi1>
    %43 = vector.shape_cast %42 : vector<512x1xi1> to vector<512x1xi1>
    %44 = vector.broadcast %43 : vector<512x1xi1> to vector<512x32xi1>
    %45 = arith.select %44, %7, %26 : vector<512x32xi1>, vector<512x32xf32>
    %c18 = arith.constant 18 : index
    %c96 = arith.constant 96 : index
    %46 = vector.load %arg9[%c18, %c96] : memref<546x288xf32, #tpu.memory_space<vmem>>, vector<512x32xf32>
    tpu.vector_store %arg9[%c18, %c96], %45 {strides = array<i32>} : memref<546x288xf32, #tpu.memory_space<vmem>>, vector<512x32xf32>,
    %47 = arith.andi %14, %14 : vector<512x1xi1>
    %48 = vector.shape_cast %47 : vector<512x1xi1> to vector<512x1xi1>
    %49 = vector.broadcast %48 : vector<512x1xi1> to vector<512x32xi1>
    %50 = arith.select %49, %7, %26 : vector<512x32xi1>, vector<512x32xf32>
    %c17_14 = arith.constant 17 : index
    %c128 = arith.constant 128 : index
    %51 = vector.load %arg9[%c17_14, %c128] : memref<546x288xf32, #tpu.memory_space<vmem>>, vector<512x32xf32>
    tpu.vector_store %arg9[%c17_14, %c128], %50 {strides = array<i32>} : memref<546x288xf32, #tpu.memory_space<vmem>>, vector<512x32xf32>,
    %52 = arith.andi %14, %22 : vector<512x1xi1>
    %53 = vector.shape_cast %52 : vector<512x1xi1> to vector<512x1xi1>
    %54 = vector.broadcast %53 : vector<512x1xi1> to vector<512x32xi1>
    %55 = arith.select %54, %7, %26 : vector<512x32xi1>, vector<512x32xf32>
    %c16 = arith.constant 16 : index
    %c160 = arith.constant 160 : index
    %56 = vector.load %arg9[%c16, %c160] : memref<546x288xf32, #tpu.memory_space<vmem>>, vector<512x32xf32>
    tpu.vector_store %arg9[%c16, %c160], %55 {strides = array<i32>} : memref<546x288xf32, #tpu.memory_space<vmem>>, vector<512x32xf32>,
    %57 = arith.andi %18, %20 : vector<512x1xi1>
    %58 = vector.shape_cast %57 : vector<512x1xi1> to vector<512x1xi1>
    %59 = vector.broadcast %58 : vector<512x1xi1> to vector<512x32xi1>
    %60 = arith.select %59, %7, %26 : vector<512x32xi1>, vector<512x32xf32>
    %c2 = arith.constant 2 : index
    %c192 = arith.constant 192 : index
    %61 = vector.load %arg9[%c2, %c192] : memref<546x288xf32, #tpu.memory_space<vmem>>, vector<512x32xf32>
    tpu.vector_store %arg9[%c2, %c192], %60 {strides = array<i32>} : memref<546x288xf32, #tpu.memory_space<vmem>>, vector<512x32xf32>,
    %62 = arith.andi %18, %14 : vector<512x1xi1>
    %63 = vector.shape_cast %62 : vector<512x1xi1> to vector<512x1xi1>
    %64 = vector.broadcast %63 : vector<512x1xi1> to vector<512x32xi1>
    %65 = arith.select %64, %7, %26 : vector<512x32xi1>, vector<512x32xf32>
    %c1 = arith.constant 1 : index
    %c224 = arith.constant 224 : index
    %66 = vector.load %arg9[%c1, %c224] : memref<546x288xf32, #tpu.memory_space<vmem>>, vector<512x32xf32>
    tpu.vector_store %arg9[%c1, %c224], %65 {strides = array<i32>} : memref<546x288xf32, #tpu.memory_space<vmem>>, vector<512x32xf32>,
    %67 = arith.andi %18, %22 : vector<512x1xi1>
    %68 = vector.shape_cast %67 : vector<512x1xi1> to vector<512x1xi1>
    %69 = vector.broadcast %68 : vector<512x1xi1> to vector<512x32xi1>
    %70 = arith.select %69, %7, %26 : vector<512x32xi1>, vector<512x32xf32>
    %c0_15 = arith.constant 0 : index
    %c256 = arith.constant 256 : index
    %71 = vector.load %arg9[%c0_15, %c256] : memref<546x288xf32, #tpu.memory_space<vmem>>, vector<512x32xf32>
    tpu.vector_store %arg9[%c0_15, %c256], %70 {strides = array<i32>} : memref<546x288xf32, #tpu.memory_space<vmem>>, vector<512x32xf32>,
    %c17_16 = arith.constant 17 : index
    %c0_17 = arith.constant 0 : index
    %72 = vector.load %arg9[%c17_16, %c0_17] : memref<546x288xf32, #tpu.memory_space<vmem>>, vector<512x288xf32>
    %c0_18 = arith.constant 0 : index
    %c0_19 = arith.constant 0 : index
    %73 = vector.load %arg4[%c0_18, %c0_19] : memref<288x32xf32, #tpu.memory_space<vmem>>, vector<288x32xf32>
    %cst_20 = arith.constant dense<0.000000e+00> : vector<512x32xf32>
    %74 = tpu.matmul %72, %73, %cst_20 {dimension_numbers = #tpu.dot_dimension_numbers<[1], [0], [0], [1], [0, 0, 1, 1], [], []>} : vector<512x288xf32>, vector<288x32xf32>, vector<512x32xf32> -> vector<512x32xf32>
    %c0_21 = arith.constant 0 : index
    %c0_22 = arith.constant 0 : index
    %75 = vector.load %arg5[%c0_21, %c0_22] : memref<1x32xf32, #tpu.memory_space<vmem>>, vector<1x32xf32>
    %76 = vector.broadcast %75 : vector<1x32xf32> to vector<512x32xf32>
    %77 = arith.addf %74, %76 : vector<512x32xf32>
    %cst_23 = arith.constant 0.000000e+00 : f32
    %78 = vector.broadcast %cst_23 : f32 to vector<512x32xf32>
    %79 = arith.maximumf %77, %78 : vector<512x32xf32>
    %c0_24 = arith.constant 0 : index
    %c0_25 = arith.constant 0 : index
    %80 = vector.load %arg6[%c0_24, %c0_25] : memref<32x128xf32, #tpu.memory_space<vmem>>, vector<32x128xf32>
    %cst_26 = arith.constant dense<0.000000e+00> : vector<512x128xf32>
    %81 = tpu.matmul %79, %80, %cst_26 {dimension_numbers = #tpu.dot_dimension_numbers<[1], [0], [0], [1], [0, 0, 1, 1], [], []>} : vector<512x32xf32>, vector<32x128xf32>, vector<512x128xf32> -> vector<512x128xf32>
    %c0_27 = arith.constant 0 : index
    %c0_28 = arith.constant 0 : index
    %82 = vector.load %arg7[%c0_27, %c0_28] : memref<1x128xf32, #tpu.memory_space<vmem>>, vector<1x128xf32>
    %83 = vector.broadcast %82 : vector<1x128xf32> to vector<512x128xf32>
    %84 = arith.addf %81, %83 : vector<512x128xf32>
    %c0_29 = arith.constant 0 : index
    %c0_30 = arith.constant 0 : index
    %85 = vector.load %arg1[%c0_29, %c0_30] : memref<512x128xf32, #tpu.memory_space<vmem>>, vector<512x128xf32>
    %86 = arith.addf %84, %85 : vector<512x128xf32>
    %cst_31 = arith.constant 0.000000e+00 : f32
    %87 = vector.broadcast %cst_31 : f32 to vector<512x128xf32>
    %88 = arith.maximumf %86, %87 : vector<512x128xf32>
    %c0_32 = arith.constant 0 : index
    %c0_33 = arith.constant 0 : index
    %89 = vector.load %arg8[%c0_32, %c0_33] : memref<512x128xf32, #tpu.memory_space<vmem>>, vector<512x128xf32>
    tpu.vector_store %arg8[%c0_32, %c0_33], %88 {strides = array<i32>} : memref<512x128xf32, #tpu.memory_space<vmem>>, vector<512x128xf32>,
    return
  }
  func.func @transform_0(%arg0: i32) -> (i32, i32) {
    %c0_i32 = arith.constant 0 : i32
    %c0_i32_0 = arith.constant 0 : i32
    return %arg0, %c0_i32 : i32, i32
  }
  func.func @transform_1(%arg0: i32) -> (i32, i32) {
    %c0_i32 = arith.constant 0 : i32
    %c0_i32_0 = arith.constant 0 : i32
    %c0_i32_1 = arith.constant 0 : i32
    return %c0_i32, %c0_i32_0 : i32, i32
  }
  func.func @transform_2(%arg0: i32) -> (i32, i32) {
    %c0_i32 = arith.constant 0 : i32
    %c0_i32_0 = arith.constant 0 : i32
    %c0_i32_1 = arith.constant 0 : i32
    return %c0_i32, %c0_i32_0 : i32, i32
  }
  func.func @transform_3(%arg0: i32) -> (i32, i32) {
    %c0_i32 = arith.constant 0 : i32
    %c0_i32_0 = arith.constant 0 : i32
    %c0_i32_1 = arith.constant 0 : i32
    return %c0_i32, %c0_i32_0 : i32, i32
  }
  func.func @transform_4(%arg0: i32) -> (i32, i32) {
    %c0_i32 = arith.constant 0 : i32
    %c0_i32_0 = arith.constant 0 : i32
    %c0_i32_1 = arith.constant 0 : i32
    return %c0_i32, %c0_i32_0 : i32, i32
  }
  func.func @transform_5(%arg0: i32) -> (i32, i32) {
    %c0_i32 = arith.constant 0 : i32
    %c0_i32_0 = arith.constant 0 : i32
    %c0_i32_1 = arith.constant 0 : i32
    return %c0_i32, %c0_i32_0 : i32, i32
  }
  func.func @transform_6(%arg0: i32) -> (i32, i32) {
    %c0_i32 = arith.constant 0 : i32
    %c0_i32_0 = arith.constant 0 : i32
    %c0_i32_1 = arith.constant 0 : i32
    return %c0_i32, %c0_i32_0 : i32, i32
  }
  func.func @transform_7(%arg0: i32) -> (i32, i32) {
    %c0_i32 = arith.constant 0 : i32
    %c0_i32_0 = arith.constant 0 : i32
    return %arg0, %c0_i32 : i32, i32
  }
}

</mosaic_0001>

<bundles_post_ra>
// kernel: bottleneck_forward.1
= control target key start
LH: loop header
LB: loop body
LE: loop exit
PB: predicated region body
PF: predicated region fallthrough
CT: control target
= control target key end

     0   :  { %12 = vsyncpa [#allocation4], 0  ;;  %s13778_s0 = inlined_call_operand.vmem [shape: f32[1024,128], index: 0, kind: input, shape index: {}]   ;;  %s13779_s1 = inlined_call_operand.vmem [shape: f32[128,32], index: 1, kind: input, shape index: {}]   ;;  %s13780_s2 = inlined_call_operand.vmem [shape: f32[1,32], index: 2, kind: input, shape index: {}]   ;;  %s13781_s3 = inlined_call_operand.vmem [shape: f32[288,32], index: 3, kind: input, shape index: {}]   ;;  %s13782_s4 = inlined_call_operand.vmem [shape: f32[1,32], index: 4, kind: input, shape index: {}]   ;;  %s13783_s5 = inlined_call_operand.vmem [shape: f32[32,128], index: 5, kind: input, shape index: {}]   ;;  %s13784_s6 = inlined_call_operand.vmem [shape: f32[1,128], index: 6, kind: input, shape index: {}]   ;;  %s13785_s7 = inlined_call_operand.hbm [shape: f32[1024,128], index: 7, kind: output, shape index: {}]  }
   0x1   :  { %14 = vsyncpa [#allocation4 + $0x1], 0  ;;  %s9450_s24 = smov 0   ;;  %s9452_s25 = smov 0  }
   0x2   :  { %s9454_s26 = smov 0   ;;  %s9456_s27 = smov 0  }
   0x3 LB: > { %s9471_s28 = sadd.s32 4294967295, %s9402_s27   ;;  %s9084_s29 = sadd.s32 4294967294, %s9402_s27   ;;  %s9402_s27 = sphi %s9456_s27, %s14465_s27   ;;  %s9398_s26 = sphi %s9454_s26, %s14464_s26   ;;  %s9394_s25 = sphi %s9452_s25, %s14463_s25   ;;  %s9390_s24 = sphi %s9450_s24, %s14462_s24  }
   0x4   : > { %s9475_s30 = sadd.s32 1, %s9402_s27   ;;  %s179_s8 = sadd.s32 1, %s9398_s26 }
   0x5   : > { %s176_s9 = ssub.s32 %s9402_s27, %s9475_s30  ;;  %p189_p0 = scmp.ne.s32.totalorder %s9398_s26, %s9394_s25 }
   0x6   : > { %p177_p1 = scmp.eq.s32.totalorder %s176_s9, 0  ;;  %p190_p2 = scmp.eq.s32.totalorder %s9471_s28, 1 }
   0x7   : > { %p195_p3 = scmp.ne.s32.totalorder %s9394_s25, %s9390_s24  ;;  %p196_p4 = scmp.eq.s32.totalorder %s9084_s29, 1 }
   0x8   : > { %s9486_s10 = scalar_select %p177_p1, %s9398_s26, %s179_s8  }
   0x9   : > { %p9488_p5 = por %p190_p2, %p189_p0  ;;  %p9492_p6 = por %p196_p4, %p195_p3 }
   0xa   : > { %p9087_p7 = scmp.ge.s32.totalorder %s9402_s27, 1  ;;  %p241_p8 = scmp.lt.s32.totalorder %s9402_s27, 3 }
   0xc   : > { %p242_p9 = pnand %p9087_p7, %p241_p8 }
   0xe   : > { %245 = sbr.rel (%p242_p9) target bundleno = 1647 (0x66f), region = 48 }
  0x13   : > { %v359_v0 = vld [vmem:[%s13779_s1 + $0x78] sm:$0xff]  ;;  %v358_v1 = vld [vmem:[%s13779_s1 + $0x70] sm:$0xff]  ;;  %v357_v2 = vld [vmem:[%s13779_s1 + $0x68] sm:$0xff]  ;;  %s9089_s15 = sshll.u32 %s9471_s28, 6  ;;  %v9404_v44 = vmov 0.0   ;;  %s9405_s22 = smov 32   ;;  %v637_v57 = vlaneseq }
  0x14   : > { %364 = vmatpush.msra.mxu0 %v359_v0  ;;  %9225 = vmatpush.msra.mxu1 %v359_v0  ;;  %v356_v3 = vld [vmem:[%s13779_s1 + $0x60] sm:$0xff]  ;;  %v355_v4 = vld [vmem:[%s13779_s1 + $0x58] sm:$0xff]  ;;  %v354_v5 = vld [vmem:[%s13779_s1 + $0x50] sm:$0xff]  ;;  %p274_p10 = scmp.lt.s32.totalorder %s9089_s15, 127  ;;  %v9581_v45 = vrot.slane %v9404_v44, 7  ;;  %1154 = vst [vmem:[#allocation2 + $0x48] sm:$0xff] %v9404_v44 }
  0x15   : > { %9226 = vmatpush.msra.mxu2 %v359_v0  ;;  %v353_v6 = vld [vmem:[%s13779_s1 + $0x48] sm:$0xff]  ;;  %v352_v7 = vld [vmem:[%s13779_s1 + $0x40] sm:$0xff]  ;;  %v351_v8 = vld [vmem:[%s13779_s1 + $0x38] sm:$0xff]  ;;  %1150 = vst [vmem:[#allocation2 + $0x30] sm:$0xfe] %v9404_v44  ;;  %s9406_s23 = smov 64  }
  0x16   : > { %365 = vmatpush.msra.mxu0 %v358_v1  ;;  %9227 = vmatpush.msra.mxu1 %v358_v1  ;;  %v350_v9 = vld [vmem:[%s13779_s1 + $0x30] sm:$0xff]  ;;  %v349_v10 = vld [vmem:[%s13779_s1 + $0x28] sm:$0xff]  ;;  %s14467_s15 = smov (!%p274_p10, %s9089_s15), 127  ;;  %v348_v11 = vld [vmem:[%s13779_s1 + $0x20] sm:$0xff]  ;;  %14036 = vst [vmem:[#allocation6_spill] sm:$0xff] %v9581_v45  ;;  %v9587_v46 = vpack.i.bf16 %v9581_v45, %v9581_v45  ;;  %vm1156_vm0 = vcmask 261120  }
  0x17   : > { %9228 = vmatpush.msra.mxu2 %v358_v1  ;;  %v347_v12 = vld [vmem:[%s13779_s1 + $0x18] sm:$0xff]  ;;  %s9090_s9 = sshll.u32 %s14467_s15, 3  ;;  %v346_v13 = vld [vmem:[%s13779_s1 + $0x10] sm:$0xff]  ;;  %v345_v14 = vld [vmem:[%s13779_s1 + $0x8] sm:$0xff]  ;;  %1151 = vst [vmem:[#allocation2 + $0x38] sm:$0xfe] %v9404_v44  ;;  %2327 = vrot.lane.b32.xlu0 %v9581_v45, %s9405_s22 }
  0x18   : > { %366 = vmatpush.msra.mxu0 %v357_v2  ;;  %9229 = vmatpush.msra.mxu1 %v357_v2  ;;  %s9547_s20 = scalar_lea.vmem %s13778_s0, %s9090_s9  ;;  %v344_v15 = vld [vmem:[%s13779_s1] sm:$0xff]  ;;  %14037 = vst [vmem:[#allocation7_spill] sm:$0xff] %v9587_v46  ;;  %vm1152_vm1 = vcmask 261121   ;;  %v9629_v60 = vshrl.u32 %v637_v57, 7  ;;  %vm1685_vm3 = vcmask 261122   ;;  %vm2071_vm6 = vcmask 1040384  }
  0x19   : > { %9230 = vmatpush.msra.mxu2 %v357_v2  ;;  %v280_v16 = vld [vmem:[%s9547_s20] sm:$0xff]  ;;  %v315_v17 = vld [vmem:[%s9547_s20 + $0x118] sm:$0xff]  ;;  %v281_v19 = vld [vmem:[%s9547_s20 + $0x8] sm:$0xff]  ;;  %1155 = vst [vmem:[#allocation2 + $0x50] sm:$0xff] %v9404_v44  ;;  %9307 = vrot.lane.b32.xlu1 %v9587_v46, %s9405_s22  ;;  %vm1492_vm8 = vcmask 1041408   ;;  %s9407_s9 = smov 96  }
  0x1a   : > { %367 = vmatpush.msra.mxu0 %v356_v3  ;;  %9231 = vmatpush.msra.mxu1 %v356_v3  ;;  %v331_v18 = vld [vmem:[%s9547_s20 + $0x198] sm:$0xff]  ;;  %v316_v20 = vld [vmem:[%s9547_s20 + $0x120] sm:$0xff]  ;;  %v282_v22 = vld [vmem:[%s9547_s20 + $0x10] sm:$0xff]  ;;  %1158 = vst [vmem:[#allocation2 + $0x60] sm:$0x3] %v9404_v44  ;;  %v702_v62 = vand.u32 15, %v9629_v60 }
  0x1b   : > { %9232 = vmatpush.msra.mxu2 %v356_v3  ;;  %v332_v21 = vld [vmem:[%s9547_s20 + $0x1a0] sm:$0xff]  ;;  %v317_v23 = vld [vmem:[%s9547_s20 + $0x128] sm:$0xff]  ;;  %v283_v25 = vld [vmem:[%s9547_s20 + $0x18] sm:$0xff]  ;;  %1159 = vst [vmem:[#allocation2 + $0x68] sm:$0x3] %v9404_v44  ;;  %v673_v63 = vadd.s32 280, %v9629_v60 }
  0x1c   : > { %368 = vmatpush.msra.mxu0 %v355_v4  ;;  %9233 = vmatpush.msra.mxu1 %v355_v4  ;;  %v333_v24 = vld [vmem:[%s9547_s20 + $0x1a8] sm:$0xff]  ;;  %v318_v26 = vld [vmem:[%s9547_s20 + $0x130] sm:$0xff]  ;;  %v284_v28 = vld [vmem:[%s9547_s20 + $0x20] sm:$0xff]  ;;  %1162 = vst [vmem:[#allocation2 + $0x600] sm:$0xff] %v9404_v44  ;;  %vm1086_vm2 = vcmp.gt.s32.totalorder %v702_v62, 0  ;;  %s270_s13 = sand.u32 1, %s9394_s25  }
  0x1d   : > { %9234 = vmatpush.msra.mxu2 %v355_v4  ;;  %v334_v27 = vld [vmem:[%s9547_s20 + $0x1b0] sm:$0xff]  ;;  %v319_v29 = vld [vmem:[%s9547_s20 + $0x138] sm:$0xff]  ;;  %v285_v30 = vld [vmem:[%s9547_s20 + $0x28] sm:$0xff]  ;;  %1163 = vst [vmem:[#allocation2 + $0x608] sm:$0xff] %v9404_v44  ;;  %s9088_s14 = sshll.u32 %s270_s13, 9  ;;  %s9360_s15 = scalar_lea.hbm %s13785_s7, 1024 }
  0x1e   : > { %369 = vmatpush.msra.mxu0 %v354_v5  ;;  %9235 = vmatpush.msra.mxu1 %v354_v5  ;;  %v320_v31 = vld [vmem:[%s9547_s20 + $0x140] sm:$0xff]  ;;  %v335_v32 = vld [vmem:[%s9547_s20 + $0x1b8] sm:$0xff]  ;;  %v286_v33 = vld [vmem:[%s9547_s20 + $0x30] sm:$0xff]  ;;  %1165 = vst [vmem:[#allocation2 + $0x618] sm:$0xff] %v9404_v44  ;;  %s12468_s16 = scalar_lea.vmem [#allocation3], %s9088_s14 }
  0x1f   : > { %9236 = vmatpush.msra.mxu2 %v354_v5  ;;  %v321_v34 = vld [vmem:[%s9547_s20 + $0x148] sm:$0xff]  ;;  %v287_v35 = vld [vmem:[%s9547_s20 + $0x38] sm:$0xff]  ;;  %v322_v36 = vld [vmem:[%s9547_s20 + $0x150] sm:$0xff]  ;;  %1166 = vst [vmem:[#allocation2 + $0x620] sm:$0xff] %v9404_v44  ;;  %v674_v5 = vadd.s32 288, %v9629_v60  ;;  %s9019_s14 = sshll.u32 %s12468_s16, 4  ;;  %s9020_s14 = int_to_ptr.vmem [resolvable:$true] %s9019_s14 }
  0x20   : > { %370 = vmatpush.msra.mxu0 %v353_v6  ;;  %9237 = vmatpush.msra.mxu1 %v353_v6  ;;  %v288_v37 = vld [vmem:[%s9547_s20 + $0x40] sm:$0xff]  ;;  %v323_v38 = vld [vmem:[%s9547_s20 + $0x158] sm:$0xff]  ;;  %v289_v39 = vld [vmem:[%s9547_s20 + $0x48] sm:$0xff]  ;;  %1168 = vst [vmem:[#allocation2 + $0x630] sm:$0x1] %v9404_v44 }
  0x21   : > { %9238 = vmatpush.msra.mxu2 %v353_v6  ;;  %v324_v40 = vld [vmem:[%s9547_s20 + $0x160] sm:$0xff]  ;;  %v290_v42 = vld [vmem:[%s9547_s20 + $0x50] sm:$0xff]  ;;  %v325_v43 = vld [vmem:[%s9547_s20 + $0x168] sm:$0xff]  ;;  %1169 = vst [vmem:[#allocation2 + $0x638] sm:$0x1] %v9404_v44  ;;  %9312 = vrot.lane.b32.xlu1 %v9404_v44, %s9406_s23  ;;  %v639_v6 = vadd.s32 8, %v9629_v60 }
  0x22   : > { %371 = vmatpush.msra.mxu0 %v352_v7  ;;  %9239 = vmatpush.msra.mxu1 %v352_v7  ;;  %v336_v41 = vld [vmem:[%s9547_s20 + $0x1c0] sm:$0xff]  ;;  %v291_v47 = vld [vmem:[%s9547_s20 + $0x58] sm:$0xff]  ;;  %v326_v48 = vld [vmem:[%s9547_s20 + $0x170] sm:$0xff]  ;;  %1157 = vst.msk [vmem:[#allocation2 + $0x58] sm:$0xff] %vm1156_vm0, %v9404_v44 }
  0x23   : > { %9240 = vmatpush.msra.mxu2 %v352_v7  ;;  %v292_v49 = vld [vmem:[%s9547_s20 + $0x60] sm:$0xff]  ;;  %v327_v50 = vld [vmem:[%s9547_s20 + $0x178] sm:$0xff]  ;;  %v337_v51 = vld [vmem:[%s9547_s20 + $0x1c8] sm:$0xff]  ;;  %1164 = vst.msk [vmem:[#allocation2 + $0x610] sm:$0xff] %vm1156_vm0, %v9404_v44 }
  0x24   : > { %372 = vmatpush.msra.mxu0 %v351_v8  ;;  %9241 = vmatpush.msra.mxu1 %v351_v8  ;;  %1167 = vst.msk [vmem:[#allocation2 + $0x628] sm:$0xff] %vm1156_vm0, %v9404_v44  ;;  %v293_v52 = vld [vmem:[%s9547_s20 + $0x68] sm:$0xff]  ;;  %v328_v53 = vld [vmem:[%s9547_s20 + $0x180] sm:$0xff]  ;;  %v338_v54 = vld [vmem:[%s9547_s20 + $0x1d0] sm:$0xff] }
  0x25   : > { %9242 = vmatpush.msra.mxu2 %v351_v8  ;;  %6544 = vst.msk [vmem:[#allocation2 + $0x310] sm:$0xff] %vm1156_vm0, %v9404_v44  ;;  %v294_v55 = vld [vmem:[%s9547_s20 + $0x70] sm:$0xff]  ;;  %v329_v56 = vld [vmem:[%s9547_s20 + $0x188] sm:$0xff]  ;;  %v295_v58 = vld [vmem:[%s9547_s20 + $0x78] sm:$0xff] }
  0x26   : > { %373 = vmatpush.msra.mxu0 %v350_v9  ;;  %9243 = vmatpush.msra.mxu1 %v350_v9  ;;  %6545 = vst.msk [vmem:[#allocation2 + $0x328] sm:$0xff] %vm1156_vm0, %v9404_v44  ;;  %v330_v59 = vld [vmem:[%s9547_s20 + $0x190] sm:$0xff]  ;;  %v9634_v61 = vld [vmem:[%s13780_s2] ss:$0 sm:$0xff] }
  0x27   : > { %9244 = vmatpush.msra.mxu2 %v350_v9  ;;  %1153 = vst.msk [vmem:[#allocation2 + $0x40] sm:$0xfe] %vm1152_vm1, %v9404_v44  ;;  %v296_v2 = vld [vmem:[%s9547_s20 + $0x80] sm:$0xff]  ;;  %v737_v9 = vand.u32 15, %v673_v63  ;;  %v676_v63 = vadd.s32 304, %v9629_v60 }
  0x28   : > { %374 = vmatpush.msra.mxu0 %v349_v10  ;;  %9245 = vmatpush.msra.mxu1 %v349_v10 }
  0x29   : > { %9246 = vmatpush.msra.mxu2 %v349_v10  ;;  %vm9655_vm4 = vcmp.lt.s32.totalorder %v737_v9, 15 }
  0x2a   : > { %375 = vmatpush.msra.mxu0 %v348_v11  ;;  %9247 = vmatpush.msra.mxu1 %v348_v11 }
  0x2b   : > { %9248 = vmatpush.msra.mxu2 %v348_v11 }
  0x2c   : > { %376 = vmatpush.msra.mxu0 %v347_v12  ;;  %9249 = vmatpush.msra.mxu1 %v347_v12 }
  0x2d   : > { %9250 = vmatpush.msra.mxu2 %v347_v12  ;;  %v738_v12 = vand.u32 15, %v674_v5 }
  0x2e   : > { %377 = vmatpush.msra.mxu0 %v346_v13  ;;  %9251 = vmatpush.msra.mxu1 %v346_v13 }
  0x2f   : > { %9252 = vmatpush.msra.mxu2 %v346_v13  ;;  %vm9669_vm5 = vcmp.gt.s32.totalorder %v738_v12, 0 }
  0x30   : > { %378 = vmatpush.msra.mxu0 %v345_v14  ;;  %9253 = vmatpush.msra.mxu1 %v345_v14 }
  0x31   : > { %9254 = vmatpush.msra.mxu2 %v345_v14  ;;  %v703_v14 = vand.u32 15, %v639_v6 }
  0x32   : > { %379 = vmatpush.msra.mxu0 %v344_v15  ;;  %9255 = vmatpush.msra.mxu1 %v344_v15 }
  0x33   : > { %380 = vmatmul.f32.vlgmr.msra.gmra.mxu0 %v280_v16  ;;  %485 = vmatmul.f32.vlgmr.msra.gmra.mxu1 %v315_v17  ;;  %vm9674_vm7 = vcmp.lt.s32.totalorder %v703_v14, 15  ;;  %v740_v16 = vand.u32 15, %v676_v63 }
  0x34   : > { %9256 = vmatpush.msra.mxu2 %v344_v15  ;;  %v689_v15 = vadd.s32 408, %v9629_v60 }
  0x35   : > { %533 = vmatmul.f32.vlgmr.msra.gmra.mxu2 %v331_v18  ;;  %vm1124_vm12 = vcmp.gt.s32.totalorder %v740_v16, 0 }
  0x3b   : > { %383 = vmatmul.f32.gmra.mxu0 %v281_v19  ;;  %488 = vmatmul.f32.gmra.mxu1 %v316_v20  ;;  %v297_v19 = vld [vmem:[%s9547_s20 + $0x88] sm:$0xff]  ;;  %v690_v20 = vadd.s32 416, %v9629_v60 }
  0x3d   : > { %536 = vmatmul.f32.gmra.mxu2 %v332_v21  ;;  %v640_v21 = vadd.s32 16, %v9629_v60 }
  0x43   : > { %386 = vmatmul.f32.gmra.mxu0 %v282_v22  ;;  %491 = vmatmul.f32.gmra.mxu1 %v317_v23  ;;  %v9663_v22 = vrot.slane %v9404_v44, 6 }
  0x45   : > { %539 = vmatmul.f32.gmra.mxu2 %v333_v24  ;;  %14041 = vst [vmem:[#allocation9_spill] sm:$0xff] %v9663_v22 }
  0x46   : > { %1717 = vst.msk [vmem:[#allocation2 + $0x348] sm:$0xff] %vm1156_vm0, %v9663_v22 }
  0x4b   : > { %389 = vmatmul.f32.gmra.mxu0 %v283_v25  ;;  %494 = vmatmul.f32.gmra.mxu1 %v318_v26 }
  0x4d   : > { %542 = vmatmul.f32.gmra.mxu2 %v334_v27 }
  0x53   : > { %392 = vmatmul.f32.gmra.mxu0 %v284_v28  ;;  %497 = vmatmul.f32.gmra.mxu1 %v319_v29  ;;  %v753_v29 = vand.u32 15, %v689_v15 }
  0x55   : > { %545 = vmatmul.f32.gmra.mxu2 %v335_v32  ;;  %vm9708_vm9 = vcmp.lt.s32.totalorder %v753_v29, 15  ;;  %v675_v29 = vadd.s32 296, %v9629_v60 }
  0x5b   : > { %395 = vmatmul.f32.gmra.mxu0 %v285_v30  ;;  %500 = vmatmul.f32.gmra.mxu1 %v320_v31 }
  0x5d   : > { %548 = vmatmul.f32.gmra.mxu2 %v336_v41 }
  0x63   : > { %398 = vmatmul.f32.gmra.mxu0 %v286_v33  ;;  %503 = vmatmul.f32.gmra.mxu1 %v321_v34  ;;  %v754_v34 = vand.u32 15, %v690_v20 }
  0x65   : > { %551 = vmatmul.f32.gmra.mxu2 %v337_v51  ;;  %v298_v51 = vld [vmem:[%s9547_s20 + $0x90] sm:$0xff]  ;;  %vm9742_vm10 = vcmp.gt.s32.totalorder %v754_v34, 0 }
  0x6b   : > { %401 = vmatmul.f32.gmra.mxu0 %v287_v35  ;;  %506 = vmatmul.f32.gmra.mxu1 %v322_v36  ;;  %v704_v36 = vand.u32 15, %v640_v21 }
  0x6d   : > { %554 = vmatmul.f32.gmra.mxu2 %v338_v54  ;;  %vm1088_vm11 = vcmp.gt.s32.totalorder %v704_v36, 0 }
  0x73   : > { %404 = vmatmul.f32.gmra.mxu0 %v288_v37  ;;  %509 = vmatmul.f32.gmra.mxu1 %v323_v38 }
  0x7b   : > { %407 = vmatmul.f32.gmra.mxu0 %v289_v39  ;;  %512 = vmatmul.f32.gmra.mxu1 %v324_v40 }
  0x83   : > { %410 = vmatmul.f32.gmra.mxu0 %v290_v42  ;;  %515 = vmatmul.f32.gmra.mxu1 %v325_v43 }
  0x8b   : > { %413 = vmatmul.f32.gmra.mxu0 %v291_v47  ;;  %518 = vmatmul.f32.gmra.mxu1 %v326_v48  ;;  %v9308_v46 = vpop.permute.xlu1 %9307 }
  0x93   : > { %416 = vmatmul.f32.gmra.mxu0 %v292_v49  ;;  %521 = vmatmul.f32.gmra.mxu1 %v327_v50 }
  0x9b   : > { %419 = vmatmul.f32.gmra.mxu0 %v293_v52  ;;  %524 = vmatmul.f32.gmra.mxu1 %v328_v53 }
  0xa3   : > { %422 = vmatmul.f32.gmra.mxu0 %v294_v55  ;;  %527 = vmatmul.f32.gmra.mxu1 %v329_v56 }
  0xab   : > { %425 = vmatmul.f32.gmra.mxu0 %v295_v58  ;;  %530 = vmatmul.f32.gmra.mxu1 %v330_v59 }
  0xb0   : > { %v381_v0 = vpop.f32.mrf.mxu0  ;;  %v486_v1 = vpop.f32.mrf.mxu1 }
  0xb1   : > { %v382_v3 = vadd.f32 %v9634_v61, %v381_v0  ;;  %v487_v4 = vadd.f32 %v9634_v61, %v486_v1 }
  0xb3   : > { %v573_v7 = vmax.f32 %v382_v3, 0.0  ;;  %v9643_v8 = vmax.f32 %v487_v4, 0.0  ;;  %428 = vmatmul.f32.gmra.mxu0 %v296_v2  ;;  %v641_v2 = vadd.s32 24, %v9629_v60  ;;  %v691_v3 = vadd.s32 424, %v9629_v60 }
  0xb5   : > { %14038 = vst [vmem:[#allocation8_spill] sm:$0xff] %v9643_v8  ;;  %2852 = vrot.lane.b32.xlu2 %v9643_v8, %s9406_s23  ;;  %v2654_v10 = vsel %vm1086_vm2, %v573_v7, 0.0  ;;  %v2072_v11 = vrot.slane %v573_v7, 7  ;;  %v9649_v13 = vrot.slane %v573_v7, 6  ;;  %v1399_v32 = vsel %vm9655_vm4, %v9643_v8, 0.0 }
  0xb6   : > { %6547 = vst.msk [vmem:[#allocation2 + $0x358] sm:$0xff] %vm1156_vm0, %v9643_v8  ;;  %2782 = vrot.lane.b32.xlu1 %v2654_v10, %s9406_s23  ;;  %v13786_v35 = vrot.slane %v9643_v8, 7  ;;  %v9706_v43 = vrot.slane %v1399_v32, 6 }
  0xb7   : > { %2199 = vrot.lane.b32.xlu0 %v2072_v11, %s9405_s22  ;;  %4197 = vst.msk [vmem:[#allocation2 + $0x38] sm:$0xfe] %vm1152_vm1, %v2072_v11 }
  0xb8   : > { %v384_v17 = vpop.f32.mrf.mxu0  ;;  %v489_v18 = vpop.f32.mrf.mxu1  ;;  %1686 = vst.msk [vmem:[#allocation2 + $0x60] sm:$0xfc] %vm1685_vm3, %v9649_v13  ;;  %vm1160_vm3 = vcmask 254976  }
  0xb9   : > { %v385_v23 = vadd.f32 %v9634_v61, %v384_v17  ;;  %v490_v24 = vadd.f32 %v9634_v61, %v489_v18  ;;  %v534_v26 = vpop.f32.mrf.mxu2  ;;  %14048 = vst [vmem:[#allocation12_spill] sm:$0xff] %v9706_v43  ;;  %v705_v18 = vand.u32 15, %v641_v2  ;;  %v300_v2 = vld [vmem:[%s9547_s20 + $0xa0] sm:$0xff] }
  0xba   : > { %v535_v27 = vadd.f32 %v9634_v61, %v534_v26  ;;  %1161 = vst.msk [vmem:[#allocation2 + $0x70] sm:$0x3] %vm1160_vm3, %v9404_v44 }
  0xbb   : > { %v9680_v30 = vmax.f32 %v385_v23, 0.0  ;;  %v9682_v31 = vmax.f32 %v490_v24, 0.0  ;;  %431 = vmatmul.f32.gmra.mxu0 %v297_v19  ;;  %v755_v19 = vand.u32 15, %v691_v3  ;;  %v299_v23 = vld [vmem:[%s9547_s20 + $0x98] sm:$0xff]  ;;  %vm9825_vm13 = vcmp.lt.s32.totalorder %v705_v18, 15 }
  0xbc   : > { %v9687_v33 = vmax.f32 %v535_v27, 0.0 }
  0xbd   : > { %v1564_v37 = vrot.slane %v9682_v31, 6  ;;  %2784 = vrot.lane.b32.xlu2 %v9680_v30, %s9406_s23  ;;  %v9696_v38 = vsel %vm9669_vm5, %v9682_v31, 0.0  ;;  %v2073_v39 = vrot.slane %v9680_v30, 7  ;;  %v1365_v40 = vsel %vm9674_vm7, %v9680_v30, 0.0 }
  0xbe   : > { %14046 = vst [vmem:[#allocation10_spill] sm:$0xff] %v9687_v33  ;;  %4582 = vrot.lane.b32.xlu1 %v2654_v10, %s9405_s22  ;;  %v1494_v41 = vrot.slane %v1365_v40, 6  ;;  %v2143_v42 = vrot.slane %v9682_v31, 7  ;;  %v1415_v58 = vsel %vm9708_vm9, %v9687_v33, 0.0  ;;  %v13787_v5 = vrot.slane %v9687_v33, 7 }
  0xbf   : > { %14047 = vst [vmem:[#allocation11_spill] sm:$0xff] %v9696_v38  ;;  %2854 = vrot.lane.b32.xlu0 %v9696_v38, %s9406_s23  ;;  %v2074_v48 = vsel %vm2071_vm6, %v2072_v11, %v2073_v39  ;;  %v9732_v54 = vsel %vm1492_vm8, %v9706_v43, %v1564_v37  ;;  %v9758_v6 = vrot.slane %v1415_v58, 6  ;;  %vm9829_vm14 = vcmp.lt.s32.totalorder %v755_v19, 15 }
  0xc0   : > { %6548 = vst.msk [vmem:[#allocation2 + $0x370] sm:$0xff] %vm1156_vm0, %v9696_v38  ;;  %v387_v49 = vpop.f32.mrf.mxu0  ;;  %v492_v50 = vpop.f32.mrf.mxu1  ;;  %v9721_v52 = vsel %vm1492_vm8, %v9649_v13, %v1494_v41  ;;  %v9726_v53 = vsel %vm2071_vm6, %v13786_v35, %v2143_v42 }
  0xc1   : > { %6563 = vst.msk [vmem:[#allocation2 + $0x4d8] sm:$0xff] %vm1156_vm0, %v9687_v33  ;;  %v388_v55 = vadd.f32 %v9634_v61, %v387_v49  ;;  %v493_v56 = vadd.f32 %v9634_v61, %v492_v50  ;;  %v537_v57 = vpop.f32.mrf.mxu2  ;;  %v739_v50 = vand.u32 15, %v675_v29 }
  0xc2   : > { %4198 = vst.msk [vmem:[#allocation2 + $0x50] sm:$0xff] %vm1156_vm0, %v2074_v48  ;;  %v538_v59 = vadd.f32 %v9634_v61, %v537_v57 }
  0xc3   : > { %14051 = vst [vmem:[#allocation13_spill] sm:$0xff] %v9726_v53  ;;  %v575_v0 = vmax.f32 %v388_v55, 0.0  ;;  %v9749_v1 = vmax.f32 %v493_v56, 0.0  ;;  %434 = vmatmul.f32.gmra.mxu0 %v298_v51  ;;  %vm9884_vm15 = vcmp.lt.s32.totalorder %v739_v50, 15 }
  0xc4   : > { %14052 = vst [vmem:[#allocation14_spill] sm:$0xff] %v9732_v54  ;;  %v9755_v4 = vmax.f32 %v538_v59, 0.0 }
  0xc5   : > { %1687 = vst.msk [vmem:[#allocation2 + $0x78] sm:$0xff] %vm1156_vm0, %v9721_v52  ;;  %4584 = vrot.lane.b32.xlu2 %v9680_v30, %s9405_s22  ;;  %v9764_v7 = vrot.slane %v575_v0, 7  ;;  %v9766_v9 = vsel %vm1088_vm11, %v575_v0, 0.0  ;;  %v2145_v10 = vrot.slane %v9749_v1, 7  ;;  %v9769_v11 = vrot.slane %v575_v0, 6 }
  0xc6   : > { %4233 = vst.msk [vmem:[#allocation2 + $0x398] sm:$0xff] %vm1156_vm0, %v9726_v53  ;;  %3486 = vrot.lane.b32.xlu1 %v9649_v13, %s9407_s9  ;;  %v1596_v12 = vrot.slane %v9755_v4, 6  ;;  %v9777_v14 = vsel %vm9742_vm10, %v9755_v4, 0.0  ;;  %v2175_v15 = vrot.slane %v9755_v4, 7  ;;  %v1401_v40 = vsel %vm9884_vm15, %v9749_v1, 0.0 }
  0xc7   : > { %14055 = vst [vmem:[#allocation15_spill] sm:$0xff] %v9749_v1  ;;  %2201 = vrot.lane.b32.xlu0 %v2074_v48, %s9405_s22  ;;  %v9787_v13 = vsel %vm2071_vm6, %v2073_v39, %v9764_v7  ;;  %v9790_v17 = vsel %vm2071_vm6, %v2143_v42, %v2145_v10  ;;  %v9802_v25 = vsel %vm1492_vm8, %v1494_v41, %v9769_v11  ;;  %v339_v39 = vld [vmem:[%s9547_s20 + $0x1d8] sm:$0xff]  ;;  %v692_v48 = vadd.s32 432, %v9629_v60 }
  0xc8   : > { %1722 = vst.msk [vmem:[#allocation2 + $0x3c0] sm:$0xff] %vm1156_vm0, %v9732_v54  ;;  %v390_v20 = vpop.f32.mrf.mxu0  ;;  %v495_v21 = vpop.f32.mrf.mxu1  ;;  %v9796_v24 = vsel %vm2071_vm6, %v13787_v5, %v2175_v15  ;;  %v9813_v30 = vsel %vm1492_vm8, %v9758_v6, %v1596_v12  ;;  %557 = vmatmul.f32.gmra.mxu2 %v339_v39  ;;  %vm2396_vm11 = vcmask 523520  }
  0xc9   : > { %6549 = vst.msk [vmem:[#allocation2 + $0x388] sm:$0xff] %vm1156_vm0, %v9749_v1  ;;  %v391_v26 = vadd.f32 %v9634_v61, %v390_v20  ;;  %v496_v27 = vadd.f32 %v9634_v61, %v495_v21  ;;  %v540_v28 = vpop.f32.mrf.mxu2  ;;  %v756_v57 = vand.u32 15, %v692_v48  ;;  %v642_v20 = vadd.s32 32, %v9629_v60 }
  0xca   : > { %14056 = vst [vmem:[#allocation16_spill] sm:$0xff] %v9777_v14  ;;  %v541_v32 = vadd.f32 %v9634_v61, %v540_v28  ;;  %v5871_v21 = vsel %vm2071_vm6, %v9581_v45, %v9764_v7 }
  0xcb   : > { %6514 = vst.msk [vmem:[#allocation2 + $0x40] sm:$0xff] %vm1156_vm0, %v9766_v9  ;;  %v9818_v34 = vmax.f32 %v391_v26, 0.0  ;;  %v9820_v36 = vmax.f32 %v496_v27, 0.0  ;;  %437 = vmatmul.f32.gmra.mxu0 %v299_v23  ;;  %vm1140_vm1 = vcmp.gt.s32.totalorder %v756_v57, 0 }
  0xcc   : > { %6564 = vst.msk [vmem:[#allocation2 + $0x4f0] sm:$0xff] %vm1156_vm0, %v9777_v14  ;;  %v9833_v42 = vmax.f32 %v541_v32, 0.0 }
  0xcd   : > { %14057 = vst [vmem:[#allocation17_spill] sm:$0xff] %v9790_v17  ;;  %3488 = vrot.lane.b32.xlu2 %v9721_v52, %s9407_s9  ;;  %v9842_v47 = vsel %vm1124_vm12, %v9820_v36, 0.0  ;;  %v2147_v49 = vrot.slane %v9820_v36, 7  ;;  %v2077_v55 = vrot.slane %v9818_v34, 7  ;;  %v1367_v52 = vsel %vm9825_vm13, %v9818_v34, 0.0 }
  0xce   : > { %14058 = vst [vmem:[#allocation18_spill] sm:$0xff] %v9796_v24  ;;  %2856 = vrot.lane.b32.xlu1 %v9749_v1, %s9406_s23  ;;  %v2177_v51 = vrot.slane %v9833_v42, 7  ;;  %v1417_v56 = vsel %vm9829_vm14, %v9833_v42, 0.0  ;;  %v1498_v59 = vrot.slane %v1367_v52, 6  ;;  %v1568_v48 = vrot.slane %v9820_v36, 6  ;;  %v301_v52 = vld [vmem:[%s9547_s20 + $0xa8] sm:$0xff] }
  0xcf   : > { %4199 = vst.msk [vmem:[#allocation2 + $0x68] sm:$0xff] %vm1156_vm0, %v9787_v13  ;;  %2271 = vrot.lane.b32.xlu0 %v9726_v53, %s9405_s22  ;;  %v9865_v58 = vsel %vm2071_vm6, %v2145_v10, %v2147_v49  ;;  %v9867_v62 = vrot.slane %v1417_v56, 6  ;;  %v9877_v16 = vsel %vm2071_vm6, %v9764_v7, %v2077_v55  ;;  %v706_v7 = vand.u32 15, %v642_v20  ;;  %v310_v1 = vld [vmem:[%s9547_s20 + $0xf0] sm:$0xff] }
  0xd0   : > { %4249 = vst.msk [vmem:[#allocation2 + $0x518] sm:$0xff] %vm1156_vm0, %v9796_v24  ;;  %v393_v63 = vpop.f32.mrf.mxu0  ;;  %v498_v0 = vpop.f32.mrf.mxu1  ;;  %v9871_v3 = vsel %vm2071_vm6, %v2175_v15, %v2177_v51  ;;  %v9896_v26 = vsel %vm1492_vm8, %v9769_v11, %v1498_v59  ;;  %v678_v20 = vadd.s32 320, %v9629_v60 }
  0xd1   : > { %14059 = vst [vmem:[#allocation19_spill] sm:$0xff] %v9813_v30  ;;  %v394_v18 = vadd.f32 %v9634_v61, %v393_v63  ;;  %v499_v10 = vadd.f32 %v9634_v61, %v498_v0  ;;  %v543_v19 = vpop.f32.mrf.mxu2  ;;  %v9902_v27 = vsel %vm1492_vm8, %v1596_v12, %v9867_v62  ;;  %vm1090_vm2 = vcmp.gt.s32.totalorder %v706_v7, 0 }
  0xd2   : > { %4234 = vst.msk [vmem:[#allocation2 + $0x3b0] sm:$0xff] %vm1156_vm0, %v9790_v17  ;;  %v544_v23 = vadd.f32 %v9634_v61, %v543_v19 }
  0xd3   : > { %1688 = vst.msk [vmem:[#allocation2 + $0x90] sm:$0xff] %vm1156_vm0, %v9802_v25  ;;  %v9904_v28 = vmax.f32 %v394_v18, 0.0  ;;  %v9906_v29 = vmax.f32 %v499_v10, 0.0  ;;  %440 = vmatmul.f32.gmra.mxu0 %v300_v2  ;;  %v1566_v18 = vrot.slane %v1401_v40, 6 }
  0xd4   : > { %14064 = vst [vmem:[#allocation20_spill] sm:$0xff] %v9833_v42  ;;  %v9910_v32 = vmax.f32 %v544_v23, 0.0  ;;  %v742_v23 = vand.u32 15, %v678_v20  ;;  %v5162_v20 = vsel %vm1492_vm8, %v9663_v22, %v9769_v11 }
  0xd5   : > { %1738 = vst.msk [vmem:[#allocation2 + $0x540] sm:$0xff] %vm1156_vm0, %v9813_v30  ;;  %5998 = vrot.lane.b32.xlu2 %v5871_v21, %s9407_s9  ;;  %v9924_v12 = vsel %vm1090_vm2, %v9904_v28, 0.0  ;;  %v2079_v41 = vrot.slane %v9904_v28, 7  ;;  %v1500_v57 = vrot.slane %v9904_v28, 6  ;;  %v2149_v10 = vrot.slane %v9906_v29, 7 }
  0xd6   : > { %6515 = vst.msk [vmem:[#allocation2 + $0x58] sm:$0xff] %vm1156_vm0, %v9818_v34  ;;  %2303 = vrot.lane.b32.xlu1 %v9796_v24, %s9405_s22  ;;  %v9920_v4 = vsel %vm1140_vm1, %v9910_v32, 0.0  ;;  %v2179_v39 = vrot.slane %v9910_v32, 7  ;;  %v9987_v21 = vsel %vm1492_vm8, %v1564_v37, %v1566_v18  ;;  %v302_v37 = vld [vmem:[%s9547_s20 + $0xb0] sm:$0xff]  ;;  %vm1126_vm4 = vcmp.gt.s32.totalorder %v742_v23, 0  ;;  %v309_v24 = vld [vmem:[%s9547_s20 + $0xe8] sm:$0xff] }
  0xd7   : > { %14065 = vst [vmem:[#allocation21_spill] sm:$0xff] %v9842_v47  ;;  %2786 = vrot.lane.b32.xlu0 %v9766_v9, %s9406_s23  ;;  %v9950_v2 = vsel %vm2071_vm6, %v2077_v55, %v2079_v41  ;;  %v9967_v55 = vsel %vm2071_vm6, %v2147_v49, %v2149_v10  ;;  %v340_v49 = vld [vmem:[%s9547_s20 + $0x1e0] sm:$0xff]  ;;  %v693_v28 = vadd.s32 440, %v9629_v60 }
  0xd8   : > { %6565 = vst.msk [vmem:[#allocation2 + $0x508] sm:$0xff] %vm1156_vm0, %v9833_v42  ;;  %v396_v44 = vpop.f32.mrf.mxu0  ;;  %v501_v50 = vpop.f32.mrf.mxu1  ;;  %v9942_v56 = vsel %vm2071_vm6, %v2177_v51, %v2179_v39  ;;  %v9958_v51 = vsel %vm1492_vm8, %v1498_v59, %v1500_v57  ;;  %v9975_v59 = vsel %vm1492_vm8, %v1566_v18, %v1568_v48  ;;  %560 = vmatmul.f32.gmra.mxu2 %v340_v49  ;;  %v341_v18 = vld [vmem:[%s9547_s20 + $0x1e8] sm:$0xff] }
  0xd9   : > { %6550 = vst.msk [vmem:[#allocation2 + $0x3a0] sm:$0xff] %vm1156_vm0, %v9842_v47  ;;  %v397_v63 = vadd.f32 %v9634_v61, %v396_v44  ;;  %v502_v0 = vadd.f32 %v9634_v61, %v501_v50  ;;  %v546_v7 = vpop.f32.mrf.mxu2 }
  0xda   : > { %14066 = vst [vmem:[#allocation22_spill] sm:$0xff] %v9865_v58  ;;  %v547_v44 = vadd.f32 %v9634_v61, %v546_v7  ;;  %v303_v7 = vld [vmem:[%s9547_s20 + $0xb8] sm:$0xff] }
  0xdb   : > { %14067 = vst [vmem:[#allocation23_spill] sm:$0xff] %v9871_v3  ;;  %v9960_v19 = vmax.f32 %v397_v63, 0.0  ;;  %443 = vmatmul.f32.gmra.mxu0 %v301_v52  ;;  %v9979_v15 = vmax.f32 %v502_v0, 0.0 }
  0xdc   : > { %4235 = vst.msk [vmem:[#allocation2 + $0x3c8] sm:$0xff] %vm1156_vm0, %v9865_v58 }
  0xdd   : > { %4250 = vst.msk [vmem:[#allocation2 + $0x530] sm:$0xff] %vm1156_vm0, %v9871_v3  ;;  %2305 = vrot.lane.b32.xlu2 %v9871_v3, %s9405_s22  ;;  %v10003_v50 = vsel %vm1126_vm4, %v9979_v15, 0.0  ;;  %v13788_v52 = vrot.slane %v9979_v15, 7  ;;  %v2081_v35 = vrot.slane %v9960_v19, 7  ;;  %v307_v3 = vld [vmem:[%s9547_s20 + $0xd8] sm:$0xff]  ;;  %vm2974_vm4 = vcmask 785920  }
  0xde   : > { %4200 = vst.msk [vmem:[#allocation2 + $0x80] sm:$0xff] %vm1156_vm0, %v9877_v16  ;;  %2203 = vrot.lane.b32.xlu1 %v9787_v13, %s9405_s22 }
  0xdf   : > { %14070 = vst [vmem:[#allocation24_spill] sm:$0xff] %v9902_v27  ;;  %4586 = vrot.lane.b32.xlu0 %v9766_v9, %s9405_s22  ;;  %v10005_v9 = vmax.f32 %v547_v44, 0.0  ;;  %v10017_v0 = vsel %vm2071_vm6, %v2149_v10, %v13788_v52  ;;  %v13790_v44 = vrot.slane %v9910_v32, 6 }
  0xe0   : > { %14071 = vst [vmem:[#allocation25_spill] sm:$0xff] %v9906_v29  ;;  %v399_v40 = vpop.f32.mrf.mxu0  ;;  %v504_v31 = vpop.f32.mrf.mxu1  ;;  %563 = vmatmul.f32.gmra.mxu2 %v341_v18 }
  0xe1   : > { %1689 = vst.msk [vmem:[#allocation2 + $0xa8] sm:$0xff] %vm1156_vm0, %v9896_v26  ;;  %v505_v13 = vadd.f32 %v9634_v61, %v504_v31  ;;  %v13789_v10 = vrot.slane %v10005_v9, 7  ;;  %v677_v31 = vadd.s32 312, %v9629_v60 }
  0xe2   : > { %1739 = vst.msk [vmem:[#allocation2 + $0x558] sm:$0xff] %vm1156_vm0, %v9902_v27 }
  0xe3   : > { %6551 = vst.msk [vmem:[#allocation2 + $0x3b8] sm:$0xff] %vm1156_vm0, %v9906_v29  ;;  %v10010_v63 = vmax.f32 %v505_v13, 0.0  ;;  %446 = vmatmul.f32.gmra.mxu0 %v302_v37  ;;  %v10044_v11 = vsel %vm2071_vm6, %v2179_v39, %v13789_v10  ;;  %v643_v13 = vadd.s32 40, %v9629_v60  ;;  %v741_v18 = vand.u32 15, %v677_v31 }
  0xe4   : > { %14072 = vst [vmem:[#allocation26_spill] sm:$0xff] %v9920_v4  ;;  %v10059_v39 = vsel %vm1492_vm8, %v9867_v62, %v13790_v44  ;;  %v304_v62 = vld [vmem:[%s9547_s20 + $0xc0] sm:$0xff] }
  0xe5   : > { %6566 = vst.msk [vmem:[#allocation2 + $0x520] sm:$0xff] %vm1156_vm0, %v9920_v4  ;;  %2858 = vrot.lane.b32.xlu2 %v9842_v47, %s9406_s23  ;;  %vm1061_vm5 = vcmp.lt.s32.totalorder %v741_v18, 15  ;;  %v13797_v4 = vrot.slane %v9979_v15, 6 }
  0xe6   : > { %6516 = vst.msk [vmem:[#allocation2 + $0x70] sm:$0xff] %vm1156_vm0, %v9924_v12  ;;  %2273 = vrot.lane.b32.xlu1 %v9790_v17, %s9405_s22  ;;  %v1403_v31 = vsel %vm1061_vm5, %v9906_v29, 0.0  ;;  %v688_v17 = vadd.s32 400, %v9629_v60  ;;  %vm3683_vm5 = vcmask 1048320  }
  0xe7   : > { %14073 = vst [vmem:[#allocation27_spill] sm:$0xff] %v9942_v56  ;;  %5289 = vrot.lane.b32.xlu0 %v5162_v20, %s9406_s23 }
  0xe8   : > { %4201 = vst.msk [vmem:[#allocation2 + $0x98] sm:$0xff] %vm1156_vm0, %v9950_v2  ;;  %v402_v49 = vpop.f32.mrf.mxu0  ;;  %v10033_v23 = vpop.f32.mrf.mxu1 }
  0xe9   : > { %4251 = vst.msk [vmem:[#allocation2 + $0x548] sm:$0xff] %vm1156_vm0, %v9942_v56  ;;  %v403_v37 = vadd.f32 %v9634_v61, %v402_v49  ;;  %v707_v49 = vand.u32 15, %v643_v13 }
  0xea   : > { %14074 = vst [vmem:[#allocation28_spill] sm:$0xff] %v9967_v55 }
  0xeb   : > { %1690 = vst.msk [vmem:[#allocation2 + $0xc0] sm:$0xff] %vm1156_vm0, %v9958_v51  ;;  %v10049_v20 = vmax.f32 %v403_v37, 0.0  ;;  %449 = vmatmul.f32.gmra.mxu0 %v303_v7  ;;  %vm1027_vm7 = vcmp.lt.s32.totalorder %v707_v49, 15  ;;  %v1570_v7 = vrot.slane %v1403_v31, 6  ;;  %v400_v31 = vadd.f32 %v9634_v61, %v399_v40 }
  0xec   : > { %14075 = vst [vmem:[#allocation29_spill] sm:$0xff] %v9975_v59  ;;  %v1369_v37 = vsel %vm1027_vm7, %v9960_v19, 0.0  ;;  %v644_v40 = vadd.s32 48, %v9629_v60  ;;  %vm7006_vm7 = vcmask 1046528  }
  0xed   : > { %6517 = vst.msk [vmem:[#allocation2 + $0x88] sm:$0xff] %vm1156_vm0, %v9960_v19  ;;  %2275 = vrot.lane.b32.xlu2 %v9865_v58, %s9405_s22  ;;  %v1502_v5 = vrot.slane %v1369_v37, 6  ;;  %v10076_v49 = vsel %vm1492_vm8, %v1568_v48, %v1570_v7  ;;  %v10099_v37 = vmax.f32 %v400_v31, 0.0  ;;  %v305_v31 = vld [vmem:[%s9547_s20 + $0xc8] sm:$0xff] }
  0xee   : > { %14076 = vst [vmem:[#allocation30_spill] sm:$0xff] %v9987_v21  ;;  %2788 = vrot.lane.b32.xlu1 %v9818_v34, %s9406_s23 }
  0xef   : > { %4236 = vst.msk [vmem:[#allocation2 + $0x3e0] sm:$0xff] %vm1156_vm0, %v9967_v55  ;;  %3490 = vrot.lane.b32.xlu0 %v9802_v25, %s9407_s9  ;;  %v10085_v25 = vsel %vm2071_vm6, %v2079_v41, %v2081_v35  ;;  %v10090_v36 = vsel %vm1492_vm8, %v1500_v57, %v1502_v5  ;;  %v342_v41 = vld [vmem:[%s9547_s20 + $0x1f0] sm:$0xff]  ;;  %v708_v57 = vand.u32 15, %v644_v40  ;;  %v13798_v40 = vrot.slane %v10099_v37, 7 }
  0xf0   : > { %1724 = vst.msk [vmem:[#allocation2 + $0x3f0] sm:$0xff] %vm1156_vm0, %v9975_v59  ;;  %v10069_v13 = vpop.f32.mrf.mxu0  ;;  %v510_v18 = vpop.f32.mrf.mxu1  ;;  %566 = vmatmul.f32.gmra.mxu2 %v342_v41 }
  0xf1   : > { %1723 = vst.msk [vmem:[#allocation2 + $0x3d8] sm:$0xff] %vm1156_vm0, %v9987_v21  ;;  %v511_v52 = vadd.f32 %v9634_v61, %v510_v18  ;;  %vm1092_vm9 = vcmp.gt.s32.totalorder %v708_v57, 0  ;;  %v9309_v57 = vunpack.i.l.bf16 %v9308_v46  ;;  %v695_v21 = vadd.s32 456, %v9629_v60 }
  0xf2   : > { %14077 = vst [vmem:[#allocation31_spill] sm:$0xff] %v10003_v50  ;;  %v10116_v44 = vsel %vm1092_vm9, %v10099_v37, 0.0  ;;  %vm2394_vm9 = vcmask 523521  }
  0xf3   : > { %14078 = vst [vmem:[#allocation32_spill] sm:$0xff] %v10005_v9  ;;  %v10092_v48 = vmax.f32 %v511_v52, 0.0  ;;  %452 = vmatmul.f32.gmra.mxu0 %v304_v62  ;;  %v757_v52 = vand.u32 15, %v693_v28 }
  0xf4   : > { %6552 = vst.msk [vmem:[#allocation2 + $0x3d0] sm:$0xff] %vm1156_vm0, %v10003_v50 }
  0xf5   : > { %14079 = vst [vmem:[#allocation33_spill] sm:$0xff] %v10010_v63  ;;  %2790 = vrot.lane.b32.xlu2 %v9924_v12, %s9406_s23  ;;  %vm1077_vm10 = vcmp.lt.s32.totalorder %v757_v52, 15  ;;  %v10130_v52 = vsel %vm2071_vm6, %v2081_v35, %v13798_v40  ;;  %v6804_v40 = vld [vmem:[%s13781_s3 + $0x108] sm:$0xff] }
  0xf6   : > { %6567 = vst.msk [vmem:[#allocation2 + $0x538] sm:$0xff] %vm1156_vm0, %v10005_v9  ;;  %4588 = vrot.lane.b32.xlu1 %v9818_v34, %s9405_s22  ;;  %v648_v34 = vadd.s32 80, %v9629_v60  ;;  %v1419_v28 = vsel %vm1077_vm10, %v10005_v9, 0.0 }
  0xf7   : > { %14080 = vst [vmem:[#allocation34_spill] sm:$0xff] %v10017_v0  ;;  %6000 = vrot.lane.b32.xlu0 %v9877_v16, %s9407_s9  ;;  %v10132_v42 = vrot.slane %v1419_v28, 6  ;;  %v10160_v28 = vsel %vm1492_vm8, %v1570_v7, %v13797_v4  ;;  %v2328_v7 = vpop.permute.xlu0 %2327  ;;  %v6786_v4 = vld [vmem:[%s13781_s3 + $0x78] sm:$0xff] }
  0xf8   : > { %6553 = vst.msk [vmem:[#allocation2 + $0x3e8] sm:$0xff] %vm1156_vm0, %v10010_v63  ;;  %v408_v18 = vpop.f32.mrf.mxu0  ;;  %v10111_v62 = vpop.f32.mrf.mxu1  ;;  %v712_v46 = vand.u32 15, %v648_v34  ;;  %v306_v34 = vld [vmem:[%s9547_s20 + $0xd0] sm:$0xff]  ;;  %7650 = vmatpush.msrb.mxu1 %v6786_v4  ;;  %v6803_v4 = vld [vmem:[%s13781_s3 + $0x100] sm:$0xff] }
  0xf9   : > { %4237 = vst.msk [vmem:[#allocation2 + $0x3f8] sm:$0xff] %vm1156_vm0, %v10017_v0  ;;  %v409_v10 = vadd.f32 %v9634_v61, %v408_v18  ;;  %v13796_v18 = vrot.slane %v10099_v37, 6  ;;  %v6805_v7 = vld [vmem:[%s13781_s3 + $0x110] sm:$0xff] }
  0xfa   : > { %14081 = vst [vmem:[#allocation35_spill] sm:$0xff] %v10044_v11  ;;  %vm1096_vm12 = vcmp.gt.s32.totalorder %v712_v46, 0 }
  0xfb   : > { %4252 = vst.msk [vmem:[#allocation2 + $0x560] sm:$0xff] %vm1156_vm0, %v10044_v11  ;;  %v10123_v41 = vmax.f32 %v409_v10, 0.0  ;;  %455 = vmatmul.f32.gmra.mxu0 %v305_v31  ;;  %v10145_v35 = vsel %vm1492_vm8, %v1502_v5, %v13796_v18 }
  0xfc   : > { %6519 = vst.msk [vmem:[#allocation2 + $0xb8] sm:$0xff] %vm1156_vm0, %v10049_v20 }
  0xfd   : > { %14082 = vst [vmem:[#allocation36_spill] sm:$0xff] %v10059_v39  ;;  %4590 = vrot.lane.b32.xlu2 %v9924_v12, %s9405_s22  ;;  %v14085_v12 = vrot.slane %v9910_v32, 6  ;;  %v684_v32 = vadd.s32 368, %v9629_v60 }
  0xfe   : > { %1740 = vst.msk [vmem:[#allocation2 + $0x570] sm:$0xff] %vm1156_vm0, %v10059_v39  ;;  %2205 = vrot.lane.b32.xlu1 %v9877_v16, %s9405_s22 }
  0xff   : > { %14083 = vst [vmem:[#allocation37_spill] sm:$0xff] %v10076_v49  ;;  %2860 = vrot.lane.b32.xlu0 %v9906_v29, %s9406_s23  ;;  %v10154_v16 = vsel %vm1492_vm8, %v14085_v12, %v10132_v42 }
 0x100   : > { %1725 = vst.msk [vmem:[#allocation2 + $0x408] sm:$0xff] %vm1156_vm0, %v10076_v49  ;;  %v411_v10 = vpop.f32.mrf.mxu0  ;;  %v516_v31 = vpop.f32.mrf.mxu1 }
 0x101   : > { %14084 = vst [vmem:[#allocation38_spill] sm:$0xff] %v10092_v48  ;;  %v412_v5 = vadd.f32 %v9634_v61, %v411_v10  ;;  %v517_v18 = vadd.f32 %v9634_v61, %v516_v31  ;;  %v6806_v10 = vld [vmem:[%s13781_s3 + $0x118] sm:$0xff]  ;;  %v694_v31 = vadd.s32 448, %v9629_v60 }
 0x102   : > { %4202 = vst.msk [vmem:[#allocation2 + $0xb0] sm:$0xff] %vm1156_vm0, %v10085_v25  ;;  %9257 = vmatpush.msra.mxu3 %v6806_v10  ;;  %8080 = vmatpush.msrb.mxu0 %v6806_v10 }
 0x103   : > { %1691 = vst.msk [vmem:[#allocation2 + $0xd8] sm:$0xff] %vm1156_vm0, %v10090_v36  ;;  %v10171_v12 = vmax.f32 %v517_v18, 0.0  ;;  %458 = vmatmul.f32.gmra.mxu0 %v306_v34  ;;  %v549_v18 = vpop.f32.mrf.mxu2  ;;  %v748_v34 = vand.u32 15, %v684_v32  ;;  %v6785_v32 = vld [vmem:[%s13781_s3 + $0x70] sm:$0xff] }
 0x104   : > { %6555 = vst.msk [vmem:[#allocation2 + $0x418] sm:$0xff] %vm1156_vm0, %v10092_v48  ;;  %9258 = vmatpush.msra.mxu3 %v6805_v7  ;;  %8081 = vmatpush.msrb.mxu0 %v6805_v7 }
 0x105   : > { %6518 = vst.msk [vmem:[#allocation2 + $0xa0] sm:$0xff] %vm1156_vm0, %v10116_v44  ;;  %2207 = vrot.lane.b32.xlu2 %v9950_v2, %s9405_s22  ;;  %vm10210_vm14 = vcmp.gt.s32.totalorder %v748_v34, 0  ;;  %7651 = vmatpush.msrb.mxu1 %v6785_v32 }
 0x106   : > { %6521 = vst.msk [vmem:[#allocation2 + $0xe8] sm:$0xff] %vm1156_vm0, %v10123_v41  ;;  %5291 = vrot.lane.b32.xlu1 %v9896_v26, %s9406_s23  ;;  %9259 = vmatpush.msra.mxu3 %v6804_v40 }
 0x107   : > { %4203 = vst.msk [vmem:[#allocation2 + $0xc8] sm:$0xff] %vm1156_vm0, %v10130_v52  ;;  %2307 = vrot.lane.b32.xlu0 %v9942_v56, %s9405_s22  ;;  %v650_v56 = vadd.s32 96, %v9629_v60  ;;  %8082 = vmatpush.msrb.mxu0 %v6804_v40  ;;  %v14093_v40 = vrot.slane %v10005_v9, 7 }
 0x108   : > { %2427 = vst.msk [vmem:[#allocation2 + $0x348] sm:$0xff] %vm2396_vm11, %v9309_v57  ;;  %v10169_v57 = vmax.f32 %v412_v5, 0.0  ;;  %v550_v5 = vadd.f32 %v9634_v61, %v549_v18  ;;  %v414_v18 = vpop.f32.mrf.mxu0  ;;  %v519_v14 = vpop.f32.mrf.mxu1  ;;  %9260 = vmatpush.msra.mxu3 %v6803_v4 }
 0x109   : > { %14086 = vst [vmem:[#allocation39_spill] sm:$0xff] %v10154_v16  ;;  %v415_v27 = vadd.f32 %v9634_v61, %v414_v18  ;;  %v520_v10 = vadd.f32 %v9634_v61, %v519_v14  ;;  %8083 = vmatpush.msrb.mxu0 %v6803_v4  ;;  %v714_v32 = vand.u32 15, %v650_v56  ;;  %v308_v56 = vld [vmem:[%s9547_s20 + $0xe0] sm:$0xff] }
 0x10a   : > { %14087 = vst [vmem:[#allocation40_spill] sm:$0xff] %v10160_v28  ;;  %v10179_v46 = vsel %vm1096_vm12, %v10169_v57, 0.0  ;;  %v10206_v39 = vmax.f32 %v550_v5, 0.0 }
 0x10b   : > { %1692 = vst.msk [vmem:[#allocation2 + $0xf0] sm:$0xff] %vm1156_vm0, %v10145_v35  ;;  %v10221_v5 = vmax.f32 %v415_v27, 0.0  ;;  %v10223_v14 = vmax.f32 %v520_v10, 0.0  ;;  %461 = vmatmul.f32.gmra.mxu0 %v307_v3  ;;  %v6783_v27 = vld [vmem:[%s13781_s3 + $0x60] sm:$0xff]  ;;  %v6781_v10 = vld [vmem:[%s13781_s3 + $0x50] sm:$0xff]  ;;  %vm1098_vm15 = vcmp.gt.s32.totalorder %v714_v32, 0 }
 0x10c   : > { %1741 = vst.msk [vmem:[#allocation2 + $0x588] sm:$0xff] %vm1156_vm0, %v10154_v16  ;;  %v758_v16 = vand.u32 15, %v694_v31  ;;  %v13811_v34 = vrot.slane %v10206_v39, 7  ;;  %v6779_v32 = vld [vmem:[%s13781_s3 + $0x40] sm:$0xff] }
 0x10d   : > { %14088 = vst [vmem:[#allocation41_spill] sm:$0xff] %v10171_v12  ;;  %v10236_v3 = vsel %vm10210_vm14, %v10223_v14, 0.0  ;;  %6002 = vrot.lane.b32.xlu2 %v9950_v2, %s9407_s9  ;;  %v6782_v2 = vld [vmem:[%s13781_s3 + $0x58] sm:$0xff] }
 0x10e   : > { %1726 = vst.msk [vmem:[#allocation2 + $0x420] sm:$0xff] %vm1156_vm0, %v10160_v28  ;;  %vm1142_vm13 = vcmp.gt.s32.totalorder %v758_v16, 0  ;;  %v6784_v16 = vld [vmem:[%s13781_s3 + $0x68] sm:$0xff]  ;;  %v10248_v7 = vsel %vm2071_vm6, %v14093_v40, %v13811_v34  ;;  %3492 = vrot.lane.b32.xlu1 %v9896_v26, %s9407_s9 }
 0x10f   : > { %6557 = vst.msk [vmem:[#allocation2 + $0x448] sm:$0xff] %vm1156_vm0, %v10171_v12  ;;  %v10216_v30 = vsel %vm1142_vm13, %v10206_v39, 0.0  ;;  %7652 = vmatpush.msrb.mxu1 %v6784_v16  ;;  %v10257_v18 = vpop.permute.xlu2 %2852  ;;  %2277 = vrot.lane.b32.xlu0 %v9967_v55, %s9405_s22 }
 0x110   : > { %6522 = vst.msk [vmem:[#allocation2 + $0x100] sm:$0xff] %vm1156_vm0, %v10179_v46  ;;  %v417_v31 = vpop.f32.mrf.mxu0  ;;  %v522_v26 = vpop.f32.mrf.mxu1 }
 0x111   : > { %14091 = vst [vmem:[#allocation42_spill] sm:$0xff] %v10216_v30  ;;  %7653 = vmatpush.msrb.mxu1 %v6783_v27  ;;  %v418_v4 = vadd.f32 %v9634_v61, %v417_v31  ;;  %v523_v16 = vadd.f32 %v9634_v61, %v522_v26  ;;  %v686_v27 = vadd.s32 384, %v9629_v60  ;;  %v6778_v31 = vld [vmem:[%s13781_s3 + $0x38] sm:$0xff] }
 0x112   : > { %6568 = vst.msk [vmem:[#allocation2 + $0x550] sm:$0xff] %vm1156_vm0, %v10216_v30  ;;  %v6780_v30 = vld [vmem:[%s13781_s3 + $0x48] sm:$0xff] }
 0x113   : > { %6523 = vst.msk [vmem:[#allocation2 + $0x118] sm:$0xff] %vm1156_vm0, %v10221_v5  ;;  %7654 = vmatpush.msrb.mxu1 %v6782_v2  ;;  %v10270_v40 = vmax.f32 %v418_v4, 0.0  ;;  %v10272_v34 = vmax.f32 %v523_v16, 0.0  ;;  %464 = vmatmul.f32.gmra.mxu0 %v308_v56  ;;  %v552_v56 = vpop.f32.mrf.mxu2  ;;  %v6777_v4 = vld [vmem:[%s13781_s3 + $0x30] sm:$0xff] }
 0x114   : > { %14092 = vst [vmem:[#allocation43_spill] sm:$0xff] %v10236_v3  ;;  %v553_v47 = vadd.f32 %v9634_v61, %v552_v56 }
 0x115   : > { %14094 = vst [vmem:[#allocation44_spill] sm:$0xff] %v10248_v7  ;;  %7655 = vmatpush.msrb.mxu1 %v6781_v10  ;;  %v10278_v2 = vsel %vm1098_vm15, %v10270_v40, 0.0  ;;  %3494 = vrot.lane.b32.xlu2 %v9958_v51, %s9407_s9  ;;  %v13823_v10 = vrot.slane %v10010_v63, 7 }
 0x116   : > { %6558 = vst.msk [vmem:[#allocation2 + $0x460] sm:$0xff] %vm1156_vm0, %v10236_v3  ;;  %5293 = vrot.lane.b32.xlu1 %v9958_v51, %s9406_s23  ;;  %v14097_v51 = vrot.slane %v9979_v15, 7  ;;  %v652_v3 = vadd.s32 112, %v9629_v60  ;;  %v10324_v28 = vmax.f32 %v553_v47, 0.0 }
 0x117   : > { %14095 = vst [vmem:[#allocation45_spill] sm:$0xff] %v10257_v18  ;;  %7656 = vmatpush.msrb.mxu1 %v6780_v30  ;;  %v750_v30 = vand.u32 15, %v686_v27  ;;  %v10295_v26 = vpop.permute.xlu2 %2784  ;;  %2792 = vrot.lane.b32.xlu0 %v9960_v19, %s9406_s23  ;;  %v13826_v27 = vrot.slane %v10049_v20, 7 }
 0x118   : > { %4253 = vst.msk [vmem:[#allocation2 + $0x578] sm:$0xff] %vm1156_vm0, %v10248_v7  ;;  %v10307_v16 = vsel %vm2071_vm6, %v14097_v51, %v13823_v10  ;;  %v525_v9 = vpop.f32.mrf.mxu1  ;;  %v14099_v51 = vrot.slane %v10099_v37, 7 }
 0x119   : > { %14096 = vst [vmem:[#allocation46_spill] sm:$0xff] %v10272_v34  ;;  %7657 = vmatpush.msrb.mxu1 %v6779_v32  ;;  %v420_v32 = vpop.f32.mrf.mxu0  ;;  %v526_v49 = vadd.f32 %v9634_v61, %v525_v9  ;;  %vm1134_vm1 = vcmp.gt.s32.totalorder %v750_v30, 0  ;;  %v6776_v9 = vld [vmem:[%s13781_s3 + $0x28] sm:$0xff]  ;;  %v696_v30 = vadd.s32 464, %v9629_v60 }
 0x11a   : > { %6559 = vst.msk [vmem:[#allocation2 + $0x478] sm:$0xff] %vm1156_vm0, %v10272_v34  ;;  %v421_v29 = vadd.f32 %v9634_v61, %v420_v32  ;;  %v10322_v10 = vsel %vm2071_vm6, %v14099_v51, %v13826_v27  ;;  %v716_v32 = vand.u32 15, %v652_v3  ;;  %v6774_v3 = vld [vmem:[%s13781_s3 + $0x18] sm:$0xff]  ;;  %v6773_v27 = vld [vmem:[%s13781_s3 + $0x10] sm:$0xff] }
 0x11b   : > { %6524 = vst.msk [vmem:[#allocation2 + $0x130] sm:$0xff] %vm1156_vm0, %v10278_v2  ;;  %7658 = vmatpush.msrb.mxu1 %v6778_v31  ;;  %v10330_v56 = vmax.f32 %v526_v49, 0.0  ;;  %467 = vmatmul.f32.gmra.mxu0 %v309_v24  ;;  %v6775_v24 = vld [vmem:[%s13781_s3 + $0x20] sm:$0xff]  ;;  %v760_v55 = vand.u32 15, %v696_v30 }
 0x11c   : > { %14098 = vst [vmem:[#allocation47_spill] sm:$0xff] %v10307_v16  ;;  %v10328_v31 = vmax.f32 %v421_v29, 0.0  ;;  %v10351_v29 = vpop.permute.xlu1 %9312  ;;  %vm10368_vm2 = vcmp.gt.s32.totalorder %v716_v32, 0  ;;  %v14107_v32 = vrot.slane %v10206_v39, 7 }
 0x11d   : > { %4238 = vst.msk [vmem:[#allocation2 + $0x410] sm:$0xff] %vm1156_vm0, %v10307_v16  ;;  %7659 = vmatpush.msrb.mxu1 %v6777_v4  ;;  %v10340_v47 = vsel %vm1134_vm1, %v10330_v56, 0.0  ;;  %2209 = vrot.lane.b32.xlu2 %v10085_v25, %s9405_s22  ;;  %v9315_v51 = vunpack.i.h.bf16 %v10351_v29  ;;  %vm1144_vm3 = vcmp.gt.s32.totalorder %v760_v55, 0  ;;  %v680_v55 = vadd.s32 336, %v9629_v60 }
 0x11e   : > { %14100 = vst [vmem:[#allocation48_spill] sm:$0xff] %v10324_v28  ;;  %2309 = vrot.lane.b32.xlu1 %v10044_v11, %s9405_s22 }
 0x11f   : > { %4204 = vst.msk [vmem:[#allocation2 + $0xe0] sm:$0xff] %vm1156_vm0, %v10322_v10  ;;  %7660 = vmatpush.msrb.mxu1 %v6776_v9  ;;  %v4585_v4 = vpop.permute.xlu2 %4584  ;;  %4592 = vrot.lane.b32.xlu0 %v9960_v19, %s9405_s22  ;;  %v555_v9 = vpop.f32.mrf.mxu2 }
 0x120   : > { %6569 = vst.msk [vmem:[#allocation2 + $0x568] sm:$0xff] %vm1156_vm0, %v10324_v28  ;;  %v528_v19 = vpop.f32.mrf.mxu1  ;;  %v556_v58 = vadd.f32 %v9634_v61, %v555_v9 }
 0x121   : > { %6525 = vst.msk [vmem:[#allocation2 + $0x148] sm:$0xff] %vm1156_vm0, %v10328_v31  ;;  %7661 = vmatpush.msrb.mxu1 %v6775_v24  ;;  %v508_v24 = vadd.f32 %v9634_v61, %v10033_v23  ;;  %v423_v11 = vpop.f32.mrf.mxu0  ;;  %v529_v49 = vadd.f32 %v9634_v61, %v528_v19  ;;  %v10377_v23 = vld [vmem:[#allocation2 + $0x478] sm:$0xff]  ;;  %v744_v19 = vand.u32 15, %v680_v55 }
 0x122   : > { %14101 = vst [vmem:[#allocation49_spill] sm:$0xff] %v10340_v47  ;;  %v424_v59 = vadd.f32 %v9634_v61, %v423_v11  ;;  %v10386_v54 = vmax.f32 %v556_v58, 0.0  ;;  %v14109_v61 = vrot.slane %v10206_v39, 6  ;;  %v6772_v58 = vld [vmem:[%s13781_s3 + $0x8] sm:$0xff] }
 0x123   : > { %6560 = vst.msk [vmem:[#allocation2 + $0x490] sm:$0xff] %vm1156_vm0, %v10340_v47  ;;  %7662 = vmatpush.msrb.mxu1 %v6774_v3  ;;  %v10398_v30 = vmax.f32 %v529_v49, 0.0  ;;  %470 = vmatmul.f32.gmra.mxu0 %v310_v1  ;;  %v10412_v1 = vmax.f32 %v508_v24, 0.0  ;;  %v6771_v47 = vld [vmem:[%s13781_s3] sm:$0xff]  ;;  %vm1128_vm10 = vcmp.gt.s32.totalorder %v744_v19, 0 }
 0x124   : > { %14102 = vst [vmem:[#allocation50_spill] sm:$0xff] %v10351_v29  ;;  %v10394_v11 = vsel %vm1492_vm8, %v10132_v42, %v14109_v61  ;;  %v10396_v3 = vmax.f32 %v424_v59, 0.0  ;;  %v10407_v9 = vsel %vm1144_vm3, %v10386_v54, 0.0  ;;  %v679_v42 = vadd.s32 328, %v9629_v60 }
 0x125   : > { %4775 = vst.msk [vmem:[#allocation2 + $0x50] sm:$0xff] %vm2396_vm11, %v4585_v4  ;;  %v14106_v4 = vrot.slane %v10324_v28, 7  ;;  %7663 = vmatpush.msrb.mxu1 %v6773_v27  ;;  %v13844_v27 = vrot.slane %v10377_v23, 1  ;;  %5295 = vrot.lane.b32.xlu2 %v10090_v36, %s9406_s23 }
 0x126   : > { %14105 = vst [vmem:[#allocation51_spill] sm:$0xff] %v10377_v23  ;;  %v10417_v59 = vsel %vm10368_vm2, %v10396_v3, 0.0  ;;  %2862 = vrot.lane.b32.xlu1 %v10003_v50, %s9406_s23  ;;  %v10449_v50 = vsel %vm1128_vm10, %v10412_v1, 0.0  ;;  %vm3681_vm2 = vcmask 1048322  }
 0x127   : > { %v10384_v38 = vsel %vm2071_vm6, %v14107_v32, %v14106_v4  ;;  %14110 = vst [vmem:[#allocation53_spill] sm:$0xff] %v10394_v11  ;;  %7664 = vmatpush.msrb.mxu1 %v6772_v58  ;;  %v645_v4 = vadd.s32 56, %v9629_v60  ;;  %6004 = vrot.lane.b32.xlu0 %v10085_v25, %s9407_s9  ;;  %v3489_v32 = vpop.permute.xlu2 %3488  ;;  %v10443_v25 = vld [vmem:[%s13780_s2] ss:$0 sm:$0xff] }
 0x128   : > { %14108 = vst [vmem:[#allocation52_spill] sm:$0xff] %v10384_v38  ;;  %v531_v58 = vpop.f32.mrf.mxu1 }
 0x129   : > { %4254 = vst.msk [vmem:[#allocation2 + $0x590] sm:$0xff] %vm1156_vm0, %v10384_v38  ;;  %7665 = vmatpush.msrb.mxu1 %v6771_v47  ;;  %v426_v61 = vpop.f32.mrf.mxu0  ;;  %v2783_v47 = vpop.permute.xlu1 %2782 }
 0x12a   : > { %14111 = vst [vmem:[#allocation54_spill] sm:$0xff] %v10398_v30  ;;  %v6716_v49 = vld [vmem:[#allocation2 + $0x490] sm:$0xff] }
 0x12b   : > { %3006 = vst.msk [vmem:[#allocation2 + $0x348] sm:$0xff] %vm2974_vm4, %v9315_v51  ;;  %v752_v51 = vand.u32 15, %v688_v17  ;;  %v7284_v24 = vrot.slane %v6716_v49, 1  ;;  %v743_v17 = vand.u32 15, %v679_v42  ;;  %v311_v49 = vld [vmem:[%s9547_s20 + $0xf8] sm:$0xff]  ;;  %v532_v42 = vadd.f32 %v10443_v25, %v531_v58 }
 0x12c   : > { %14112 = vst [vmem:[#allocation55_spill] sm:$0xff] %v10407_v9  ;;  %473 = vmatmul.f32.gmra.mxu0 %v311_v49 }
 0x12d   : > { %1742 = vst.msk [vmem:[#allocation2 + $0x5a0] sm:$0xff] %vm1156_vm0, %v10394_v11  ;;  %v7285_v55 = vsel %vm7006_vm7, %v13844_v27, %v7284_v24  ;;  %v709_v11 = vand.u32 15, %v645_v4  ;;  %v13845_v27 = vrot.slane %v10412_v1, 7  ;;  %vm10452_vm12 = vcmp.gt.s32.totalorder %v752_v51, 0  ;;  %2864 = vrot.lane.b32.xlu2 %v10010_v63, %s9406_s23 }
 0x12e   : > { %6561 = vst.msk [vmem:[#allocation2 + $0x4a8] sm:$0xff] %vm1156_vm0, %v10398_v30  ;;  %9136 = vmatmul.msk.f32.vlgmr.msra.gmra.mxu3 %vm1156_vm0, %v7285_v55  ;;  %v654_v4 = vadd.s32 128, %v9629_v60  ;;  %vm10458_vm14 = vcmp.lt.s32.totalorder %v743_v17, 15  ;;  %v10464_v55 = vmax.f32 %v532_v42, 0.0  ;;  %v14118_v51 = vrot.slane %v10010_v63, 7  ;;  %2279 = vrot.lane.b32.xlu1 %v10017_v0, %s9405_s22 }
 0x12f   : > { %6526 = vst.msk [vmem:[#allocation2 + $0x160] sm:$0xff] %vm1156_vm0, %v10417_v59  ;;  %vm1029_vm13 = vcmp.lt.s32.totalorder %v709_v11, 15  ;;  %v1405_v49 = vsel %vm10458_vm14, %v10010_v63, 0.0  ;;  %v14121_v42 = vrot.slane %v10099_v37, 6  ;;  %3496 = vrot.lane.b32.xlu0 %v10090_v36, %s9407_s9  ;;  %v759_v63 = vand.u32 15, %v695_v21 }
 0x130   : > { %6570 = vst.msk [vmem:[#allocation2 + $0x580] sm:$0xff] %vm1156_vm0, %v10407_v9  ;;  %v427_v9 = vadd.f32 %v10443_v25, %v426_v61  ;;  %v1371_v11 = vsel %vm1029_vm13, %v10049_v20, 0.0  ;;  %v718_v61 = vand.u32 15, %v654_v4  ;;  %v14122_v4 = vrot.slane %v9979_v15, 6 }
 0x131   : > { %3684 = vst.msk [vmem:[#allocation2 + $0x48] sm:$0xff] %vm3683_vm5, %v3489_v32  ;;  %v2200_v32 = vpop.permute.xlu0 %2199  ;;  %v14124_v36 = vrot.slane %v9687_v33, 7  ;;  %v14125_v0 = vrot.slane %v10464_v55, 7  ;;  %v4583_v53 = vpop.permute.xlu1 %4582  ;;  %v14127_v21 = vrot.slane %v10464_v55, 6  ;;  %vm1079_vm1 = vcmp.lt.s32.totalorder %v759_v63, 15 }
 0x132   : > { %14113 = vst [vmem:[#allocation56_spill] sm:$0xff] %v10449_v50  ;;  %v10462_v58 = vmax.f32 %v427_v9, 0.0  ;;  %v10478_v9 = vrot.slane %v1371_v11, 6  ;;  %vm1102_vm15 = vcmp.gt.s32.totalorder %v718_v61, 0  ;;  %v656_v33 = vadd.s32 144, %v9629_v60 }
 0x133   : > { %2395 = vst.msk [vmem:[#allocation2 + $0x60] sm:$0xfe] %vm2394_vm9, %v2200_v32  ;;  %v10473_v32 = vsel %vm2071_vm6, %v14118_v51, %v13845_v27  ;;  %v10489_v51 = vsel %vm10452_vm12, %v10464_v55, 0.0  ;;  %v10493_v27 = vrot.slane %v1405_v49, 6 }
 0x134   : > { %6554 = vst.msk [vmem:[#allocation2 + $0x400] sm:$0xff] %vm1156_vm0, %v10449_v50  ;;  %v10503_v19 = vsel %vm1492_vm8, %v14121_v42, %v10478_v9  ;;  %v429_v42 = vpop.f32.mrf.mxu0 }
 0x135   : > { %14119 = vst [vmem:[#allocation57_spill] sm:$0xff] %v10473_v32  ;;  %v6719_v17 = vld [vmem:[#allocation2 + $0x4a8] sm:$0xff]  ;;  %v10517_v37 = vsel %vm1492_vm8, %v14122_v4, %v10493_v27  ;;  %v10539_v4 = vsel %vm1492_vm8, %v14127_v21, %v9758_v6  ;;  %2311 = vrot.lane.b32.xlu2 %v10248_v7, %s9405_s22  ;;  %v13863_v7 = vrot.slane %v10386_v54, 6 }
 0x136   : > { %4239 = vst.msk [vmem:[#allocation2 + $0x428] sm:$0xff] %vm1156_vm0, %v10473_v32  ;;  %v7290_v11 = vrot.slane %v6719_v17, 1  ;;  %v10509_v17 = vpop.permute.xlu2 %5998  ;;  %2794 = vrot.lane.b32.xlu1 %v10116_v44, %s9406_s23 }
 0x137   : > { %6527 = vst.msk [vmem:[#allocation2 + $0x178] sm:$0xff] %vm1156_vm0, %v10462_v58  ;;  %2211 = vrot.lane.b32.xlu0 %v10130_v52, %s9405_s22 }
 0x138   : > { %14120 = vst [vmem:[#allocation58_spill] sm:$0xff] %v10489_v51  ;;  %v7291_v49 = vsel %vm7006_vm7, %v7284_v24, %v7290_v11  ;;  %v10527_v24 = vsel %vm2071_vm6, %v14125_v0, %v14124_v36 }
 0x139   : > { %6562 = vst.msk [vmem:[#allocation2 + $0x4c0] sm:$0xff] %vm1156_vm0, %v10489_v51  ;;  %v312_v51 = vld [vmem:[%s9547_s20 + $0x100] sm:$0xff]  ;;  %9137 = vmatmul.msk.f32.gmra.mxu3 %vm1156_vm0, %v7291_v49  ;;  %v10531_v15 = vpop.permute.xlu0 %2854  ;;  %v1421_v49 = vsel %vm1079_vm1, %v10324_v28, 0.0 }
 0x13a   : > { %2975 = vst.msk [vmem:[#allocation2 + $0x60] sm:$0xff] %vm2974_vm4, %v2783_v47  ;;  %v430_v47 = vadd.f32 %v10443_v25, %v429_v42  ;;  %476 = vmatmul.f32.gmra.mxu0 %v312_v51  ;;  %v1606_v42 = vrot.slane %v1421_v49, 6  ;;  %v14130_v51 = vrot.slane %v10206_v39, 6  ;;  %v313_v49 = vld [vmem:[%s9547_s20 + $0x108] sm:$0xff]  ;;  %v3487_v39 = vpop.permute.xlu1 %3486 }
 0x13b   : > { %14123 = vst [vmem:[#allocation59_spill] sm:$0xff] %v10517_v37 }
 0x13c   : > { %1693 = vst.msk [vmem:[#allocation2 + $0x108] sm:$0xff] %vm1156_vm0, %v10503_v19  ;;  %v10542_v0 = vmax.f32 %v430_v47, 0.0  ;;  %v10561_v61 = vsel %vm1492_vm8, %v14130_v51, %v1606_v42  ;;  %v432_v47 = vpop.f32.mrf.mxu0 }
 0x13d   : > { %14126 = vst [vmem:[#allocation60_spill] sm:$0xff] %v10527_v24  ;;  %2281 = vrot.lane.b32.xlu2 %v10307_v16, %s9405_s22 }
 0x13e   : > { %1727 = vst.msk [vmem:[#allocation2 + $0x438] sm:$0xff] %vm1156_vm0, %v10517_v37  ;;  %v10550_v6 = vsel %vm1102_vm15, %v10542_v0, 0.0  ;;  %v2306_v36 = vpop.permute.xlu2 %2305  ;;  %4594 = vrot.lane.b32.xlu1 %v10116_v44, %s9405_s22 }
 0x13f   : > { %14128 = vst [vmem:[#allocation61_spill] sm:$0xff] %v10539_v4  ;;  %5297 = vrot.lane.b32.xlu0 %v10145_v35, %s9406_s23 }
 0x140   : > { %4774 = vst.msk [vmem:[#allocation2 + $0x38] sm:$0xff] %vm2396_vm11, %v4583_v53  ;;  %v6722_v53 = vld [vmem:[#allocation2 + $0x4c0] sm:$0xff] }
 0x141   : > { %4248 = vst.msk [vmem:[#allocation2 + $0x500] sm:$0xff] %vm1156_vm0, %v10527_v24  ;;  %v7296_v63 = vrot.slane %v6722_v53, 1  ;;  %v433_v53 = vadd.f32 %v10443_v25, %v432_v47  ;;  %v2202_v51 = vpop.permute.xlu0 %2201  ;;  %v13858_v47 = vrot.slane %v10386_v54, 7 }
 0x142   : > { %1737 = vst.msk [vmem:[#allocation2 + $0x528] sm:$0xff] %vm1156_vm0, %v10539_v4  ;;  %479 = vmatmul.f32.gmra.mxu0 %v313_v49  ;;  %v314_v4 = vld [vmem:[%s9547_s20 + $0x110] sm:$0xff]  ;;  %v10626_v37 = vpop.permute.xlu1 %2856 }
 0x143   : > { %14129 = vst [vmem:[#allocation62_spill] sm:$0xff] %v10550_v6  ;;  %v7297_v21 = vsel %vm7006_vm7, %v7290_v11, %v7296_v63  ;;  %v10579_v11 = vld [vmem:[#allocation2 + $0x4d8] sm:$0xff] }
 0x144   : > { %6528 = vst.msk [vmem:[#allocation2 + $0x190] sm:$0xff] %vm1156_vm0, %v10550_v6  ;;  %9138 = vmatmul.msk.f32.gmra.mxu3 %vm1156_vm0, %v7297_v21  ;;  %v10606_v21 = vsel %vm1492_vm8, %v1606_v42, %v13863_v7 }
 0x145   : > { %14131 = vst [vmem:[#allocation63_spill] sm:$0xff] %v10561_v61  ;;  %2796 = vrot.lane.b32.xlu2 %v10049_v20, %s9406_s23 }
 0x146   : > { %1743 = vst.msk [vmem:[#allocation2 + $0x5b8] sm:$0xff] %vm1156_vm0, %v10561_v61  ;;  %v406_v61 = vadd.f32 %v10443_v25, %v10069_v13  ;;  %v14133_v13 = vrot.slane %v10324_v28, 7  ;;  %v2859_v44 = vpop.permute.xlu2 %2858  ;;  %6006 = vrot.lane.b32.xlu1 %v10130_v52, %s9407_s9 }
 0x147   : > { %2449 = vst.msk [vmem:[#allocation2 + $0x558] sm:$0xff] %vm2396_vm11, %v2306_v36  ;;  %v10576_v36 = vmax.f32 %v433_v53, 0.0  ;;  %v720_v53 = vand.u32 15, %v656_v33  ;;  %v10612_v33 = vld [vmem:[#allocation2 + $0x48] sm:$0xff]  ;;  %2313 = vrot.lane.b32.xlu0 %v10384_v38, %s9405_s22 }
 0x148   : > { %3682 = vst.msk [vmem:[#allocation2 + $0x30] sm:$0xfc] %vm3681_vm2, %v3487_v39  ;;  %v10594_v49 = vsel %vm2071_vm6, %v14133_v13, %v13858_v47  ;;  %v343_v39 = vld [vmem:[%s9547_s20 + $0x1f8] sm:$0xff]  ;;  %v10608_v13 = vmax.f32 %v406_v61, 0.0  ;;  %v435_v47 = vpop.f32.mrf.mxu0  ;;  %v14136_v61 = vrot.slane %v10412_v1, 6 }
 0x149   : > { %14132 = vst [vmem:[#allocation64_spill] sm:$0xff] %v10576_v36  ;;  %569 = vmatmul.f32.gmra.mxu2 %v343_v39  ;;  %v436_v16 = vadd.f32 %v10443_v25, %v435_v47  ;;  %v2272_v39 = vpop.permute.xlu0 %2271  ;;  %vm1104_vm3 = vcmp.gt.s32.totalorder %v720_v53, 0 }
 0x14a   : > { %2397 = vst.msk [vmem:[#allocation2 + $0x78] sm:$0xff] %vm2396_vm11, %v2202_v51  ;;  %v646_v51 = vadd.s32 64, %v9629_v60  ;;  %v10623_v7 = vsel %vm1492_vm8, %v10493_v27, %v14136_v61  ;;  %v13870_v27 = vrot.slane %v10612_v33, 1  ;;  %482 = vmatmul.f32.gmra.mxu0 %v314_v4  ;;  %v6578_v61 = vld [vmem:[#allocation2 + $0x40] sm:$0xfe] }
 0x14b   : > { %2976 = vst.msk [vmem:[#allocation2 + $0x78] sm:$0xff] %vm2974_vm4, %v10295_v26  ;;  %v7302_v26 = vrot.slane %v10579_v11, 1  ;;  %v681_v11 = vadd.s32 344, %v9629_v60  ;;  %v10635_v47 = vmax.f32 %v436_v16, 0.0  ;;  %v7013_v4 = vrot.slane %v6578_v61, 1 }
 0x14c   : > { %6529 = vst.msk [vmem:[#allocation2 + $0x1a8] sm:$0xff] %vm1156_vm0, %v10576_v36  ;;  %v710_v42 = vand.u32 15, %v646_v51 }
 0x14d   : > { %14134 = vst [vmem:[#allocation65_spill] sm:$0xff] %v10594_v49  ;;  %v7303_v28 = vsel %vm7006_vm7, %v7296_v63, %v7302_v26  ;;  %v745_v63 = vand.u32 15, %v681_v11  ;;  %v10651_v16 = vsel %vm1104_vm3, %v10635_v47, 0.0  ;;  %v13872_v11 = vrot.slane %v10608_v13, 7  ;;  %4596 = vrot.lane.b32.xlu2 %v10049_v20, %s9405_s22 }
 0x14e   : > { %4255 = vst.msk [vmem:[#allocation2 + $0x5a8] sm:$0xff] %vm1156_vm0, %v10594_v49  ;;  %9139 = vmatmul.msk.f32.gmra.mxu3 %vm1156_vm0, %v7303_v28  ;;  %vm1094_vm9 = vcmp.gt.s32.totalorder %v710_v42, 0  ;;  %v10637_v28 = vld [vmem:[#allocation2 + $0x58] sm:$0xff]  ;;  %3498 = vrot.lane.b32.xlu1 %v10145_v35, %s9407_s9 }
 0x14f   : > { %14135 = vst [vmem:[#allocation66_spill] sm:$0xff] %v10606_v21  ;;  %v6576_v18 = vld [vmem:[#allocation2 + $0x30] sm:$0xfe]  ;;  %v10642_v29 = vsel %vm1094_vm9, %v10608_v13, 0.0  ;;  %vm1065_vm10 = vcmp.lt.s32.totalorder %v745_v63, 15  ;;  %v6802_v42 = vld [vmem:[%s13781_s3 + $0xf8] sm:$0xff]  ;;  %v2276_v63 = vpop.permute.xlu2 %2275  ;;  %2866 = vrot.lane.b32.xlu0 %v10449_v50, %s9406_s23 }
 0x150   : > { %1744 = vst.msk [vmem:[#allocation2 + $0x5d0] sm:$0xff] %vm1156_vm0, %v10606_v21  ;;  %v10629_v21 = vld [vmem:[#allocation2 + $0x4f0] sm:$0xff]  ;;  %v7007_v51 = vrot.slane %v6576_v18, 1  ;;  %7859 = vmatpush.msrb.mxu2 %v6802_v42  ;;  %v438_v52 = vpop.f32.mrf.mxu0 }
 0x151   : > { %14137 = vst [vmem:[#allocation67_spill] sm:$0xff] %v10623_v7  ;;  %v7308_v18 = vrot.slane %v10629_v21, 1  ;;  %v7014_v21 = vrot.slane %v10637_v28, 1  ;;  %v14139_v28 = vrot.slane %v10049_v20, 7  ;;  %v2787_v42 = vpop.permute.xlu0 %2786 }
 0x152   : > { %1728 = vst.msk [vmem:[#allocation2 + $0x450] sm:$0xff] %vm1156_vm0, %v10623_v7  ;;  %v7009_v53 = vsel %vm7006_vm7, %v7007_v51, %v13870_v27  ;;  %v439_v27 = vadd.f32 %v10443_v25, %v438_v52  ;;  %v658_v52 = vadd.s32 160, %v9629_v60 }
 0x153   : > { %2432 = vst.msk [vmem:[#allocation2 + $0x3c0] sm:$0xff] %vm2396_vm11, %v2272_v39  ;;  %7666 = vmatmul.f32.vlgmr.msrb.gmra.mxu1 %v7009_v53  ;;  %v1407_v39 = vsel %vm1065_vm10, %v10092_v48, 0.0  ;;  %v7309_v61 = vsel %vm7006_vm7, %v7302_v26, %v7308_v18  ;;  %v10677_v53 = vsel %vm2071_vm6, %v14139_v28, %v13872_v11  ;;  %v14141_v26 = vrot.slane %v10412_v1, 7 }
 0x154   : > { %3011 = vst.msk [vmem:[#allocation2 + $0x3c0] sm:$0xff] %vm2974_vm4, %v10531_v15  ;;  %v10668_v51 = vrot.slane %v1407_v39, 6  ;;  %v2304_v15 = vpop.permute.xlu1 %2303  ;;  %v10681_v39 = vld [vmem:[#allocation2 + $0x508] sm:$0xff]  ;;  %v7015_v28 = vsel %vm7006_vm7, %v7013_v4, %v7014_v21  ;;  %v10694_v11 = vmax.f32 %v439_v27, 0.0  ;;  %v6801_v27 = vld [vmem:[%s13781_s3 + $0xf0] sm:$0xff]  ;;  %v13881_v4 = vrot.slane %v10608_v13, 6 }
 0x155   : > { %6520 = vst.msk [vmem:[#allocation2 + $0xd0] sm:$0xff] %vm1156_vm0, %v10642_v29  ;;  %9091 = vmatmul.msk.f32.vlgmr.msrb.gmra.mxu0 %vm1156_vm0, %v7015_v28  ;;  %7860 = vmatpush.msrb.mxu2 %v6801_v27  ;;  %v6799_v28 = vld [vmem:[%s13781_s3 + $0xe0] sm:$0xff] }
 0x156   : > { %14138 = vst [vmem:[#allocation68_spill] sm:$0xff] %v10651_v16  ;;  %9140 = vmatmul.msk.f32.gmra.mxu3 %vm1156_vm0, %v7309_v61  ;;  %v10697_v61 = vld [vmem:[#allocation2 + $0x70] sm:$0xff]  ;;  %v10737_v35 = vsel %vm1492_vm8, %v10478_v9, %v13881_v4  ;;  %v6798_v9 = vld [vmem:[%s13781_s3 + $0xd8] sm:$0xff]  ;;  %6008 = vrot.lane.b32.xlu2 %v10322_v10, %s9407_s9 }
 0x157   : > { %6530 = vst.msk [vmem:[#allocation2 + $0x1c0] sm:$0xff] %vm1156_vm0, %v10651_v16  ;;  %v10728_v20 = vpop.permute.xlu2 %2790  ;;  %v10746_v16 = vld [vmem:[#allocation2 + $0x520] sm:$0xff]  ;;  %2213 = vrot.lane.b32.xlu1 %v10322_v10, %s9405_s22  ;;  %2283 = vrot.lane.b32.xlu0 %v10473_v32, %s9405_s22 }
 0x158   : > { %2434 = vst.msk [vmem:[#allocation2 + $0x3f0] sm:$0xff] %vm2396_vm11, %v2276_v63  ;;  %v14140_v63 = vrot.slane %v10092_v48, 7  ;;  %v13882_v4 = vrot.slane %v10746_v16, 1 }
 0x159   : > { %3013 = vst.msk [vmem:[#allocation2 + $0x3f0] sm:$0xff] %vm2974_vm4, %v2859_v44  ;;  %v14144_v44 = vrot.slane %v10412_v1, 6  ;;  %v6800_v1 = vld [vmem:[%s13781_s3 + $0xe8] sm:$0xff]  ;;  %v4587_v23 = vpop.permute.xlu0 %4586 }
 0x15a   : > { %v10689_v38 = vsel %vm2071_vm6, %v14141_v26, %v14140_v63  ;;  %2448 = vst.msk [vmem:[#allocation2 + $0x540] sm:$0xff] %vm2396_vm11, %v2304_v15  ;;  %v7314_v15 = vrot.slane %v10681_v39, 1  ;;  %v722_v39 = vand.u32 15, %v658_v52  ;;  %v7020_v26 = vrot.slane %v10697_v61, 1  ;;  %v441_v61 = vpop.f32.mrf.mxu0  ;;  %7861 = vmatpush.msrb.mxu2 %v6800_v1 }
 0x15b   : > { %14142 = vst [vmem:[#allocation69_spill] sm:$0xff] %v10689_v38  ;;  %v10705_v63 = vsel %vm1492_vm8, %v14144_v44, %v10668_v51  ;;  %v558_v44 = vpop.f32.mrf.mxu2  ;;  %v647_v52 = vadd.s32 72, %v9629_v60  ;;  %v442_v7 = vadd.f32 %v10443_v25, %v441_v61  ;;  %v10759_v61 = vld [vmem:[#allocation2 + $0x88] sm:$0xff] }
 0x15c   : > { %14143 = vst [vmem:[#allocation70_spill] sm:$0xff] %v10694_v11  ;;  %v7315_v27 = vsel %vm7006_vm7, %v7308_v18, %v7314_v15  ;;  %v559_v50 = vadd.f32 %v10443_v25, %v558_v44  ;;  %vm1106_vm12 = vcmp.gt.s32.totalorder %v722_v39, 0  ;;  %v7021_v18 = vsel %vm7006_vm7, %v7014_v21, %v7020_v26  ;;  %7862 = vmatpush.msrb.mxu2 %v6799_v28 }
 0x15d   : > { %4205 = vst.msk [vmem:[#allocation2 + $0xf8] sm:$0xff] %vm1156_vm0, %v10677_v53  ;;  %v10755_v44 = vmax.f32 %v442_v7, 0.0  ;;  %9092 = vmatmul.msk.f32.gmra.mxu0 %vm1156_vm0, %v7021_v18  ;;  %v6797_v7 = vld [vmem:[%s13781_s3 + $0xd0] sm:$0xff]  ;;  %v7321_v28 = vsel %vm7006_vm7, %v7314_v15, %v13882_v4  ;;  %v10805_v15 = vld [vmem:[#allocation2 + $0x538] sm:$0xff]  ;;  %v514_v4 = vadd.f32 %v10443_v25, %v10111_v62  ;;  %v10826_v62 = vld [vmem:[#allocation2 + $0xa0] sm:$0xff] }
 0x15e   : > { %14145 = vst [vmem:[#allocation71_spill] sm:$0xff] %v10705_v63  ;;  %9141 = vmatmul.msk.f32.gmra.mxu3 %vm1156_vm0, %v7315_v27  ;;  %v10753_v1 = vmax.f32 %v559_v50, 0.0  ;;  %v711_v27 = vand.u32 15, %v647_v52  ;;  %7863 = vmatpush.msrb.mxu2 %v6798_v9  ;;  %v6795_v52 = vld [vmem:[%s13781_s3 + $0xc0] sm:$0xff]  ;;  %v14152_v9 = vrot.slane %v10386_v54, 7 }
 0x15f   : > { %4240 = vst.msk [vmem:[#allocation2 + $0x440] sm:$0xff] %vm1156_vm0, %v10689_v38  ;;  %3500 = vrot.lane.b32.xlu2 %v10503_v19, %s9407_s9  ;;  %5299 = vrot.lane.b32.xlu1 %v10503_v19, %s9406_s23  ;;  %v14158_v19 = vrot.slane %v10746_v16, 1  ;;  %v14159_v16 = vrot.slane %v10608_v13, 6 }
 0x160   : > { %6531 = vst.msk [vmem:[#allocation2 + $0x1d8] sm:$0xff] %vm1156_vm0, %v10694_v11  ;;  %v13883_v21 = vrot.slane %v10753_v1, 7  ;;  %7864 = vmatpush.msrb.mxu2 %v6797_v7  ;;  %vm10784_vm13 = vcmp.lt.s32.totalorder %v711_v27, 15  ;;  %2798 = vrot.lane.b32.xlu0 %v10642_v29, %s9406_s23 }
 0x161   : > { %1729 = vst.msk [vmem:[#allocation2 + $0x468] sm:$0xff] %vm1156_vm0, %v10705_v63  ;;  %v2204_v63 = vpop.permute.xlu1 %2203  ;;  %v5290_v50 = vpop.permute.xlu0 %5289 }
 0x162   : > { %14146 = vst [vmem:[#allocation72_spill] sm:$0xff] %v10737_v35  ;;  %v444_v10 = vpop.f32.mrf.mxu0  ;;  %v10800_v18 = vsel %vm2071_vm6, %v14152_v9, %v13883_v21  ;;  %v14154_v9 = vrot.slane %v10759_v61, 1 }
 0x163   : > { %1694 = vst.msk [vmem:[#allocation2 + $0x120] sm:$0xff] %vm1156_vm0, %v10737_v35  ;;  %v445_v7 = vadd.f32 %v10443_v25, %v444_v10  ;;  %v660_v10 = vadd.s32 176, %v9629_v60 }
 0x164   : > { %2398 = vst.msk [vmem:[#allocation2 + $0x90] sm:$0xff] %vm2396_vm11, %v2204_v63  ;;  %v10764_v63 = vsel %vm1106_vm12, %v10755_v44, 0.0  ;;  %v7027_v21 = vsel %vm7006_vm7, %v7020_v26, %v14154_v9  ;;  %v7326_v26 = vrot.slane %v10805_v15, 1  ;;  %v14157_v9 = vrot.slane %v10608_v13, 7  ;;  %v6790_v13 = vld [vmem:[%s13781_s3 + $0x98] sm:$0xff] }
 0x165   : > { %14147 = vst [vmem:[#allocation73_spill] sm:$0xff] %v10753_v1  ;;  %v10822_v27 = vmax.f32 %v445_v7, 0.0  ;;  %9093 = vmatmul.msk.f32.gmra.mxu0 %vm1156_vm0, %v7027_v21  ;;  %v698_v21 = vadd.s32 480, %v9629_v60  ;;  %v10849_v7 = vmax.f32 %v514_v4, 0.0 }
 0x166   : > { %14148 = vst [vmem:[#allocation74_spill] sm:$0xff] %v10755_v44  ;;  %9142 = vmatmul.msk.f32.gmra.mxu3 %vm1156_vm0, %v7321_v28  ;;  %v6794_v28 = vld [vmem:[%s13781_s3 + $0xb8] sm:$0xff]  ;;  %v13904_v44 = vrot.slane %v10169_v57, 7 }
 0x167   : > { %4776 = vst.msk [vmem:[#allocation2 + $0x68] sm:$0xff] %vm2396_vm11, %v4587_v23  ;;  %v6796_v23 = vld [vmem:[%s13781_s3 + $0xc8] sm:$0xff]  ;;  %v762_v32 = vand.u32 15, %v698_v21  ;;  %v14162_v21 = vrot.slane %v10759_v61, 1  ;;  %2215 = vrot.lane.b32.xlu2 %v10677_v53, %s9405_s22  ;;  %2868 = vrot.lane.b32.xlu1 %v10092_v48, %s9406_s23 }
 0x168   : > { %2977 = vst.msk [vmem:[#allocation2 + $0x90] sm:$0xff] %vm2974_vm4, %v2787_v42  ;;  %v4591_v42 = vpop.permute.xlu2 %4590  ;;  %7865 = vmatpush.msrb.mxu2 %v6796_v23  ;;  %v1373_v23 = vsel %vm10784_vm13, %v10123_v41, 0.0  ;;  %4598 = vrot.lane.b32.xlu0 %v10642_v29, %s9405_s22  ;;  %v6787_v29 = vld [vmem:[%s13781_s3 + $0x80] sm:$0xff] }
 0x169   : > { %14149 = vst [vmem:[#allocation75_spill] sm:$0xff] %v10764_v63  ;;  %vm1146_vm1 = vcmp.gt.s32.totalorder %v762_v32, 0  ;;  %v14167_v32 = vrot.slane %v10092_v48, 7  ;;  %v662_v48 = vadd.s32 192, %v9629_v60 }
 0x16a   : > { %6571 = vst.msk [vmem:[#allocation2 + $0x598] sm:$0xff] %vm1156_vm0, %v10753_v1  ;;  %7866 = vmatpush.msrb.mxu2 %v6795_v52  ;;  %v10847_v52 = vrot.slane %v1373_v23, 6 }
 0x16b   : > { %6532 = vst.msk [vmem:[#allocation2 + $0x1f0] sm:$0xff] %vm1156_vm0, %v10764_v63  ;;  %v10878_v63 = vld [vmem:[#allocation2 + $0x550] sm:$0xff] }
 0x16c   : > { %4778 = vst.msk [vmem:[#allocation2 + $0x98] sm:$0xff] %vm2396_vm11, %v4591_v42  ;;  %v2274_v42 = vpop.permute.xlu1 %2273  ;;  %7867 = vmatpush.msrb.mxu2 %v6794_v28  ;;  %v6791_v28 = vld [vmem:[%s13781_s3 + $0xa0] sm:$0xff] }
 0x16d   : > { %14153 = vst [vmem:[#allocation76_spill] sm:$0xff] %v10800_v18 }
 0x16e   : > { %4256 = vst.msk [vmem:[#allocation2 + $0x5c0] sm:$0xff] %vm1156_vm0, %v10800_v18 }
 0x16f   : > { %2433 = vst.msk [vmem:[#allocation2 + $0x3d8] sm:$0xff] %vm2396_vm11, %v2274_v42  ;;  %v14156_v42 = vrot.slane %v10123_v41, 7  ;;  %5301 = vrot.lane.b32.xlu2 %v10737_v35, %s9406_s23  ;;  %2315 = vrot.lane.b32.xlu1 %v10594_v49, %s9405_s22 }
 0x170   : > { %14155 = vst [vmem:[#allocation77_spill] sm:$0xff] %v10822_v27  ;;  %v2208_v23 = vpop.permute.xlu2 %2207  ;;  %6010 = vrot.lane.b32.xlu0 %v10677_v53, %s9407_s9  ;;  %v683_v53 = vadd.s32 360, %v9629_v60 }
 0x171   : > { %5483 = vst.msk [vmem:[#allocation2 + $0x38] sm:$0xff] %vm2974_vm4, %v5290_v50  ;;  %v10836_v39 = vsel %vm2071_vm6, %v14157_v9, %v14156_v42  ;;  %v682_v50 = vadd.s32 352, %v9629_v60  ;;  %v724_v42 = vand.u32 15, %v660_v10  ;;  %v6792_v9 = vld [vmem:[%s13781_s3 + $0xa8] sm:$0xff]  ;;  %v7327_v10 = vsel %vm7006_vm7, %v14158_v19, %v7326_v26 }
 0x172   : > { %6192 = vst.msk [vmem:[#allocation2 + $0x38] sm:$0xff] %vm3683_vm5, %v10509_v17  ;;  %v6793_v17 = vld [vmem:[%s13781_s3 + $0xb0] sm:$0xff]  ;;  %9143 = vmatmul.msk.f32.gmra.mxu3 %vm1156_vm0, %v7327_v10  ;;  %v10884_v19 = vsel %vm1492_vm8, %v14159_v16, %v10847_v52 }
 0x173   : > { %6533 = vst.msk [vmem:[#allocation2 + $0x208] sm:$0xff] %vm1156_vm0, %v10822_v27  ;;  %7868 = vmatpush.msrb.mxu2 %v6793_v17  ;;  %v746_v4 = vand.u32 15, %v682_v50  ;;  %vm1108_vm15 = vcmp.gt.s32.totalorder %v724_v42, 0  ;;  %v10901_v42 = vld [vmem:[#allocation2 + $0xb8] sm:$0xff] }
 0x174   : > { %3012 = vst.msk [vmem:[#allocation2 + $0x3d8] sm:$0xff] %vm2974_vm4, %v10626_v37  ;;  %v447_v37 = vpop.f32.mrf.mxu0  ;;  %v10875_v50 = vpop.permute.xlu1 %2788 }
 0x175   : > { %4206 = vst.msk [vmem:[#allocation2 + $0x110] sm:$0xff] %vm1156_vm0, %v10836_v39  ;;  %v448_v17 = vadd.f32 %v10443_v25, %v447_v37  ;;  %7869 = vmatpush.msrb.mxu2 %v6792_v9  ;;  %vm1130_vm14 = vcmp.gt.s32.totalorder %v746_v4, 0  ;;  %v561_v9 = vpop.f32.mrf.mxu2 }
 0x176   : > { %2400 = vst.msk [vmem:[#allocation2 + $0xc0] sm:$0xff] %vm2396_vm11, %v2208_v23  ;;  %v3491_v23 = vpop.permute.xlu0 %3490  ;;  %v10893_v10 = vsel %vm1130_vm14, %v10849_v7, 0.0  ;;  %v562_v61 = vadd.f32 %v10443_v25, %v561_v9 }
 0x177   : > { %2979 = vst.msk [vmem:[#allocation2 + $0xc0] sm:$0xff] %vm2974_vm4, %v10728_v20  ;;  %v14161_v20 = vrot.slane %v10826_v62, 1  ;;  %v10898_v4 = vmax.f32 %v448_v17, 0.0  ;;  %7870 = vmatpush.msrb.mxu2 %v6791_v28  ;;  %v6789_v28 = vld [vmem:[%s13781_s3 + $0x90] sm:$0xff]  ;;  %2317 = vrot.lane.b32.xlu2 %v10800_v18, %s9405_s22  ;;  %v664_v18 = vadd.s32 208, %v9629_v60 }
 0x178   : > { %14160 = vst [vmem:[#allocation78_spill] sm:$0xff] %v10884_v19  ;;  %v10914_v17 = vmax.f32 %v562_v61, 0.0  ;;  %2285 = vrot.lane.b32.xlu1 %v10689_v38, %s9405_s22  ;;  %2217 = vrot.lane.b32.xlu0 %v10836_v39, %s9405_s22  ;;  %v2163_v38 = vrot.slane %v10223_v14, 7 }
 0x179   : > { %3685 = vst.msk [vmem:[#allocation2 + $0x60] sm:$0xff] %vm3683_vm5, %v3491_v23  ;;  %v7033_v37 = vsel %vm7006_vm7, %v14162_v21, %v14161_v20  ;;  %v13891_v23 = vrot.slane %v10878_v63, 1  ;;  %v10910_v16 = vsel %vm1108_vm15, %v10898_v4, 0.0  ;;  %7871 = vmatpush.msrb.mxu2 %v6790_v13  ;;  %v6788_v20 = vld [vmem:[%s13781_s3 + $0x88] sm:$0xff]  ;;  %v13894_v21 = vrot.slane %v10849_v7, 7 }
 0x17a   : > { %14163 = vst [vmem:[#allocation79_spill] sm:$0xff] %v10893_v10  ;;  %9094 = vmatmul.msk.f32.gmra.mxu0 %vm1156_vm0, %v7033_v37  ;;  %v10930_v37 = vpop.permute.xlu2 %6002  ;;  %v10933_v9 = vsel %vm1146_vm1, %v10914_v17, 0.0 }
 0x17b   : > { %14164 = vst [vmem:[#allocation80_spill] sm:$0xff] %v10898_v4  ;;  %7872 = vmatpush.msrb.mxu2 %v6789_v28  ;;  %v7333_v61 = vsel %vm7006_vm7, %v7326_v26, %v13891_v23  ;;  %v10950_v28 = vsel %vm2071_vm6, %v14167_v32, %v13894_v21  ;;  %v10958_v23 = vld [vmem:[#allocation2 + $0x568] sm:$0xff]  ;;  %v14169_v32 = vrot.slane %v10901_v42, 1 }
 0x17c   : > { %6556 = vst.msk [vmem:[#allocation2 + $0x430] sm:$0xff] %vm1156_vm0, %v10893_v10  ;;  %v450_v13 = vpop.f32.mrf.mxu0  ;;  %v4589_v4 = vpop.permute.xlu1 %4588  ;;  %9144 = vmatmul.msk.f32.gmra.mxu3 %vm1156_vm0, %v7333_v61 }
 0x17d   : > { %1695 = vst.msk [vmem:[#allocation2 + $0x138] sm:$0xff] %vm1156_vm0, %v10884_v19  ;;  %7873 = vmatpush.msrb.mxu2 %v6788_v20  ;;  %v564_v27 = vpop.f32.mrf.mxu2  ;;  %v10974_v20 = vld [vmem:[#allocation2 + $0xd0] sm:$0xff] }
 0x17e   : > { %14165 = vst [vmem:[#allocation81_spill] sm:$0xff] %v10910_v16  ;;  %v10954_v15 = vpop.permute.xlu0 %6000 }
 0x17f   : > { %6534 = vst.msk [vmem:[#allocation2 + $0x220] sm:$0xff] %vm1156_vm0, %v10910_v16  ;;  %v451_v16 = vadd.f32 %v10443_v25, %v450_v13  ;;  %v14170_v13 = vrot.slane %v10826_v62, 1  ;;  %7874 = vmatpush.msrb.mxu2 %v6787_v29  ;;  %v14172_v62 = vrot.slane %v10612_v33, 1  ;;  %v7044_v29 = vrot.slane %v10974_v20, 1  ;;  %2870 = vrot.lane.b32.xlu2 %v10893_v10, %s9406_s23 }
 0x180   : > { %14166 = vst [vmem:[#allocation82_spill] sm:$0xff] %v10933_v9  ;;  %v10956_v26 = vld [vmem:[#allocation2 + $0x60] sm:$0xff]  ;;  %2800 = vrot.lane.b32.xlu1 %v10123_v41, %s9406_s23  ;;  %5303 = vrot.lane.b32.xlu0 %v10884_v19, %s9406_s23  ;;  %v14195_v10 = vrot.slane %v10169_v57, 7 }
 0x181   : > { %6572 = vst.msk [vmem:[#allocation2 + $0x5b0] sm:$0xff] %vm1156_vm0, %v10933_v9  ;;  %v697_v9 = vadd.s32 472, %v9629_v60  ;;  %v7039_v61 = vsel %vm7006_vm7, %v14170_v13, %v14169_v32  ;;  %v13903_v21 = vrot.slane %v10956_v26, 1  ;;  %v10971_v43 = vmax.f32 %v451_v16, 0.0 }
 0x182   : > { %14168 = vst [vmem:[#allocation83_spill] sm:$0xff] %v10950_v28  ;;  %9095 = vmatmul.msk.f32.gmra.mxu0 %vm1156_vm0, %v7039_v61  ;;  %v7338_v13 = vrot.slane %v10958_v23, 1  ;;  %v726_v23 = vand.u32 15, %v662_v48  ;;  %v2191_v61 = vrot.slane %v10914_v17, 7  ;;  %v1580_v48 = vrot.slane %v10849_v7, 6 }
 0x183   : > { %4241 = vst.msk [vmem:[#allocation2 + $0x458] sm:$0xff] %vm1156_vm0, %v10950_v28  ;;  %v761_v8 = vand.u32 15, %v697_v9  ;;  %v7017_v32 = vsel %vm7006_vm7, %v14172_v62, %v13903_v21  ;;  %v3495_v62 = vpop.permute.xlu2 %3494  ;;  %v14176_v21 = vrot.slane %v10753_v1, 7 }
 0x184   : > { %4777 = vst.msk [vmem:[#allocation2 + $0x80] sm:$0xff] %vm2396_vm11, %v4589_v4  ;;  %v565_v4 = vadd.f32 %v10443_v25, %v564_v27  ;;  %7669 = vmatmul.f32.gmra.mxu1 %v7017_v32  ;;  %v14174_v27 = vrot.slane %v10123_v41, 7  ;;  %v453_v20 = vpop.f32.mrf.mxu0  ;;  %v14175_v32 = vrot.slane %v10878_v63, 1  ;;  %v14178_v63 = vrot.slane %v10169_v57, 6 }
 0x185   : > { %14171 = vst [vmem:[#allocation84_spill] sm:$0xff] %v10971_v43  ;;  %vm1081_vm2 = vcmp.lt.s32.totalorder %v761_v8, 15  ;;  %v454_v33 = vadd.f32 %v10443_v25, %v453_v20  ;;  %vm1110_vm3 = vcmp.gt.s32.totalorder %v726_v23, 0 }
 0x186   : > { %6535 = vst.msk [vmem:[#allocation2 + $0x238] sm:$0xff] %vm1156_vm0, %v10971_v43  ;;  %v10988_v16 = vmax.f32 %v565_v4, 0.0  ;;  %v10995_v9 = vsel %vm2071_vm6, %v14174_v27, %v13904_v44  ;;  %v1423_v4 = vsel %vm1081_vm2, %v10753_v1, 0.0  ;;  %v7339_v27 = vsel %vm7006_vm7, %v14175_v32, %v7338_v13  ;;  %v11024_v49 = vpop.permute.xlu0 %2860 }
 0x187   : > { %4207 = vst.msk [vmem:[#allocation2 + $0x128] sm:$0xff] %vm1156_vm0, %v10995_v9  ;;  %v11009_v8 = vrot.slane %v1423_v4, 6  ;;  %v11019_v44 = vsel %vm2071_vm6, %v14176_v21, %v2191_v61  ;;  %v2206_v4 = vpop.permute.xlu1 %2205  ;;  %9145 = vmatmul.msk.f32.gmra.mxu3 %vm1156_vm0, %v7339_v27  ;;  %v11032_v32 = vsel %vm1492_vm8, %v10847_v52, %v14178_v63  ;;  %v14179_v21 = vrot.slane %v10901_v42, 1  ;;  %v11049_v52 = vld [vmem:[#allocation2 + $0xe8] sm:$0xff]  ;;  %2287 = vrot.lane.b32.xlu2 %v10950_v28, %s9405_s22  ;;  %v11240_v28 = vld [vmem:[#allocation2 + $0x130] sm:$0xff] }
 0x188   : > { %14173 = vst [vmem:[#allocation85_spill] sm:$0xff] %v10988_v16  ;;  %v14180_v27 = vrot.slane %v10386_v54, 6  ;;  %v747_v43 = vand.u32 15, %v683_v53  ;;  %v11044_v35 = vmax.f32 %v454_v33, 0.0  ;;  %v11055_v54 = vsel %vm1492_vm8, %v10668_v51, %v1580_v48  ;;  %6012 = vrot.lane.b32.xlu1 %v10836_v39, %s9407_s9  ;;  %2872 = vrot.lane.b32.xlu0 %v10171_v12, %s9406_s23 }
 0x189   : > { %6573 = vst.msk [vmem:[#allocation2 + $0x5c8] sm:$0xff] %vm1156_vm0, %v10988_v16  ;;  %v7045_v20 = vsel %vm7006_vm7, %v14179_v21, %v7044_v29  ;;  %v11077_v51 = vrot.slane %v10988_v16, 7  ;;  %v2095_v39 = vrot.slane %v10270_v40, 7 }
 0x18a   : > { %3687 = vst.msk [vmem:[#allocation2 + $0x90] sm:$0xff] %vm3683_vm5, %v3495_v62  ;;  %v6746_v62 = vld [vmem:[#allocation2 + $0x580] sm:$0xff]  ;;  %v11042_v1 = vsel %vm1492_vm8, %v14180_v27, %v11009_v8  ;;  %9096 = vmatmul.msk.f32.gmra.mxu0 %vm1156_vm0, %v7045_v20  ;;  %vm11057_vm9 = vcmp.lt.s32.totalorder %v747_v43, 15  ;;  %v11062_v33 = vsel %vm1110_vm3, %v11044_v35, 0.0 }
 0x18b   : > { %14177 = vst [vmem:[#allocation86_spill] sm:$0xff] %v11019_v44  ;;  %v7344_v23 = vrot.slane %v6746_v62, 1  ;;  %v2210_v53 = vpop.permute.xlu2 %2209  ;;  %v11090_v20 = vsel %vm2071_vm6, %v2191_v61, %v11077_v51 }
 0x18c   : > { %4257 = vst.msk [vmem:[#allocation2 + $0x5d8] sm:$0xff] %vm1156_vm0, %v11019_v44  ;;  %v456_v63 = vpop.f32.mrf.mxu0 }
 0x18d   : > { %2399 = vst.msk [vmem:[#allocation2 + $0xa8] sm:$0xff] %vm2396_vm11, %v2206_v4  ;;  %v11081_v4 = vld [vmem:[#allocation2 + $0x598] sm:$0xff]  ;;  %v7345_v21 = vsel %vm7006_vm7, %v7338_v13, %v7344_v23  ;;  %v457_v42 = vadd.f32 %v10443_v25, %v456_v63  ;;  %v14188_v13 = vrot.slane %v11049_v52, 1  ;;  %v11109_v63 = vld [vmem:[#allocation2 + $0x100] sm:$0xff] }
 0x18e   : > { %14181 = vst [vmem:[#allocation87_spill] sm:$0xff] %v11042_v1  ;;  %v2308_v62 = vpop.permute.xlu0 %2307 }
 0x18f   : > { %14182 = vst [vmem:[#allocation88_spill] sm:$0xff] %v11044_v35  ;;  %v5292_v43 = vpop.permute.xlu1 %5291  ;;  %9146 = vmatmul.msk.f32.gmra.mxu3 %vm1156_vm0, %v7345_v21  ;;  %v7051_v61 = vsel %vm7006_vm7, %v7044_v29, %v14188_v13  ;;  %v14190_v21 = vrot.slane %v10171_v12, 7  ;;  %v700_v13 = vadd.s32 496, %v9629_v60  ;;  %2802 = vrot.lane.b32.xlu2 %v10179_v46, %s9406_s23 }
 0x190   : > { %2978 = vst.msk [vmem:[#allocation2 + $0xa8] sm:$0xff] %vm2974_vm4, %v10875_v50  ;;  %v1409_v50 = vsel %vm11057_vm9, %v10171_v12, 0.0  ;;  %2219 = vrot.lane.b32.xlu1 %v10995_v9, %s9405_s22  ;;  %2319 = vrot.lane.b32.xlu0 %v11019_v44, %s9405_s22 }
 0x191   : > { %1696 = vst.msk [vmem:[#allocation2 + $0x150] sm:$0xff] %vm1156_vm0, %v11032_v32  ;;  %v11092_v27 = vrot.slane %v1409_v50, 6  ;;  %v13915_v50 = vrot.slane %v11081_v4, 1 }
 0x192   : > { %14183 = vst [vmem:[#allocation89_spill] sm:$0xff] %v11055_v54  ;;  %9097 = vmatmul.msk.f32.gmra.mxu0 %vm1156_vm0, %v7051_v61 }
 0x193   : > { %14186 = vst [vmem:[#allocation90_spill] sm:$0xff] %v11062_v33  ;;  %v11121_v29 = vsel %vm1492_vm8, %v1580_v48, %v11092_v27  ;;  %v7351_v48 = vsel %vm7006_vm7, %v7344_v23, %v13915_v50  ;;  %v5296_v61 = vpop.permute.xlu2 %5295  ;;  %v6577_v50 = vld [vmem:[#allocation2 + $0x38] sm:$0xfe] }
 0x194   : > { %1745 = vst.msk [vmem:[#allocation2 + $0x5e8] sm:$0xff] %vm1156_vm0, %v11042_v1  ;;  %v14191_v1 = vrot.slane %v10849_v7, 7  ;;  %v764_v7 = vand.u32 15, %v700_v13  ;;  %v13927_v13 = vrot.slane %v10914_v17, 6 }
 0x195   : > { %6536 = vst.msk [vmem:[#allocation2 + $0x250] sm:$0xff] %vm1156_vm0, %v11062_v33 }
 0x196   : > { %1730 = vst.msk [vmem:[#allocation2 + $0x480] sm:$0xff] %vm1156_vm0, %v11055_v54  ;;  %v2278_v35 = vpop.permute.xlu0 %2277  ;;  %vm1148_vm10 = vcmp.gt.s32.totalorder %v764_v7, 0  ;;  %v14199_v7 = vrot.slane %v10171_v12, 7 }
 0x197   : > { %2401 = vst.msk [vmem:[#allocation2 + $0xd8] sm:$0xff] %vm2396_vm11, %v2210_v53  ;;  %v11104_v53 = vmax.f32 %v457_v42, 0.0  ;;  %v567_v42 = vpop.f32.mrf.mxu2  ;;  %9147 = vmatmul.msk.f32.gmra.mxu3 %vm1156_vm0, %v7351_v48 }
 0x198   : > { %14187 = vst [vmem:[#allocation91_spill] sm:$0xff] %v11090_v20  ;;  %2321 = vrot.lane.b32.xlu1 %v11090_v20, %s9405_s22 }
 0x199   : > { %4258 = vst.msk [vmem:[#allocation2 + $0x5f0] sm:$0xff] %vm1156_vm0, %v11090_v20  ;;  %v11398_v20 = vld [vmem:[#allocation2 + $0x160] sm:$0xff] }
 0x19a   : > { %5484 = vst.msk [vmem:[#allocation2 + $0x50] sm:$0xff] %vm2974_vm4, %v5292_v43  ;;  %v11116_v43 = vsel %vm2071_vm6, %v14191_v1, %v14190_v21  ;;  %v7056_v1 = vrot.slane %v11109_v63, 1  ;;  %v11141_v21 = vld [vmem:[#allocation2 + $0x5b0] sm:$0xff]  ;;  %v14194_v63 = vrot.slane %v10221_v5, 7 }
 0x19b   : > { %14189 = vst [vmem:[#allocation92_spill] sm:$0xff] %v11104_v53  ;;  %2289 = vrot.lane.b32.xlu0 %v11116_v43, %s9405_s22 }
 0x19c   : > { %6193 = vst.msk [vmem:[#allocation2 + $0x50] sm:$0xff] %vm3683_vm5, %v10954_v15  ;;  %v728_v15 = vand.u32 15, %v664_v18  ;;  %v699_v18 = vadd.s32 488, %v9629_v60  ;;  %v11148_v23 = vsel %vm2071_vm6, %v14195_v10, %v14194_v63  ;;  %v11159_v10 = vld [vmem:[#allocation2 + $0x118] sm:$0xff]  ;;  %v7356_v63 = vrot.slane %v11141_v21, 1 }
 0x19d   : > { %14192 = vst [vmem:[#allocation93_spill] sm:$0xff] %v11116_v43  ;;  %v11184_v21 = vsel %vm2071_vm6, %v14199_v7, %v2163_v38  ;;  %v11219_v7 = vld [vmem:[#allocation2 + $0x5c8] sm:$0xff] }
 0x19e   : > { %2450 = vst.msk [vmem:[#allocation2 + $0x570] sm:$0xff] %vm2396_vm11, %v2308_v62  ;;  %v568_v62 = vadd.f32 %v10443_v25, %v567_v42  ;;  %v459_v42 = vpop.f32.mrf.mxu0  ;;  %v763_v33 = vand.u32 15, %v699_v18  ;;  %vm1112_vm12 = vcmp.gt.s32.totalorder %v728_v15, 0  ;;  %v7010_v15 = vrot.slane %v6577_v50, 1 }
 0x19f   : > { %14193 = vst [vmem:[#allocation94_spill] sm:$0xff] %v11121_v29  ;;  %v460_v19 = vadd.f32 %v10443_v25, %v459_v42  ;;  %v14205_v50 = vrot.slane %v11081_v4, 1 }
 0x1a0   : > { %6537 = vst.msk [vmem:[#allocation2 + $0x268] sm:$0xff] %vm1156_vm0, %v11104_v53  ;;  %v11153_v54 = vmax.f32 %v568_v62, 0.0  ;;  %v3493_v53 = vpop.permute.xlu1 %3492  ;;  %v14197_v62 = vrot.slane %v11049_v52, 1  ;;  %v7062_v52 = vrot.slane %v11159_v10, 1  ;;  %vm11186_vm13 = vcmp.lt.s32.totalorder %v763_v33, 15  ;;  %2291 = vrot.lane.b32.xlu1 %v11184_v21, %s9405_s22 }
 0x1a1   : > { %4242 = vst.msk [vmem:[#allocation2 + $0x470] sm:$0xff] %vm1156_vm0, %v11116_v43  ;;  %v11173_v48 = vmax.f32 %v460_v19, 0.0  ;;  %v11204_v33 = vsel %vm1492_vm8, %v11009_v8, %v13927_v13  ;;  %v11217_v8 = vpop.permute.xlu2 %2864  ;;  %v1425_v4 = vsel %vm11186_vm13, %v10988_v16, 0.0  ;;  %v666_v16 = vadd.s32 224, %v9629_v60 }
 0x1a2   : > { %1731 = vst.msk [vmem:[#allocation2 + $0x498] sm:$0xff] %vm1156_vm0, %v11121_v29  ;;  %v7057_v18 = vsel %vm7006_vm7, %v14197_v62, %v7056_v1  ;;  %v11171_v42 = vsel %vm1148_vm10, %v11153_v54, 0.0  ;;  %v7357_v62 = vsel %vm7006_vm7, %v14205_v50, %v7356_v63  ;;  %v7063_v50 = vsel %vm7006_vm7, %v7056_v1, %v7062_v52  ;;  %v2793_v29 = vpop.permute.xlu0 %2792 }
 0x1a3   : > { %5486 = vst.msk [vmem:[#allocation2 + $0x80] sm:$0xff] %vm2974_vm4, %v5296_v61  ;;  %v11167_v61 = vld [vmem:[#allocation2 + $0x50] sm:$0xff]  ;;  %9098 = vmatmul.msk.f32.gmra.mxu0 %vm1156_vm0, %v7057_v18  ;;  %v13936_v18 = vrot.slane %v10272_v34, 7  ;;  %9148 = vmatmul.msk.f32.gmra.mxu3 %vm1156_vm0, %v7357_v62  ;;  %v13935_v1 = vrot.slane %v11219_v7, 1  ;;  %v14208_v62 = vrot.slane %v10221_v5, 7 }
 0x1a4   : > { %14196 = vst [vmem:[#allocation95_spill] sm:$0xff] %v11153_v54  ;;  %2804 = vrot.lane.b32.xlu0 %v10221_v5, %s9406_s23 }
 0x1a5   : > { %4208 = vst.msk [vmem:[#allocation2 + $0x140] sm:$0xff] %vm1156_vm0, %v11148_v23 }
 0x1a6   : > { %3686 = vst.msk [vmem:[#allocation2 + $0x78] sm:$0xff] %vm3683_vm5, %v3493_v53  ;;  %v13926_v53 = vrot.slane %v11167_v61, 1 }
 0x1a7   : > { %14198 = vst [vmem:[#allocation96_spill] sm:$0xff] %v11171_v42 }
 0x1a8   : > { %2435 = vst.msk [vmem:[#allocation2 + $0x408] sm:$0xff] %vm2396_vm11, %v2278_v35  ;;  %v11191_v35 = vsel %vm1112_vm12, %v11173_v48, 0.0  ;;  %v5294_v12 = vpop.permute.xlu1 %5293  ;;  %2806 = vrot.lane.b32.xlu1 %v10278_v2, %s9406_s23 }
 0x1a9   : > { %3014 = vst.msk [vmem:[#allocation2 + $0x408] sm:$0xff] %vm2974_vm4, %v11024_v49  ;;  %v7012_v49 = vsel %vm7006_vm7, %v7010_v15, %v13926_v53  ;;  %v649_v15 = vadd.s32 88, %v9629_v60  ;;  %v11233_v53 = vsel %vm2071_vm6, %v2163_v38, %v13936_v18  ;;  %v11306_v18 = vld [vmem:[%s13780_s2] ss:$0 sm:$0xff] }
 0x1aa   : > { %14200 = vst [vmem:[#allocation97_spill] sm:$0xff] %v11184_v21  ;;  %7875 = vmatmul.f32.vlgmr.msrb.gmra.mxu2 %v7012_v49  ;;  %v462_v49 = vpop.f32.mrf.mxu0 }
 0x1ab   : > { %14203 = vst [vmem:[#allocation98_spill] sm:$0xff] %v11191_v35  ;;  %v713_v13 = vand.u32 15, %v649_v15  ;;  %v11246_v15 = vrot.slane %v1425_v4, 6  ;;  %9099 = vmatmul.msk.f32.gmra.mxu0 %vm1156_vm0, %v7063_v50  ;;  %v685_v50 = vadd.s32 376, %v9629_v60 }
 0x1ac   : > { %6574 = vst.msk [vmem:[#allocation2 + $0x5e0] sm:$0xff] %vm1156_vm0, %v11171_v42  ;;  %v463_v42 = vadd.f32 %v10443_v25, %v462_v49  ;;  %v11256_v49 = vsel %vm2071_vm6, %v14208_v62, %v2095_v39 }
 0x1ad   : > { %14204 = vst [vmem:[#allocation99_spill] sm:$0xff] %v11204_v33  ;;  %v6585_v19 = vld [vmem:[#allocation2 + $0x78] sm:$0xff]  ;;  %vm1033_vm14 = vcmp.lt.s32.totalorder %v713_v13, 15  ;;  %v14209_v13 = vrot.slane %v10956_v26, 1  ;;  %v7363_v26 = vsel %vm7006_vm7, %v7356_v63, %v13935_v1  ;;  %v2097_v1 = vrot.slane %v10328_v31, 7  ;;  %2223 = vrot.lane.b32.xlu0 %v11256_v49, %s9405_s22 }
 0x1ae   : > { %6538 = vst.msk [vmem:[#allocation2 + $0x280] sm:$0xff] %vm1156_vm0, %v11191_v35  ;;  %v7022_v38 = vrot.slane %v6585_v19, 1  ;;  %v11248_v25 = vmax.f32 %v463_v42, 0.0  ;;  %v13942_v42 = vrot.slane %v11240_v28, 1  ;;  %9149 = vmatmul.msk.f32.gmra.mxu3 %vm1156_vm0, %v7363_v26  ;;  %v11314_v35 = vld [vmem:[#allocation2 + $0x148] sm:$0xff] }
 0x1af   : > { %4243 = vst.msk [vmem:[#allocation2 + $0x488] sm:$0xff] %vm1156_vm0, %v11184_v21  ;;  %v11317_v10 = vsel %vm2071_vm6, %v2095_v39, %v2097_v1 }
 0x1b0   : > { %14206 = vst [vmem:[#allocation100_spill] sm:$0xff] %v11233_v53  ;;  %v7023_v4 = vsel %vm7006_vm7, %v14209_v13, %v7022_v38  ;;  %v2312_v13 = vpop.permute.xlu2 %2311  ;;  %2225 = vrot.lane.b32.xlu1 %v11317_v10, %s9405_s22 }
 0x1b1   : > { %1746 = vst.msk [vmem:[#allocation2 + $0x600] sm:$0xff] %vm1156_vm0, %v11204_v33  ;;  %7672 = vmatmul.f32.gmra.mxu1 %v7023_v4  ;;  %v11289_v4 = vld [vmem:[#allocation2 + $0x90] sm:$0xff] }
 0x1b2   : > { %4244 = vst.msk [vmem:[#allocation2 + $0x4a0] sm:$0xff] %vm1156_vm0, %v11233_v53 }
 0x1b3   : > { %5485 = vst.msk [vmem:[#allocation2 + $0x68] sm:$0xff] %vm2974_vm4, %v5294_v12  ;;  %v1375_v12 = vsel %vm1033_vm14, %v10221_v5, 0.0  ;;  %v11291_v63 = vld [vmem:[#allocation2 + $0x5e0] sm:$0xff] }
 0x1b4   : > { %14207 = vst [vmem:[#allocation101_spill] sm:$0xff] %v11248_v25  ;;  %v1514_v19 = vrot.slane %v1375_v12, 6  ;;  %v14222_v33 = vrot.slane %v11291_v63, 1 }
 0x1b5   : > { %6194 = vst.msk [vmem:[#allocation2 + $0x68] sm:$0xff] %vm3683_vm5, %v10930_v37  ;;  %v730_v37 = vand.u32 15, %v666_v16  ;;  %v14211_v16 = vrot.slane %v10914_v17, 6  ;;  %v465_v17 = vpop.f32.mrf.mxu0 }
 0x1b6   : > { %2980 = vst.msk [vmem:[#allocation2 + $0xd8] sm:$0xff] %vm2974_vm4, %v2793_v29  ;;  %v14210_v29 = vrot.slane %v10169_v57, 6  ;;  %v2167_v57 = vrot.slane %v10330_v56, 7  ;;  %v466_v44 = vadd.f32 %v11306_v18, %v465_v17 }
 0x1b7   : > { %6539 = vst.msk [vmem:[#allocation2 + $0x298] sm:$0xff] %vm1156_vm0, %v11248_v25  ;;  %v11285_v12 = vsel %vm1492_vm8, %v14211_v16, %v11246_v15  ;;  %v7069_v16 = vsel %vm7006_vm7, %v7062_v52, %v13942_v42  ;;  %vm11309_vm15 = vcmp.gt.s32.totalorder %v730_v37, 0  ;;  %v2196_v37 = vsel %vm2071_vm6, %v11077_v51, %v9581_v45 }
 0x1b8   : > { %4209 = vst.msk [vmem:[#allocation2 + $0x158] sm:$0xff] %vm1156_vm0, %v11256_v49  ;;  %v11279_v62 = vsel %vm1492_vm8, %v14210_v29, %v1514_v19  ;;  %v749_v29 = vand.u32 15, %v685_v50  ;;  %v2310_v50 = vpop.permute.xlu1 %2309  ;;  %v14215_v42 = vrot.slane %v10272_v34, 7  ;;  %v11334_v25 = vmax.f32 %v466_v44, 0.0  ;;  %9100 = vmatmul.msk.f32.gmra.mxu0 %vm1156_vm0, %v7069_v16  ;;  %2323 = vrot.lane.b32.xlu2 %v2196_v37, %s9405_s22 }
 0x1b9   : > { %14212 = vst [vmem:[#allocation102_spill] sm:$0xff] %v11285_v12  ;;  %v7074_v45 = vrot.slane %v11314_v35, 1  ;;  %v13949_v44 = vrot.slane %v10270_v40, 6  ;;  %v2099_v35 = vrot.slane %v10396_v3, 7  ;;  %v2169_v16 = vrot.slane %v10398_v30, 7 }
 0x1ba   : > { %1697 = vst.msk [vmem:[#allocation2 + $0x168] sm:$0xff] %vm1156_vm0, %v11279_v62  ;;  %v11332_v39 = vsel %vm2071_vm6, %v14215_v42, %v2167_v57  ;;  %vm11339_vm1 = vcmp.lt.s32.totalorder %v749_v29, 15  ;;  %v11353_v42 = vsel %vm11309_vm15, %v11334_v25, 0.0  ;;  %v14221_v29 = vrot.slane %v11167_v61, 1 }
 0x1bb   : > { %2452 = vst.msk [vmem:[#allocation2 + $0x5a0] sm:$0xff] %vm2396_vm11, %v2312_v13  ;;  %v4593_v13 = vpop.permute.xlu0 %4592  ;;  %v1411_v37 = vsel %vm11339_vm1, %v10272_v34, 0.0  ;;  %2295 = vrot.lane.b32.xlu0 %v11332_v39, %s9405_s22  ;;  %vm1170_vm1 = vcmask 253952  }
 0x1bc   : > { %1747 = vst.msk [vmem:[#allocation2 + $0x618] sm:$0xff] %vm1156_vm0, %v11285_v12  ;;  %v11326_v17 = vld [vmem:[#allocation2 + $0x68] sm:$0xff]  ;;  %v14219_v12 = vrot.slane %v11289_v4, 1 }
 0x1bd   : > { %2451 = vst.msk [vmem:[#allocation2 + $0x588] sm:$0xff] %vm2396_vm11, %v2310_v50  ;;  %v13950_v50 = vrot.slane %v11326_v17, 1 }
 0x1be   : > { %14216 = vst [vmem:[#allocation103_spill] sm:$0xff] %v11332_v39  ;;  %v7029_v26 = vsel %vm7006_vm7, %v7022_v38, %v14219_v12  ;;  %v14223_v12 = vrot.slane %v11219_v7, 1  ;;  %v651_v7 = vadd.s32 104, %v9629_v60 }
 0x1bf   : > { %4779 = vst.msk [vmem:[#allocation2 + $0xb0] sm:$0xff] %vm2396_vm11, %v4593_v13  ;;  %7675 = vmatmul.f32.gmra.mxu1 %v7029_v26  ;;  %v7019_v38 = vsel %vm7006_vm7, %v14221_v29, %v13950_v50  ;;  %v11377_v13 = vsel %vm1492_vm8, %v1514_v19, %v13949_v44  ;;  %v2282_v26 = vpop.permute.xlu2 %2281  ;;  %v468_v29 = vpop.f32.mrf.mxu0  ;;  %v13952_v50 = vrot.slane %v11153_v54, 6 }
 0x1c0   : > { %4210 = vst.msk [vmem:[#allocation2 + $0x170] sm:$0xff] %vm1156_vm0, %v11317_v10  ;;  %7878 = vmatmul.f32.gmra.mxu2 %v7019_v38  ;;  %v7369_v61 = vsel %vm7006_vm7, %v14223_v12, %v14222_v33  ;;  %v14224_v38 = vrot.slane %v11240_v28, 1  ;;  %v11392_v33 = vsel %vm2071_vm6, %v2097_v1, %v2099_v35  ;;  %v469_v52 = vadd.f32 %v11306_v18, %v468_v29  ;;  %v2863_v12 = vpop.permute.xlu1 %2862 }
 0x1c1   : > { %14220 = vst [vmem:[#allocation104_spill] sm:$0xff] %v11353_v42  ;;  %9150 = vmatmul.msk.f32.gmra.mxu3 %vm1156_vm0, %v7369_v61  ;;  %v11402_v28 = vsel %vm2071_vm6, %v2167_v57, %v2169_v16  ;;  %v668_v1 = vadd.s32 240, %v9629_v60  ;;  %v1584_v29 = vrot.slane %v10223_v14, 6  ;;  %v7080_v61 = vrot.slane %v11398_v20, 1  ;;  %2221 = vrot.lane.b32.xlu2 %v11148_v23, %s9405_s22 }
 0x1c2   : > { %4245 = vst.msk [vmem:[#allocation2 + $0x4b8] sm:$0xff] %vm1156_vm0, %v11332_v39  ;;  %v7075_v19 = vsel %vm7006_vm7, %v14224_v38, %v7074_v45  ;;  %v11409_v38 = vmax.f32 %v469_v52, 0.0  ;;  %v1617_v57 = vsel %vm1492_vm8, %v11246_v15, %v9663_v22  ;;  %v14226_v14 = vrot.slane %v10464_v55, 7  ;;  %2297 = vrot.lane.b32.xlu1 %v11402_v28, %s9405_s22 }
 0x1c3   : > { %6540 = vst.msk [vmem:[#allocation2 + $0x2b0] sm:$0xff] %vm1156_vm0, %v11353_v42  ;;  %v6005_v44 = vpop.permute.xlu0 %6004  ;;  %9101 = vmatmul.msk.f32.gmra.mxu0 %vm1156_vm0, %v7075_v19  ;;  %2810 = vrot.lane.b32.xlu0 %v10417_v59, %s9406_s23 }
 0x1c4   : > { %1698 = vst.msk [vmem:[#allocation2 + $0x180] sm:$0xff] %vm1156_vm0, %v11377_v13 }
 0x1c5   : > { %2437 = vst.msk [vmem:[#allocation2 + $0x438] sm:$0xff] %vm2396_vm11, %v2282_v26  ;;  %v11404_v26 = vrot.slane %v1411_v37, 6  ;;  %v11437_v37 = vsel %vm1492_vm8, %v11246_v15, %v13952_v50 }
 0x1c6   : > { %3016 = vst.msk [vmem:[#allocation2 + $0x438] sm:$0xff] %vm2974_vm4, %v11217_v8  ;;  %v715_v8 = vand.u32 15, %v651_v7  ;;  %v732_v7 = vand.u32 15, %v668_v1 }
 0x1c7   : > { %14225 = vst [vmem:[#allocation105_spill] sm:$0xff] %v11402_v28  ;;  %v11431_v20 = vsel %vm1492_vm8, %v1584_v29, %v11404_v26  ;;  %v11450_v52 = vpop.permute.xlu2 %2796  ;;  %v471_v15 = vpop.f32.mrf.mxu0 }
 0x1c8   : > { %6195 = vst.msk [vmem:[#allocation2 + $0x80] sm:$0xff] %vm3683_vm5, %v6005_v44  ;;  %v11427_v44 = vsel %vm2071_vm6, %v2169_v16, %v14226_v14  ;;  %v2101_v16 = vrot.slane %v10462_v58, 7  ;;  %vm11444_vm2 = vcmp.lt.s32.totalorder %v715_v8, 15  ;;  %v7081_v14 = vsel %vm7006_vm7, %v7074_v45, %v7080_v61  ;;  %v2280_v34 = vpop.permute.xlu1 %2279 }
 0x1c9   : > { %4211 = vst.msk [vmem:[#allocation2 + $0x188] sm:$0xff] %vm1156_vm0, %v11392_v33  ;;  %v687_v8 = vadd.s32 392, %v9629_v60  ;;  %v1377_v45 = vsel %vm11444_vm2, %v10328_v31, 0.0  ;;  %vm1116_vm3 = vcmp.gt.s32.totalorder %v732_v7, 0  ;;  %v14233_v7 = vrot.slane %v11326_v17, 1  ;;  %2293 = vrot.lane.b32.xlu2 %v11233_v53, %s9405_s22 }
 0x1ca   : > { %4246 = vst.msk [vmem:[#allocation2 + $0x4d0] sm:$0xff] %vm1156_vm0, %v11402_v28  ;;  %v11455_v1 = vsel %vm2071_vm6, %v2099_v35, %v2101_v16  ;;  %v1518_v22 = vrot.slane %v1377_v45, 6  ;;  %v14237_v17 = vrot.slane %v10396_v3, 6  ;;  %v14246_v28 = vrot.slane %v10464_v55, 6  ;;  %2812 = vrot.lane.b32.xlu1 %v10462_v58, %s9406_s23 }
 0x1cb   : > { %6541 = vst.msk [vmem:[#allocation2 + $0x2c8] sm:$0xff] %vm1156_vm0, %v11409_v38  ;;  %v3497_v21 = vpop.permute.xlu0 %3496  ;;  %v751_v50 = vand.u32 15, %v687_v8  ;;  %9102 = vmatmul.msk.f32.gmra.mxu0 %vm1156_vm0, %v7081_v14  ;;  %2229 = vrot.lane.b32.xlu0 %v11455_v1, %s9405_s22 }
 0x1cc   : > { %14227 = vst [vmem:[#allocation106_spill] sm:$0xff] %v11427_v44 }
 0x1cd   : > { %14228 = vst [vmem:[#allocation107_spill] sm:$0xff] %v11431_v20  ;;  %vm11488_vm9 = vcmp.lt.s32.totalorder %v751_v50, 15  ;;  %v11507_v50 = vsel %vm1492_vm8, %v1518_v22, %v14237_v17 }
 0x1ce   : > { %14229 = vst [vmem:[#allocation108_spill] sm:$0xff] %v11437_v37  ;;  %v472_v37 = vadd.f32 %v11306_v18, %v471_v15  ;;  %v11475_v15 = vsel %vm1492_vm8, %v11092_v27, %v1584_v29 }
 0x1cf   : > { %4247 = vst.msk [vmem:[#allocation2 + $0x4e8] sm:$0xff] %vm1156_vm0, %v11427_v44  ;;  %v11462_v43 = vld [vmem:[#allocation2 + $0x80] sm:$0xff]  ;;  %v4597_v14 = vpop.permute.xlu2 %4596  ;;  %v474_v8 = vpop.f32.mrf.mxu0 }
 0x1d0   : > { %1748 = vst.msk [vmem:[#allocation2 + $0x630] sm:$0xff] %vm1156_vm0, %v1617_v57  ;;  %v11464_v57 = vld [vmem:[#allocation2 + $0x178] sm:$0xff]  ;;  %v13962_v35 = vrot.slane %v11462_v43, 1  ;;  %v475_v27 = vadd.f32 %v11306_v18, %v474_v8  ;;  %v2795_v17 = vpop.permute.xlu1 %2794 }
 0x1d1   : > { %1733 = vst.msk [vmem:[#allocation2 + $0x4c8] sm:$0xff] %vm1156_vm0, %v11431_v20  ;;  %v11477_v20 = vmax.f32 %v472_v37, 0.0  ;;  %v7086_v19 = vrot.slane %v11464_v57, 1  ;;  %v1588_v37 = vrot.slane %v10330_v56, 6  ;;  %v653_v56 = vadd.s32 120, %v9629_v60  ;;  %2808 = vrot.lane.b32.xlu2 %v10328_v31, %s9406_s23 }
 0x1d2   : > { %4212 = vst.msk [vmem:[#allocation2 + $0x1a0] sm:$0xff] %vm1156_vm0, %v11455_v1 }
 0x1d3   : > { %2436 = vst.msk [vmem:[#allocation2 + $0x420] sm:$0xff] %vm2396_vm11, %v2280_v34  ;;  %v7025_v34 = vsel %vm7006_vm7, %v14233_v7, %v13962_v35  ;;  %v11493_v29 = vsel %vm1116_vm3, %v11477_v20, 0.0  ;;  %v7087_v57 = vsel %vm7006_vm7, %v7080_v61, %v7086_v19  ;;  %v2212_v35 = vpop.permute.xlu0 %2211  ;;  %v14238_v61 = vrot.slane %v10270_v40, 6  ;;  %2301 = vrot.lane.b32.xlu0 %v10527_v24, %s9405_s22  ;;  %v6632_v24 = vld [vmem:[#allocation2 + $0x1f0] sm:$0xff] }
 0x1d4   : > { %14232 = vst [vmem:[#allocation109_spill] sm:$0xff] %v11475_v15  ;;  %7881 = vmatmul.f32.gmra.mxu2 %v7025_v34  ;;  %9103 = vmatmul.msk.f32.gmra.mxu0 %vm1156_vm0, %v7087_v57 }
 0x1d5   : > { %3015 = vst.msk [vmem:[#allocation2 + $0x420] sm:$0xff] %vm2974_vm4, %v2863_v12  ;;  %v1413_v12 = vsel %vm11488_vm9, %v10398_v30, 0.0  ;;  %v6620_v30 = vld [vmem:[#allocation2 + $0x190] sm:$0xff] }
 0x1d6   : > { %3688 = vst.msk [vmem:[#allocation2 + $0xa8] sm:$0xff] %vm3683_vm5, %v3497_v21  ;;  %v13965_v21 = vrot.slane %v10542_v0, 7  ;;  %v1590_v7 = vrot.slane %v1413_v12, 6  ;;  %v11535_v12 = vmax.f32 %v475_v27, 0.0  ;;  %v7092_v34 = vrot.slane %v6620_v30, 1 }
 0x1d7   : > { %14236 = vst [vmem:[#allocation110_spill] sm:$0xff] %v11493_v29  ;;  %v11573_v27 = vpop.permute.xlu2 %6008 }
 0x1d8   : > { %1732 = vst.msk [vmem:[#allocation2 + $0x4b0] sm:$0xff] %vm1156_vm0, %v11475_v15  ;;  %v11522_v45 = vsel %vm2071_vm6, %v2101_v16, %v13965_v21  ;;  %v717_v16 = vand.u32 15, %v653_v56  ;;  %v11543_v21 = vsel %vm1492_vm8, %v11404_v26, %v1588_v37  ;;  %v14241_v26 = vrot.slane %v11153_v54, 7 }
 0x1d9   : > { %6542 = vst.msk [vmem:[#allocation2 + $0x2e0] sm:$0xff] %vm1156_vm0, %v11493_v29  ;;  %2227 = vrot.lane.b32.xlu2 %v11392_v33, %s9405_s22  ;;  %2231 = vrot.lane.b32.xlu1 %v11522_v45, %s9405_s22  ;;  %v14262_v29 = vrot.slane %v11291_v63, 1 }
 0x1da   : > { %1700 = vst.msk [vmem:[#allocation2 + $0x1b0] sm:$0xff] %vm1156_vm0, %v11507_v50  ;;  %vm1037_vm10 = vcmp.lt.s32.totalorder %v717_v16, 15  ;;  %v11560_v30 = vsel %vm2071_vm6, %v11077_v51, %v14241_v26  ;;  %v11577_v51 = vpop.f32.mrf.mxu0  ;;  %v4595_v16 = vpop.permute.xlu1 %4594  ;;  %v6623_v26 = vld [vmem:[#allocation2 + $0x1a8] sm:$0xff] }
 0x1db   : > { %4781 = vst.msk [vmem:[#allocation2 + $0xe0] sm:$0xff] %vm2396_vm11, %v4597_v14  ;;  %v11532_v14 = vsel %vm1492_vm8, %v14238_v61, %v1518_v22  ;;  %v11549_v22 = vsel %vm1492_vm8, %v1588_v37, %v1590_v7  ;;  %v14243_v37 = vrot.slane %v11289_v4, 1  ;;  %v7093_v4 = vsel %vm7006_vm7, %v7086_v19, %v7092_v34 }
 0x1dc   : > { %4213 = vst.msk [vmem:[#allocation2 + $0x1b8] sm:$0xff] %vm1156_vm0, %v11522_v45  ;;  %9104 = vmatmul.msk.f32.gmra.mxu0 %vm1156_vm0, %v7093_v4  ;;  %v7098_v19 = vrot.slane %v6623_v26, 1 }
 0x1dd   : > { %2402 = vst.msk [vmem:[#allocation2 + $0xf0] sm:$0xff] %vm2396_vm11, %v2212_v35  ;;  %v11539_v8 = vld [vmem:[#allocation2 + $0xa8] sm:$0xff]  ;;  %v1379_v35 = vsel %vm1037_vm10, %v10462_v58, 0.0 }
 0x1de   : > { %2981 = vst.msk [vmem:[#allocation2 + $0xf0] sm:$0xff] %vm2974_vm4, %v2795_v17  ;;  %v13966_v40 = vrot.slane %v11539_v8, 1  ;;  %v1522_v56 = vrot.slane %v1379_v35, 6  ;;  %v14244_v17 = vrot.slane %v10396_v3, 6  ;;  %v5298_v35 = vpop.permute.xlu0 %5297  ;;  %v2105_v3 = vrot.slane %v10576_v36, 7 }
 0x1df   : > { %14239 = vst [vmem:[#allocation111_spill] sm:$0xff] %v11543_v21 }
 0x1e0   : > { %1699 = vst.msk [vmem:[#allocation2 + $0x198] sm:$0xff] %vm1156_vm0, %v11532_v14  ;;  %v7035_v57 = vsel %vm7006_vm7, %v14243_v37, %v13966_v40  ;;  %v11583_v61 = vsel %vm1492_vm8, %v14244_v17, %v1522_v56  ;;  %v1524_v37 = vrot.slane %v10542_v0, 6  ;;  %v14245_v17 = vrot.slane %v10542_v0, 7 }
 0x1e1   : > { %14240 = vst [vmem:[#allocation112_spill] sm:$0xff] %v11549_v22  ;;  %7678 = vmatmul.f32.gmra.mxu1 %v7035_v57  ;;  %v3501_v57 = vpop.permute.xlu2 %3500  ;;  %v672_v0 = vadd.s32 272, %v9629_v60  ;;  %2299 = vrot.lane.b32.xlu2 %v11427_v44, %s9405_s22 }
 0x1e2   : > { %6543 = vst.msk [vmem:[#allocation2 + $0x2f8] sm:$0xff] %vm1156_vm0, %v11535_v12  ;;  %v11606_v4 = vpop.f32.mrf.mxu0  ;;  %v6007_v26 = vpop.permute.xlu1 %6006  ;;  %5305 = vrot.lane.b32.xlu1 %v11032_v32, %s9406_s23 }
 0x1e3   : > { %14242 = vst [vmem:[#allocation113_spill] sm:$0xff] %v11560_v30 }
 0x1e4   : > { %1734 = vst.msk [vmem:[#allocation2 + $0x4e0] sm:$0xff] %vm1156_vm0, %v11543_v21  ;;  %v11614_v21 = vsel %vm1492_vm8, %v1590_v7, %v14246_v28  ;;  %v736_v28 = vand.u32 15, %v672_v0  ;;  %v2107_v7 = vrot.slane %v10635_v47, 7 }
 0x1e5   : > { %1735 = vst.msk [vmem:[#allocation2 + $0x4f8] sm:$0xff] %vm1156_vm0, %v11549_v22 }
 0x1e6   : > { %4259 = vst.msk [vmem:[#allocation2 + $0x608] sm:$0xff] %vm1156_vm0, %v11560_v30  ;;  %v2314_v40 = vpop.permute.xlu0 %2313  ;;  %v6626_v30 = vld [vmem:[#allocation2 + $0x1c0] sm:$0xff]  ;;  %v11644_v0 = vsel %vm2071_vm6, %v2105_v3, %v2107_v7  ;;  %vm1120_vm13 = vcmp.gt.s32.totalorder %v736_v28, 0  ;;  %v14249_v28 = vrot.slane %v11462_v43, 1 }
 0x1e7   : > { %1701 = vst.msk [vmem:[#allocation2 + $0x1c8] sm:$0xff] %vm1156_vm0, %v11583_v61 }
 0x1e8   : > { %4780 = vst.msk [vmem:[#allocation2 + $0xc8] sm:$0xff] %vm2396_vm11, %v4595_v16  ;;  %v11603_v16 = vsel %vm2071_vm6, %v14245_v17, %v2105_v3  ;;  %v7104_v17 = vrot.slane %v6626_v30, 1 }
 0x1e9   : > { %5487 = vst.msk [vmem:[#allocation2 + $0x98] sm:$0xff] %vm2974_vm4, %v5298_v35  ;;  %v7099_v35 = vsel %vm7006_vm7, %v7092_v34, %v7098_v19  ;;  %v655_v34 = vadd.s32 136, %v9629_v60  ;;  %v2216_v30 = vpop.permute.xlu2 %2215  ;;  %2814 = vrot.lane.b32.xlu2 %v10550_v6, %s9406_s23  ;;  %v6647_v6 = vld [vmem:[#allocation2 + $0x268] sm:$0xff] }
 0x1ea   : > { %3690 = vst.msk [vmem:[#allocation2 + $0xd8] sm:$0xff] %vm3683_vm5, %v3501_v57  ;;  %v11619_v57 = vsel %vm1492_vm8, %v1522_v56, %v1524_v37  ;;  %9105 = vmatmul.msk.f32.gmra.mxu0 %vm1156_vm0, %v7099_v35  ;;  %v483_v56 = vpop.f32.mrf.mxu0  ;;  %v7105_v35 = vsel %vm7006_vm7, %v7098_v19, %v7104_v17 }
 0x1eb   : > { %4214 = vst.msk [vmem:[#allocation2 + $0x1d0] sm:$0xff] %vm1156_vm0, %v11603_v16  ;;  %v719_v55 = vand.u32 15, %v655_v34  ;;  %v484_v44 = vadd.f32 %v11306_v18, %v483_v56 }
 0x1ec   : > { %14247 = vst [vmem:[#allocation114_spill] sm:$0xff] %v11614_v21 }
 0x1ed   : > { %6196 = vst.msk [vmem:[#allocation2 + $0x98] sm:$0xff] %vm3683_vm5, %v6007_v26  ;;  %vm1039_vm12 = vcmp.lt.s32.totalorder %v719_v55, 15 }
 0x1ee   : > { %2453 = vst.msk [vmem:[#allocation2 + $0x5b8] sm:$0xff] %vm2396_vm11, %v2314_v40  ;;  %v13976_v40 = vrot.slane %v10694_v11, 7  ;;  %v1381_v34 = vsel %vm1039_vm12, %v10576_v36, 0.0  ;;  %v2867_v22 = vpop.permute.xlu0 %2866 }
 0x1ef   : > { %1736 = vst.msk [vmem:[#allocation2 + $0x510] sm:$0xff] %vm1156_vm0, %v11614_v21  ;;  %v3499_v21 = vpop.permute.xlu1 %3498  ;;  %v1526_v19 = vrot.slane %v1381_v34, 6 }
 0x1f0   : > { %1702 = vst.msk [vmem:[#allocation2 + $0x1e0] sm:$0xff] %vm1156_vm0, %v11619_v57  ;;  %v11641_v26 = vsel %vm2071_vm6, %v2107_v7, %v13976_v40  ;;  %v570_v7 = vpop.f32.mrf.mxu2  ;;  %v607_v40 = vmax.f32 %v484_v44, 0.0 }
 0x1f1   : > { %2404 = vst.msk [vmem:[#allocation2 + $0x120] sm:$0xff] %vm2396_vm11, %v2216_v30  ;;  %v11650_v30 = vld [vmem:[#allocation2 + $0x1d8] sm:$0xff]  ;;  %v571_v56 = vadd.f32 %v11306_v18, %v570_v7  ;;  %v11661_v53 = vsel %vm1492_vm8, %v1524_v37, %v1526_v19  ;;  %v5302_v43 = vpop.permute.xlu2 %5301  ;;  %6014 = vrot.lane.b32.xlu2 %v10995_v9, %s9407_s9  ;;  %v14261_v9 = vld [vmem:[#allocation72_spill] sm:$0xff] }
 0x1f2   : > { %14248 = vst [vmem:[#allocation115_spill] sm:$0xff] %v11641_v26  ;;  %9106 = vmatmul.msk.f32.gmra.mxu0 %vm1156_vm0, %v7105_v35  ;;  %v7110_v34 = vrot.slane %v11650_v30, 1  ;;  %v11671_v44 = vrot.slane %v607_v40, 7  ;;  %v11673_v18 = vsel %vm1120_vm13, %v607_v40, 0.0  ;;  %v14252_v35 = vld [vmem:[#allocation8_spill] sm:$0xff]  ;;  %v11698_v15 = vrot.slane %v607_v40, 6  ;;  %3502 = vrot.lane.b32.xlu0 %v14261_v9, %s9407_s9 }
 0x1f3   : > { %4216 = vst.msk [vmem:[#allocation2 + $0x200] sm:$0xff] %vm1156_vm0, %v11641_v26  ;;  %v11677_v37 = vmax.f32 %v571_v56, 0.0  ;;  %v14253_v30 = vrot.slane %v14252_v35, 7  ;;  %v1528_v56 = vrot.slane %v10635_v47, 6  ;;  %v657_v47 = vadd.s32 152, %v9629_v60 }
 0x1f4   : > { %v11648_v55 = vld [vmem:[#allocation2 + $0x98] sm:$0xff]  ;;  %3689 = vst.msk [vmem:[#allocation2 + $0xc0] sm:$0xff] %vm3683_vm5, %v3499_v21 }
 0x1f5   : > { %v13978_v3 = vrot.slane %v11648_v55, 1  ;;  %4215 = vst.msk [vmem:[#allocation2 + $0x1e8] sm:$0xff] %vm1156_vm0, %v11644_v0  ;;  %v11691_v7 = vsel %vm2071_vm6, %v11671_v44, %v14253_v30  ;;  %v7116_v30 = vrot.slane %v6632_v24, 1  ;;  %v11711_v35 = vsel %vm1492_vm8, %v1526_v19, %v1528_v56  ;;  %v14259_v19 = vld [vmem:[#allocation12_spill] sm:$0xff] }
 0x1f6   : > { %1703 = vst.msk [vmem:[#allocation2 + $0x1f8] sm:$0xff] %vm1156_vm0, %v11661_v53 }
 0x1f7   : > { %v7031_v21 = vsel %vm7006_vm7, %v14249_v28, %v13978_v3  ;;  %14250 = vst [vmem:[#allocation116_spill] sm:$0xff] %v11671_v44  ;;  %v7111_v28 = vsel %vm7006_vm7, %v7104_v17, %v7110_v34  ;;  %v2284_v3 = vpop.permute.xlu0 %2283  ;;  %v14254_v17 = vrot.slane %v11539_v8, 1 }
 0x1f8   : > { %7884 = vmatmul.f32.gmra.mxu2 %v7031_v21  ;;  %14251 = vst [vmem:[#allocation117_spill] sm:$0xff] %v11677_v37  ;;  %v2214_v21 = vpop.permute.xlu1 %2213 }
 0x1f9   : > { %6546 = vst.msk [vmem:[#allocation2 + $0x340] sm:$0xff] %vm1156_vm0, %v11673_v18  ;;  %2233 = vrot.lane.b32.xlu2 %v11603_v16, %s9405_s22 }
 0x1fa   : > { %6575 = vst.msk [vmem:[#allocation2 + $0x5f8] sm:$0xff] %vm1156_vm0, %v11677_v37  ;;  %9107 = vmatmul.msk.f32.gmra.mxu0 %vm1156_vm0, %v7111_v28  ;;  %v14255_v37 = vld [vmem:[#allocation74_spill] sm:$0xff]  ;;  %2816 = vrot.lane.b32.xlu0 %v10576_v36, %s9406_s23 }
 0x1fb   : > { %5489 = vst.msk [vmem:[#allocation2 + $0xc8] sm:$0xff] %vm2974_vm4, %v5302_v43  ;;  %v6594_v39 = vld [vmem:[#allocation2 + $0xc0] sm:$0xff]  ;;  %v2111_v40 = vrot.slane %v14255_v37, 7  ;;  %v11732_v28 = vld [vmem:[#allocation2 + $0xd8] sm:$0xff] }
 0x1fc   : > { %4232 = vst.msk [vmem:[#allocation2 + $0x380] sm:$0xff] %vm1156_vm0, %v11691_v7  ;;  %v7040_v54 = vrot.slane %v6594_v39, 1  ;;  %v721_v39 = vand.u32 15, %v657_v47  ;;  %v7117_v47 = vsel %vm7006_vm7, %v7110_v34, %v7116_v30 }
 0x1fd   : > { %2403 = vst.msk [vmem:[#allocation2 + $0x108] sm:$0xff] %vm2396_vm11, %v2214_v21 }
 0x1fe   : > { %2982 = vst.msk [vmem:[#allocation2 + $0x108] sm:$0xff] %vm2974_vm4, %v11450_v52  ;;  %v7041_v43 = vsel %vm7006_vm7, %v14254_v17, %v7040_v54  ;;  %v14257_v52 = vrot.slane %v10694_v11, 7  ;;  %vm1041_vm14 = vcmp.lt.s32.totalorder %v721_v39, 15  ;;  %v13990_v39 = vrot.slane %v11732_v28, 1 }
 0x1ff   : > { %2438 = vst.msk [vmem:[#allocation2 + $0x450] sm:$0xff] %vm2396_vm11, %v2284_v3  ;;  %7681 = vmatmul.f32.gmra.mxu1 %v7041_v43  ;;  %v2318_v3 = vpop.permute.xlu2 %2317  ;;  %v1383_v17 = vsel %vm1041_vm14, %v10694_v11, 0.0 }
 0x200   : > { %14256 = vst [vmem:[#allocation74_spill] sm:$0xff] %v11711_v35  ;;  %v11721_v8 = vsel %vm2071_vm6, %v14257_v52, %v2111_v40  ;;  %v5300_v43 = vpop.permute.xlu1 %5299  ;;  %v2799_v52 = vpop.permute.xlu0 %2798  ;;  %v7047_v63 = vsel %vm7006_vm7, %v7040_v54, %v13990_v39 }
 0x201   : > { %3017 = vst.msk [vmem:[#allocation2 + $0x450] sm:$0xff] %vm2974_vm4, %v2867_v22  ;;  %v6761_v24 = vld [vmem:[#allocation2 + $0x5f8] sm:$0xff]  ;;  %v11728_v22 = vsel %vm1492_vm8, %v11698_v15, %v14259_v19  ;;  %v6635_v19 = vld [vmem:[#allocation2 + $0x208] sm:$0xff]  ;;  %2820 = vrot.lane.b32.xlu2 %v10694_v11, %s9406_s23 }
 0x202   : > { %14258 = vst [vmem:[#allocation118_spill] sm:$0xff] %v11721_v8  ;;  %v7374_v21 = vrot.slane %v6761_v24, 1  ;;  %9108 = vmatmul.msk.f32.gmra.mxu0 %vm1156_vm0, %v7117_v47  ;;  %v14264_v24 = vld [vmem:[#allocation77_spill] sm:$0xff]  ;;  %2235 = vrot.lane.b32.xlu0 %v11644_v0, %s9405_s22 }
 0x203   : > { %1704 = vst.msk [vmem:[#allocation2 + $0x210] sm:$0xff] %vm1156_vm0, %v11711_v35  ;;  %v1530_v35 = vrot.slane %v1383_v17, 6  ;;  %v14265_v17 = vld [vmem:[#allocation80_spill] sm:$0xff]  ;;  %v6764_v47 = vld [vmem:[#allocation2 + $0x610] sm:$0xff] }
 0x204   : > { %14260 = vst [vmem:[#allocation12_spill] sm:$0xff] %v11728_v22  ;;  %v7375_v9 = vsel %vm7006_vm7, %v14262_v29, %v7374_v21  ;;  %v7122_v29 = vrot.slane %v6635_v19, 1 }
 0x205   : > { %4217 = vst.msk [vmem:[#allocation2 + $0x218] sm:$0xff] %vm1156_vm0, %v11721_v8  ;;  %9151 = vmatmul.msk.f32.gmra.mxu3 %vm1156_vm0, %v7375_v9  ;;  %v11751_v34 = vsel %vm1492_vm8, %v1528_v56, %v1530_v35  ;;  %v14266_v56 = vld [vmem:[#allocation68_spill] sm:$0xff]  ;;  %v1532_v9 = vrot.slane %v14255_v37, 6 }
 0x206   : > { %2455 = vst.msk [vmem:[#allocation2 + $0x5e8] sm:$0xff] %vm2396_vm11, %v2318_v3  ;;  %v2113_v3 = vrot.slane %v14264_v24, 7  ;;  %2818 = vrot.lane.b32.xlu1 %v14266_v56, %s9406_s23  ;;  %v6638_v56 = vld [vmem:[#allocation2 + $0x220] sm:$0xff] }
 0x207   : > { %1721 = vst.msk [vmem:[#allocation2 + $0x3a8] sm:$0xff] %vm1156_vm0, %v11728_v22  ;;  %7684 = vmatmul.f32.gmra.mxu1 %v7047_v63  ;;  %v2871_v54 = vpop.permute.xlu2 %2870  ;;  %v7123_v63 = vsel %vm7006_vm7, %v7116_v30, %v7122_v29  ;;  %v659_v30 = vadd.s32 168, %v9629_v60 }
 0x208   : > { %5488 = vst.msk [vmem:[#allocation2 + $0xb0] sm:$0xff] %vm2974_vm4, %v5300_v43  ;;  %v11771_v19 = vsel %vm2071_vm6, %v2111_v40, %v2113_v3  ;;  %v2869_v39 = vpop.permute.xlu1 %2868  ;;  %v4599_v22 = vpop.permute.xlu0 %4598 }
 0x209   : > { %6197 = vst.msk [vmem:[#allocation2 + $0xb0] sm:$0xff] %vm3683_vm5, %v11573_v27  ;;  %v2115_v27 = vrot.slane %v14265_v17, 7  ;;  %v11787_v40 = vpop.f32.mrf.mxu3  ;;  %5307 = vrot.lane.b32.xlu2 %v11279_v62, %s9406_s23 }
 0x20a   : > { %14263 = vst [vmem:[#allocation72_spill] sm:$0xff] %v11751_v34  ;;  %9109 = vmatmul.msk.f32.gmra.mxu0 %vm1156_vm0, %v7123_v63  ;;  %v723_v63 = vand.u32 15, %v659_v30  ;;  %6016 = vrot.lane.b32.xlu0 %v11148_v23, %s9407_s9 }
 0x20b   : > { %2983 = vst.msk [vmem:[#allocation2 + $0x120] sm:$0xff] %vm2974_vm4, %v2799_v52  ;;  %v11768_v43 = vsel %vm2071_vm6, %v2113_v3, %v2115_v27  ;;  %v7380_v52 = vrot.slane %v6764_v47, 1  ;;  %v7128_v3 = vrot.slane %v6638_v56, 1  ;;  %v11803_v56 = vld [vmem:[#allocation2 + $0x628] sm:$0xff] }
 0x20c   : > { %1705 = vst.msk [vmem:[#allocation2 + $0x228] sm:$0xff] %vm1156_vm0, %v11751_v34  ;;  %vm1043_vm15 = vcmp.lt.s32.totalorder %v723_v63, 15 }
 0x20d   : > { %14267 = vst [vmem:[#allocation80_spill] sm:$0xff] %v11768_v43  ;;  %v7381_v36 = vsel %vm7006_vm7, %v7374_v21, %v7380_v52  ;;  %v11790_v21 = vsel %vm1492_vm8, %v1530_v35, %v1532_v9 }
 0x20e   : > { %14268 = vst [vmem:[#allocation119_spill] sm:$0xff] %v11771_v19  ;;  %9152 = vmatmul.msk.f32.gmra.mxu3 %vm1156_vm0, %v7381_v36  ;;  %2237 = vrot.lane.b32.xlu1 %v11641_v26, %s9405_s22  ;;  %v11815_v26 = vpop.f32.mrf.mxu0 }
 0x20f   : > { %4219 = vst.msk [vmem:[#allocation2 + $0x248] sm:$0xff] %vm1156_vm0, %v11768_v43  ;;  %v2288_v35 = vpop.permute.xlu2 %2287 }
 0x210   : > { %4218 = vst.msk [vmem:[#allocation2 + $0x230] sm:$0xff] %vm1156_vm0, %v11771_v19  ;;  %v11781_v47 = vld [vmem:[#allocation2 + $0xb0] sm:$0xff]  ;;  %v2316_v30 = vpop.permute.xlu1 %2315 }
 0x211   : > { %4782 = vst.msk [vmem:[#allocation2 + $0xf8] sm:$0xff] %vm2396_vm11, %v4599_v22  ;;  %v13994_v37 = vrot.slane %v11781_v47, 1  ;;  %v14271_v22 = vrot.slane %v11648_v55, 1  ;;  %v7129_v55 = vsel %vm7006_vm7, %v7122_v29, %v7128_v3  ;;  %2239 = vrot.lane.b32.xlu2 %v11721_v8, %s9405_s22 }
 0x212   : > { %14269 = vst [vmem:[#allocation120_spill] sm:$0xff] %v11787_v40  ;;  %v13999_v40 = vrot.slane %v11803_v56, 1  ;;  %9110 = vmatmul.msk.f32.gmra.mxu0 %vm1156_vm0, %v7129_v55  ;;  %v1536_v55 = vrot.slane %v14265_v17, 6 }
 0x213   : > { %14270 = vst [vmem:[#allocation121_spill] sm:$0xff] %v11790_v21  ;;  %v7037_v36 = vsel %vm7006_vm7, %v14271_v22, %v13994_v37  ;;  %v1385_v22 = vsel %vm1043_vm15, %v14264_v24, 0.0  ;;  %v6641_v37 = vld [vmem:[#allocation2 + $0x238] sm:$0xff]  ;;  %vm6254_vm15 = vcmask 1041152  }
 0x214   : > { %1706 = vst.msk [vmem:[#allocation2 + $0x240] sm:$0xff] %vm1156_vm0, %v11790_v21  ;;  %7887 = vmatmul.f32.gmra.mxu2 %v7037_v36  ;;  %v6011_v36 = vpop.permute.xlu0 %6010  ;;  %v7387_v11 = vsel %vm7006_vm7, %v7380_v52, %v13999_v40  ;;  %v1534_v21 = vrot.slane %v1385_v22, 6  ;;  %v14273_v52 = vld [vmem:[#allocation84_spill] sm:$0xff] }
 0x215   : > { %2440 = vst.msk [vmem:[#allocation2 + $0x480] sm:$0xff] %vm2396_vm11, %v2288_v35  ;;  %v2117_v63 = vrot.slane %v14273_v52, 7  ;;  %v11829_v35 = vpop.f32.mrf.mxu3 }
 0x216   : > { %3019 = vst.msk [vmem:[#allocation2 + $0x480] sm:$0xff] %vm2974_vm4, %v2871_v54  ;;  %9153 = vmatmul.msk.f32.gmra.mxu3 %vm1156_vm0, %v7387_v11  ;;  %v11822_v29 = vsel %vm1492_vm8, %v1532_v9, %v1534_v21  ;;  %v7134_v54 = vrot.slane %v6641_v37, 1  ;;  %4600 = vrot.lane.b32.xlu1 %v10123_v41, %s9405_s22  ;;  %v11840_v37 = vld [vmem:[#allocation2 + $0x620] sm:$0xff]  ;;  %v8344_v41 = vld [vmem:[%s13783_s5 + $0x18] sm:$0xff]  ;;  %v11858_v40 = vpop.f32.mrf.mxu0 }
 0x217   : > { %2454 = vst.msk [vmem:[#allocation2 + $0x5d0] sm:$0xff] %vm2396_vm11, %v2316_v30  ;;  %v11835_v11 = vpop.permute.xlu2 %2802  ;;  %v11838_v9 = vsel %vm2071_vm6, %v2115_v27, %v2117_v63  ;;  %v6644_v27 = vld [vmem:[#allocation2 + $0x250] sm:$0xff]  ;;  %8553 = vmatpush.msrb.mxu3 %v8344_v41 }
 0x218   : > { %6198 = vst.msk [vmem:[#allocation2 + $0xc8] sm:$0xff] %vm3683_vm5, %v6011_v36  ;;  %v7135_v22 = vsel %vm7006_vm7, %v7128_v3, %v7134_v54  ;;  %v2286_v23 = vpop.permute.xlu1 %2285  ;;  %v661_v3 = vadd.s32 184, %v9629_v60 }
 0x219   : > { %14272 = vst [vmem:[#allocation122_spill] sm:$0xff] %v11822_v29 }
 0x21a   : > { %1707 = vst.msk [vmem:[#allocation2 + $0x258] sm:$0xff] %vm1156_vm0, %v11822_v29  ;;  %9111 = vmatmul.msk.f32.gmra.mxu0 %vm1156_vm0, %v7135_v22  ;;  %v725_v41 = vand.u32 15, %v661_v3  ;;  %v14280_v29 = vld [vmem:[#allocation92_spill] sm:$0xff] }
 0x21b   : > { %14274 = vst [vmem:[#allocation123_spill] sm:$0xff] %v11829_v35  ;;  %v7140_v35 = vrot.slane %v6644_v27, 1  ;;  %v2121_v8 = vrot.slane %v14280_v29, 7 }
 0x21c   : > { %14275 = vst [vmem:[#allocation124_spill] sm:$0xff] %v11838_v9  ;;  %v2218_v30 = vpop.permute.xlu0 %2217  ;;  %vm1045_vm2 = vcmp.lt.s32.totalorder %v725_v41, 15  ;;  %v14283_v41 = vrot.slane %v11803_v56, 1 }
 0x21d   : > { %14276 = vst [vmem:[#allocation125_spill] sm:$0xff] %v11840_v37 }
 0x21e   : > { %1171 = vst.msk [vmem:[#allocation2 + $0x640] sm:$0x1] %vm1170_vm1, %v11840_v37  ;;  %v11862_v37 = vsel %vm1492_vm8, %v1534_v21, %v1536_v55  ;;  %2824 = vrot.lane.b32.xlu1 %v14264_v24, %s9406_s23  ;;  %v8343_v21 = vld [vmem:[%s13783_s5 + $0x10] sm:$0xff]  ;;  %v7141_v24 = vsel %vm7006_vm7, %v7134_v54, %v7140_v35 }
 0x21f   : > { %4220 = vst.msk [vmem:[#allocation2 + $0x260] sm:$0xff] %vm1156_vm0, %v11838_v9  ;;  %v11852_v36 = vld [vmem:[#allocation2 + $0xc8] sm:$0xff]  ;;  %v2324_v3 = vpop.permute.xlu2 %2323  ;;  %8554 = vmatpush.msrb.mxu3 %v8343_v21 }
 0x220   : > { %2439 = vst.msk [vmem:[#allocation2 + $0x468] sm:$0xff] %vm2396_vm11, %v2286_v23  ;;  %v14005_v17 = vrot.slane %v11852_v36, 1  ;;  %v2801_v21 = vpop.permute.xlu1 %2800 }
 0x221   : > { %3018 = vst.msk [vmem:[#allocation2 + $0x468] sm:$0xff] %vm2974_vm4, %v2869_v39  ;;  %v14278_v39 = vrot.slane %v11781_v47, 1  ;;  %v14281_v47 = vld [vmem:[#allocation75_spill] sm:$0xff] }
 0x222   : > { %2405 = vst.msk [vmem:[#allocation2 + $0x138] sm:$0xff] %vm2396_vm11, %v2218_v30  ;;  %v14279_v30 = vld [vmem:[#allocation88_spill] sm:$0xff]  ;;  %2822 = vrot.lane.b32.xlu0 %v14281_v47, %s9406_s23  ;;  %9112 = vmatmul.msk.f32.gmra.mxu0 %vm1156_vm0, %v7141_v24 }
 0x223   : > { %14277 = vst [vmem:[#allocation126_spill] sm:$0xff] %v11862_v37  ;;  %v7043_v22 = vsel %vm7006_vm7, %v14278_v39, %v14005_v17  ;;  %v2119_v27 = vrot.slane %v14279_v30, 7  ;;  %v11885_v17 = vpop.f32.mrf.mxu3 }
 0x224   : > { %1708 = vst.msk [vmem:[#allocation2 + $0x270] sm:$0xff] %vm1156_vm0, %v11862_v37  ;;  %7890 = vmatmul.f32.gmra.mxu2 %v7043_v22  ;;  %v8342_v22 = vld [vmem:[%s13783_s5 + $0x8] sm:$0xff]  ;;  %v8341_v37 = vld [vmem:[%s13783_s5] sm:$0xff]  ;;  %v5304_v34 = vpop.permute.xlu0 %5303 }
 0x225   : > { %v6770_v23 = vld [vmem:[#allocation2 + $0x640] sm:$0x1]  ;;  %14282 = vst [vmem:[#allocation88_spill] sm:$0xff] %v11885_v17  ;;  %v11893_v47 = vsel %vm2071_vm6, %v2119_v27, %v2121_v8  ;;  %8555 = vmatpush.msrb.mxu3 %v8342_v22  ;;  %v11902_v54 = vsel %vm2071_vm6, %v2117_v63, %v2119_v27  ;;  %v14285_v63 = vld [vmem:[#allocation81_spill] sm:$0xff]  ;;  %v11917_v27 = vpop.f32.mrf.mxu0 }
 0x226   : > { %v7392_v39 = vrot.slane %v6770_v23, 1  ;;  %2458 = vst.msk [vmem:[#allocation2 + $0x630] sm:$0xff] %vm2396_vm11, %v2324_v3  ;;  %v1387_v23 = vsel %vm1045_vm2, %v14273_v52, 0.0  ;;  %2826 = vrot.lane.b32.xlu2 %v14285_v63, %s9406_s23  ;;  %2243 = vrot.lane.b32.xlu1 %v11768_v43, %s9405_s22  ;;  %v2127_v43 = vrot.slane %v11334_v25, 7 }
 0x227   : > { %4222 = vst.msk [vmem:[#allocation2 + $0x290] sm:$0xff] %vm1156_vm0, %v11893_v47  ;;  %v1538_v3 = vrot.slane %v1387_v23, 6  ;;  %8556 = vmatpush.msrb.mxu3 %v8341_v37  ;;  %v663_v23 = vadd.s32 200, %v9629_v60 }
 0x228   : > { %v7393_v17 = vsel %vm7006_vm7, %v14283_v41, %v7392_v39  ;;  %2984 = vst.msk [vmem:[#allocation2 + $0x138] sm:$0xff] %vm2974_vm4, %v2801_v21  ;;  %v7146_v39 = vrot.slane %v6647_v6, 1  ;;  %v1540_v6 = vrot.slane %v14279_v30, 6  ;;  %v6013_v37 = vpop.permute.xlu1 %6012  ;;  %v2123_v41 = vrot.slane %v11173_v48, 7 }
 0x229   : > { %9154 = vmatmul.msk.f32.gmra.mxu3 %vm1156_vm0, %v7393_v17  ;;  %5490 = vst.msk [vmem:[#allocation2 + $0xe0] sm:$0xff] %vm2974_vm4, %v5304_v34  ;;  %v11909_v56 = vsel %vm1492_vm8, %v1536_v55, %v1538_v3  ;;  %v2222_v34 = vpop.permute.xlu2 %2221  ;;  %v6650_v17 = vld [vmem:[#allocation2 + $0x280] sm:$0xff] }
 0x22a   : > { %14284 = vst [vmem:[#allocation92_spill] sm:$0xff] %v11909_v56  ;;  %2241 = vrot.lane.b32.xlu0 %v11771_v19, %s9405_s22  ;;  %v7147_v24 = vsel %vm7006_vm7, %v7140_v35, %v7146_v39  ;;  %v7152_v21 = vrot.slane %v6650_v17, 1  ;;  %v11935_v30 = vsel %vm1492_vm8, %v1538_v3, %v1540_v6  ;;  %v727_v35 = vand.u32 15, %v663_v23 }
 0x22b   : > { %4221 = vst.msk [vmem:[#allocation2 + $0x278] sm:$0xff] %vm1156_vm0, %v11902_v54  ;;  %v11928_v22 = vpop.f32.mrf.mxu3  ;;  %9113 = vmatmul.msk.f32.gmra.mxu0 %vm1156_vm0, %v7147_v24  ;;  %v11944_v24 = vsel %vm2071_vm6, %v2121_v8, %v2123_v41 }
 0x22c   : > { %1709 = vst.msk [vmem:[#allocation2 + $0x288] sm:$0xff] %vm1156_vm0, %v11909_v56  ;;  %v11926_v55 = vpop.permute.xlu0 %2872  ;;  %vm1047_vm3 = vcmp.lt.s32.totalorder %v727_v35, 15 }
 0x22d   : > { %2407 = vst.msk [vmem:[#allocation2 + $0x168] sm:$0xff] %vm2396_vm11, %v2222_v34  ;;  %v14288_v34 = vld [vmem:[#allocation78_spill] sm:$0xff]  ;;  %v11950_v3 = vpop.f32.mrf.mxu0  ;;  %v1389_v17 = vsel %vm1047_vm3, %v14280_v29, 0.0 }
 0x22e   : > { %14286 = vst [vmem:[#allocation127_spill] sm:$0xff] %v11928_v22  ;;  %4602 = vrot.lane.b32.xlu2 %v10179_v46, %s9405_s22  ;;  %3504 = vrot.lane.b32.xlu1 %v14288_v34, %s9407_s9  ;;  %v7153_v46 = vsel %vm7006_vm7, %v7146_v39, %v7152_v21  ;;  %v6653_v22 = vld [vmem:[#allocation2 + $0x298] sm:$0xff]  ;;  %v11968_v39 = vld [vmem:[%s13782_s4] ss:$0 sm:$0xff] }
 0x22f   : > { %6199 = vst.msk [vmem:[#allocation2 + $0xe0] sm:$0xff] %vm3683_vm5, %v6013_v37 }
 0x230   : > { %14287 = vst [vmem:[#allocation128_spill] sm:$0xff] %v11935_v30  ;;  %v2220_v23 = vpop.permute.xlu1 %2219 }
 0x231   : > { %1710 = vst.msk [vmem:[#allocation2 + $0x2a0] sm:$0xff] %vm1156_vm0, %v11935_v30  ;;  %v2294_v37 = vpop.permute.xlu2 %2293  ;;  %v1542_v30 = vrot.slane %v1389_v17, 6  ;;  %v14291_v17 = vrot.slane %v11852_v36, 1 }
 0x232   : > { %5309 = vrot.lane.b32.xlu0 %v11377_v13, %s9406_s23  ;;  %4223 = vst.msk [vmem:[#allocation2 + $0x2a8] sm:$0xff] %vm1156_vm0, %v11944_v24 }
 0x233   : > { %2443 = vst.msk [vmem:[#allocation2 + $0x4c8] sm:$0xff] %vm2396_vm11, %v2294_v37  ;;  %9114 = vmatmul.msk.f32.gmra.mxu0 %vm1156_vm0, %v7153_v46  ;;  %v11963_v35 = vsel %vm1492_vm8, %v1540_v6, %v1542_v30  ;;  %v11970_v37 = vpop.f32.mrf.mxu3  ;;  %v7667_v46 = vpop.f32.mrf.mxu1  ;;  %v14292_v6 = vld [vmem:[#allocation101_spill] sm:$0xff] }
 0x234   : > { %v2320_v34 = vpop.permute.xlu0 %2319  ;;  %2406 = vst.msk [vmem:[#allocation2 + $0x150] sm:$0xff] %vm2396_vm11, %v2220_v23  ;;  %v7158_v23 = vrot.slane %v6653_v22, 1  ;;  %v2125_v56 = vrot.slane %v14292_v6, 7 }
 0x235   : > { %2985 = vst.msk [vmem:[#allocation2 + $0x150] sm:$0xff] %vm2974_vm4, %v11835_v11 }
 0x236   : > { %v11955_v8 = vld [vmem:[#allocation2 + $0xe0] sm:$0xff]  ;;  %14289 = vst [vmem:[#allocation78_spill] sm:$0xff] %v11963_v35  ;;  %2245 = vrot.lane.b32.xlu2 %v11838_v9, %s9405_s22  ;;  %v11991_v22 = vsel %vm2071_vm6, %v2125_v56, %v2127_v43 }
 0x237   : > { %v14017_v63 = vrot.slane %v11955_v8, 1  ;;  %14290 = vst [vmem:[#allocation129_spill] sm:$0xff] %v11970_v37  ;;  %v7159_v37 = vsel %vm7006_vm7, %v7152_v21, %v7158_v23 }
 0x238   : > { %2456 = vst.msk [vmem:[#allocation2 + $0x600] sm:$0xff] %vm2396_vm11, %v2320_v34  ;;  %v14293_v34 = vld [vmem:[#allocation90_spill] sm:$0xff] }
 0x239   : > { %v7049_v11 = vsel %vm7006_vm7, %v14291_v17, %v14017_v63  ;;  %1711 = vst.msk [vmem:[#allocation2 + $0x2b8] sm:$0xff] %vm1156_vm0, %v11963_v35  ;;  %2830 = vrot.lane.b32.xlu1 %v14293_v34, %s9406_s23  ;;  %v11988_v36 = vpop.permute.xlu2 %2808  ;;  %v11994_v17 = vsel %vm2071_vm6, %v2123_v41, %v2125_v56  ;;  %v7668_v63 = vadd.f32 %v11968_v39, %v7667_v46  ;;  %v2322_v34 = vpop.permute.xlu1 %2321 }
 0x23a   : > { %7893 = vmatmul.f32.gmra.mxu2 %v7049_v11  ;;  %2828 = vrot.lane.b32.xlu0 %v14273_v52, %s9406_s23  ;;  %14294 = vst [vmem:[#allocation101_spill] sm:$0xff] %v11991_v22  ;;  %v1544_v11 = vrot.slane %v11173_v48, 6  ;;  %v7876_v35 = vpop.f32.mrf.mxu2  ;;  %v6656_v52 = vld [vmem:[#allocation2 + $0x2b0] sm:$0xff]  ;;  %v12004_v41 = vpop.f32.mrf.mxu0  ;;  %v665_v48 = vadd.s32 216, %v9629_v60 }
 0x23b   : > { %4225 = vst.msk [vmem:[#allocation2 + $0x2d8] sm:$0xff] %vm1156_vm0, %v11991_v22  ;;  %v7877_v9 = vadd.f32 %v7876_v35, %v7668_v63  ;;  %9115 = vmatmul.msk.f32.gmra.mxu0 %vm1156_vm0, %v7159_v37  ;;  %v7164_v46 = vrot.slane %v6656_v52, 1  ;;  %v12019_v35 = vpop.f32.mrf.mxu3 }
 0x23c   : > { %4224 = vst.msk [vmem:[#allocation2 + $0x2c0] sm:$0xff] %vm1156_vm0, %v11994_v17  ;;  %v2290_v56 = vpop.permute.xlu0 %2289  ;;  %v12013_v19 = vsel %vm1492_vm8, %v1542_v30, %v1544_v11  ;;  %v729_v63 = vand.u32 15, %v665_v48  ;;  %v6659_v30 = vld [vmem:[#allocation2 + $0x2c8] sm:$0xff] }
 0x23d   : > { %2457 = vst.msk [vmem:[#allocation2 + $0x618] sm:$0xff] %vm2396_vm11, %v2322_v34  ;;  %v8086_v21 = vadd.f32 %v11815_v26, %v7877_v9  ;;  %v7165_v52 = vsel %vm7006_vm7, %v7158_v23, %v7164_v46  ;;  %v7670_v23 = vpop.f32.mrf.mxu1 }
 0x23e   : > { %2441 = vst.msk [vmem:[#allocation2 + $0x498] sm:$0xff] %vm2396_vm11, %v2290_v56  ;;  %2832 = vrot.lane.b32.xlu2 %v14280_v29, %s9406_s23  ;;  %vm1049_vm9 = vcmp.lt.s32.totalorder %v729_v63, 15  ;;  %v12036_v63 = vrot.slane %v11409_v38, 7 }
 0x23f   : > { %3020 = vst.msk [vmem:[#allocation2 + $0x498] sm:$0xff] %vm2974_vm4, %v11926_v55  ;;  %v8277_v37 = vmax.f32 %v8086_v21, 0.0  ;;  %v1391_v9 = vsel %vm1049_vm9, %v14292_v6, 0.0  ;;  %v7170_v21 = vrot.slane %v6659_v30, 1  ;;  %v6662_v30 = vld [vmem:[#allocation2 + $0x2e0] sm:$0xff] }
 0x240   : > { %1712 = vst.msk [vmem:[#allocation2 + $0x2d0] sm:$0xff] %vm1156_vm0, %v12013_v19  ;;  %v1546_v34 = vrot.slane %v1391_v9, 6 }
 0x241   : > { %14295 = vst [vmem:[#allocation130_spill] sm:$0xff] %v12019_v35  ;;  %2249 = vrot.lane.b32.xlu1 %v11893_v47, %s9405_s22  ;;  %v2228_v26 = vpop.permute.xlu2 %2227  ;;  %9155 = vmatmul.msk.f32.vlgmr.msrb.gmra.mxu3 %vm1156_vm0, %v8277_v37  ;;  %v2292_v55 = vpop.permute.xlu1 %2291 }
 0x242   : > { %2247 = vrot.lane.b32.xlu0 %v11902_v54, %s9405_s22  ;;  %2410 = vst.msk [vmem:[#allocation2 + $0x1b0] sm:$0xff] %vm2396_vm11, %v2228_v26  ;;  %v12033_v48 = vsel %vm1492_vm8, %v1544_v11, %v1546_v34  ;;  %v12040_v37 = vpop.f32.mrf.mxu0  ;;  %v12048_v11 = vsel %vm2071_vm6, %v2127_v43, %v12036_v63 }
 0x243   : > { %2442 = vst.msk [vmem:[#allocation2 + $0x4b0] sm:$0xff] %vm2396_vm11, %v2292_v55  ;;  %9116 = vmatmul.msk.f32.gmra.mxu0 %vm1156_vm0, %v7165_v52  ;;  %v1548_v52 = vrot.slane %v11334_v25, 6  ;;  %v12055_v9 = vpop.f32.mrf.mxu3  ;;  %v7879_v43 = vpop.f32.mrf.mxu2 }
 0x244   : > { %v2805_v56 = vpop.permute.xlu0 %2804  ;;  %1713 = vst.msk [vmem:[#allocation2 + $0x2e8] sm:$0xff] %vm1156_vm0, %v12033_v48 }
 0x245   : > { %2986 = vst.msk [vmem:[#allocation2 + $0x168] sm:$0xff] %vm2974_vm4, %v2805_v56 }
 0x246   : > { %3506 = vrot.lane.b32.xlu2 %v11032_v32, %s9407_s9  ;;  %4226 = vst.msk [vmem:[#allocation2 + $0x2f0] sm:$0xff] %vm1156_vm0, %v12048_v11  ;;  %v7671_v32 = vadd.f32 %v11968_v39, %v7670_v23  ;;  %v7176_v23 = vrot.slane %v6662_v30, 1  ;;  %v6665_v30 = vld [vmem:[#allocation2 + $0x2f8] sm:$0xff] }
 0x247   : > { %14296 = vst [vmem:[#allocation131_spill] sm:$0xff] %v12055_v9 }
 0x248   : > { %v7880_v56 = vadd.f32 %v7879_v43, %v7671_v32 }
 0x249   : > { %6018 = vrot.lane.b32.xlu1 %v11256_v49, %s9407_s9  ;;  %v2300_v26 = vpop.permute.xlu2 %2299  ;;  %v7171_v49 = vsel %vm7006_vm7, %v7164_v46, %v7170_v21  ;;  %v2807_v55 = vpop.permute.xlu1 %2806 }
 0x24a   : > { %4604 = vrot.lane.b32.xlu0 %v10221_v5, %s9405_s22  ;;  %2446 = vst.msk [vmem:[#allocation2 + $0x510] sm:$0xff] %vm2396_vm11, %v2300_v26  ;;  %v667_v5 = vadd.s32 232, %v9629_v60  ;;  %v8089_v25 = vadd.f32 %v11858_v40, %v7880_v56  ;;  %v12066_v26 = vsel %vm1492_vm8, %v1546_v34, %v1548_v52  ;;  %v12074_v32 = vpop.f32.mrf.mxu0  ;;  %v14297_v40 = vld [vmem:[#allocation98_spill] sm:$0xff]  ;;  %v7177_v34 = vsel %vm7006_vm7, %v7170_v21, %v7176_v23 }
 0x24b   : > { %9117 = vmatmul.msk.f32.gmra.mxu0 %vm1156_vm0, %v7171_v49  ;;  %1714 = vst.msk [vmem:[#allocation2 + $0x300] sm:$0xff] %vm1156_vm0, %v12066_v26  ;;  %v7182_v21 = vrot.slane %v6665_v30, 1 }
 0x24c   : > { %v2224_v35 = vpop.permute.xlu0 %2223  ;;  %v731_v46 = vand.u32 15, %v667_v5  ;;  %v12083_v5 = vpop.f32.mrf.mxu3 }
 0x24d   : > { %2408 = vst.msk [vmem:[#allocation2 + $0x180] sm:$0xff] %vm2396_vm11, %v2224_v35  ;;  %v8278_v35 = vmax.f32 %v8089_v25, 0.0  ;;  %v7183_v30 = vsel %vm7006_vm7, %v7176_v23, %v7182_v21 }
 0x24e   : > { %2987 = vst.msk [vmem:[#allocation2 + $0x180] sm:$0xff] %vm2974_vm4, %v2807_v55  ;;  %2251 = vrot.lane.b32.xlu2 %v11944_v24, %s9405_s22  ;;  %vm1051_vm10 = vcmp.lt.s32.totalorder %v731_v46, 15 }
 0x24f   : > { %9156 = vmatmul.msk.f32.gmra.mxu3 %vm1156_vm0, %v8278_v35  ;;  %v1393_v55 = vsel %vm1051_vm10, %v11409_v38, 0.0  ;;  %14298 = vst [vmem:[#allocation132_spill] sm:$0xff] %v12083_v5  ;;  %v7673_v35 = vpop.f32.mrf.mxu1 }
 0x250   : > { %v1550_v56 = vrot.slane %v1393_v55, 6 }
 0x251   : > { %2836 = vrot.lane.b32.xlu1 %v14292_v6, %s9406_s23  ;;  %v12078_v49 = vpop.permute.xlu2 %2814  ;;  %v2226_v43 = vpop.permute.xlu1 %2225 }
 0x252   : > { %2834 = vrot.lane.b32.xlu0 %v14297_v40, %s9406_s23  ;;  %2409 = vst.msk [vmem:[#allocation2 + $0x198] sm:$0xff] %vm2396_vm11, %v2226_v43  ;;  %v12090_v46 = vsel %vm1492_vm8, %v1548_v52, %v1550_v56  ;;  %v14301_v40 = vld [vmem:[#allocation9_spill] sm:$0xff] }
 0x253   : > { %2988 = vst.msk [vmem:[#allocation2 + $0x198] sm:$0xff] %vm2974_vm4, %v11988_v36  ;;  %9118 = vmatmul.msk.f32.gmra.mxu0 %vm1156_vm0, %v7177_v34  ;;  %v4064_v36 = vrot.slane %v11477_v20, 7  ;;  %v7674_v34 = vadd.f32 %v11968_v39, %v7673_v35 }
 0x254   : > { %v2296_v25 = vpop.permute.xlu0 %2295  ;;  %14299 = vst [vmem:[#allocation133_spill] sm:$0xff] %v12090_v46 }
 0x255   : > { %2444 = vst.msk [vmem:[#allocation2 + $0x4e0] sm:$0xff] %vm2396_vm11, %v2296_v25  ;;  %v12107_v25 = vpop.f32.mrf.mxu0  ;;  %v12115_v55 = vsel %vm2071_vm6, %v12036_v63, %v4064_v36 }
 0x256   : > { %2838 = vrot.lane.b32.xlu2 %v11353_v42, %s9406_s23  ;;  %1715 = vst.msk [vmem:[#allocation2 + $0x318] sm:$0xff] %vm1156_vm0, %v12090_v46  ;;  %v6668_v42 = vld [vmem:[#allocation2 + $0x310] sm:$0xff] }
 0x257   : > { %v7882_v43 = vpop.f32.mrf.mxu2  ;;  %v7188_v23 = vrot.slane %v6668_v42, 1  ;;  %4227 = vst.msk [vmem:[#allocation2 + $0x308] sm:$0xff] %vm1156_vm0, %v12115_v55 }
 0x258   : > { %v7883_v9 = vadd.f32 %v7882_v43, %v7674_v34  ;;  %v1553_v34 = vsel %vm1492_vm8, %v1550_v56, %v14301_v40 }
 0x259   : > { %2255 = vrot.lane.b32.xlu1 %v11991_v22, %s9405_s22  ;;  %v12103_v52 = vpop.permute.xlu2 %6014  ;;  %v2298_v5 = vpop.permute.xlu1 %2297  ;;  %1716 = vst.msk [vmem:[#allocation2 + $0x330] sm:$0xff] %vm1156_vm0, %v1553_v34  ;;  %v12148_v34 = vrot.slane %v11535_v12, 7 }
 0x25a   : > { %2253 = vrot.lane.b32.xlu0 %v11994_v17, %s9405_s22  ;;  %2445 = vst.msk [vmem:[#allocation2 + $0x4f8] sm:$0xff] %vm2396_vm11, %v2298_v5  ;;  %v8092_v35 = vadd.f32 %v11917_v27, %v7883_v9  ;;  %v12117_v22 = vpop.f32.mrf.mxu3  ;;  %v14302_v5 = vrot.slane %v11477_v20, 6  ;;  %v9332_v9 = vld [vmem:[%s13780_s2] ss:$0 sm:$0xff] }
 0x25b   : > { %9119 = vmatmul.msk.f32.gmra.mxu0 %vm1156_vm0, %v7183_v30  ;;  %14300 = vst [vmem:[#allocation134_spill] sm:$0xff] %v12117_v22  ;;  %v481_v43 = vadd.f32 %v9332_v9, %v11606_v4 }
 0x25c   : > { %v2811_v46 = vpop.permute.xlu0 %2810  ;;  %v12126_v27 = vsel %vm1492_vm8, %v1550_v56, %v14302_v5  ;;  %v8279_v42 = vmax.f32 %v8092_v35, 0.0  ;;  %v6671_v35 = vld [vmem:[#allocation2 + $0x328] sm:$0xff]  ;;  %14303 = vst [vmem:[#allocation135_spill] sm:$0xff] %v12148_v34 }
 0x25d   : > { %2989 = vst.msk [vmem:[#allocation2 + $0x1b0] sm:$0xff] %vm2974_vm4, %v2811_v46  ;;  %v478_v46 = vadd.f32 %v9332_v9, %v11577_v51  ;;  %v7189_v51 = vsel %vm7006_vm7, %v7182_v21, %v7188_v23  ;;  %v12145_v30 = vmax.f32 %v481_v43, 0.0  ;;  %v12150_v9 = vpop.f32.mrf.mxu0  ;;  %v7194_v21 = vrot.slane %v6671_v35, 1 }
 0x25e   : > { %6020 = vrot.lane.b32.xlu2 %v11317_v10, %s9407_s9  ;;  %9157 = vmatmul.msk.f32.gmra.mxu3 %vm1156_vm0, %v8279_v42  ;;  %v12156_v42 = vsel %vm2071_vm6, %v4064_v36, %v12148_v34  ;;  %v14305_v36 = vld [vmem:[#allocation6_spill] sm:$0xff] }
 0x25f   : > { %v12143_v4 = vmax.f32 %v478_v46, 0.0  ;;  %v2137_v43 = vrot.slane %v12145_v30, 7  ;;  %4228 = vst.msk [vmem:[#allocation2 + $0x320] sm:$0xff] %vm1156_vm0, %v12156_v42 }
 0x261   : > { %5311 = vrot.lane.b32.xlu1 %v11532_v14, %s9406_s23  ;;  %v2234_v56 = vpop.permute.xlu2 %2233  ;;  %v2813_v10 = vpop.permute.xlu1 %2812  ;;  %v12160_v46 = vrot.slane %v12143_v4, 7  ;;  %v12179_v35 = vsel %vm2071_vm6, %v2137_v43, %v11671_v44 }
 0x262   : > { %2840 = vrot.lane.b32.xlu0 %v11409_v38, %s9406_s23  ;;  %2413 = vst.msk [vmem:[#allocation2 + $0x1f8] sm:$0xff] %vm2396_vm11, %v2234_v56  ;;  %v12167_v56 = vpop.f32.mrf.mxu3 }
 0x263   : > { %9120 = vmatmul.msk.f32.gmra.mxu0 %vm1156_vm0, %v7189_v51  ;;  %14304 = vst [vmem:[#allocation136_spill] sm:$0xff] %v12167_v56  ;;  %v2132_v51 = vsel %vm2071_vm6, %v12036_v63, %v14305_v36  ;;  %v7195_v56 = vsel %vm7006_vm7, %v7188_v23, %v7194_v21  ;;  %v4069_v23 = vsel %vm2071_vm6, %v12148_v34, %v12160_v46  ;;  %v670_v34 = vadd.s32 256, %v9629_v60 }
 0x264   : > { %v2230_v5 = vpop.permute.xlu0 %2229  ;;  %4231 = vst.msk [vmem:[#allocation2 + $0x368] sm:$0xff] %vm1156_vm0, %v12179_v35 }
 0x265   : > { %2411 = vst.msk [vmem:[#allocation2 + $0x1c8] sm:$0xff] %vm2396_vm11, %v2230_v5  ;;  %v12183_v5 = vsel %vm2071_vm6, %v12160_v46, %v2137_v43  ;;  %v671_v43 = vadd.s32 264, %v9629_v60  ;;  %v12199_v22 = vpop.f32.mrf.mxu0 }
 0x266   : > { %2990 = vst.msk [vmem:[#allocation2 + $0x1c8] sm:$0xff] %vm2974_vm4, %v2813_v10  ;;  %2257 = vrot.lane.b32.xlu2 %v12048_v11, %s9405_s22 }
 0x267   : > { %4230 = vst.msk [vmem:[#allocation2 + $0x350] sm:$0xff] %vm1156_vm0, %v12183_v5 }
 0x268   : > { %14306 = vst [vmem:[#allocation6_spill] sm:$0xff] %v12199_v22 }
 0x269   : > { %4606 = vrot.lane.b32.xlu1 %v10278_v2, %s9405_s22  ;;  %v12175_v10 = vpop.permute.xlu2 %2820  ;;  %v2232_v2 = vpop.permute.xlu1 %2231  ;;  %4229 = vst.msk [vmem:[#allocation2 + $0x338] sm:$0xff] %vm1156_vm0, %v4069_v23 }
 0x26a   : > { %2259 = vrot.lane.b32.xlu0 %v2132_v51, %s9405_s22  ;;  %2412 = vst.msk [vmem:[#allocation2 + $0x1e0] sm:$0xff] %vm2396_vm11, %v2232_v2  ;;  %v6674_v51 = vld [vmem:[#allocation2 + $0x340] sm:$0xff]  ;;  %v735_v2 = vand.u32 15, %v671_v43  ;;  %v12210_v44 = vpop.f32.mrf.mxu3  ;;  %v12215_v43 = vrot.slane %v12143_v4, 6 }
 0x26b   : > { %2991 = vst.msk [vmem:[#allocation2 + $0x1e0] sm:$0xff] %vm2974_vm4, %v12078_v49  ;;  %9121 = vmatmul.msk.f32.gmra.mxu0 %vm1156_vm0, %v7195_v56  ;;  %v7200_v49 = vrot.slane %v6674_v51, 1 }
 0x26c   : > { %v2302_v63 = vpop.permute.xlu0 %2301  ;;  %vm1055_vm12 = vcmp.lt.s32.totalorder %v735_v2, 15  ;;  %14307 = vst [vmem:[#allocation137_spill] sm:$0xff] %v12210_v44  ;;  %v7676_v2 = vpop.f32.mrf.mxu1 }
 0x26d   : > { %2447 = vst.msk [vmem:[#allocation2 + $0x528] sm:$0xff] %vm2396_vm11, %v2302_v63  ;;  %v7201_v63 = vsel %vm7006_vm7, %v7194_v21, %v7200_v49  ;;  %v1397_v22 = vsel %vm1055_vm12, %v12145_v30, 0.0 }
 0x26e   : > { %5313 = vrot.lane.b32.xlu2 %v11507_v50, %s9406_s23  ;;  %14308 = vst [vmem:[#allocation138_spill] sm:$0xff] %v12215_v43 }
 0x271   : > { %3510 = vrot.lane.b32.xlu1 %v11377_v13, %s9407_s9  ;;  %v12208_v56 = vpop.permute.xlu2 %5307  ;;  %v5306_v23 = vpop.permute.xlu1 %5305  ;;  %v1558_v13 = vrot.slane %v1397_v22, 6  ;;  %v6677_v22 = vld [vmem:[#allocation2 + $0x358] sm:$0xff] }
 0x272   : > { %3508 = vrot.lane.b32.xlu0 %v11279_v62, %s9407_s9  ;;  %5491 = vst.msk [vmem:[#allocation2 + $0xf8] sm:$0xff] %vm2974_vm4, %v5306_v23  ;;  %v1557_v62 = vsel %vm1492_vm8, %v14301_v40, %v12215_v43  ;;  %v734_v23 = vand.u32 15, %v670_v34  ;;  %v12242_v44 = vpop.f32.mrf.mxu3  ;;  %v7206_v34 = vrot.slane %v6677_v22, 1 }
 0x273   : > { %6200 = vst.msk [vmem:[#allocation2 + $0xf8] sm:$0xff] %vm3683_vm5, %v12103_v52  ;;  %9122 = vmatmul.msk.f32.gmra.mxu0 %vm1156_vm0, %v7201_v63  ;;  %v12227_v21 = vsel %vm1492_vm8, %v12215_v43, %v1558_v13  ;;  %v7677_v52 = vadd.f32 %v11968_v39, %v7676_v2  ;;  %v12238_v63 = vpop.f32.mrf.mxu0 }
 0x274   : > { %v3503_v51 = vpop.permute.xlu0 %3502  ;;  %14309 = vst [vmem:[#allocation139_spill] sm:$0xff] %v12227_v21  ;;  %vm1118_vm13 = vcmp.gt.s32.totalorder %v734_v23, 0 }
 0x275   : > { %3691 = vst.msk [vmem:[#allocation2 + $0xf0] sm:$0xff] %vm3683_vm5, %v3503_v51  ;;  %v12255_v22 = vsel %vm1118_vm13, %v12143_v4, 0.0  ;;  %v14312_v4 = vrot.slane %v11732_v28, 1 }
 0x276   : > { %4608 = vrot.lane.b32.xlu2 %v10328_v31, %s9405_s22  ;;  %1718 = vst.msk [vmem:[#allocation2 + $0x360] sm:$0xff] %vm1156_vm0, %v1557_v62 }
 0x277   : > { %1719 = vst.msk [vmem:[#allocation2 + $0x378] sm:$0xff] %vm1156_vm0, %v12227_v21  ;;  %v7207_v21 = vsel %vm7006_vm7, %v7200_v49, %v7206_v34  ;;  %v12260_v49 = vsel %vm1492_vm8, %v1558_v13, %v11698_v15 }
 0x278   : > { %14310 = vst [vmem:[#allocation140_spill] sm:$0xff] %v12242_v44 }
 0x279   : > { %6024 = vrot.lane.b32.xlu1 %v11455_v1, %s9407_s9  ;;  %v2240_v51 = vpop.permute.xlu2 %2239  ;;  %v2819_v43 = vpop.permute.xlu1 %2818  ;;  %1720 = vst.msk [vmem:[#allocation2 + $0x390] sm:$0xff] %vm1156_vm0, %v12260_v49 }
 0x27a   : > { %6022 = vrot.lane.b32.xlu0 %v11392_v33, %s9407_s9  ;;  %2416 = vst.msk [vmem:[#allocation2 + $0x240] sm:$0xff] %vm2396_vm11, %v2240_v51  ;;  %v12246_v40 = vld [vmem:[#allocation2 + $0xf8] sm:$0xff]  ;;  %v6680_v51 = vld [vmem:[#allocation2 + $0x370] sm:$0xff] }
 0x27b   : > { %v7885_v31 = vpop.f32.mrf.mxu2  ;;  %9123 = vmatmul.msk.f32.gmra.mxu0 %vm1156_vm0, %v7207_v21  ;;  %v7054_v44 = vrot.slane %v12246_v40, 1  ;;  %v6692_v40 = vld [vmem:[#allocation2 + $0x3d0] sm:$0xff] }
 0x27c   : > { %v7886_v62 = vadd.f32 %v7885_v31, %v7677_v52  ;;  %v2817_v1 = vpop.permute.xlu0 %2816  ;;  %v12251_v33 = vld [vmem:[#allocation2 + $0xf0] sm:$0xff]  ;;  %v7212_v31 = vrot.slane %v6680_v51, 1  ;;  %v6683_v51 = vld [vmem:[#allocation2 + $0x388] sm:$0xff] }
 0x27d   : > { %2992 = vst.msk [vmem:[#allocation2 + $0x1f8] sm:$0xff] %vm2974_vm4, %v2817_v1  ;;  %v7052_v23 = vrot.slane %v12251_v33, 1  ;;  %v12285_v1 = vpop.f32.mrf.mxu0 }
 0x27e   : > { %v8095_v2 = vadd.f32 %v11950_v3, %v7886_v62  ;;  %2846 = vrot.lane.b32.xlu2 %v12255_v22, %s9406_s23  ;;  %v14311_v3 = vrot.slane %v11955_v8, 1  ;;  %v12281_v62 = vpop.f32.mrf.mxu3 }
 0x27f   : > { %v7053_v13 = vsel %vm7006_vm7, %v14312_v4, %v7052_v23 }
 0x280   : > { %v7055_v21 = vsel %vm7006_vm7, %v14311_v3, %v7054_v44  ;;  %v8280_v52 = vmax.f32 %v8095_v2, 0.0  ;;  %7687 = vmatmul.f32.gmra.mxu1 %v7053_v13  ;;  %v7213_v3 = vsel %vm7006_vm7, %v7206_v34, %v7212_v31  ;;  %v7218_v34 = vrot.slane %v6683_v51, 1 }
 0x281   : > { %7896 = vmatmul.f32.gmra.mxu2 %v7055_v21  ;;  %2850 = vrot.lane.b32.xlu1 %v11673_v18, %s9406_s23  ;;  %v12279_v8 = vpop.permute.xlu2 %2826  ;;  %v2238_v28 = vpop.permute.xlu1 %2237  ;;  %v2136_v21 = vsel %vm2071_vm6, %v14305_v36, %v12160_v46 }
 0x282   : > { %9158 = vmatmul.msk.f32.gmra.mxu3 %vm1156_vm0, %v8280_v52  ;;  %2848 = vrot.lane.b32.xlu0 %v12145_v30, %s9406_s23  ;;  %2415 = vst.msk [vmem:[#allocation2 + $0x228] sm:$0xff] %vm2396_vm11, %v2238_v28  ;;  %v7219_v46 = vsel %vm7006_vm7, %v7212_v31, %v7218_v34 }
 0x283   : > { %2994 = vst.msk [vmem:[#allocation2 + $0x228] sm:$0xff] %vm2974_vm4, %v12175_v10  ;;  %9124 = vmatmul.msk.f32.gmra.mxu0 %vm1156_vm0, %v7213_v3 }
 0x284   : > { %v2236_v2 = vpop.permute.xlu0 %2235 }
 0x285   : > { %2414 = vst.msk [vmem:[#allocation2 + $0x210] sm:$0xff] %vm2396_vm11, %v2236_v2 }
 0x286   : > { %2993 = vst.msk [vmem:[#allocation2 + $0x210] sm:$0xff] %vm2974_vm4, %v2819_v43  ;;  %2263 = vrot.lane.b32.xlu2 %v2136_v21, %s9405_s22  ;;  %v12305_v13 = vpop.f32.mrf.mxu3  ;;  %v12307_v43 = vpop.f32.mrf.mxu0 }
 0x289   : > { %2267 = vrot.lane.b32.xlu1 %v12179_v35, %s9405_s22  ;;  %v4603_v52 = vpop.permute.xlu2 %4602  ;;  %v4601_v10 = vpop.permute.xlu1 %4600  ;;  %v6686_v35 = vld [vmem:[#allocation2 + $0x3a0] sm:$0xff] }
 0x28a   : > { %2265 = vrot.lane.b32.xlu0 %v12183_v5, %s9405_s22  ;;  %4784 = vst.msk [vmem:[#allocation2 + $0x128] sm:$0xff] %vm2396_vm11, %v4603_v52  ;;  %v7679_v5 = vpop.f32.mrf.mxu1  ;;  %v7224_v31 = vrot.slane %v6686_v35, 1 }
 0x28b   : > { %4783 = vst.msk [vmem:[#allocation2 + $0x110] sm:$0xff] %vm2396_vm11, %v4601_v10  ;;  %9125 = vmatmul.msk.f32.gmra.mxu0 %vm1156_vm0, %v7219_v46  ;;  %v7680_v2 = vadd.f32 %v11968_v39, %v7679_v5 }
 0x28c   : > { %v6017_v4 = vpop.permute.xlu0 %6016  ;;  %5492 = vst.msk [vmem:[#allocation2 + $0x110] sm:$0xff] %vm2974_vm4, %v12208_v56  ;;  %v7225_v52 = vsel %vm7006_vm7, %v7218_v34, %v7224_v31 }
 0x28d   : > { %6201 = vst.msk [vmem:[#allocation2 + $0x110] sm:$0xff] %vm3683_vm5, %v6017_v4  ;;  %v6689_v4 = vld [vmem:[#allocation2 + $0x3b8] sm:$0xff] }
 0x28e   : > { %3512 = vrot.lane.b32.xlu2 %v11532_v14, %s9407_s9  ;;  %v12322_v10 = vpop.f32.mrf.mxu3  ;;  %v12330_v5 = vpop.f32.mrf.mxu0 }
 0x291   : > { %5317 = vrot.lane.b32.xlu1 %v11619_v57, %s9406_s23  ;;  %v2246_v28 = vpop.permute.xlu2 %2245  ;;  %v2825_v56 = vpop.permute.xlu1 %2824 }
 0x292   : > { %5315 = vrot.lane.b32.xlu0 %v11583_v61, %s9406_s23  ;;  %2419 = vst.msk [vmem:[#allocation2 + $0x288] sm:$0xff] %vm2396_vm11, %v2246_v28 }
 0x293   : > { %9126 = vmatmul.msk.f32.gmra.mxu0 %vm1156_vm0, %v7225_v52 }
 0x294   : > { %v2823_v21 = vpop.permute.xlu0 %2822  ;;  %v12326_v14 = vld [vmem:[#allocation2 + $0x110] sm:$0xff] }
 0x295   : > { %2995 = vst.msk [vmem:[#allocation2 + $0x240] sm:$0xff] %vm2974_vm4, %v2823_v21  ;;  %v7060_v35 = vrot.slane %v12326_v14, 1  ;;  %v7682_v21 = vpop.f32.mrf.mxu1 }
 0x296   : > { %2269 = vrot.lane.b32.xlu2 %v11691_v7, %s9405_s22  ;;  %v7683_v52 = vadd.f32 %v11968_v39, %v7682_v21 }
 0x297   : > { %v7888_v3 = vpop.f32.mrf.mxu2  ;;  %v7061_v34 = vsel %vm7006_vm7, %v7054_v44, %v7060_v35  ;;  %v12351_v44 = vpop.f32.mrf.mxu3 }
 0x298   : > { %v7889_v51 = vadd.f32 %v7888_v3, %v7680_v2  ;;  %v7230_v2 = vrot.slane %v6689_v4, 1  ;;  %7899 = vmatmul.f32.gmra.mxu2 %v7061_v34 }
 0x299   : > { %4612 = vrot.lane.b32.xlu1 %v10462_v58, %s9405_s22  ;;  %v2244_v3 = vpop.permute.xlu1 %2243 }
 0x29a   : > { %v8098_v46 = vadd.f32 %v12004_v41, %v7889_v51  ;;  %v12341_v41 = vpop.permute.xlu2 %2832  ;;  %4610 = vrot.lane.b32.xlu0 %v10417_v59, %s9405_s22  ;;  %2418 = vst.msk [vmem:[#allocation2 + $0x270] sm:$0xff] %vm2396_vm11, %v2244_v3  ;;  %v7231_v51 = vsel %vm7006_vm7, %v7224_v31, %v7230_v2  ;;  %v7236_v59 = vrot.slane %v6692_v40, 1  ;;  %v12359_v31 = vpop.f32.mrf.mxu0 }
 0x29b   : > { %2997 = vst.msk [vmem:[#allocation2 + $0x270] sm:$0xff] %vm2974_vm4, %v12279_v8  ;;  %9127 = vmatmul.msk.f32.gmra.mxu0 %vm1156_vm0, %v7231_v51 }
 0x29c   : > { %v8281_v28 = vmax.f32 %v8098_v46, 0.0  ;;  %v2242_v58 = vpop.permute.xlu0 %2241  ;;  %v7237_v34 = vsel %vm7006_vm7, %v7230_v2, %v7236_v59 }
 0x29d   : > { %2417 = vst.msk [vmem:[#allocation2 + $0x258] sm:$0xff] %vm2396_vm11, %v2242_v58 }
 0x29e   : > { %9159 = vmatmul.msk.f32.gmra.mxu3 %vm1156_vm0, %v8281_v28  ;;  %2996 = vst.msk [vmem:[#allocation2 + $0x258] sm:$0xff] %vm2974_vm4, %v2825_v56  ;;  %6026 = vrot.lane.b32.xlu2 %v11522_v45, %s9407_s9 }
 0x2a1   : > { %3516 = vrot.lane.b32.xlu1 %v11583_v61, %s9407_s9  ;;  %v3505_v4 = vpop.permute.xlu1 %3504  ;;  %v6695_v61 = vld [vmem:[#allocation2 + $0x3e8] sm:$0xff] }
 0x2a2   : > { %v3507_v8 = vpop.permute.xlu2 %3506  ;;  %3514 = vrot.lane.b32.xlu0 %v11507_v50, %s9407_s9  ;;  %3692 = vst.msk [vmem:[#allocation2 + $0x108] sm:$0xff] %vm3683_vm5, %v3505_v4  ;;  %v12372_v50 = vpop.f32.mrf.mxu3  ;;  %v7242_v58 = vrot.slane %v6695_v61, 1  ;;  %v14313_v4 = vld [vmem:[#allocation62_spill] sm:$0xff] }
 0x2a3   : > { %3693 = vst.msk [vmem:[#allocation2 + $0x120] sm:$0xff] %vm3683_vm5, %v3507_v8  ;;  %9128 = vmatmul.msk.f32.gmra.mxu0 %vm1156_vm0, %v7237_v34  ;;  %v12380_v2 = vpop.f32.mrf.mxu0  ;;  %v14316_v61 = vld [vmem:[#allocation74_spill] sm:$0xff] }
 0x2a4   : > { %v5310_v45 = vpop.permute.xlu0 %5309  ;;  %v7243_v8 = vsel %vm7006_vm7, %v7236_v59, %v7242_v58 }
 0x2a5   : > { %5493 = vst.msk [vmem:[#allocation2 + $0x128] sm:$0xff] %vm2974_vm4, %v5310_v45 }
 0x2a6   : > { %5319 = vrot.lane.b32.xlu2 %v11661_v53, %s9406_s23 }
 0x2a7   : > { %v7891_v46 = vpop.f32.mrf.mxu2 }
 0x2a8   : > { %v7892_v56 = vadd.f32 %v7891_v46, %v7683_v52 }
 0x2a9   : > { %6030 = vrot.lane.b32.xlu1 %v11644_v0, %s9407_s9  ;;  %v6603_v40 = vld [vmem:[#allocation2 + $0x108] sm:$0xff]  ;;  %v6698_v0 = vld [vmem:[#allocation2 + $0x400] sm:$0xff] }
 0x2aa   : > { %v8101_v28 = vadd.f32 %v12040_v37, %v7892_v56  ;;  %v2252_v51 = vpop.permute.xlu2 %2251  ;;  %6028 = vrot.lane.b32.xlu0 %v11603_v16, %s9407_s9  ;;  %v7058_v52 = vrot.slane %v6603_v40, 1  ;;  %v12390_v46 = vld [vmem:[#allocation2 + $0x120] sm:$0xff]  ;;  %v14314_v56 = vld [vmem:[#allocation72_spill] sm:$0xff]  ;;  %v7248_v59 = vrot.slane %v6698_v0, 1  ;;  %v12396_v34 = vpop.f32.mrf.mxu3  ;;  %v6701_v40 = vld [vmem:[#allocation2 + $0x418] sm:$0xff] }
 0x2ab   : > { %2422 = vst.msk [vmem:[#allocation2 + $0x2d0] sm:$0xff] %vm2396_vm11, %v2252_v51  ;;  %v2831_v37 = vpop.permute.xlu1 %2830  ;;  %9129 = vmatmul.msk.f32.gmra.mxu0 %vm1156_vm0, %v7243_v8  ;;  %v14032_v33 = vrot.slane %v12390_v46, 1  ;;  %v12403_v51 = vpop.f32.mrf.mxu0 }
 0x2ac   : > { %v8282_v3 = vmax.f32 %v8101_v28, 0.0  ;;  %v2829_v21 = vpop.permute.xlu0 %2828  ;;  %v7059_v16 = vsel %vm7006_vm7, %v7052_v23, %v7058_v52  ;;  %14315 = vst [vmem:[#allocation62_spill] sm:$0xff] %v12396_v34 }
 0x2ad   : > { %2998 = vst.msk [vmem:[#allocation2 + $0x288] sm:$0xff] %vm2974_vm4, %v2829_v21  ;;  %7690 = vmatmul.f32.gmra.mxu1 %v7059_v16  ;;  %v7685_v21 = vpop.f32.mrf.mxu1  ;;  %v7065_v8 = vsel %vm7006_vm7, %v7058_v52, %v14032_v33 }
 0x2ae   : > { %9160 = vmatmul.msk.f32.gmra.mxu3 %vm1156_vm0, %v8282_v3  ;;  %4614 = vrot.lane.b32.xlu2 %v14313_v4, %s9405_s22  ;;  %v7249_v3 = vsel %vm7006_vm7, %v7242_v58, %v7248_v59  ;;  %v14317_v58 = vld [vmem:[#allocation68_spill] sm:$0xff]  ;;  %v7686_v0 = vadd.f32 %v11968_v39, %v7685_v21  ;;  %v6704_v39 = vld [vmem:[#allocation2 + $0x430] sm:$0xff] }
 0x2af   : > { %v14318_v4 = vld [vmem:[#allocation64_spill] sm:$0xff] }
 0x2b1   : > { %5323 = vrot.lane.b32.xlu1 %v14314_v56, %s9406_s23 }
 0x2b2   : > { %v12394_v45 = vpop.permute.xlu2 %2838  ;;  %5321 = vrot.lane.b32.xlu0 %v14316_v61, %s9406_s23 }
 0x2b3   : > { %v2250_v23 = vpop.permute.xlu1 %2249  ;;  %9130 = vmatmul.msk.f32.gmra.mxu0 %vm1156_vm0, %v7249_v3  ;;  %v12422_v3 = vpop.f32.mrf.mxu3 }
 0x2b4   : > { %2421 = vst.msk [vmem:[#allocation2 + $0x2b8] sm:$0xff] %vm2396_vm11, %v2250_v23  ;;  %v2248_v28 = vpop.permute.xlu0 %2247  ;;  %v12429_v21 = vpop.f32.mrf.mxu0 }
 0x2b5   : > { %3000 = vst.msk [vmem:[#allocation2 + $0x2b8] sm:$0xff] %vm2974_vm4, %v12341_v41  ;;  %7693 = vmatmul.f32.gmra.mxu1 %v7065_v8  ;;  %v7254_v41 = vrot.slane %v6701_v40, 1 }
 0x2b6   : > { %2420 = vst.msk [vmem:[#allocation2 + $0x2a0] sm:$0xff] %vm2396_vm11, %v2248_v28  ;;  %3518 = vrot.lane.b32.xlu2 %v11619_v57, %s9407_s9 }
 0x2b7   : > { %2999 = vst.msk [vmem:[#allocation2 + $0x2a0] sm:$0xff] %vm2974_vm4, %v2831_v37  ;;  %v7255_v57 = vsel %vm7006_vm7, %v7248_v59, %v7254_v41  ;;  %v12442_v59 = vld [vmem:[%s13784_s6] ss:$0 sm:$0xff] }
 0x2b8   : > { %14319 = vst [vmem:[#allocation72_spill] sm:$0xff] %v12422_v3 }
 0x2b9   : > { %4618 = vrot.lane.b32.xlu1 %v14317_v58, %s9405_s22  ;;  %v14320_v58 = vld [vmem:[#allocation115_spill] sm:$0xff] }
 0x2ba   : > { %v12418_v16 = vpop.permute.xlu2 %6020  ;;  %4616 = vrot.lane.b32.xlu0 %v14318_v4, %s9405_s22 }
 0x2bb   : > { %v6019_v52 = vpop.permute.xlu1 %6018  ;;  %9131 = vmatmul.msk.f32.gmra.mxu0 %vm1156_vm0, %v7255_v57  ;;  %v6707_v57 = vld [vmem:[#allocation2 + $0x448] sm:$0xff] }
 0x2bc   : > { %6202 = vst.msk [vmem:[#allocation2 + $0x128] sm:$0xff] %vm3683_vm5, %v6019_v52  ;;  %v4605_v37 = vpop.permute.xlu0 %4604 }
 0x2bd   : > { %v7894_v23 = vpop.f32.mrf.mxu2  ;;  %4785 = vst.msk [vmem:[#allocation2 + $0x140] sm:$0xff] %vm2396_vm11, %v4605_v37 }
 0x2be   : > { %v7895_v28 = vadd.f32 %v7894_v23, %v7686_v0  ;;  %6032 = vrot.lane.b32.xlu2 %v14320_v58, %s9407_s9  ;;  %v7260_v0 = vrot.slane %v6704_v39, 1  ;;  %v14322_v58 = vld [vmem:[#allocation119_spill] sm:$0xff] }
 0x2c0   : > { %v8104_v40 = vadd.f32 %v12074_v32, %v7895_v28  ;;  %v7261_v28 = vsel %vm7006_vm7, %v7254_v41, %v7260_v0  ;;  %v14321_v41 = vld [vmem:[#allocation121_spill] sm:$0xff] }
 0x2c1   : > { %3522 = vrot.lane.b32.xlu1 %v14316_v61, %s9407_s9 }
 0x2c2   : > { %v8283_v8 = vmax.f32 %v8104_v40, 0.0  ;;  %v2258_v32 = vpop.permute.xlu2 %2257  ;;  %3520 = vrot.lane.b32.xlu0 %v11661_v53, %s9407_s9  ;;  %v8750_v53 = vld [vmem:[%s9547_s20] sm:$0xff] }
 0x2c3   : > { %2425 = vst.msk [vmem:[#allocation2 + $0x318] sm:$0xff] %vm2396_vm11, %v2258_v32  ;;  %v2837_v4 = vpop.permute.xlu1 %2836  ;;  %v12445_v23 = vld [vmem:[#allocation2 + $0x128] sm:$0xff]  ;;  %9132 = vmatmul.msk.f32.gmra.mxu0 %vm1156_vm0, %v7261_v28  ;;  %v7266_v32 = vrot.slane %v6707_v57, 1  ;;  %v14324_v57 = vld [vmem:[#allocation70_spill] sm:$0xff] }
 0x2c4   : > { %9161 = vmatmul.msk.f32.gmra.mxu3 %vm1156_vm0, %v8283_v8  ;;  %v2835_v61 = vpop.permute.xlu0 %2834  ;;  %v14033_v52 = vrot.slane %v12445_v23, 1  ;;  %v8558_v37 = vpop.f32.mrf.mxu3 }
 0x2c5   : > { %3001 = vst.msk [vmem:[#allocation2 + $0x2d0] sm:$0xff] %vm2974_vm4, %v2835_v61  ;;  %v8559_v40 = vadd.f32 %v12442_v59, %v8558_v37  ;;  %v12464_v61 = vpop.f32.mrf.mxu0  ;;  %v14323_v37 = vld [vmem:[#allocation118_spill] sm:$0xff] }
 0x2c6   : > { %v7067_v39 = vsel %vm7006_vm7, %v7060_v35, %v14033_v52  ;;  %5325 = vrot.lane.b32.xlu2 %v14321_v41, %s9406_s23  ;;  %v7267_v35 = vsel %vm7006_vm7, %v7260_v0, %v7266_v32 }
 0x2c7   : > { %7902 = vmatmul.f32.gmra.mxu2 %v7067_v39  ;;  %v8814_v8 = vadd.f32 %v8750_v53, %v8559_v40  ;;  %v6710_v53 = vld [vmem:[#allocation2 + $0x460] sm:$0xff] }
 0x2c8   : > { %v7272_v0 = vrot.slane %v6710_v53, 1  ;;  %v14327_v53 = vld [vmem:[#allocation77_spill] sm:$0xff] }
 0x2c9   : > { %6036 = vrot.lane.b32.xlu1 %v14322_v58, %s9407_s9  ;;  %v8878_v33 = vmax.f32 %v8814_v8, 0.0 }
 0x2ca   : > { %v5314_v28 = vpop.permute.xlu2 %5313  ;;  %6034 = vrot.lane.b32.xlu0 %v14323_v37, %s9407_s9  ;;  %v7273_v58 = vsel %vm7006_vm7, %v7266_v32, %v7272_v0  ;;  %v8751_v37 = vld [vmem:[%s9547_s20 + $0x8] sm:$0xff] }
 0x2cb   : > { %v2256_v3 = vpop.permute.xlu1 %2255  ;;  %8942 = vst [vmem:[%s12468_s16] sm:$0xff] %v8878_v33  ;;  %9133 = vmatmul.msk.f32.gmra.mxu0 %vm1156_vm0, %v7267_v35  ;;  %v14325_v33 = vld [vmem:[#allocation126_spill] sm:$0xff] }
 0x2cc   : > { %v2254_v14 = vpop.permute.xlu0 %2253  ;;  %2424 = vst.msk [vmem:[#allocation2 + $0x300] sm:$0xff] %vm2396_vm11, %v2256_v3  ;;  %v14326_v3 = vld [vmem:[#allocation122_spill] sm:$0xff] }
 0x2cd   : > { %3003 = vst.msk [vmem:[#allocation2 + $0x300] sm:$0xff] %vm2974_vm4, %v12394_v45  ;;  %v12485_v39 = vpop.f32.mrf.mxu0 }
 0x2ce   : > { %2423 = vst.msk [vmem:[#allocation2 + $0x2e8] sm:$0xff] %vm2396_vm11, %v2254_v14  ;;  %4620 = vrot.lane.b32.xlu2 %v14324_v57, %s9405_s22 }
 0x2cf   : > { %3002 = vst.msk [vmem:[#allocation2 + $0x2e8] sm:$0xff] %vm2974_vm4, %v2837_v4 }
 0x2d1   : > { %5329 = vrot.lane.b32.xlu1 %v14325_v33, %s9406_s23 }
 0x2d2   : > { %v4609_v40 = vpop.permute.xlu2 %4608  ;;  %5327 = vrot.lane.b32.xlu0 %v14326_v3, %s9406_s23  ;;  %v8561_v4 = vpop.f32.mrf.mxu3 }
 0x2d3   : > { %4787 = vst.msk [vmem:[#allocation2 + $0x170] sm:$0xff] %vm2396_vm11, %v4609_v40  ;;  %v5312_v45 = vpop.permute.xlu1 %5311  ;;  %9134 = vmatmul.msk.f32.gmra.mxu0 %vm1156_vm0, %v7273_v58  ;;  %v8562_v14 = vadd.f32 %v12442_v59, %v8561_v4  ;;  %v14328_v40 = vld [vmem:[#allocation75_spill] sm:$0xff] }
 0x2d4   : > { %5494 = vst.msk [vmem:[#allocation2 + $0x140] sm:$0xff] %vm2974_vm4, %v5312_v45  ;;  %v2841_v8 = vpop.permute.xlu0 %2840  ;;  %v14329_v58 = vld [vmem:[#allocation51_spill] sm:$0xff] }
 0x2d5   : > { %6203 = vst.msk [vmem:[#allocation2 + $0x140] sm:$0xff] %vm3683_vm5, %v12418_v16  ;;  %v8815_v35 = vadd.f32 %v8751_v37, %v8562_v14  ;;  %v14330_v52 = vrot.slane %v14329_v58, 1  ;;  %v12505_v34 = vpop.f32.mrf.mxu0  ;;  %v14331_v37 = vld [vmem:[#allocation50_spill] sm:$0xff] }
 0x2d6   : > { %3004 = vst.msk [vmem:[#allocation2 + $0x318] sm:$0xff] %vm2974_vm4, %v2841_v8  ;;  %3524 = vrot.lane.b32.xlu2 %v14314_v56, %s9407_s9  ;;  %v9314_v14 = vunpack.i.l.bf16 %v14331_v37 }
 0x2d7   : > { %v8879_v32 = vmax.f32 %v8815_v35, 0.0  ;;  %v7279_v8 = vsel %vm7006_vm7, %v7272_v0, %v14330_v52  ;;  %v14332_v35 = vld [vmem:[#allocation80_spill] sm:$0xff]  ;;  %v14333_v52 = vrot.slane %v12445_v23, 1 }
 0x2d9   : > { %4624 = vrot.lane.b32.xlu1 %v14327_v53, %s9405_s22  ;;  %8943 = vst [vmem:[%s12468_s16 + $0x8] sm:$0xff] %v8879_v32 }
 0x2da   : > { %v2847_v57 = vpop.permute.xlu2 %2846  ;;  %4622 = vrot.lane.b32.xlu0 %v14328_v40, %s9405_s22  ;;  %v8752_v40 = vld [vmem:[%s9547_s20 + $0x10] sm:$0xff] }
 0x2db   : > { %v4607_v16 = vpop.permute.xlu1 %4606  ;;  %9135 = vmatmul.msk.f32.gmra.mxu0 %vm1156_vm0, %v7279_v8 }
 0x2dc   : > { %v2260_v45 = vpop.permute.xlu0 %2259  ;;  %v6610_v4 = vld [vmem:[#allocation2 + $0x140] sm:$0xff]  ;;  %4786 = vst.msk [vmem:[#allocation2 + $0x158] sm:$0xff] %vm2396_vm11, %v4607_v16 }
 0x2dd   : > { %v7072_v56 = vrot.slane %v6610_v4, 1  ;;  %5495 = vst.msk [vmem:[#allocation2 + $0x158] sm:$0xff] %vm2974_vm4, %v5314_v28 }
 0x2de   : > { %2426 = vst.msk [vmem:[#allocation2 + $0x330] sm:$0xff] %vm2396_vm11, %v2260_v45  ;;  %6038 = vrot.lane.b32.xlu2 %v14332_v35, %s9407_s9  ;;  %v14334_v45 = vld [vmem:[#allocation92_spill] sm:$0xff]  ;;  %v14336_v35 = vld [vmem:[#allocation81_spill] sm:$0xff] }
 0x2df   : > { %v7073_v0 = vsel %vm7006_vm7, %v14333_v52, %v7072_v56  ;;  %3005 = vst.msk [vmem:[#allocation2 + $0x330] sm:$0xff] %vm2974_vm4, %v9314_v14  ;;  %v14337_v52 = vrot.slane %v12390_v46, 1 }
 0x2e0   : > { %7905 = vmatmul.f32.gmra.mxu2 %v7073_v0  ;;  %v14338_v0 = vld [vmem:[#allocation78_spill] sm:$0xff] }
 0x2e1   : > { %3528 = vrot.lane.b32.xlu1 %v14326_v3, %s9407_s9  ;;  %v8564_v32 = vpop.f32.mrf.mxu3 }
 0x2e2   : > { %v2264_v53 = vpop.permute.xlu2 %2263  ;;  %3526 = vrot.lane.b32.xlu0 %v14321_v41, %s9407_s9  ;;  %v8565_v16 = vadd.f32 %v12442_v59, %v8564_v32  ;;  %v14340_v32 = vld [vmem:[#allocation45_spill] sm:$0xff] }
 0x2e3   : > { %2428 = vst.msk [vmem:[#allocation2 + $0x360] sm:$0xff] %vm2396_vm11, %v2264_v53  ;;  %v3511_v28 = vpop.permute.xlu1 %3510 }
 0x2e4   : > { %3007 = vst.msk [vmem:[#allocation2 + $0x360] sm:$0xff] %vm2974_vm4, %v2847_v57  ;;  %v3509_v23 = vpop.permute.xlu0 %3508  ;;  %v8816_v3 = vadd.f32 %v8752_v40, %v8565_v16  ;;  %v14335_v57 = vld [vmem:[#allocation124_spill] sm:$0xff] }
 0x2e5   : > { %3695 = vst.msk [vmem:[#allocation2 + $0x150] sm:$0xff] %vm3683_vm5, %v3511_v28 }
 0x2e6   : > { %3694 = vst.msk [vmem:[#allocation2 + $0x138] sm:$0xff] %vm3683_vm5, %v3509_v23  ;;  %5331 = vrot.lane.b32.xlu2 %v14334_v45, %s9406_s23  ;;  %v8880_v41 = vmax.f32 %v8816_v3, 0.0  ;;  %v14339_v23 = vld [vmem:[#allocation128_spill] sm:$0xff] }
 0x2e8   : > { %8944 = vst [vmem:[%s12468_s16 + $0x10] sm:$0xff] %v8880_v41 }
 0x2e9   : > { %6042 = vrot.lane.b32.xlu1 %v11902_v54, %s9407_s9 }
 0x2ea   : > { %v3513_v58 = vpop.permute.xlu2 %3512  ;;  %6040 = vrot.lane.b32.xlu0 %v14335_v57, %s9407_s9 }
 0x2eb   : > { %3696 = vst.msk [vmem:[#allocation2 + $0x168] sm:$0xff] %vm3683_vm5, %v3513_v58  ;;  %v6025_v8 = vpop.permute.xlu1 %6024 }
 0x2ec   : > { %v6023_v4 = vpop.permute.xlu0 %6022  ;;  %v6612_v53 = vld [vmem:[#allocation2 + $0x150] sm:$0xff] }
 0x2ed   : > { %v6609_v37 = vld [vmem:[#allocation2 + $0x138] sm:$0xff]  ;;  %6204 = vst.msk [vmem:[#allocation2 + $0x158] sm:$0xff] %vm3683_vm5, %v6023_v4  ;;  %v7076_v16 = vrot.slane %v6612_v53, 1 }
 0x2ee   : > { %v7070_v14 = vrot.slane %v6609_v37, 1  ;;  %4626 = vrot.lane.b32.xlu2 %v14336_v35, %s9405_s22  ;;  %v14341_v37 = vld [vmem:[#allocation90_spill] sm:$0xff] }
 0x2f0   : > { %v7071_v54 = vsel %vm7006_vm7, %v14337_v52, %v7070_v14  ;;  %v7077_v58 = vsel %vm7006_vm7, %v7070_v14, %v7076_v16  ;;  %v14342_v52 = vld [vmem:[#allocation84_spill] sm:$0xff] }
 0x2f1   : > { %7696 = vmatmul.f32.gmra.mxu1 %v7071_v54  ;;  %5335 = vrot.lane.b32.xlu1 %v14338_v0, %s9406_s23 }
 0x2f2   : > { %v2270_v28 = vpop.permute.xlu2 %2269  ;;  %5333 = vrot.lane.b32.xlu0 %v14339_v23, %s9406_s23  ;;  %v12553_v4 = vld [vmem:[#allocation2 + $0x168] sm:$0xff] }
 0x2f3   : > { %2431 = vst.msk [vmem:[#allocation2 + $0x3a8] sm:$0xff] %vm2396_vm11, %v2270_v28  ;;  %v2851_v40 = vpop.permute.xlu1 %2850  ;;  %v7082_v53 = vrot.slane %v12553_v4, 1 }
 0x2f4   : > { %3010 = vst.msk [vmem:[#allocation2 + $0x3a8] sm:$0xff] %vm2974_vm4, %v14340_v32  ;;  %v2849_v3 = vpop.permute.xlu0 %2848  ;;  %v6613_v46 = vld [vmem:[#allocation2 + $0x158] sm:$0xff]  ;;  %v12574_v32 = vld [vmem:[%s13782_s4] ss:$0 sm:$0xff] }
 0x2f5   : > { %v7078_v41 = vrot.slane %v6613_v46, 1  ;;  %v7083_v14 = vsel %vm7006_vm7, %v7076_v16, %v7082_v53 }
 0x2f6   : > { %3530 = vrot.lane.b32.xlu2 %v14325_v33, %s9407_s9 }
 0x2f7   : > { %v7079_v57 = vsel %vm7006_vm7, %v7072_v56, %v7078_v41 }
 0x2f8   : > { %7908 = vmatmul.f32.gmra.mxu2 %v7079_v57  ;;  %v8753_v57 = vld [vmem:[%s9547_s20 + $0x18] sm:$0xff] }
 0x2f9   : > { %7699 = vmatmul.f32.gmra.mxu1 %v7077_v58  ;;  %4630 = vrot.lane.b32.xlu1 %v14341_v37, %s9405_s22 }
 0x2fa   : > { %v6027_v35 = vpop.permute.xlu2 %6026  ;;  %4628 = vrot.lane.b32.xlu0 %v14342_v52, %s9405_s22 }
 0x2fb   : > { %v2268_v54 = vpop.permute.xlu1 %2267 }
 0x2fc   : > { %2430 = vst.msk [vmem:[#allocation2 + $0x390] sm:$0xff] %vm2396_vm11, %v2268_v54  ;;  %v2266_v33 = vpop.permute.xlu0 %2265 }
 0x2fd   : > { %3009 = vst.msk [vmem:[#allocation2 + $0x390] sm:$0xff] %vm2974_vm4, %v2851_v40  ;;  %v7688_v56 = vpop.f32.mrf.mxu1 }
 0x2fe   : > { %2429 = vst.msk [vmem:[#allocation2 + $0x378] sm:$0xff] %vm2396_vm11, %v2266_v33  ;;  %6044 = vrot.lane.b32.xlu2 %v11893_v47, %s9407_s9  ;;  %v7689_v40 = vadd.f32 %v12574_v32, %v7688_v56 }
 0x2ff   : > { %3008 = vst.msk [vmem:[#allocation2 + $0x378] sm:$0xff] %vm2974_vm4, %v2849_v3 }
 0x301   : > { %7702 = vmatmul.f32.gmra.mxu1 %v7083_v14  ;;  %3534 = vrot.lane.b32.xlu1 %v14339_v23, %s9407_s9 }
 0x302   : > { %v5320_v28 = vpop.permute.xlu2 %5319  ;;  %3532 = vrot.lane.b32.xlu0 %v14334_v45, %s9407_s9 }
 0x303   : > { %v5318_v47 = vpop.permute.xlu1 %5317 }
 0x304   : > { %v7897_v3 = vpop.f32.mrf.mxu2  ;;  %v5316_v58 = vpop.permute.xlu0 %5315 }
 0x305   : > { %v7898_v46 = vadd.f32 %v7897_v3, %v7689_v40  ;;  %v8567_v16 = vpop.f32.mrf.mxu3  ;;  %5496 = vst.msk [vmem:[#allocation2 + $0x170] sm:$0xff] %vm2974_vm4, %v5316_v58 }
 0x306   : > { %v8568_v23 = vadd.f32 %v12442_v59, %v8567_v16  ;;  %6205 = vst.msk [vmem:[#allocation2 + $0x170] sm:$0xff] %vm3683_vm5, %v6025_v8  ;;  %5337 = vrot.lane.b32.xlu2 %v12013_v19, %s9406_s23 }
 0x307   : > { %v8107_v37 = vadd.f32 %v12107_v25, %v7898_v46 }
 0x308   : > { %v8817_v52 = vadd.f32 %v8753_v57, %v8568_v23 }
 0x309   : > { %v8284_v45 = vmax.f32 %v8107_v37, 0.0  ;;  %6048 = vrot.lane.b32.xlu1 %v11994_v17, %s9407_s9 }
 0x30a   : > { %v8881_v54 = vmax.f32 %v8817_v52, 0.0  ;;  %v4615_v33 = vpop.permute.xlu2 %4614  ;;  %6046 = vrot.lane.b32.xlu0 %v11944_v24, %s9407_s9  ;;  %v14344_v52 = vld [vmem:[#allocation101_spill] sm:$0xff] }
 0x30b   : > { %4790 = vst.msk [vmem:[#allocation2 + $0x1b8] sm:$0xff] %vm2396_vm11, %v4615_v33  ;;  %9162 = vmatmul.msk.f32.gmra.mxu3 %vm1156_vm0, %v8284_v45  ;;  %v4613_v25 = vpop.permute.xlu1 %4612 }
 0x30c   : > { %8945 = vst [vmem:[%s12468_s16 + $0x18] sm:$0xff] %v8881_v54  ;;  %v4611_v8 = vpop.permute.xlu0 %4610 }
 0x30d   : > { %4789 = vst.msk [vmem:[#allocation2 + $0x1a0] sm:$0xff] %vm2396_vm11, %v4613_v25  ;;  %v6616_v56 = vld [vmem:[#allocation2 + $0x170] sm:$0xff] }
 0x30e   : > { %5498 = vst.msk [vmem:[#allocation2 + $0x1a0] sm:$0xff] %vm2974_vm4, %v5320_v28  ;;  %v7084_v14 = vrot.slane %v6616_v56, 1  ;;  %4632 = vrot.lane.b32.xlu2 %v14280_v29, %s9405_s22 }
 0x30f   : > { %4788 = vst.msk [vmem:[#allocation2 + $0x188] sm:$0xff] %vm2396_vm11, %v4611_v8 }
 0x310   : > { %5497 = vst.msk [vmem:[#allocation2 + $0x188] sm:$0xff] %vm2974_vm4, %v5318_v47  ;;  %v7085_v24 = vsel %vm7006_vm7, %v7078_v41, %v7084_v14  ;;  %v14343_v47 = vld [vmem:[#allocation98_spill] sm:$0xff] }
 0x311   : > { %6206 = vst.msk [vmem:[#allocation2 + $0x188] sm:$0xff] %vm3683_vm5, %v6027_v35  ;;  %5341 = vrot.lane.b32.xlu1 %v12066_v26, %s9406_s23  ;;  %7911 = vmatmul.f32.gmra.mxu2 %v7085_v24 }
 0x312   : > { %v3519_v17 = vpop.permute.xlu2 %3518  ;;  %5339 = vrot.lane.b32.xlu0 %v12033_v48, %s9406_s23 }
 0x313   : > { %3699 = vst.msk [vmem:[#allocation2 + $0x1b0] sm:$0xff] %vm3683_vm5, %v3519_v17  ;;  %v3517_v28 = vpop.permute.xlu1 %3516 }
 0x314   : > { %3698 = vst.msk [vmem:[#allocation2 + $0x198] sm:$0xff] %vm3683_vm5, %v3517_v28  ;;  %v3515_v40 = vpop.permute.xlu0 %3514 }
 0x315   : > { %3697 = vst.msk [vmem:[#allocation2 + $0x180] sm:$0xff] %vm3683_vm5, %v3515_v40 }
 0x316   : > { %3536 = vrot.lane.b32.xlu2 %v14338_v0, %s9407_s9  ;;  %v8754_v0 = vld [vmem:[%s9547_s20 + $0x20] sm:$0xff] }
 0x318   : > { %v6619_v29 = vld [vmem:[#allocation2 + $0x188] sm:$0xff] }
 0x319   : > { %v7090_v41 = vrot.slane %v6619_v29, 1  ;;  %4636 = vrot.lane.b32.xlu1 %v14292_v6, %s9405_s22  ;;  %v669_v6 = vadd.s32 248, %v9629_v60 }
 0x31a   : > { %v12612_v35 = vpop.permute.xlu2 %6032  ;;  %4634 = vrot.lane.b32.xlu0 %v14343_v47, %s9405_s22  ;;  %v6624_v29 = vld [vmem:[#allocation2 + $0x1b0] sm:$0xff] }
 0x31b   : > { %v7091_v3 = vsel %vm7006_vm7, %v7084_v14, %v7090_v41  ;;  %v6031_v46 = vpop.permute.xlu1 %6030  ;;  %v6621_v33 = vld [vmem:[#allocation2 + $0x198] sm:$0xff]  ;;  %v733_v56 = vand.u32 15, %v669_v6  ;;  %v7900_v6 = vpop.f32.mrf.mxu2 }
 0x31c   : > { %7914 = vmatmul.f32.gmra.mxu2 %v7091_v3  ;;  %v6029_v58 = vpop.permute.xlu0 %6028  ;;  %v6618_v16 = vld [vmem:[#allocation2 + $0x180] sm:$0xff]  ;;  %v7094_v24 = vrot.slane %v6621_v33, 1 }
 0x31d   : > { %6207 = vst.msk [vmem:[#allocation2 + $0x1a0] sm:$0xff] %vm3683_vm5, %v6029_v58  ;;  %v7088_v23 = vrot.slane %v6618_v16, 1  ;;  %vm12633_vm14 = vcmp.lt.s32.totalorder %v733_v56, 15  ;;  %v7100_v58 = vrot.slane %v6624_v29, 1 }
 0x31e   : > { %6050 = vrot.lane.b32.xlu2 %v14344_v52, %s9407_s9  ;;  %v3262_v3 = vsel %vm12633_vm14, %v11535_v12, 0.0 }
 0x31f   : > { %v7089_v45 = vsel %vm7006_vm7, %v7082_v53, %v7088_v23  ;;  %v7101_v33 = vsel %vm7006_vm7, %v7094_v24, %v7100_v58 }
 0x320   : > { %7705 = vmatmul.f32.gmra.mxu1 %v7089_v45 }
 0x321   : > { %v8570_v57 = vpop.f32.mrf.mxu3  ;;  %3540 = vrot.lane.b32.xlu1 %v12033_v48, %s9407_s9  ;;  %v14347_v48 = vld [vmem:[#allocation133_spill] sm:$0xff] }
 0x322   : > { %v8571_v37 = vadd.f32 %v12442_v59, %v8570_v57  ;;  %v5326_v25 = vpop.permute.xlu2 %5325  ;;  %3538 = vrot.lane.b32.xlu0 %v12013_v19, %s9407_s9  ;;  %v7095_v19 = vsel %vm7006_vm7, %v7088_v23, %v7094_v24  ;;  %v12650_v57 = vrot.slane %v3262_v3, 6  ;;  %v8755_v23 = vld [vmem:[%s9547_s20 + $0x28] sm:$0xff] }
 0x323   : > { %v5324_v14 = vpop.permute.xlu1 %5323 }
 0x324   : > { %v8818_v54 = vadd.f32 %v8754_v0, %v8571_v37  ;;  %v5322_v17 = vpop.permute.xlu0 %5321  ;;  %v6622_v28 = vld [vmem:[#allocation2 + $0x1a0] sm:$0xff] }
 0x325   : > { %5499 = vst.msk [vmem:[#allocation2 + $0x1b8] sm:$0xff] %vm2974_vm4, %v5322_v17  ;;  %v7096_v4 = vrot.slane %v6622_v28, 1 }
 0x326   : > { %v8882_v8 = vmax.f32 %v8818_v54, 0.0  ;;  %6208 = vst.msk [vmem:[#allocation2 + $0x1b8] sm:$0xff] %vm3683_vm5, %v6031_v46  ;;  %5343 = vrot.lane.b32.xlu2 %v14347_v48, %s9406_s23  ;;  %v14348_v54 = vld [vmem:[#allocation104_spill] sm:$0xff] }
 0x327   : > { %v7097_v40 = vsel %vm7006_vm7, %v7090_v41, %v7096_v4 }
 0x328   : > { %8946 = vst [vmem:[%s12468_s16 + $0x20] sm:$0xff] %v8882_v8  ;;  %7708 = vmatmul.f32.gmra.mxu1 %v7095_v19  ;;  %7917 = vmatmul.f32.gmra.mxu2 %v7097_v40  ;;  %v14349_v8 = vrot.slane %v11477_v20, 6  ;;  %v14350_v19 = vld [vmem:[#allocation110_spill] sm:$0xff] }
 0x329   : > { %6054 = vrot.lane.b32.xlu1 %v12115_v55, %s9407_s9 }
 0x32a   : > { %v4621_v47 = vpop.permute.xlu2 %4620  ;;  %6052 = vrot.lane.b32.xlu0 %v12048_v11, %s9407_s9  ;;  %v7691_v16 = vpop.f32.mrf.mxu1  ;;  %v12667_v56 = vsel %vm1492_vm8, %v14349_v8, %v12650_v57 }
 0x32b   : > { %4793 = vst.msk [vmem:[#allocation2 + $0x200] sm:$0xff] %vm2396_vm11, %v4621_v47  ;;  %v4619_v46 = vpop.permute.xlu1 %4618  ;;  %v7692_v55 = vadd.f32 %v12574_v32, %v7691_v16 }
 0x32c   : > { %4792 = vst.msk [vmem:[#allocation2 + $0x1e8] sm:$0xff] %vm2396_vm11, %v4619_v46  ;;  %v4617_v41 = vpop.permute.xlu0 %4616 }
 0x32d   : > { %5501 = vst.msk [vmem:[#allocation2 + $0x1e8] sm:$0xff] %vm2974_vm4, %v5326_v25  ;;  %v6625_v37 = vld [vmem:[#allocation2 + $0x1b8] sm:$0xff]  ;;  %v7901_v45 = vadd.f32 %v7900_v6, %v7692_v55 }
 0x32e   : > { %4791 = vst.msk [vmem:[#allocation2 + $0x1d0] sm:$0xff] %vm2396_vm11, %v4617_v41  ;;  %v7102_v52 = vrot.slane %v6625_v37, 1  ;;  %4638 = vrot.lane.b32.xlu2 %v14348_v54, %s9405_s22  ;;  %v8756_v37 = vld [vmem:[%s9547_s20 + $0x30] sm:$0xff] }
 0x32f   : > { %5500 = vst.msk [vmem:[#allocation2 + $0x1d0] sm:$0xff] %vm2974_vm4, %v5324_v14  ;;  %v8110_v17 = vadd.f32 %v12150_v9, %v7901_v45 }
 0x330   : > { %6209 = vst.msk [vmem:[#allocation2 + $0x1d0] sm:$0xff] %vm3683_vm5, %v12612_v35  ;;  %7711 = vmatmul.f32.gmra.mxu1 %v7101_v33  ;;  %v7103_v14 = vsel %vm7006_vm7, %v7096_v4, %v7102_v52 }
 0x331   : > { %v8573_v0 = vpop.f32.mrf.mxu3  ;;  %5347 = vrot.lane.b32.xlu1 %v12667_v56, %s9406_s23  ;;  %7920 = vmatmul.f32.gmra.mxu2 %v7103_v14  ;;  %v8285_v35 = vmax.f32 %v8110_v17, 0.0  ;;  %v14352_v14 = vld [vmem:[#allocation135_spill] sm:$0xff] }
 0x332   : > { %v8574_v11 = vadd.f32 %v12442_v59, %v8573_v0  ;;  %v3525_v24 = vpop.permute.xlu2 %3524  ;;  %5345 = vrot.lane.b32.xlu0 %v12126_v27, %s9406_s23  ;;  %v5931_v17 = vsel %vm2071_vm6, %v14352_v14, %v14305_v36 }
 0x333   : > { %3702 = vst.msk [vmem:[#allocation2 + $0x1f8] sm:$0xff] %vm3683_vm5, %v3525_v24  ;;  %v3523_v20 = vpop.permute.xlu1 %3522  ;;  %9163 = vmatmul.msk.f32.gmra.mxu3 %vm1156_vm0, %v8285_v35 }
 0x334   : > { %v8819_v25 = vadd.f32 %v8755_v23, %v8574_v11  ;;  %v3521_v53 = vpop.permute.xlu0 %3520  ;;  %3701 = vst.msk [vmem:[#allocation2 + $0x1e0] sm:$0xff] %vm3683_vm5, %v3523_v20 }
 0x335   : > { %3700 = vst.msk [vmem:[#allocation2 + $0x1c8] sm:$0xff] %vm3683_vm5, %v3521_v53 }
 0x336   : > { %v8883_v28 = vmax.f32 %v8819_v25, 0.0  ;;  %3542 = vrot.lane.b32.xlu2 %v12066_v26, %s9407_s9 }
 0x337   : > { %v6628_v9 = vld [vmem:[#allocation2 + $0x1d0] sm:$0xff] }
 0x338   : > { %8947 = vst [vmem:[%s12468_s16 + $0x28] sm:$0xff] %v8883_v28  ;;  %v7108_v4 = vrot.slane %v6628_v9, 1 }
 0x339   : > { %4642 = vrot.lane.b32.xlu1 %v14350_v19, %s9405_s22  ;;  %v14353_v19 = vld [vmem:[#allocation6_spill] sm:$0xff] }
 0x33a   : > { %v6039_v40 = vpop.permute.xlu2 %6038  ;;  %4640 = vrot.lane.b32.xlu0 %v11409_v38, %s9405_s22  ;;  %v7109_v29 = vsel %vm7006_vm7, %v7102_v52, %v7108_v4  ;;  %v7694_v52 = vpop.f32.mrf.mxu1  ;;  %v6633_v28 = vld [vmem:[#allocation2 + $0x1f8] sm:$0xff] }
 0x33b   : > { %7923 = vmatmul.f32.gmra.mxu2 %v7109_v29  ;;  %v6037_v47 = vpop.permute.xlu1 %6036  ;;  %v6630_v16 = vld [vmem:[#allocation2 + $0x1e0] sm:$0xff]  ;;  %v7695_v25 = vadd.f32 %v12574_v32, %v7694_v52 }
 0x33c   : > { %v6035_v3 = vpop.permute.xlu0 %6034  ;;  %v6627_v46 = vld [vmem:[#allocation2 + $0x1c8] sm:$0xff]  ;;  %v7112_v6 = vrot.slane %v6630_v16, 1 }
 0x33d   : > { %6210 = vst.msk [vmem:[#allocation2 + $0x1e8] sm:$0xff] %vm3683_vm5, %v6035_v3  ;;  %v7106_v41 = vrot.slane %v6627_v46, 1 }
 0x33e   : > { %6056 = vrot.lane.b32.xlu2 %v12156_v42, %s9407_s9 }
 0x33f   : > { %v7107_v26 = vsel %vm7006_vm7, %v7100_v58, %v7106_v41  ;;  %v7113_v33 = vsel %vm7006_vm7, %v7106_v41, %v7112_v6 }
 0x340   : > { %7714 = vmatmul.f32.gmra.mxu1 %v7107_v26 }
 0x341   : > { %3546 = vrot.lane.b32.xlu1 %v12126_v27, %s9407_s9  ;;  %v14351_v27 = vld [vmem:[#allocation9_spill] sm:$0xff] }
 0x342   : > { %v5332_v38 = vpop.permute.xlu2 %5331  ;;  %3544 = vrot.lane.b32.xlu0 %v14347_v48, %s9407_s9  ;;  %v5222_v45 = vsel %vm1492_vm8, %v12650_v57, %v14351_v27  ;;  %v5226_v26 = vsel %vm1492_vm8, %v14351_v27, %v11698_v15 }
 0x343   : > { %v5330_v55 = vpop.permute.xlu1 %5329 }
 0x344   : > { %v5328_v0 = vpop.permute.xlu0 %5327  ;;  %v6631_v11 = vld [vmem:[#allocation2 + $0x1e8] sm:$0xff] }
 0x345   : > { %5502 = vst.msk [vmem:[#allocation2 + $0x200] sm:$0xff] %vm2974_vm4, %v5328_v0  ;;  %v7114_v58 = vrot.slane %v6631_v11, 1 }
 0x346   : > { %6211 = vst.msk [vmem:[#allocation2 + $0x200] sm:$0xff] %vm3683_vm5, %v6037_v47  ;;  %5349 = vrot.lane.b32.xlu2 %v5222_v45, %s9406_s23  ;;  %v14355_v45 = vld [vmem:[#allocation139_spill] sm:$0xff] }
 0x347   : > { %v8576_v23 = vpop.f32.mrf.mxu3  ;;  %v7115_v54 = vsel %vm7006_vm7, %v7108_v4, %v7114_v58  ;;  %v7118_v4 = vrot.slane %v6633_v28, 1 }
 0x348   : > { %v8577_v42 = vadd.f32 %v12442_v59, %v8576_v23  ;;  %7926 = vmatmul.f32.gmra.mxu2 %v7115_v54  ;;  %7717 = vmatmul.f32.gmra.mxu1 %v7113_v33 }
 0x349   : > { %6060 = vrot.lane.b32.xlu1 %v14305_v36, %s9407_s9  ;;  %v7119_v41 = vsel %vm7006_vm7, %v7112_v6, %v7118_v4 }
 0x34a   : > { %v8820_v48 = vadd.f32 %v8756_v37, %v8577_v42  ;;  %v4627_v24 = vpop.permute.xlu2 %4626  ;;  %6058 = vrot.lane.b32.xlu0 %v5931_v17, %s9407_s9  ;;  %v7903_v35 = vpop.f32.mrf.mxu2  ;;  %v14357_v17 = vld [vmem:[#allocation12_spill] sm:$0xff] }
 0x34b   : > { %4796 = vst.msk [vmem:[#allocation2 + $0x248] sm:$0xff] %vm2396_vm11, %v4627_v24  ;;  %v7904_v20 = vadd.f32 %v7903_v35, %v7695_v25  ;;  %v4625_v53 = vpop.permute.xlu1 %4624  ;;  %v14358_v35 = vld [vmem:[#allocation13_spill] sm:$0xff] }
 0x34c   : > { %v8884_v8 = vmax.f32 %v8820_v48, 0.0  ;;  %4795 = vst.msk [vmem:[#allocation2 + $0x230] sm:$0xff] %vm2396_vm11, %v4625_v53  ;;  %v4623_v9 = vpop.permute.xlu0 %4622  ;;  %v14356_v48 = vld [vmem:[#allocation138_spill] sm:$0xff] }
 0x34d   : > { %v8113_v29 = vadd.f32 %v14353_v19, %v7904_v20  ;;  %5504 = vst.msk [vmem:[#allocation2 + $0x230] sm:$0xff] %vm2974_vm4, %v5332_v38  ;;  %v6634_v47 = vld [vmem:[#allocation2 + $0x200] sm:$0xff]  ;;  %v3423_v54 = vsel %vm1492_vm8, %v12650_v57, %v14356_v48 }
 0x34e   : > { %8948 = vst [vmem:[%s12468_s16 + $0x30] sm:$0xff] %v8884_v8  ;;  %v7120_v3 = vrot.slane %v6634_v47, 1  ;;  %4644 = vrot.lane.b32.xlu2 %v11535_v12, %s9405_s22 }
 0x34f   : > { %4794 = vst.msk [vmem:[#allocation2 + $0x218] sm:$0xff] %vm2396_vm11, %v4623_v9  ;;  %v8286_v46 = vmax.f32 %v8113_v29, 0.0 }
 0x350   : > { %5503 = vst.msk [vmem:[#allocation2 + $0x218] sm:$0xff] %vm2974_vm4, %v5330_v55  ;;  %v7121_v38 = vsel %vm7006_vm7, %v7114_v58, %v7120_v3  ;;  %7720 = vmatmul.f32.gmra.mxu1 %v7119_v41  ;;  %v14354_v58 = vld [vmem:[#allocation116_spill] sm:$0xff] }
 0x351   : > { %6212 = vst.msk [vmem:[#allocation2 + $0x218] sm:$0xff] %vm3683_vm5, %v6039_v40  ;;  %5353 = vrot.lane.b32.xlu1 %v5226_v26, %s9406_s23  ;;  %7929 = vmatmul.f32.gmra.mxu2 %v7121_v38  ;;  %v14359_v38 = vld [vmem:[#allocation30_spill] sm:$0xff] }
 0x352   : > { %v3531_v16 = vpop.permute.xlu2 %3530  ;;  %9164 = vmatmul.msk.f32.gmra.mxu3 %vm1156_vm0, %v8286_v46  ;;  %5351 = vrot.lane.b32.xlu0 %v14351_v27, %s9406_s23 }
 0x353   : > { %3705 = vst.msk [vmem:[#allocation2 + $0x240] sm:$0xff] %vm3683_vm5, %v3531_v16  ;;  %v3529_v12 = vpop.permute.xlu1 %3528 }
 0x354   : > { %3704 = vst.msk [vmem:[#allocation2 + $0x228] sm:$0xff] %vm3683_vm5, %v3529_v12  ;;  %v3527_v40 = vpop.permute.xlu0 %3526 }
 0x355   : > { %3703 = vst.msk [vmem:[#allocation2 + $0x210] sm:$0xff] %vm3683_vm5, %v3527_v40  ;;  %v14360_v40 = vld [vmem:[#allocation14_spill] sm:$0xff] }
 0x356   : > { %3548 = vrot.lane.b32.xlu2 %v12667_v56, %s9407_s9  ;;  %v5935_v56 = vsel %vm2071_vm6, %v14305_v36, %v14354_v58  ;;  %v14362_v58 = vld [vmem:[#allocation8_spill] sm:$0xff] }
 0x358   : > { %v6637_v15 = vld [vmem:[#allocation2 + $0x218] sm:$0xff] }
 0x359   : > { %v7126_v55 = vrot.slane %v6637_v15, 1  ;;  %4648 = vrot.lane.b32.xlu1 %v12145_v30, %s9405_s22 }
 0x35a   : > { %v6045_v0 = vpop.permute.xlu2 %6044  ;;  %4646 = vrot.lane.b32.xlu0 %v12255_v22, %s9405_s22  ;;  %v6642_v57 = vld [vmem:[#allocation2 + $0x240] sm:$0xff] }
 0x35b   : > { %v7127_v23 = vsel %vm7006_vm7, %v7120_v3, %v7126_v55  ;;  %v6043_v37 = vpop.permute.xlu1 %6042  ;;  %v6639_v52 = vld [vmem:[#allocation2 + $0x228] sm:$0xff]  ;;  %v7136_v9 = vrot.slane %v6642_v57, 1 }
 0x35c   : > { %7932 = vmatmul.f32.gmra.mxu2 %v7127_v23  ;;  %v6041_v6 = vpop.permute.xlu0 %6040  ;;  %v6636_v11 = vld [vmem:[#allocation2 + $0x210] sm:$0xff]  ;;  %v7130_v25 = vrot.slane %v6639_v52, 1 }
 0x35d   : > { %6213 = vst.msk [vmem:[#allocation2 + $0x230] sm:$0xff] %vm3683_vm5, %v6041_v6  ;;  %v7124_v42 = vrot.slane %v6636_v11, 1 }
 0x35e   : > { %6062 = vrot.lane.b32.xlu2 %v5935_v56, %s9407_s9 }
 0x35f   : > { %v7125_v30 = vsel %vm7006_vm7, %v7118_v4, %v7124_v42  ;;  %v7131_v24 = vsel %vm7006_vm7, %v7124_v42, %v7130_v25 }
 0x360   : > { %7723 = vmatmul.f32.gmra.mxu1 %v7125_v30 }
 0x361   : > { %3552 = vrot.lane.b32.xlu1 %v14355_v45, %s9407_s9 }
 0x362   : > { %v5338_v22 = vpop.permute.xlu2 %5337  ;;  %3550 = vrot.lane.b32.xlu0 %v3423_v54, %s9407_s9  ;;  %v14363_v54 = vld [vmem:[#allocation17_spill] sm:$0xff] }
 0x363   : > { %v5336_v33 = vpop.permute.xlu1 %5335  ;;  %v7906_v46 = vpop.f32.mrf.mxu2 }
 0x364   : > { %v5334_v8 = vpop.permute.xlu0 %5333  ;;  %v6640_v36 = vld [vmem:[#allocation2 + $0x230] sm:$0xff] }
 0x365   : > { %5505 = vst.msk [vmem:[#allocation2 + $0x248] sm:$0xff] %vm2974_vm4, %v5334_v8  ;;  %v7132_v14 = vrot.slane %v6640_v36, 1 }
 0x366   : > { %6214 = vst.msk [vmem:[#allocation2 + $0x248] sm:$0xff] %vm3683_vm5, %v6043_v37  ;;  %5355 = vrot.lane.b32.xlu2 %v14357_v17, %s9406_s23  ;;  %v14361_v37 = vld [vmem:[#allocation11_spill] sm:$0xff] }
 0x367   : > { %v7133_v28 = vsel %vm7006_vm7, %v7126_v55, %v7132_v14 }
 0x368   : > { %7726 = vmatmul.f32.gmra.mxu1 %v7131_v24  ;;  %7935 = vmatmul.f32.gmra.mxu2 %v7133_v28 }
 0x369   : > { %6066 = vrot.lane.b32.xlu1 %v14358_v35, %s9407_s9  ;;  %v14364_v35 = vld [vmem:[#allocation29_spill] sm:$0xff] }
 0x36a   : > { %v4633_v20 = vpop.permute.xlu2 %4632  ;;  %6064 = vrot.lane.b32.xlu0 %v11691_v7, %s9407_s9  ;;  %v7137_v7 = vsel %vm7006_vm7, %v7130_v25, %v7136_v9 }
 0x36b   : > { %4799 = vst.msk [vmem:[#allocation2 + $0x290] sm:$0xff] %vm2396_vm11, %v4633_v20  ;;  %v4631_v53 = vpop.permute.xlu1 %4630 }
 0x36c   : > { %4798 = vst.msk [vmem:[#allocation2 + $0x278] sm:$0xff] %vm2396_vm11, %v4631_v53  ;;  %v4629_v4 = vpop.permute.xlu0 %4628 }
 0x36d   : > { %5507 = vst.msk [vmem:[#allocation2 + $0x278] sm:$0xff] %vm2974_vm4, %v5338_v22  ;;  %v6643_v29 = vld [vmem:[#allocation2 + $0x248] sm:$0xff] }
 0x36e   : > { %v7697_v19 = vpop.f32.mrf.mxu1  ;;  %4797 = vst.msk [vmem:[#allocation2 + $0x260] sm:$0xff] %vm2396_vm11, %v4629_v4  ;;  %v7138_v3 = vrot.slane %v6643_v29, 1  ;;  %4650 = vrot.lane.b32.xlu2 %v11673_v18, %s9405_s22 }
 0x36f   : > { %v7698_v47 = vadd.f32 %v12574_v32, %v7697_v19  ;;  %5506 = vst.msk [vmem:[#allocation2 + $0x260] sm:$0xff] %vm2974_vm4, %v5336_v33  ;;  %v14366_v19 = vld [vmem:[#allocation22_spill] sm:$0xff] }
 0x370   : > { %6215 = vst.msk [vmem:[#allocation2 + $0x260] sm:$0xff] %vm3683_vm5, %v6045_v0  ;;  %7729 = vmatmul.f32.gmra.mxu1 %v7137_v7  ;;  %v7139_v26 = vsel %vm7006_vm7, %v7132_v14, %v7138_v3  ;;  %v8757_v7 = vld [vmem:[%s9547_s20 + $0x38] sm:$0xff] }
 0x371   : > { %v7907_v41 = vadd.f32 %v7906_v46, %v7698_v47  ;;  %5359 = vrot.lane.b32.xlu1 %v14359_v38, %s9406_s23  ;;  %7938 = vmatmul.f32.gmra.mxu2 %v7139_v26 }
 0x372   : > { %v3537_v16 = vpop.permute.xlu2 %3536  ;;  %5357 = vrot.lane.b32.xlu0 %v14360_v40, %s9406_s23 }
 0x373   : > { %v8116_v12 = vadd.f32 %v12238_v63, %v7907_v41  ;;  %3708 = vst.msk [vmem:[#allocation2 + $0x288] sm:$0xff] %vm3683_vm5, %v3537_v16  ;;  %v3535_v18 = vpop.permute.xlu1 %3534 }
 0x374   : > { %3707 = vst.msk [vmem:[#allocation2 + $0x270] sm:$0xff] %vm3683_vm5, %v3535_v18  ;;  %v3533_v55 = vpop.permute.xlu0 %3532 }
 0x375   : > { %v8287_v15 = vmax.f32 %v8116_v12, 0.0  ;;  %3706 = vst.msk [vmem:[#allocation2 + $0x258] sm:$0xff] %vm3683_vm5, %v3533_v55  ;;  %v14367_v12 = vld [vmem:[#allocation15_spill] sm:$0xff] }
 0x376   : > { %v7700_v0 = vpop.f32.mrf.mxu1  ;;  %3554 = vrot.lane.b32.xlu2 %v12260_v49, %s9407_s9 }
 0x377   : > { %9165 = vmatmul.msk.f32.gmra.mxu3 %vm1156_vm0, %v8287_v15  ;;  %v6646_v23 = vld [vmem:[#allocation2 + $0x260] sm:$0xff]  ;;  %v7701_v11 = vadd.f32 %v12574_v32, %v7700_v0  ;;  %v14368_v0 = vld [vmem:[#allocation40_spill] sm:$0xff] }
 0x378   : > { %v7144_v63 = vrot.slane %v6646_v23, 1 }
 0x379   : > { %4654 = vrot.lane.b32.xlu1 %v14361_v37, %s9405_s22  ;;  %v14369_v37 = vld [vmem:[#allocation37_spill] sm:$0xff] }
 0x37a   : > { %v6051_v6 = vpop.permute.xlu2 %6050  ;;  %v7145_v42 = vsel %vm7006_vm7, %v7138_v3, %v7144_v63  ;;  %4652 = vrot.lane.b32.xlu0 %v14362_v58, %s9405_s22 }
 0x37b   : > { %7941 = vmatmul.f32.gmra.mxu2 %v7145_v42  ;;  %v6049_v56 = vpop.permute.xlu1 %6048  ;;  %v7909_v30 = vpop.f32.mrf.mxu2  ;;  %v6648_v8 = vld [vmem:[#allocation2 + $0x270] sm:$0xff] }
 0x37c   : > { %v7910_v52 = vadd.f32 %v7909_v30, %v7701_v11  ;;  %v6047_v45 = vpop.permute.xlu0 %6046  ;;  %v6645_v22 = vld [vmem:[#allocation2 + $0x258] sm:$0xff]  ;;  %v7148_v24 = vrot.slane %v6648_v8, 1 }
 0x37d   : > { %6216 = vst.msk [vmem:[#allocation2 + $0x278] sm:$0xff] %vm3683_vm5, %v6047_v45  ;;  %v7142_v49 = vrot.slane %v6645_v22, 1  ;;  %v14370_v22 = vld [vmem:[#allocation25_spill] sm:$0xff] }
 0x37e   : > { %v8119_v48 = vadd.f32 %v12285_v1, %v7910_v52  ;;  %6068 = vrot.lane.b32.xlu2 %v14363_v54, %s9407_s9  ;;  %v7703_v18 = vpop.f32.mrf.mxu1  ;;  %v14371_v54 = vld [vmem:[#allocation21_spill] sm:$0xff] }
 0x37f   : > { %v7143_v33 = vsel %vm7006_vm7, %v7136_v9, %v7142_v49  ;;  %v7149_v20 = vsel %vm7006_vm7, %v7142_v49, %v7148_v24  ;;  %v14365_v9 = vld [vmem:[#allocation28_spill] sm:$0xff] }
 0x380   : > { %v8288_v25 = vmax.f32 %v8119_v48, 0.0  ;;  %7732 = vmatmul.f32.gmra.mxu1 %v7143_v33 }
 0x381   : > { %3558 = vrot.lane.b32.xlu1 %v14360_v40, %s9407_s9 }
 0x382   : > { %v5344_v36 = vpop.permute.xlu2 %5343  ;;  %9166 = vmatmul.msk.f32.gmra.mxu3 %vm1156_vm0, %v8288_v25  ;;  %3556 = vrot.lane.b32.xlu0 %v14357_v17, %s9407_s9  ;;  %v6651_v17 = vld [vmem:[#allocation2 + $0x288] sm:$0xff] }
 0x383   : > { %v5342_v14 = vpop.permute.xlu1 %5341  ;;  %v7154_v47 = vrot.slane %v6651_v17, 1 }
 0x384   : > { %v5340_v1 = vpop.permute.xlu0 %5339  ;;  %v6649_v28 = vld [vmem:[#allocation2 + $0x278] sm:$0xff] }
 0x385   : > { %5508 = vst.msk [vmem:[#allocation2 + $0x290] sm:$0xff] %vm2974_vm4, %v5340_v1  ;;  %v7150_v57 = vrot.slane %v6649_v28, 1  ;;  %v7155_v40 = vsel %vm7006_vm7, %v7148_v24, %v7154_v47  ;;  %v14372_v24 = vld [vmem:[#allocation34_spill] sm:$0xff] }
 0x386   : > { %6217 = vst.msk [vmem:[#allocation2 + $0x290] sm:$0xff] %vm3683_vm5, %v6049_v56  ;;  %5361 = vrot.lane.b32.xlu2 %v14364_v35, %s9406_s23 }
 0x387   : > { %v7151_v53 = vsel %vm7006_vm7, %v7144_v63, %v7150_v57  ;;  %v7704_v63 = vadd.f32 %v12574_v32, %v7703_v18 }
 0x388   : > { %7735 = vmatmul.f32.gmra.mxu1 %v7149_v20  ;;  %7944 = vmatmul.f32.gmra.mxu2 %v7151_v53 }
 0x389   : > { %6072 = vrot.lane.b32.xlu1 %v14365_v9, %s9407_s9 }
 0x38a   : > { %v4639_v4 = vpop.permute.xlu2 %4638  ;;  %6070 = vrot.lane.b32.xlu0 %v14366_v19, %s9407_s9 }
 0x38b   : > { %4802 = vst.msk [vmem:[#allocation2 + $0x2d8] sm:$0xff] %vm2396_vm11, %v4639_v4  ;;  %v4637_v29 = vpop.permute.xlu1 %4636 }
 0x38c   : > { %4801 = vst.msk [vmem:[#allocation2 + $0x2c0] sm:$0xff] %vm2396_vm11, %v4637_v29  ;;  %v4635_v3 = vpop.permute.xlu0 %4634 }
 0x38d   : > { %5510 = vst.msk [vmem:[#allocation2 + $0x2c0] sm:$0xff] %vm2974_vm4, %v5344_v36  ;;  %v6652_v41 = vld [vmem:[#allocation2 + $0x290] sm:$0xff] }
 0x38e   : > { %v8579_v46 = vpop.f32.mrf.mxu3  ;;  %4800 = vst.msk [vmem:[#allocation2 + $0x2a8] sm:$0xff] %vm2396_vm11, %v4635_v3  ;;  %v7156_v16 = vrot.slane %v6652_v41, 1  ;;  %4656 = vrot.lane.b32.xlu2 %v14367_v12, %s9405_s22  ;;  %v14375_v12 = vld [vmem:[#allocation47_spill] sm:$0xff] }
 0x38f   : > { %v8580_v26 = vadd.f32 %v12442_v59, %v8579_v46  ;;  %5509 = vst.msk [vmem:[#allocation2 + $0x2a8] sm:$0xff] %vm2974_vm4, %v5342_v14  ;;  %v14373_v46 = vld [vmem:[#allocation59_spill] sm:$0xff] }
 0x390   : > { %6218 = vst.msk [vmem:[#allocation2 + $0x2a8] sm:$0xff] %vm3683_vm5, %v6051_v6  ;;  %7738 = vmatmul.f32.gmra.mxu1 %v7155_v40  ;;  %v7157_v55 = vsel %vm7006_vm7, %v7150_v57, %v7156_v16 }
 0x391   : > { %v8821_v15 = vadd.f32 %v8757_v7, %v8580_v26  ;;  %5365 = vrot.lane.b32.xlu1 %v14368_v0, %s9406_s23  ;;  %7947 = vmatmul.f32.gmra.mxu2 %v7157_v55  ;;  %v14374_v7 = vld [vmem:[#allocation57_spill] sm:$0xff] }
 0x392   : > { %v3543_v59 = vpop.permute.xlu2 %3542  ;;  %5363 = vrot.lane.b32.xlu0 %v14369_v37, %s9406_s23 }
 0x393   : > { %v8885_v23 = vmax.f32 %v8821_v15, 0.0  ;;  %3711 = vst.msk [vmem:[#allocation2 + $0x2d0] sm:$0xff] %vm3683_vm5, %v3543_v59  ;;  %v3541_v11 = vpop.permute.xlu1 %3540 }
 0x394   : > { %v3539_v6 = vpop.permute.xlu0 %3538  ;;  %v7912_v42 = vpop.f32.mrf.mxu2  ;;  %3710 = vst.msk [vmem:[#allocation2 + $0x2b8] sm:$0xff] %vm3683_vm5, %v3541_v11 }
 0x395   : > { %8949 = vst [vmem:[%s12468_s16 + $0x38] sm:$0xff] %v8885_v23  ;;  %v7913_v58 = vadd.f32 %v7912_v42, %v7704_v63  ;;  %v14376_v23 = vld [vmem:[#allocation117_spill] sm:$0xff]  ;;  %v14377_v42 = vld [vmem:[#allocation31_spill] sm:$0xff] }
 0x396   : > { %3709 = vst.msk [vmem:[#allocation2 + $0x2a0] sm:$0xff] %vm3683_vm5, %v3539_v6  ;;  %3560 = vrot.lane.b32.xlu2 %v14359_v38, %s9407_s9  ;;  %v12869_v63 = vrot.slane %v14376_v23, 7 }
 0x397   : > { %v8122_v56 = vadd.f32 %v12307_v43, %v7913_v58  ;;  %v6655_v30 = vld [vmem:[#allocation2 + $0x2a8] sm:$0xff] }
 0x398   : > { %v7162_v52 = vrot.slane %v6655_v30, 1  ;;  %4261 = vst.msk [vmem:[#allocation2 + $0x638] sm:$0x1] %vm1170_vm1, %v12869_v63 }
 0x399   : > { %v8289_v45 = vmax.f32 %v8122_v56, 0.0  ;;  %4660 = vrot.lane.b32.xlu1 %v14370_v22, %s9405_s22 }
 0x39a   : > { %v6057_v49 = vpop.permute.xlu2 %6056  ;;  %v7163_v48 = vsel %vm7006_vm7, %v7156_v16, %v7162_v52  ;;  %4658 = vrot.lane.b32.xlu0 %v14371_v54, %s9405_s22  ;;  %v12860_v26 = vld [vmem:[#allocation2 + $0x2d0] sm:$0xff] }
 0x39b   : > { %7950 = vmatmul.f32.gmra.mxu2 %v7163_v48  ;;  %v6055_v33 = vpop.permute.xlu1 %6054  ;;  %9167 = vmatmul.msk.f32.gmra.mxu3 %vm1156_vm0, %v8289_v45  ;;  %v6657_v20 = vld [vmem:[#allocation2 + $0x2b8] sm:$0xff]  ;;  %v7172_v59 = vrot.slane %v12860_v26, 1  ;;  %v14378_v45 = vld [vmem:[#allocation95_spill] sm:$0xff] }
 0x39c   : > { %v6053_v43 = vpop.permute.xlu0 %6052  ;;  %v7166_v19 = vrot.slane %v6657_v20, 1  ;;  %v14379_v22 = vrot.slane %v14378_v45, 7  ;;  %v14380_v48 = vld [vmem:[#allocation71_spill] sm:$0xff] }
 0x39d   : > { %6219 = vst.msk [vmem:[#allocation2 + $0x2c0] sm:$0xff] %vm3683_vm5, %v6053_v43  ;;  %v7706_v38 = vpop.f32.mrf.mxu1  ;;  %v6654_v25 = vld [vmem:[#allocation2 + $0x2a0] sm:$0xff] }
 0x39e   : > { %v7707_v8 = vadd.f32 %v12574_v32, %v7706_v38  ;;  %v7160_v36 = vrot.slane %v6654_v25, 1  ;;  %6074 = vrot.lane.b32.xlu2 %v14372_v24, %s9407_s9  ;;  %v7173_v30 = vsel %vm7006_vm7, %v7166_v19, %v7172_v59  ;;  %v12906_v20 = vld [vmem:[%s13784_s6] ss:$0 sm:$0xff] }
 0x39f   : > { %v7915_v14 = vpop.f32.mrf.mxu2 }
 0x3a0   : > { %v7916_v1 = vadd.f32 %v7915_v14, %v7707_v8  ;;  %v7161_v28 = vsel %vm7006_vm7, %v7154_v47, %v7160_v36 }
 0x3a1   : > { %7741 = vmatmul.f32.gmra.mxu1 %v7161_v28  ;;  %3564 = vrot.lane.b32.xlu1 %v14369_v37, %s9407_s9 }
 0x3a2   : > { %v5350_v57 = vpop.permute.xlu2 %5349  ;;  %v8125_v53 = vadd.f32 %v12330_v5, %v7916_v1  ;;  %3562 = vrot.lane.b32.xlu0 %v14364_v35, %s9407_s9  ;;  %v7167_v35 = vsel %vm7006_vm7, %v7160_v36, %v7166_v19  ;;  %v8758_v1 = vld [vmem:[%s9547_s20 + $0x40] sm:$0xff] }
 0x3a3   : > { %v5348_v17 = vpop.permute.xlu1 %5347 }
 0x3a4   : > { %v8290_v9 = vmax.f32 %v8125_v53, 0.0  ;;  %v5346_v4 = vpop.permute.xlu0 %5345  ;;  %v6658_v29 = vld [vmem:[#allocation2 + $0x2c0] sm:$0xff] }
 0x3a5   : > { %5511 = vst.msk [vmem:[#allocation2 + $0x2d8] sm:$0xff] %vm2974_vm4, %v5346_v4  ;;  %v7168_v3 = vrot.slane %v6658_v29, 1  ;;  %v7709_v47 = vpop.f32.mrf.mxu1  ;;  %v14383_v4 = vld [vmem:[#allocation33_spill] sm:$0xff] }
 0x3a6   : > { %6220 = vst.msk [vmem:[#allocation2 + $0x2d8] sm:$0xff] %vm3683_vm5, %v6055_v33  ;;  %9168 = vmatmul.msk.f32.gmra.mxu3 %vm1156_vm0, %v8290_v9  ;;  %5367 = vrot.lane.b32.xlu2 %v14373_v46, %s9406_s23  ;;  %v7710_v16 = vadd.f32 %v12574_v32, %v7709_v47  ;;  %v14381_v33 = vld [vmem:[#allocation67_spill] sm:$0xff] }
 0x3a7   : > { %v7169_v5 = vsel %vm7006_vm7, %v7162_v52, %v7168_v3 }
 0x3a8   : > { %7953 = vmatmul.f32.gmra.mxu2 %v7169_v5 }
 0x3a9   : > { %7744 = vmatmul.f32.gmra.mxu1 %v7167_v35  ;;  %6078 = vrot.lane.b32.xlu1 %v14374_v7, %s9407_s9 }
 0x3aa   : > { %v4645_v41 = vpop.permute.xlu2 %4644  ;;  %6076 = vrot.lane.b32.xlu0 %v14375_v12, %s9407_s9 }
 0x3ab   : > { %4805 = vst.msk [vmem:[#allocation2 + $0x320] sm:$0xff] %vm2396_vm11, %v4645_v41  ;;  %v4643_v40 = vpop.permute.xlu1 %4642  ;;  %v7918_v18 = vpop.f32.mrf.mxu2  ;;  %v14384_v41 = vld [vmem:[#allocation69_spill] sm:$0xff] }
 0x3ac   : > { %4804 = vst.msk [vmem:[#allocation2 + $0x308] sm:$0xff] %vm2396_vm11, %v4643_v40  ;;  %v7919_v15 = vadd.f32 %v7918_v18, %v7710_v16  ;;  %v4641_v55 = vpop.permute.xlu0 %4640 }
 0x3ad   : > { %5513 = vst.msk [vmem:[#allocation2 + $0x308] sm:$0xff] %vm2974_vm4, %v5350_v57  ;;  %v6661_v37 = vld [vmem:[#allocation2 + $0x2d8] sm:$0xff]  ;;  %v7712_v56 = vpop.f32.mrf.mxu1 }
 0x3ae   : > { %v8128_v11 = vadd.f32 %v12359_v31, %v7919_v15  ;;  %4803 = vst.msk [vmem:[#allocation2 + $0x2f0] sm:$0xff] %vm2396_vm11, %v4641_v55  ;;  %v7174_v6 = vrot.slane %v6661_v37, 1  ;;  %4662 = vrot.lane.b32.xlu2 %v14377_v42, %s9405_s22  ;;  %v12884_v31 = vsel %vm2071_vm6, %v14379_v22, %v12869_v63 }
 0x3af   : > { %5512 = vst.msk [vmem:[#allocation2 + $0x2f0] sm:$0xff] %vm2974_vm4, %v5348_v17  ;;  %v14382_v17 = vld [vmem:[#allocation56_spill] sm:$0xff] }
 0x3b0   : > { %v8291_v58 = vmax.f32 %v8128_v11, 0.0  ;;  %6221 = vst.msk [vmem:[#allocation2 + $0x2f0] sm:$0xff] %vm3683_vm5, %v6057_v49  ;;  %v7175_v52 = vsel %vm7006_vm7, %v7168_v3, %v7174_v6  ;;  %v7713_v49 = vadd.f32 %v12574_v32, %v7712_v56  ;;  %v14385_v56 = vld [vmem:[#allocation89_spill] sm:$0xff] }
 0x3b1   : > { %7747 = vmatmul.f32.gmra.mxu1 %v7173_v30  ;;  %5371 = vrot.lane.b32.xlu1 %v14380_v48, %s9406_s23  ;;  %4260 = vst.msk [vmem:[#allocation2 + $0x620] sm:$0xff] %vm1156_vm0, %v12884_v31 }
 0x3b2   : > { %v3549_v54 = vpop.permute.xlu2 %3548  ;;  %7956 = vmatmul.f32.gmra.mxu2 %v7175_v52  ;;  %9169 = vmatmul.msk.f32.gmra.mxu3 %vm1156_vm0, %v8291_v58  ;;  %v14386_v52 = vld [vmem:[#allocation93_spill] sm:$0xff] }
 0x3b3   : > { %3714 = vst.msk [vmem:[#allocation2 + $0x318] sm:$0xff] %vm3683_vm5, %v3549_v54  ;;  %5369 = vrot.lane.b32.xlu0 %v14381_v33, %s9406_s23  ;;  %v3547_v43 = vpop.permute.xlu1 %3546 }
 0x3b4   : > { %3713 = vst.msk [vmem:[#allocation2 + $0x300] sm:$0xff] %vm3683_vm5, %v3547_v43  ;;  %v3545_v38 = vpop.permute.xlu0 %3544  ;;  %v7921_v25 = vpop.f32.mrf.mxu2 }
 0x3b5   : > { %3712 = vst.msk [vmem:[#allocation2 + $0x2e8] sm:$0xff] %vm3683_vm5, %v3545_v38  ;;  %v7922_v8 = vadd.f32 %v7921_v25, %v7713_v49  ;;  %v14387_v49 = vld [vmem:[#allocation83_spill] sm:$0xff] }
 0x3b6   : > { %3566 = vrot.lane.b32.xlu2 %v14368_v0, %s9407_s9  ;;  %v8582_v24 = vpop.f32.mrf.mxu3 }
 0x3b7   : > { %v8131_v36 = vadd.f32 %v12380_v2, %v7922_v8  ;;  %v6664_v14 = vld [vmem:[#allocation2 + $0x2f0] sm:$0xff]  ;;  %v8583_v53 = vadd.f32 %v12906_v20, %v8582_v24 }
 0x3b8   : > { %v7180_v28 = vrot.slane %v6664_v14, 1  ;;  %v14388_v14 = vld [vmem:[#allocation38_spill] sm:$0xff] }
 0x3b9   : > { %v8292_v57 = vmax.f32 %v8131_v36, 0.0  ;;  %4666 = vrot.lane.b32.xlu1 %v14382_v17, %s9405_s22  ;;  %v8822_v0 = vadd.f32 %v8758_v1, %v8583_v53  ;;  %v14389_v53 = vld [vmem:[#allocation109_spill] sm:$0xff] }
 0x3ba   : > { %v6063_v2 = vpop.permute.xlu2 %6062  ;;  %v7181_v9 = vsel %vm7006_vm7, %v7174_v6, %v7180_v28  ;;  %v12933_v30 = vld [vmem:[#allocation2 + $0x318] sm:$0xff] }
 0x3bb   : > { %4664 = vrot.lane.b32.xlu0 %v14383_v4, %s9405_s22  ;;  %7959 = vmatmul.f32.gmra.mxu2 %v7181_v9  ;;  %v6061_v19 = vpop.permute.xlu1 %6060  ;;  %v8886_v47 = vmax.f32 %v8822_v0, 0.0  ;;  %v6666_v12 = vld [vmem:[#allocation2 + $0x300] sm:$0xff]  ;;  %v7190_v38 = vrot.slane %v12933_v30, 1  ;;  %v14390_v9 = vld [vmem:[#allocation94_spill] sm:$0xff] }
 0x3bc   : > { %9170 = vmatmul.msk.f32.gmra.mxu3 %vm1156_vm0, %v8292_v57  ;;  %v6059_v29 = vpop.permute.xlu0 %6058  ;;  %v6663_v3 = vld [vmem:[#allocation2 + $0x2e8] sm:$0xff]  ;;  %v7184_v37 = vrot.slane %v6666_v12, 1  ;;  %v14391_v12 = vld [vmem:[#allocation41_spill] sm:$0xff] }
 0x3bd   : > { %6222 = vst.msk [vmem:[#allocation2 + $0x308] sm:$0xff] %vm3683_vm5, %v6059_v29  ;;  %v7178_v5 = vrot.slane %v6663_v3, 1  ;;  %v7715_v35 = vpop.f32.mrf.mxu1 }
 0x3be   : > { %8950 = vst [vmem:[%s12468_s16 + $0x40] sm:$0xff] %v8886_v47  ;;  %v7716_v7 = vadd.f32 %v12574_v32, %v7715_v35  ;;  %6080 = vrot.lane.b32.xlu2 %v14384_v41, %s9407_s9  ;;  %v7924_v16 = vpop.f32.mrf.mxu2  ;;  %v7191_v24 = vsel %vm7006_vm7, %v7184_v37, %v7190_v38 }
 0x3bf   : > { %v7179_v26 = vsel %vm7006_vm7, %v7172_v59, %v7178_v5 }
 0x3c0   : > { %7750 = vmatmul.f32.gmra.mxu1 %v7179_v26  ;;  %v7925_v40 = vadd.f32 %v7924_v16, %v7716_v7 }
 0x3c1   : > { %3570 = vrot.lane.b32.xlu1 %v14381_v33, %s9407_s9 }
 0x3c2   : > { %v5356_v18 = vpop.permute.xlu2 %5355  ;;  %v8134_v15 = vadd.f32 %v12403_v51, %v7925_v40  ;;  %v7185_v51 = vsel %vm7006_vm7, %v7178_v5, %v7184_v37  ;;  %v8759_v5 = vld [vmem:[%s9547_s20 + $0x48] sm:$0xff]  ;;  %v14392_v37 = vld [vmem:[#allocation79_spill] sm:$0xff] }
 0x3c3   : > { %3568 = vrot.lane.b32.xlu0 %v14373_v46, %s9407_s9  ;;  %v5354_v55 = vpop.permute.xlu1 %5353 }
 0x3c4   : > { %v6667_v11 = vld [vmem:[#allocation2 + $0x308] sm:$0xff]  ;;  %v8293_v6 = vmax.f32 %v8134_v15, 0.0  ;;  %v5352_v42 = vpop.permute.xlu0 %5351 }
 0x3c5   : > { %v7186_v58 = vrot.slane %v6667_v11, 1  ;;  %5514 = vst.msk [vmem:[#allocation2 + $0x320] sm:$0xff] %vm2974_vm4, %v5352_v42  ;;  %v7718_v59 = vpop.f32.mrf.mxu1 }
 0x3c6   : > { %6223 = vst.msk [vmem:[#allocation2 + $0x320] sm:$0xff] %vm3683_vm5, %v6061_v19  ;;  %9171 = vmatmul.msk.f32.gmra.mxu3 %vm1156_vm0, %v8293_v6  ;;  %5373 = vrot.lane.b32.xlu2 %v14385_v56, %s9406_s23  ;;  %v7719_v54 = vadd.f32 %v12574_v32, %v7718_v59 }
 0x3c7   : > { %v7187_v46 = vsel %vm7006_vm7, %v7180_v28, %v7186_v58 }
 0x3c8   : > { %7753 = vmatmul.f32.gmra.mxu1 %v7185_v51  ;;  %7962 = vmatmul.f32.gmra.mxu2 %v7187_v46  ;;  %v14393_v51 = vld [vmem:[#allocation97_spill] sm:$0xff] }
 0x3c9   : > { %6084 = vrot.lane.b32.xlu1 %v14386_v52, %s9407_s9 }
 0x3ca   : > { %v4651_v22 = vpop.permute.xlu2 %4650 }
 0x3cb   : > { %4808 = vst.msk [vmem:[#allocation2 + $0x368] sm:$0xff] %vm2396_vm11, %v4651_v22  ;;  %6082 = vrot.lane.b32.xlu0 %v14387_v49, %s9407_s9  ;;  %v4649_v33 = vpop.permute.xlu1 %4648  ;;  %v7927_v43 = vpop.f32.mrf.mxu2 }
 0x3cc   : > { %4807 = vst.msk [vmem:[#allocation2 + $0x350] sm:$0xff] %vm2396_vm11, %v4649_v33  ;;  %v7928_v25 = vadd.f32 %v7927_v43, %v7719_v54  ;;  %v4647_v8 = vpop.permute.xlu0 %4646 }
 0x3cd   : > { %5516 = vst.msk [vmem:[#allocation2 + $0x350] sm:$0xff] %vm2974_vm4, %v5356_v18  ;;  %v6670_v32 = vld [vmem:[#allocation2 + $0x320] sm:$0xff]  ;;  %v7721_v57 = vpop.f32.mrf.mxu1 }
 0x3ce   : > { %v8137_v36 = vadd.f32 %v12429_v21, %v7928_v25  ;;  %4806 = vst.msk [vmem:[#allocation2 + $0x338] sm:$0xff] %vm2396_vm11, %v4647_v8  ;;  %4668 = vrot.lane.b32.xlu2 %v14388_v14, %s9405_s22  ;;  %v7192_v1 = vrot.slane %v6670_v32, 1  ;;  %v14394_v32 = vld [vmem:[#allocation107_spill] sm:$0xff] }
 0x3cf   : > { %5515 = vst.msk [vmem:[#allocation2 + $0x338] sm:$0xff] %vm2974_vm4, %v5354_v55 }
 0x3d0   : > { %v8294_v28 = vmax.f32 %v8137_v36, 0.0  ;;  %6224 = vst.msk [vmem:[#allocation2 + $0x338] sm:$0xff] %vm3683_vm5, %v6063_v2  ;;  %7756 = vmatmul.f32.gmra.mxu1 %v7191_v24  ;;  %v7193_v21 = vsel %vm7006_vm7, %v7186_v58, %v7192_v1  ;;  %v12961_v2 = vld [vmem:[%s13782_s4] ss:$0 sm:$0xff] }
 0x3d1   : > { %5377 = vrot.lane.b32.xlu1 %v14389_v53, %s9406_s23  ;;  %7965 = vmatmul.f32.gmra.mxu2 %v7193_v21  ;;  %v7722_v4 = vadd.f32 %v12961_v2, %v7721_v57  ;;  %v14396_v57 = vld [vmem:[#allocation100_spill] sm:$0xff] }
 0x3d2   : > { %v3555_v17 = vpop.permute.xlu2 %3554  ;;  %9172 = vmatmul.msk.f32.gmra.mxu3 %vm1156_vm0, %v8294_v28  ;;  %v14395_v28 = vld [vmem:[#allocation103_spill] sm:$0xff] }
 0x3d3   : > { %3717 = vst.msk [vmem:[#allocation2 + $0x360] sm:$0xff] %vm3683_vm5, %v3555_v17  ;;  %5375 = vrot.lane.b32.xlu0 %v14390_v9, %s9406_s23  ;;  %v3553_v0 = vpop.permute.xlu1 %3552 }
 0x3d4   : > { %3716 = vst.msk [vmem:[#allocation2 + $0x348] sm:$0xff] %vm3683_vm5, %v3553_v0  ;;  %v3551_v19 = vpop.permute.xlu0 %3550  ;;  %v7930_v29 = vpop.f32.mrf.mxu2 }
 0x3d5   : > { %3715 = vst.msk [vmem:[#allocation2 + $0x330] sm:$0xff] %vm3683_vm5, %v3551_v19  ;;  %v7931_v3 = vadd.f32 %v7930_v29, %v7722_v4  ;;  %v8585_v47 = vpop.f32.mrf.mxu3 }
 0x3d6   : > { %v8586_v35 = vadd.f32 %v12906_v20, %v8585_v47  ;;  %3572 = vrot.lane.b32.xlu2 %v14380_v48, %s9407_s9 }
 0x3d7   : > { %v6673_v7 = vld [vmem:[#allocation2 + $0x338] sm:$0xff]  ;;  %v8140_v41 = vadd.f32 %v12464_v61, %v7931_v3  ;;  %v14397_v3 = vld [vmem:[#allocation43_spill] sm:$0xff] }
 0x3d8   : > { %v7198_v26 = vrot.slane %v6673_v7, 1  ;;  %v8823_v16 = vadd.f32 %v8759_v5, %v8586_v35 }
 0x3d9   : > { %4672 = vrot.lane.b32.xlu1 %v14391_v12, %s9405_s22  ;;  %v8295_v18 = vmax.f32 %v8140_v41, 0.0  ;;  %v14399_v12 = vld [vmem:[#allocation111_spill] sm:$0xff] }
 0x3da   : > { %v6069_v40 = vpop.permute.xlu2 %6068  ;;  %v7199_v15 = vsel %vm7006_vm7, %v7192_v1, %v7198_v26  ;;  %v8887_v55 = vmax.f32 %v8823_v16, 0.0  ;;  %v12995_v24 = vld [vmem:[#allocation2 + $0x360] sm:$0xff] }
 0x3db   : > { %4670 = vrot.lane.b32.xlu0 %v14392_v37, %s9405_s22  ;;  %7968 = vmatmul.f32.gmra.mxu2 %v7199_v15  ;;  %v6067_v11 = vpop.permute.xlu1 %6066  ;;  %v6675_v22 = vld [vmem:[#allocation2 + $0x348] sm:$0xff]  ;;  %v7208_v0 = vrot.slane %v12995_v24, 1  ;;  %v8148_v37 = vpop.f32.mrf.mxu0 }
 0x3dc   : > { %9173 = vmatmul.msk.f32.gmra.mxu3 %vm1156_vm0, %v8295_v18  ;;  %8951 = vst [vmem:[%s12468_s16 + $0x48] sm:$0xff] %v8887_v55  ;;  %v6065_v48 = vpop.permute.xlu0 %6064  ;;  %v6672_v6 = vld [vmem:[#allocation2 + $0x330] sm:$0xff]  ;;  %v7202_v43 = vrot.slane %v6675_v22, 1 }
 0x3dd   : > { %v7724_v61 = vpop.f32.mrf.mxu1  ;;  %6225 = vst.msk [vmem:[#allocation2 + $0x350] sm:$0xff] %vm3683_vm5, %v6065_v48  ;;  %v7196_v58 = vrot.slane %v6672_v6, 1 }
 0x3de   : > { %v7725_v42 = vadd.f32 %v12961_v2, %v7724_v61  ;;  %6086 = vrot.lane.b32.xlu2 %v14393_v51, %s9407_s9  ;;  %v7209_v7 = vsel %vm7006_vm7, %v7202_v43, %v7208_v0  ;;  %v14400_v51 = vld [vmem:[#allocation49_spill] sm:$0xff] }
 0x3df   : > { %v7933_v59 = vpop.f32.mrf.mxu2  ;;  %v7197_v30 = vsel %vm7006_vm7, %v7190_v38, %v7196_v58 }
 0x3e0   : > { %v7934_v46 = vadd.f32 %v7933_v59, %v7725_v42  ;;  %7759 = vmatmul.f32.gmra.mxu1 %v7197_v30 }
 0x3e1   : > { %3576 = vrot.lane.b32.xlu1 %v14390_v9, %s9407_s9 }
 0x3e2   : > { %v5362_v52 = vpop.permute.xlu2 %5361  ;;  %v8143_v54 = vadd.f32 %v12485_v39, %v7934_v46  ;;  %v7203_v39 = vsel %vm7006_vm7, %v7196_v58, %v7202_v43  ;;  %v8760_v58 = vld [vmem:[%s9547_s20 + $0x50] sm:$0xff] }
 0x3e3   : > { %3574 = vrot.lane.b32.xlu0 %v14385_v56, %s9407_s9  ;;  %v5360_v49 = vpop.permute.xlu1 %5359 }
 0x3e4   : > { %v8296_v33 = vmax.f32 %v8143_v54, 0.0  ;;  %v5358_v25 = vpop.permute.xlu0 %5357  ;;  %v6676_v8 = vld [vmem:[#allocation2 + $0x350] sm:$0xff] }
 0x3e5   : > { %5517 = vst.msk [vmem:[#allocation2 + $0x368] sm:$0xff] %vm2974_vm4, %v5358_v25  ;;  %v7727_v36 = vpop.f32.mrf.mxu1  ;;  %v7204_v38 = vrot.slane %v6676_v8, 1 }
 0x3e6   : > { %9174 = vmatmul.msk.f32.gmra.mxu3 %vm1156_vm0, %v8296_v33  ;;  %6226 = vst.msk [vmem:[#allocation2 + $0x368] sm:$0xff] %vm3683_vm5, %v6067_v11  ;;  %5379 = vrot.lane.b32.xlu2 %v14394_v32, %s9406_s23  ;;  %v7728_v1 = vadd.f32 %v12961_v2, %v7727_v36 }
 0x3e7   : > { %v7205_v56 = vsel %vm7006_vm7, %v7198_v26, %v7204_v38 }
 0x3e8   : > { %7762 = vmatmul.f32.gmra.mxu1 %v7203_v39  ;;  %7971 = vmatmul.f32.gmra.mxu2 %v7205_v56 }
 0x3e9   : > { %6090 = vrot.lane.b32.xlu1 %v14395_v28, %s9407_s9 }
 0x3ea   : > { %v4657_v14 = vpop.permute.xlu2 %4656 }
 0x3eb   : > { %4811 = vst.msk [vmem:[#allocation2 + $0x3b0] sm:$0xff] %vm2396_vm11, %v4657_v14  ;;  %6088 = vrot.lane.b32.xlu0 %v14396_v57, %s9407_s9  ;;  %v4655_v21 = vpop.permute.xlu1 %4654  ;;  %v7936_v17 = vpop.f32.mrf.mxu2 }
 0x3ec   : > { %4810 = vst.msk [vmem:[#allocation2 + $0x398] sm:$0xff] %vm2396_vm11, %v4655_v21  ;;  %v7937_v9 = vadd.f32 %v7936_v17, %v7728_v1  ;;  %v4653_v4 = vpop.permute.xlu0 %4652  ;;  %v8151_v14 = vpop.f32.mrf.mxu0 }
 0x3ed   : > { %5519 = vst.msk [vmem:[#allocation2 + $0x398] sm:$0xff] %vm2974_vm4, %v5362_v52  ;;  %v6679_v29 = vld [vmem:[#allocation2 + $0x368] sm:$0xff]  ;;  %v7730_v35 = vpop.f32.mrf.mxu1  ;;  %v14401_v52 = vld [vmem:[#allocation46_spill] sm:$0xff] }
 0x3ee   : > { %v8146_v19 = vadd.f32 %v12505_v34, %v7937_v9  ;;  %4809 = vst.msk [vmem:[#allocation2 + $0x380] sm:$0xff] %vm2396_vm11, %v4653_v4  ;;  %4674 = vrot.lane.b32.xlu2 %v14397_v3, %s9405_s22  ;;  %v7210_v47 = vrot.slane %v6679_v29, 1  ;;  %v14398_v34 = vld [vmem:[#allocation112_spill] sm:$0xff]  ;;  %v7731_v16 = vadd.f32 %v12961_v2, %v7730_v35  ;;  %v8761_v29 = vld [vmem:[%s9547_s20 + $0x58] sm:$0xff] }
 0x3ef   : > { %5518 = vst.msk [vmem:[#allocation2 + $0x380] sm:$0xff] %vm2974_vm4, %v5360_v49 }
 0x3f0   : > { %v8297_v5 = vmax.f32 %v8146_v19, 0.0  ;;  %6227 = vst.msk [vmem:[#allocation2 + $0x380] sm:$0xff] %vm3683_vm5, %v6069_v40  ;;  %7765 = vmatmul.f32.gmra.mxu1 %v7209_v7  ;;  %v7211_v41 = vsel %vm7006_vm7, %v7204_v38, %v7210_v47  ;;  %v14402_v38 = vld [vmem:[#allocation105_spill] sm:$0xff] }
 0x3f1   : > { %5383 = vrot.lane.b32.xlu1 %v14398_v34, %s9406_s23  ;;  %7974 = vmatmul.f32.gmra.mxu2 %v7211_v41 }
 0x3f2   : > { %v3561_v26 = vpop.permute.xlu2 %3560  ;;  %9175 = vmatmul.msk.f32.gmra.mxu3 %vm1156_vm0, %v8297_v5  ;;  %v14403_v5 = vld [vmem:[#allocation114_spill] sm:$0xff] }
 0x3f3   : > { %3720 = vst.msk [vmem:[#allocation2 + $0x3a8] sm:$0xff] %vm3683_vm5, %v3561_v26  ;;  %5381 = vrot.lane.b32.xlu0 %v14399_v12, %s9406_s23  ;;  %v3559_v40 = vpop.permute.xlu1 %3558 }
 0x3f4   : > { %3719 = vst.msk [vmem:[#allocation2 + $0x390] sm:$0xff] %vm3683_vm5, %v3559_v40  ;;  %v7939_v18 = vpop.f32.mrf.mxu2  ;;  %v3557_v15 = vpop.permute.xlu0 %3556  ;;  %v14404_v40 = vld [vmem:[#allocation61_spill] sm:$0xff] }
 0x3f5   : > { %v7940_v55 = vadd.f32 %v7939_v18, %v7731_v16  ;;  %3718 = vst.msk [vmem:[#allocation2 + $0x378] sm:$0xff] %vm3683_vm5, %v3557_v15  ;;  %v14405_v15 = vld [vmem:[#allocation106_spill] sm:$0xff] }
 0x3f6   : > { %3578 = vrot.lane.b32.xlu2 %v14389_v53, %s9407_s9 }
 0x3f7   : > { %v8149_v11 = vadd.f32 %v8148_v37, %v7940_v55  ;;  %v6682_v48 = vld [vmem:[#allocation2 + $0x380] sm:$0xff] }
 0x3f8   : > { %v7216_v61 = vrot.slane %v6682_v48, 1 }
 0x3f9   : > { %v8298_v6 = vmax.f32 %v8149_v11, 0.0  ;;  %4678 = vrot.lane.b32.xlu1 %v14400_v51, %s9405_s22  ;;  %v8154_v11 = vpop.f32.mrf.mxu0 }
 0x3fa   : > { %v8588_v42 = vpop.f32.mrf.mxu3  ;;  %v13026_v59 = vpop.permute.xlu2 %6074  ;;  %v7217_v30 = vsel %vm7006_vm7, %v7210_v47, %v7216_v61  ;;  %v13054_v26 = vld [vmem:[#allocation2 + $0x3a8] sm:$0xff] }
 0x3fb   : > { %v8589_v46 = vadd.f32 %v12906_v20, %v8588_v42  ;;  %4676 = vrot.lane.b32.xlu0 %v14401_v52, %s9405_s22  ;;  %7977 = vmatmul.f32.gmra.mxu2 %v7217_v30  ;;  %v6073_v53 = vpop.permute.xlu1 %6072  ;;  %v6684_v1 = vld [vmem:[#allocation2 + $0x390] sm:$0xff] }
 0x3fc   : > { %9176 = vmatmul.msk.f32.gmra.mxu3 %vm1156_vm0, %v8298_v6  ;;  %v6071_v54 = vpop.permute.xlu0 %6070  ;;  %v6681_v33 = vld [vmem:[#allocation2 + $0x378] sm:$0xff]  ;;  %v7220_v17 = vrot.slane %v6684_v1, 1 }
 0x3fd   : > { %v8824_v22 = vadd.f32 %v8760_v58, %v8589_v46  ;;  %v7733_v49 = vpop.f32.mrf.mxu1  ;;  %6228 = vst.msk [vmem:[#allocation2 + $0x398] sm:$0xff] %vm3683_vm5, %v6071_v54  ;;  %v7214_v8 = vrot.slane %v6681_v33, 1  ;;  %v14406_v33 = vld [vmem:[#allocation54_spill] sm:$0xff] }
 0x3fe   : > { %v7734_v25 = vadd.f32 %v12961_v2, %v7733_v49  ;;  %v7942_v36 = vpop.f32.mrf.mxu2  ;;  %6092 = vrot.lane.b32.xlu2 %v14402_v38, %s9407_s9  ;;  %v14407_v38 = vld [vmem:[#allocation60_spill] sm:$0xff]  ;;  %v14408_v1 = vld [vmem:[#allocation18_spill] sm:$0xff] }
 0x3ff   : > { %v8888_v43 = vmax.f32 %v8824_v22, 0.0  ;;  %v7215_v56 = vsel %vm7006_vm7, %v7208_v0, %v7214_v8 }
 0x400   : > { %v7943_v39 = vadd.f32 %v7942_v36, %v7734_v25  ;;  %7768 = vmatmul.f32.gmra.mxu1 %v7215_v56 }
 0x401   : > { %8952 = vst [vmem:[%s12468_s16 + $0x50] sm:$0xff] %v8888_v43  ;;  %2874 = vrot.lane.b32.xlu1 %v14397_v3, %s9406_s23  ;;  %v8157_v36 = vpop.f32.mrf.mxu0 }
 0x402   : > { %v5368_v24 = vpop.permute.xlu2 %5367  ;;  %v8152_v28 = vadd.f32 %v8151_v14, %v7943_v39 }
 0x403   : > { %3580 = vrot.lane.b32.xlu0 %v14394_v32, %s9407_s9  ;;  %v5366_v57 = vpop.permute.xlu1 %5365  ;;  %v7221_v32 = vsel %vm7006_vm7, %v7214_v8, %v7220_v17 }
 0x404   : > { %v8299_v21 = vmax.f32 %v8152_v28, 0.0  ;;  %v5364_v9 = vpop.permute.xlu0 %5363  ;;  %v6685_v4 = vld [vmem:[#allocation2 + $0x398] sm:$0xff] }
 0x405   : > { %5520 = vst.msk [vmem:[#allocation2 + $0x3b0] sm:$0xff] %vm2974_vm4, %v5364_v9  ;;  %v7736_v0 = vpop.f32.mrf.mxu1  ;;  %v8591_v19 = vpop.f32.mrf.mxu3  ;;  %v7222_v47 = vrot.slane %v6685_v4, 1 }
 0x406   : > { %9177 = vmatmul.msk.f32.gmra.mxu3 %vm1156_vm0, %v8299_v21  ;;  %6229 = vst.msk [vmem:[#allocation2 + $0x3b0] sm:$0xff] %vm3683_vm5, %v6073_v53  ;;  %v8592_v3 = vadd.f32 %v12906_v20, %v8591_v19  ;;  %5385 = vrot.lane.b32.xlu2 %v14403_v5, %s9406_s23  ;;  %v7737_v16 = vadd.f32 %v12961_v2, %v7736_v0 }
 0x407   : > { %v7223_v35 = vsel %vm7006_vm7, %v7216_v61, %v7222_v47  ;;  %v7226_v61 = vrot.slane %v13054_v26, 1 }
 0x408   : > { %v8825_v7 = vadd.f32 %v8761_v29, %v8592_v3  ;;  %7771 = vmatmul.f32.gmra.mxu1 %v7221_v32  ;;  %7980 = vmatmul.f32.gmra.mxu2 %v7223_v35  ;;  %v8762_v29 = vld [vmem:[%s9547_s20 + $0x60] sm:$0xff] }
 0x409   : > { %5387 = vrot.lane.b32.xlu1 %v14404_v40, %s9406_s23  ;;  %v7227_v22 = vsel %vm7006_vm7, %v7220_v17, %v7226_v61  ;;  %v8160_v26 = vpop.f32.mrf.mxu0 }
 0x40a   : > { %v4663_v41 = vpop.permute.xlu2 %4662  ;;  %v8889_v18 = vmax.f32 %v8825_v7, 0.0 }
 0x40b   : > { %4814 = vst.msk [vmem:[#allocation2 + $0x3f8] sm:$0xff] %vm2396_vm11, %v4663_v41  ;;  %6094 = vrot.lane.b32.xlu0 %v14405_v15, %s9407_s9  ;;  %v4661_v55 = vpop.permute.xlu1 %4660  ;;  %v7945_v37 = vpop.f32.mrf.mxu2 }
 0x40c   : > { %4813 = vst.msk [vmem:[#allocation2 + $0x3e0] sm:$0xff] %vm2396_vm11, %v4661_v55  ;;  %v7946_v48 = vadd.f32 %v7945_v37, %v7737_v16  ;;  %v4659_v6 = vpop.permute.xlu0 %4658  ;;  %v14411_v55 = vld [vmem:[#allocation19_spill] sm:$0xff] }
 0x40d   : > { %8953 = vst [vmem:[%s12468_s16 + $0x58] sm:$0xff] %v8889_v18  ;;  %v6688_v58 = vld [vmem:[#allocation2 + $0x3b0] sm:$0xff]  ;;  %v7739_v53 = vpop.f32.mrf.mxu1  ;;  %v14410_v18 = vld [vmem:[#allocation10_spill] sm:$0xff] }
 0x40e   : > { %5522 = vst.msk [vmem:[#allocation2 + $0x3e0] sm:$0xff] %vm2974_vm4, %v5368_v24  ;;  %v8155_v42 = vadd.f32 %v8154_v11, %v7946_v48  ;;  %3582 = vrot.lane.b32.xlu2 %v14399_v12, %s9407_s9  ;;  %v7228_v46 = vrot.slane %v6688_v58, 1  ;;  %v7740_v12 = vadd.f32 %v12961_v2, %v7739_v53 }
 0x40f   : > { %4812 = vst.msk [vmem:[#allocation2 + $0x3c8] sm:$0xff] %vm2396_vm11, %v4659_v6 }
 0x410   : > { %v8300_v30 = vmax.f32 %v8155_v42, 0.0  ;;  %5521 = vst.msk [vmem:[#allocation2 + $0x3c8] sm:$0xff] %vm2974_vm4, %v5366_v57  ;;  %7774 = vmatmul.f32.gmra.mxu1 %v7227_v22  ;;  %v7229_v54 = vsel %vm7006_vm7, %v7222_v47, %v7228_v46  ;;  %v14409_v47 = vld [vmem:[#allocation58_spill] sm:$0xff] }
 0x411   : > { %6230 = vst.msk [vmem:[#allocation2 + $0x3c8] sm:$0xff] %vm3683_vm5, %v13026_v59  ;;  %3584 = vrot.lane.b32.xlu1 %v14398_v34, %s9407_s9  ;;  %7983 = vmatmul.f32.gmra.mxu2 %v7229_v54  ;;  %v8763_v54 = vld [vmem:[%s9547_s20 + $0x68] sm:$0xff] }
 0x412   : > { %v3567_v49 = vpop.permute.xlu2 %3566  ;;  %9178 = vmatmul.msk.f32.gmra.mxu3 %vm1156_vm0, %v8300_v30 }
 0x413   : > { %3723 = vst.msk [vmem:[#allocation2 + $0x3f0] sm:$0xff] %vm3683_vm5, %v3567_v49  ;;  %4680 = vrot.lane.b32.xlu0 %v14406_v33, %s9405_s22  ;;  %v3565_v43 = vpop.permute.xlu1 %3564 }
 0x414   : > { %3722 = vst.msk [vmem:[#allocation2 + $0x3d8] sm:$0xff] %vm3683_vm5, %v3565_v43  ;;  %v7948_v59 = vpop.f32.mrf.mxu2  ;;  %v3563_v25 = vpop.permute.xlu0 %3562 }
 0x415   : > { %v7949_v8 = vadd.f32 %v7948_v59, %v7740_v12  ;;  %3721 = vst.msk [vmem:[#allocation2 + $0x3c0] sm:$0xff] %vm3683_vm5, %v3563_v25 }
 0x416   : > { %6096 = vrot.lane.b32.xlu2 %v14407_v38, %s9407_s9  ;;  %v8163_v38 = vpop.f32.mrf.mxu0 }
 0x417   : > { %v8158_v34 = vadd.f32 %v8157_v36, %v7949_v8 }
 0x418   : > { %v6691_v39 = vld [vmem:[#allocation2 + $0x3c8] sm:$0xff] }
 0x419   : > { %v8301_v56 = vmax.f32 %v8158_v34, 0.0  ;;  %v7234_v14 = vrot.slane %v6691_v39, 1  ;;  %6098 = vrot.lane.b32.xlu1 %v14408_v1, %s9407_s9 }
 0x41a   : > { %v13085_v24 = vpop.permute.xlu2 %6080  ;;  %v13113_v12 = vld [vmem:[#allocation2 + $0x3f0] sm:$0xff] }
 0x41b   : > { %2876 = vrot.lane.b32.xlu0 %v14401_v52, %s9406_s23  ;;  %v7235_v28 = vsel %vm7006_vm7, %v7228_v46, %v7234_v14  ;;  %v6079_v57 = vpop.permute.xlu1 %6078  ;;  %9179 = vmatmul.msk.f32.gmra.mxu3 %vm1156_vm0, %v8301_v56  ;;  %v6693_v41 = vld [vmem:[#allocation2 + $0x3d8] sm:$0xff]  ;;  %v7244_v34 = vrot.slane %v13113_v12, 1 }
 0x41c   : > { %7986 = vmatmul.f32.gmra.mxu2 %v7235_v28  ;;  %v6077_v21 = vpop.permute.xlu0 %6076  ;;  %v6690_v17 = vld [vmem:[#allocation2 + $0x3c0] sm:$0xff]  ;;  %v7238_v48 = vrot.slane %v6693_v41, 1 }
 0x41d   : > { %6231 = vst.msk [vmem:[#allocation2 + $0x3e0] sm:$0xff] %vm3683_vm5, %v6077_v21  ;;  %v7232_v4 = vrot.slane %v6690_v17, 1 }
 0x41e   : > { %v7742_v9 = vpop.f32.mrf.mxu1  ;;  %v8594_v19 = vpop.f32.mrf.mxu3  ;;  %4682 = vrot.lane.b32.xlu2 %v14409_v47, %s9405_s22  ;;  %v7245_v28 = vsel %vm7006_vm7, %v7238_v48, %v7244_v34 }
 0x41f   : > { %v7743_v0 = vadd.f32 %v12961_v2, %v7742_v9  ;;  %v7951_v52 = vpop.f32.mrf.mxu2  ;;  %v8595_v3 = vadd.f32 %v12906_v20, %v8594_v19  ;;  %v7233_v32 = vsel %vm7006_vm7, %v7226_v61, %v7232_v4  ;;  %v7239_v30 = vsel %vm7006_vm7, %v7232_v4, %v7238_v48  ;;  %v14413_v9 = vld [vmem:[#allocation36_spill] sm:$0xff] }
 0x420   : > { %7777 = vmatmul.f32.gmra.mxu1 %v7233_v32 }
 0x421   : > { %v7952_v35 = vadd.f32 %v7951_v52, %v7743_v0  ;;  %v8826_v16 = vadd.f32 %v8762_v29, %v8595_v3  ;;  %4684 = vrot.lane.b32.xlu1 %v14410_v18, %s9405_s22  ;;  %v14414_v0 = vld [vmem:[#allocation23_spill] sm:$0xff] }
 0x422   : > { %v5374_v7 = vpop.permute.xlu2 %5373 }
 0x423   : > { %v8161_v15 = vadd.f32 %v8160_v26, %v7952_v35  ;;  %5389 = vrot.lane.b32.xlu0 %v14411_v55, %s9406_s23  ;;  %v5372_v37 = vpop.permute.xlu1 %5371  ;;  %v8890_v11 = vmax.f32 %v8826_v16, 0.0  ;;  %v8764_v35 = vld [vmem:[%s9547_s20 + $0x70] sm:$0xff] }
 0x424   : > { %v6694_v42 = vld [vmem:[#allocation2 + $0x3e0] sm:$0xff] }
 0x425   : > { %v8302_v6 = vmax.f32 %v8161_v15, 0.0  ;;  %v5370_v61 = vpop.permute.xlu0 %5369  ;;  %8954 = vst [vmem:[%s12468_s16 + $0x60] sm:$0xff] %v8890_v11  ;;  %v7240_v58 = vrot.slane %v6694_v42, 1 }
 0x426   : > { %5523 = vst.msk [vmem:[#allocation2 + $0x3f8] sm:$0xff] %vm2974_vm4, %v5370_v61  ;;  %v7745_v46 = vpop.f32.mrf.mxu1  ;;  %2878 = vrot.lane.b32.xlu2 %v14400_v51, %s9406_s23  ;;  %v14415_v61 = vld [vmem:[#allocation16_spill] sm:$0xff] }
 0x427   : > { %9180 = vmatmul.msk.f32.gmra.mxu3 %vm1156_vm0, %v8302_v6  ;;  %6232 = vst.msk [vmem:[#allocation2 + $0x3f8] sm:$0xff] %vm3683_vm5, %v6079_v57  ;;  %v7241_v53 = vsel %vm7006_vm7, %v7234_v14, %v7240_v58  ;;  %v7746_v43 = vadd.f32 %v12961_v2, %v7745_v46 }
 0x428   : > { %7780 = vmatmul.f32.gmra.mxu1 %v7239_v30  ;;  %7989 = vmatmul.f32.gmra.mxu2 %v7241_v53 }
 0x429   : > { %v8597_v22 = vpop.f32.mrf.mxu3  ;;  %2880 = vrot.lane.b32.xlu1 %v14406_v33, %s9406_s23 }
 0x42a   : > { %v4669_v49 = vpop.permute.xlu2 %4668  ;;  %v8598_v51 = vadd.f32 %v12906_v20, %v8597_v22 }
 0x42b   : > { %4817 = vst.msk [vmem:[#allocation2 + $0x440] sm:$0xff] %vm2396_vm11, %v4669_v49  ;;  %3586 = vrot.lane.b32.xlu0 %v14403_v5, %s9407_s9  ;;  %v4667_v59 = vpop.permute.xlu1 %4666  ;;  %v7954_v25 = vpop.f32.mrf.mxu2  ;;  %v14412_v5 = vld [vmem:[#allocation24_spill] sm:$0xff]  ;;  %v8765_v49 = vld [vmem:[%s9547_s20 + $0x78] sm:$0xff] }
 0x42c   : > { %v8827_v8 = vadd.f32 %v8763_v54, %v8598_v51  ;;  %4816 = vst.msk [vmem:[#allocation2 + $0x428] sm:$0xff] %vm2396_vm11, %v4667_v59  ;;  %v7955_v36 = vadd.f32 %v7954_v25, %v7746_v43  ;;  %v14416_v43 = vld [vmem:[#allocation27_spill] sm:$0xff] }
 0x42d   : > { %5525 = vst.msk [vmem:[#allocation2 + $0x428] sm:$0xff] %vm2974_vm4, %v5374_v7  ;;  %v4665_v33 = vpop.permute.xlu0 %4664  ;;  %v8166_v7 = vpop.f32.mrf.mxu0 }
 0x42e   : > { %v8891_v39 = vmax.f32 %v8827_v8, 0.0  ;;  %v8164_v56 = vadd.f32 %v8163_v38, %v7955_v36  ;;  %4815 = vst.msk [vmem:[#allocation2 + $0x410] sm:$0xff] %vm2396_vm11, %v4665_v33  ;;  %5391 = vrot.lane.b32.xlu2 %v14412_v5, %s9406_s23  ;;  %v6697_v14 = vld [vmem:[#allocation2 + $0x3f8] sm:$0xff]  ;;  %v7748_v21 = vpop.f32.mrf.mxu1 }
 0x42f   : > { %5524 = vst.msk [vmem:[#allocation2 + $0x410] sm:$0xff] %vm2974_vm4, %v5372_v37  ;;  %v7246_v57 = vrot.slane %v6697_v14, 1 }
 0x430   : > { %8955 = vst [vmem:[%s12468_s16 + $0x68] sm:$0xff] %v8891_v39  ;;  %v8303_v1 = vmax.f32 %v8164_v56, 0.0  ;;  %7783 = vmatmul.f32.gmra.mxu1 %v7245_v28  ;;  %v14417_v56 = vld [vmem:[#allocation35_spill] sm:$0xff] }
 0x431   : > { %6233 = vst.msk [vmem:[#allocation2 + $0x410] sm:$0xff] %vm3683_vm5, %v13085_v24  ;;  %5393 = vrot.lane.b32.xlu1 %v14413_v9, %s9406_s23  ;;  %v7247_v4 = vsel %vm7006_vm7, %v7240_v58, %v7246_v57  ;;  %v7749_v24 = vadd.f32 %v12961_v2, %v7748_v21 }
 0x432   : > { %v3573_v17 = vpop.permute.xlu2 %3572  ;;  %9181 = vmatmul.msk.f32.gmra.mxu3 %vm1156_vm0, %v8303_v1  ;;  %7992 = vmatmul.f32.gmra.mxu2 %v7247_v4  ;;  %v14418_v4 = vld [vmem:[#allocation20_spill] sm:$0xff] }
 0x433   : > { %3726 = vst.msk [vmem:[#allocation2 + $0x438] sm:$0xff] %vm3683_vm5, %v3573_v17  ;;  %6100 = vrot.lane.b32.xlu0 %v14414_v0, %s9407_s9  ;;  %v3571_v19 = vpop.permute.xlu1 %3570 }
 0x434   : > { %3725 = vst.msk [vmem:[#allocation2 + $0x420] sm:$0xff] %vm3683_vm5, %v3571_v19 }
 0x435   : > { %v3569_v29 = vpop.permute.xlu0 %3568  ;;  %v7957_v52 = vpop.f32.mrf.mxu2 }
 0x436   : > { %3724 = vst.msk [vmem:[#allocation2 + $0x408] sm:$0xff] %vm3683_vm5, %v3569_v29  ;;  %v7958_v3 = vadd.f32 %v7957_v52, %v7749_v24  ;;  %v8600_v32 = vpop.f32.mrf.mxu3  ;;  %3588 = vrot.lane.b32.xlu2 %v14404_v40, %s9407_s9  ;;  %v8169_v8 = vpop.f32.mrf.mxu0  ;;  %v14419_v52 = vld [vmem:[#allocation26_spill] sm:$0xff] }
 0x437   : > { %v8601_v41 = vadd.f32 %v12906_v20, %v8600_v32  ;;  %v8766_v32 = vld [vmem:[%s9547_s20 + $0x80] sm:$0xff] }
 0x438   : > { %v8167_v26 = vadd.f32 %v8166_v7, %v7958_v3  ;;  %v6700_v16 = vld [vmem:[#allocation2 + $0x410] sm:$0xff]  ;;  %v14420_v7 = vld [vmem:[#allocation39_spill] sm:$0xff] }
 0x439   : > { %v8828_v15 = vadd.f32 %v8764_v35, %v8601_v41  ;;  %v7252_v37 = vrot.slane %v6700_v16, 1  ;;  %3590 = vrot.lane.b32.xlu1 %v14411_v55, %s9407_s9 }
 0x43a   : > { %v13149_v11 = vpop.permute.xlu2 %6086  ;;  %v8304_v48 = vmax.f32 %v8167_v26, 0.0  ;;  %v13179_v24 = vld [vmem:[#allocation2 + $0x438] sm:$0xff] }
 0x43b   : > { %v8892_v6 = vmax.f32 %v8828_v15, 0.0  ;;  %4686 = vrot.lane.b32.xlu0 %v14415_v61, %s9405_s22  ;;  %v7253_v42 = vsel %vm7006_vm7, %v7246_v57, %v7252_v37  ;;  %v6085_v58 = vpop.permute.xlu1 %6084  ;;  %v6702_v38 = vld [vmem:[#allocation2 + $0x420] sm:$0xff]  ;;  %v7262_v15 = vrot.slane %v13179_v24, 1 }
 0x43c   : > { %7995 = vmatmul.f32.gmra.mxu2 %v7253_v42  ;;  %9182 = vmatmul.msk.f32.gmra.mxu3 %vm1156_vm0, %v8304_v48  ;;  %v7256_v57 = vrot.slane %v6702_v38, 1 }
 0x43d   : > { %8956 = vst [vmem:[%s12468_s16 + $0x70] sm:$0xff] %v8892_v6  ;;  %v6083_v40 = vpop.permute.xlu0 %6082  ;;  %v7751_v46 = vpop.f32.mrf.mxu1  ;;  %v6699_v30 = vld [vmem:[#allocation2 + $0x408] sm:$0xff] }
 0x43e   : > { %6234 = vst.msk [vmem:[#allocation2 + $0x428] sm:$0xff] %vm3683_vm5, %v6083_v40  ;;  %v7752_v53 = vadd.f32 %v12961_v2, %v7751_v46  ;;  %v7250_v55 = vrot.slane %v6699_v30, 1  ;;  %v7960_v22 = vpop.f32.mrf.mxu2  ;;  %6102 = vrot.lane.b32.xlu2 %v14416_v43, %s9407_s9  ;;  %v7263_v30 = vsel %vm7006_vm7, %v7256_v57, %v7262_v15 }
 0x43f   : > { %v8603_v54 = vpop.f32.mrf.mxu3 }
 0x440   : > { %v7961_v51 = vadd.f32 %v7960_v22, %v7752_v53  ;;  %v8604_v59 = vadd.f32 %v12906_v20, %v8603_v54  ;;  %v7251_v25 = vsel %vm7006_vm7, %v7244_v34, %v7250_v55 }
 0x441   : > { %7786 = vmatmul.f32.gmra.mxu1 %v7251_v25  ;;  %6104 = vrot.lane.b32.xlu1 %v14417_v56, %s9407_s9 }
 0x442   : > { %v5380_v36 = vpop.permute.xlu2 %5379  ;;  %v8170_v33 = vadd.f32 %v8169_v8, %v7961_v51  ;;  %v8829_v39 = vadd.f32 %v8765_v49, %v8604_v59  ;;  %v8767_v59 = vld [vmem:[%s9547_s20 + $0x88] sm:$0xff] }
 0x443   : > { %2882 = vrot.lane.b32.xlu0 %v14409_v47, %s9406_s23  ;;  %v5378_v14 = vpop.permute.xlu1 %5377  ;;  %v7257_v47 = vsel %vm7006_vm7, %v7250_v55, %v7256_v57 }
 0x444   : > { %v8305_v1 = vmax.f32 %v8170_v33, 0.0  ;;  %v8893_v28 = vmax.f32 %v8829_v39, 0.0 }
 0x445   : > { %v5376_v12 = vpop.permute.xlu0 %5375  ;;  %v6703_v21 = vld [vmem:[#allocation2 + $0x428] sm:$0xff]  ;;  %v7754_v17 = vpop.f32.mrf.mxu1 }
 0x446   : > { %8957 = vst [vmem:[%s12468_s16 + $0x78] sm:$0xff] %v8893_v28  ;;  %9183 = vmatmul.msk.f32.gmra.mxu3 %vm1156_vm0, %v8305_v1  ;;  %v7258_v34 = vrot.slane %v6703_v21, 1  ;;  %4688 = vrot.lane.b32.xlu2 %v14418_v4, %s9405_s22  ;;  %v7755_v29 = vadd.f32 %v12961_v2, %v7754_v17  ;;  %v14422_v1 = vld [vmem:[#allocation63_spill] sm:$0xff] }
 0x447   : > { %5526 = vst.msk [vmem:[#allocation2 + $0x440] sm:$0xff] %vm2974_vm4, %v5376_v12  ;;  %v14423_v12 = vld [vmem:[#allocation44_spill] sm:$0xff] }
 0x448   : > { %6235 = vst.msk [vmem:[#allocation2 + $0x440] sm:$0xff] %vm3683_vm5, %v6085_v58  ;;  %v7259_v0 = vsel %vm7006_vm7, %v7252_v37, %v7258_v34  ;;  %v8172_v37 = vpop.f32.mrf.mxu0 }
 0x449   : > { %7789 = vmatmul.f32.gmra.mxu1 %v7257_v47  ;;  %7998 = vmatmul.f32.gmra.mxu2 %v7259_v0  ;;  %v8606_v3 = vpop.f32.mrf.mxu3 }
 0x44a   : > { %v4675_v19 = vpop.permute.xlu2 %4674  ;;  %4690 = vrot.lane.b32.xlu1 %v14419_v52, %s9405_s22  ;;  %v8607_v35 = vadd.f32 %v12906_v20, %v8606_v3  ;;  %v8768_v3 = vld [vmem:[%s9547_s20 + $0x90] sm:$0xff] }
 0x44b   : > { %4820 = vst.msk [vmem:[#allocation2 + $0x488] sm:$0xff] %vm2396_vm11, %v4675_v19  ;;  %5395 = vrot.lane.b32.xlu0 %v14420_v7, %s9406_s23  ;;  %v4673_v41 = vpop.permute.xlu1 %4672  ;;  %v7963_v26 = vpop.f32.mrf.mxu2 }
 0x44c   : > { %4819 = vst.msk [vmem:[#allocation2 + $0x470] sm:$0xff] %vm2396_vm11, %v4673_v41  ;;  %v7964_v16 = vadd.f32 %v7963_v26, %v7755_v29  ;;  %v8830_v48 = vadd.f32 %v8766_v32, %v8607_v35 }
 0x44d   : > { %5528 = vst.msk [vmem:[#allocation2 + $0x470] sm:$0xff] %vm2974_vm4, %v5380_v36  ;;  %v4671_v6 = vpop.permute.xlu0 %4670  ;;  %v7757_v55 = vpop.f32.mrf.mxu1  ;;  %v14421_v36 = vld [vmem:[#allocation53_spill] sm:$0xff] }
 0x44e   : > { %v8173_v42 = vadd.f32 %v8172_v37, %v7964_v16  ;;  %4818 = vst.msk [vmem:[#allocation2 + $0x458] sm:$0xff] %vm2396_vm11, %v4671_v6  ;;  %v8894_v58 = vmax.f32 %v8830_v48, 0.0  ;;  %2884 = vrot.lane.b32.xlu2 %v14410_v18, %s9406_s23  ;;  %v7758_v54 = vadd.f32 %v12961_v2, %v7757_v55 }
 0x44f   : > { %5527 = vst.msk [vmem:[#allocation2 + $0x458] sm:$0xff] %vm2974_vm4, %v5378_v14  ;;  %v6706_v40 = vld [vmem:[#allocation2 + $0x440] sm:$0xff] }
 0x450   : > { %v8306_v46 = vmax.f32 %v8173_v42, 0.0  ;;  %6236 = vst.msk [vmem:[#allocation2 + $0x458] sm:$0xff] %vm3683_vm5, %v13149_v11  ;;  %v7264_v53 = vrot.slane %v6706_v40, 1  ;;  %v8175_v25 = vpop.f32.mrf.mxu0 }
 0x451   : > { %8958 = vst [vmem:[%s12468_s16 + $0x80] sm:$0xff] %v8894_v58  ;;  %7792 = vmatmul.f32.gmra.mxu1 %v7263_v30 }
 0x452   : > { %v3579_v22 = vpop.permute.xlu2 %3578  ;;  %2886 = vrot.lane.b32.xlu1 %v14415_v61, %s9406_s23  ;;  %v7265_v18 = vsel %vm7006_vm7, %v7258_v34, %v7264_v53  ;;  %9184 = vmatmul.msk.f32.gmra.mxu3 %vm1156_vm0, %v8306_v46 }
 0x453   : > { %3729 = vst.msk [vmem:[#allocation2 + $0x480] sm:$0xff] %vm3683_vm5, %v3579_v22  ;;  %8001 = vmatmul.f32.gmra.mxu2 %v7265_v18  ;;  %3592 = vrot.lane.b32.xlu0 %v14412_v5, %s9407_s9  ;;  %v3577_v11 = vpop.permute.xlu1 %3576 }
 0x454   : > { %3728 = vst.msk [vmem:[#allocation2 + $0x468] sm:$0xff] %vm3683_vm5, %v3577_v11  ;;  %v7966_v43 = vpop.f32.mrf.mxu2  ;;  %v8769_v11 = vld [vmem:[%s9547_s20 + $0x98] sm:$0xff] }
 0x455   : > { %v3575_v49 = vpop.permute.xlu0 %3574  ;;  %v7967_v61 = vadd.f32 %v7966_v43, %v7758_v54  ;;  %v8609_v51 = vpop.f32.mrf.mxu3  ;;  %v14426_v43 = vld [vmem:[#allocation65_spill] sm:$0xff] }
 0x456   : > { %3727 = vst.msk [vmem:[#allocation2 + $0x450] sm:$0xff] %vm3683_vm5, %v3575_v49  ;;  %v8610_v8 = vadd.f32 %v12906_v20, %v8609_v51  ;;  %5397 = vrot.lane.b32.xlu2 %v14421_v36, %s9406_s23 }
 0x457   : > { %v6709_v5 = vld [vmem:[#allocation2 + $0x458] sm:$0xff]  ;;  %v8176_v38 = vadd.f32 %v8175_v25, %v7967_v61  ;;  %v13254_v61 = vld [vmem:[%s13784_s6] ss:$0 sm:$0xff] }
 0x458   : > { %v7270_v33 = vrot.slane %v6709_v5, 1  ;;  %v8831_v39 = vadd.f32 %v8767_v59, %v8610_v8  ;;  %v8178_v48 = vpop.f32.mrf.mxu0 }
 0x459   : > { %v8307_v14 = vmax.f32 %v8176_v38, 0.0 }
 0x45a   : > { %v13216_v56 = vpop.permute.xlu2 %6092  ;;  %5399 = vrot.lane.b32.xlu1 %v14422_v1, %s9406_s23  ;;  %v7271_v28 = vsel %vm7006_vm7, %v7264_v53, %v7270_v33  ;;  %v8895_v57 = vmax.f32 %v8831_v39, 0.0  ;;  %v13247_v49 = vld [vmem:[#allocation2 + $0x480] sm:$0xff] }
 0x45b   : > { %6106 = vrot.lane.b32.xlu0 %v14423_v12, %s9407_s9  ;;  %8004 = vmatmul.f32.gmra.mxu2 %v7271_v28  ;;  %v6091_v21 = vpop.permute.xlu1 %6090  ;;  %v6711_v37 = vld [vmem:[#allocation2 + $0x468] sm:$0xff]  ;;  %v7280_v38 = vrot.slane %v13247_v49, 1  ;;  %v14427_v12 = vld [vmem:[#allocation42_spill] sm:$0xff] }
 0x45c   : > { %9185 = vmatmul.msk.f32.gmra.mxu3 %vm1156_vm0, %v8307_v14  ;;  %8959 = vst [vmem:[%s12468_s16 + $0x88] sm:$0xff] %v8895_v57  ;;  %v7274_v40 = vrot.slane %v6711_v37, 1  ;;  %v8770_v37 = vld [vmem:[%s9547_s20 + $0xa0] sm:$0xff] }
 0x45d   : > { %v6089_v34 = vpop.permute.xlu0 %6088  ;;  %v6708_v17 = vld [vmem:[#allocation2 + $0x450] sm:$0xff]  ;;  %v7760_v47 = vpop.f32.mrf.mxu1 }
 0x45e   : > { %6237 = vst.msk [vmem:[#allocation2 + $0x470] sm:$0xff] %vm3683_vm5, %v6089_v34  ;;  %v7268_v0 = vrot.slane %v6708_v17, 1  ;;  %v7761_v19 = vadd.f32 %v12961_v2, %v7760_v47  ;;  %3594 = vrot.lane.b32.xlu2 %v14413_v9, %s9407_s9  ;;  %v7969_v32 = vpop.f32.mrf.mxu2  ;;  %v14424_v9 = vld [vmem:[#allocation32_spill] sm:$0xff] }
 0x45f   : > { %v8612_v29 = vpop.f32.mrf.mxu3 }
 0x460   : > { %v8613_v35 = vadd.f32 %v12906_v20, %v8612_v29  ;;  %v7269_v41 = vsel %vm7006_vm7, %v7262_v15, %v7268_v0  ;;  %v7970_v26 = vadd.f32 %v7969_v32, %v7761_v19  ;;  %v7275_v55 = vsel %vm7006_vm7, %v7268_v0, %v7274_v40  ;;  %v14428_v19 = vld [vmem:[#allocation48_spill] sm:$0xff] }
 0x461   : > { %7795 = vmatmul.f32.gmra.mxu1 %v7269_v41 }
 0x462   : > { %v5386_v16 = vpop.permute.xlu2 %5385  ;;  %v8832_v6 = vadd.f32 %v8768_v3, %v8613_v35  ;;  %3596 = vrot.lane.b32.xlu1 %v14420_v7, %s9407_s9  ;;  %v8179_v42 = vadd.f32 %v8178_v48, %v7970_v26  ;;  %v14425_v7 = vld [vmem:[#allocation52_spill] sm:$0xff]  ;;  %v14429_v3 = vld [vmem:[#allocation66_spill] sm:$0xff] }
 0x463   : > { %4692 = vrot.lane.b32.xlu0 %v14424_v9, %s9405_s22  ;;  %v5384_v20 = vpop.permute.xlu1 %5383 }
 0x464   : > { %v8896_v58 = vmax.f32 %v8832_v6, 0.0  ;;  %v8308_v24 = vmax.f32 %v8179_v42, 0.0 }
 0x465   : > { %v5382_v15 = vpop.permute.xlu0 %5381  ;;  %v6712_v46 = vld [vmem:[#allocation2 + $0x470] sm:$0xff]  ;;  %v7763_v53 = vpop.f32.mrf.mxu1 }
 0x466   : > { %8960 = vst [vmem:[%s12468_s16 + $0x90] sm:$0xff] %v8896_v58  ;;  %v7276_v30 = vrot.slane %v6712_v46, 1  ;;  %9186 = vmatmul.msk.f32.gmra.mxu3 %vm1156_vm0, %v8308_v24  ;;  %6108 = vrot.lane.b32.xlu2 %v14425_v7, %s9407_s9  ;;  %v7764_v59 = vadd.f32 %v12961_v2, %v7763_v53  ;;  %v13301_v7 = vld [vmem:[%s13782_s4] ss:$0 sm:$0xff] }
 0x467   : > { %5529 = vst.msk [vmem:[#allocation2 + $0x488] sm:$0xff] %vm2974_vm4, %v5382_v15 }
 0x468   : > { %6238 = vst.msk [vmem:[#allocation2 + $0x488] sm:$0xff] %vm3683_vm5, %v6091_v21  ;;  %v7277_v22 = vsel %vm7006_vm7, %v7270_v33, %v7276_v30  ;;  %v8181_v33 = vpop.f32.mrf.mxu0  ;;  %v7281_v21 = vsel %vm7006_vm7, %v7274_v40, %v7280_v38 }
 0x469   : > { %7798 = vmatmul.f32.gmra.mxu1 %v7275_v55  ;;  %8007 = vmatmul.f32.gmra.mxu2 %v7277_v22  ;;  %v8615_v18 = vpop.f32.mrf.mxu3  ;;  %v8771_v22 = vld [vmem:[%s9547_s20 + $0xa8] sm:$0xff] }
 0x46a   : > { %v3583_v54 = vpop.permute.xlu2 %3582  ;;  %6110 = vrot.lane.b32.xlu1 %v14426_v43, %s9407_s9  ;;  %v8616_v51 = vadd.f32 %v13254_v61, %v8615_v18  ;;  %v14430_v18 = vld [vmem:[#allocation87_spill] sm:$0xff] }
 0x46b   : > { %2888 = vrot.lane.b32.xlu0 %v14418_v4, %s9406_s23  ;;  %v4679_v8 = vpop.permute.xlu1 %4678  ;;  %v7972_v5 = vpop.f32.mrf.mxu2 }
 0x46c   : > { %v8833_v25 = vadd.f32 %v8769_v11, %v8616_v51  ;;  %4822 = vst.msk [vmem:[#allocation2 + $0x4b8] sm:$0xff] %vm2396_vm11, %v4679_v8  ;;  %v7973_v39 = vadd.f32 %v7972_v5, %v7764_v59 }
 0x46d   : > { %v4677_v14 = vpop.permute.xlu0 %4676  ;;  %5531 = vst.msk [vmem:[#allocation2 + $0x4b8] sm:$0xff] %vm2974_vm4, %v5386_v16  ;;  %v7766_v47 = vpop.f32.mrf.mxu1 }
 0x46e   : > { %v8897_v28 = vmax.f32 %v8833_v25, 0.0  ;;  %v8182_v57 = vadd.f32 %v8181_v33, %v7973_v39  ;;  %4821 = vst.msk [vmem:[#allocation2 + $0x4a0] sm:$0xff] %vm2396_vm11, %v4677_v14  ;;  %4694 = vrot.lane.b32.xlu2 %v14427_v12, %s9405_s22  ;;  %v7767_v32 = vadd.f32 %v12961_v2, %v7766_v47  ;;  %v14431_v33 = vld [vmem:[#allocation99_spill] sm:$0xff] }
 0x46f   : > { %v6715_v4 = vld [vmem:[#allocation2 + $0x488] sm:$0xff]  ;;  %5530 = vst.msk [vmem:[#allocation2 + $0x4a0] sm:$0xff] %vm2974_vm4, %v5384_v20 }
 0x470   : > { %8961 = vst [vmem:[%s12468_s16 + $0x98] sm:$0xff] %v8897_v28  ;;  %v7282_v34 = vrot.slane %v6715_v4, 1  ;;  %v8309_v17 = vmax.f32 %v8182_v57, 0.0  ;;  %v8184_v48 = vpop.f32.mrf.mxu0  ;;  %v14432_v28 = vld [vmem:[#allocation76_spill] sm:$0xff] }
 0x471   : > { %7801 = vmatmul.f32.gmra.mxu1 %v7281_v21  ;;  %6239 = vst.msk [vmem:[#allocation2 + $0x4a0] sm:$0xff] %vm3683_vm5, %v13216_v56 }
 0x472   : > { %v13271_v0 = vpop.permute.xlu2 %6096  ;;  %4696 = vrot.lane.b32.xlu1 %v14428_v19, %s9405_s22  ;;  %v7283_v29 = vsel %vm7006_vm7, %v7276_v30, %v7282_v34  ;;  %9187 = vmatmul.msk.f32.gmra.mxu3 %vm1156_vm0, %v8309_v17 }
 0x473   : > { %8010 = vmatmul.f32.gmra.mxu2 %v7283_v29  ;;  %5401 = vrot.lane.b32.xlu0 %v14429_v3, %s9406_s23  ;;  %v2875_v35 = vpop.permute.xlu1 %2874 }
 0x474   : > { %3021 = vst.msk [vmem:[#allocation2 + $0x4b0] sm:$0xff] %vm2974_vm4, %v2875_v35  ;;  %v7975_v26 = vpop.f32.mrf.mxu2 }
 0x475   : > { %v3581_v41 = vpop.permute.xlu0 %3580  ;;  %3731 = vst.msk [vmem:[#allocation2 + $0x4b0] sm:$0xff] %vm3683_vm5, %v3583_v54  ;;  %v7976_v56 = vadd.f32 %v7975_v26, %v7767_v32  ;;  %v8618_v16 = vpop.f32.mrf.mxu3 }
 0x476   : > { %3730 = vst.msk [vmem:[#allocation2 + $0x498] sm:$0xff] %vm3683_vm5, %v3581_v41  ;;  %v8619_v6 = vadd.f32 %v13254_v61, %v8618_v16  ;;  %2890 = vrot.lane.b32.xlu2 %v14419_v52, %s9406_s23  ;;  %v8772_v41 = vld [vmem:[%s9547_s20 + $0xb0] sm:$0xff]  ;;  %v14433_v16 = vld [vmem:[#allocation55_spill] sm:$0xff] }
 0x477   : > { %v8185_v2 = vadd.f32 %v8184_v48, %v7976_v56 }
 0x478   : > { %v8834_v42 = vadd.f32 %v8770_v37, %v8619_v6  ;;  %v6718_v58 = vld [vmem:[#allocation2 + $0x4a0] sm:$0xff]  ;;  %v8187_v8 = vpop.f32.mrf.mxu0 }
 0x479   : > { %v8310_v40 = vmax.f32 %v8185_v2, 0.0  ;;  %v7288_v24 = vrot.slane %v6718_v58, 1 }
 0x47a   : > { %v4683_v20 = vpop.permute.xlu2 %4682  ;;  %2892 = vrot.lane.b32.xlu1 %v14424_v9, %s9406_s23  ;;  %v8898_v15 = vmax.f32 %v8834_v42, 0.0 }
 0x47b   : > { %4824 = vst.msk [vmem:[#allocation2 + $0x4e8] sm:$0xff] %vm2396_vm11, %v4683_v20  ;;  %3598 = vrot.lane.b32.xlu0 %v14421_v36, %s9407_s9  ;;  %v7289_v46 = vsel %vm7006_vm7, %v7282_v34, %v7288_v24  ;;  %v5388_v30 = vpop.permute.xlu1 %5387  ;;  %9188 = vmatmul.msk.f32.gmra.mxu3 %vm1156_vm0, %v8310_v40 }
 0x47c   : > { %8962 = vst [vmem:[%s12468_s16 + $0xa0] sm:$0xff] %v8898_v15  ;;  %8013 = vmatmul.f32.gmra.mxu2 %v7289_v46  ;;  %v13314_v39 = vld [vmem:[#allocation2 + $0x4b0] sm:$0xff] }
 0x47d   : > { %v6095_v52 = vpop.permute.xlu0 %6094  ;;  %v7769_v53 = vpop.f32.mrf.mxu1  ;;  %v6717_v9 = vld [vmem:[#allocation2 + $0x498] sm:$0xff]  ;;  %v7292_v21 = vrot.slane %v13314_v39, 1 }
 0x47e   : > { %6240 = vst.msk [vmem:[#allocation2 + $0x4b8] sm:$0xff] %vm3683_vm5, %v6095_v52  ;;  %v7770_v55 = vadd.f32 %v13301_v7, %v7769_v53  ;;  %5403 = vrot.lane.b32.xlu2 %v14430_v18, %s9406_s23  ;;  %v7286_v11 = vrot.slane %v6717_v9, 1  ;;  %v7978_v54 = vpop.f32.mrf.mxu2  ;;  %v14435_v52 = vld [vmem:[#allocation91_spill] sm:$0xff] }
 0x47f   : > { %v8621_v36 = vpop.f32.mrf.mxu3 }
 0x480   : > { %v8622_v43 = vadd.f32 %v13254_v61, %v8621_v36  ;;  %v7979_v51 = vadd.f32 %v7978_v54, %v7770_v55  ;;  %v7287_v59 = vsel %vm7006_vm7, %v7280_v38, %v7286_v11  ;;  %v7293_v32 = vsel %vm7006_vm7, %v7286_v11, %v7292_v21  ;;  %v8190_v6 = vpop.f32.mrf.mxu0 }
 0x481   : > { %7804 = vmatmul.f32.gmra.mxu1 %v7287_v59 }
 0x482   : > { %v2879_v25 = vpop.permute.xlu2 %2878  ;;  %v8835_v5 = vadd.f32 %v8771_v22, %v8622_v43  ;;  %5405 = vrot.lane.b32.xlu1 %v14431_v33, %s9406_s23  ;;  %v8188_v14 = vadd.f32 %v8187_v8, %v7979_v51  ;;  %v8773_v43 = vld [vmem:[%s9547_s20 + $0xb8] sm:$0xff] }
 0x483   : > { %3023 = vst.msk [vmem:[#allocation2 + $0x4e0] sm:$0xff] %vm2974_vm4, %v2879_v25  ;;  %6112 = vrot.lane.b32.xlu0 %v14432_v28, %s9407_s9  ;;  %v3585_v49 = vpop.permute.xlu1 %3584  ;;  %v14436_v25 = vld [vmem:[#allocation73_spill] sm:$0xff] }
 0x484   : > { %v8899_v57 = vmax.f32 %v8835_v5, 0.0  ;;  %v8311_v4 = vmax.f32 %v8188_v14, 0.0  ;;  %v701_v5 = vadd.s32 504, %v9629_v60 }
 0x485   : > { %v4681_v38 = vpop.permute.xlu0 %4680  ;;  %v6721_v34 = vld [vmem:[#allocation2 + $0x4b8] sm:$0xff]  ;;  %v7772_v47 = vpop.f32.mrf.mxu1 }
 0x486   : > { %8963 = vst [vmem:[%s12468_s16 + $0xa8] sm:$0xff] %v8899_v57  ;;  %v7294_v17 = vrot.slane %v6721_v34, 1  ;;  %9189 = vmatmul.msk.f32.gmra.mxu3 %vm1156_vm0, %v8311_v4  ;;  %3600 = vrot.lane.b32.xlu2 %v14422_v1, %s9407_s9  ;;  %v7773_v56 = vadd.f32 %v13301_v7, %v7772_v47  ;;  %v765_v60 = vand.u32 15, %v701_v5 }
 0x487   : > { %4823 = vst.msk [vmem:[#allocation2 + $0x4d0] sm:$0xff] %vm2396_vm11, %v4681_v38  ;;  %v14437_v38 = vld [vmem:[#allocation82_spill] sm:$0xff] }
 0x488   : > { %5532 = vst.msk [vmem:[#allocation2 + $0x4d0] sm:$0xff] %vm2974_vm4, %v5388_v30  ;;  %v7295_v29 = vsel %vm7006_vm7, %v7288_v24, %v7294_v17  ;;  %v8193_v59 = vpop.f32.mrf.mxu0  ;;  %vm13377_vm6 = vcmp.lt.s32.totalorder %v765_v60, 15 }
 0x489   : > { %6241 = vst.msk [vmem:[#allocation2 + $0x4d0] sm:$0xff] %vm3683_vm5, %v13271_v0  ;;  %8016 = vmatmul.f32.gmra.mxu2 %v7295_v29  ;;  %v8624_v35 = vpop.f32.mrf.mxu3  ;;  %7807 = vmatmul.f32.gmra.mxu1 %v7293_v32  ;;  %v8774_v32 = vld [vmem:[%s9547_s20 + $0xc0] sm:$0xff] }
 0x48a   : > { %v5392_v26 = vpop.permute.xlu2 %5391  ;;  %3602 = vrot.lane.b32.xlu1 %v14429_v3, %s9407_s9  ;;  %v8625_v1 = vadd.f32 %v13254_v61, %v8624_v35  ;;  %v14434_v3 = vld [vmem:[#allocation86_spill] sm:$0xff] }
 0x48b   : > { %4698 = vrot.lane.b32.xlu0 %v14433_v16, %s9405_s22  ;;  %v6099_v37 = vpop.permute.xlu1 %6098  ;;  %v7981_v48 = vpop.f32.mrf.mxu2 }
 0x48c   : > { %v8836_v0 = vadd.f32 %v8772_v41, %v8625_v1  ;;  %v7982_v2 = vadd.f32 %v7981_v48, %v7773_v56  ;;  %v8776_v1 = vld [vmem:[%s9547_s20 + $0xd0] sm:$0xff] }
 0x48d   : > { %v2877_v42 = vpop.permute.xlu0 %2876  ;;  %v7775_v15 = vpop.f32.mrf.mxu1 }
 0x48e   : > { %v8900_v58 = vmax.f32 %v8836_v0, 0.0  ;;  %3022 = vst.msk [vmem:[#allocation2 + $0x4c8] sm:$0xff] %vm2974_vm4, %v2877_v42  ;;  %v8191_v20 = vadd.f32 %v8190_v6, %v7982_v2  ;;  %6114 = vrot.lane.b32.xlu2 %v14434_v3, %s9407_s9  ;;  %v7776_v9 = vadd.f32 %v13301_v7, %v7775_v15  ;;  %v14441_v15 = vld [vmem:[#allocation108_spill] sm:$0xff] }
 0x48f   : > { %3732 = vst.msk [vmem:[#allocation2 + $0x4c8] sm:$0xff] %vm3683_vm5, %v3585_v49 }
 0x490   : > { %8964 = vst [vmem:[%s12468_s16 + $0xb0] sm:$0xff] %v8900_v58  ;;  %v6724_v40 = vld [vmem:[#allocation2 + $0x4d0] sm:$0xff]  ;;  %v8312_v24 = vmax.f32 %v8191_v20, 0.0  ;;  %v8196_v2 = vpop.f32.mrf.mxu0 }
 0x491   : > { %v7300_v46 = vrot.slane %v6724_v40, 1 }
 0x492   : > { %v3589_v30 = vpop.permute.xlu2 %3588  ;;  %6116 = vrot.lane.b32.xlu1 %v14435_v52, %s9407_s9  ;;  %9190 = vmatmul.msk.f32.gmra.mxu3 %vm1156_vm0, %v8312_v24 }
 0x493   : > { %2894 = vrot.lane.b32.xlu0 %v14427_v12, %s9406_s23  ;;  %v7301_v53 = vsel %vm7006_vm7, %v7294_v17, %v7300_v46  ;;  %v4685_v55 = vpop.permute.xlu1 %4684  ;;  %v14438_v17 = vld [vmem:[#allocation102_spill] sm:$0xff] }
 0x494   : > { %8019 = vmatmul.f32.gmra.mxu2 %v7301_v53  ;;  %4825 = vst.msk [vmem:[#allocation2 + $0x500] sm:$0xff] %vm2396_vm11, %v4685_v55  ;;  %v7984_v22 = vpop.f32.mrf.mxu2 }
 0x495   : > { %v5390_v36 = vpop.permute.xlu0 %5389  ;;  %5534 = vst.msk [vmem:[#allocation2 + $0x500] sm:$0xff] %vm2974_vm4, %v5392_v26  ;;  %v7985_v11 = vadd.f32 %v7984_v22, %v7776_v9  ;;  %v8627_v54 = vpop.f32.mrf.mxu3  ;;  %v8775_v22 = vld [vmem:[%s9547_s20 + $0xc8] sm:$0xff] }
 0x496   : > { %v6723_v51 = vld [vmem:[#allocation2 + $0x4c8] sm:$0xff]  ;;  %5533 = vst.msk [vmem:[#allocation2 + $0x4e8] sm:$0xff] %vm2974_vm4, %v5390_v36  ;;  %v8628_v12 = vadd.f32 %v13254_v61, %v8627_v54  ;;  %4700 = vrot.lane.b32.xlu2 %v14436_v25, %s9405_s22 }
 0x497   : > { %v7298_v8 = vrot.slane %v6723_v51, 1  ;;  %6242 = vst.msk [vmem:[#allocation2 + $0x4e8] sm:$0xff] %vm3683_vm5, %v6099_v37  ;;  %v8194_v14 = vadd.f32 %v8193_v59, %v7985_v11 }
 0x498   : > { %v8837_v28 = vadd.f32 %v8773_v43, %v8628_v12 }
 0x499   : > { %v7299_v57 = vsel %vm7006_vm7, %v7292_v21, %v7298_v8  ;;  %v8313_v4 = vmax.f32 %v8194_v14, 0.0 }
 0x49a   : > { %v13362_v49 = vpop.permute.xlu2 %6102  ;;  %4702 = vrot.lane.b32.xlu1 %v14437_v38, %s9405_s22  ;;  %7810 = vmatmul.f32.gmra.mxu1 %v7299_v57  ;;  %v8901_v34 = vmax.f32 %v8837_v28, 0.0  ;;  %v8199_v28 = vpop.f32.mrf.mxu0 }
 0x49b   : > { %5407 = vrot.lane.b32.xlu0 %v14438_v17, %s9406_s23  ;;  %v2881_v47 = vpop.permute.xlu1 %2880  ;;  %9191 = vmatmul.msk.f32.gmra.mxu3 %vm1156_vm0, %v8313_v4 }
 0x49c   : > { %8965 = vst [vmem:[%s12468_s16 + $0xb8] sm:$0xff] %v8901_v34 }
 0x49d   : > { %v3587_v39 = vpop.permute.xlu0 %3586  ;;  %3024 = vst.msk [vmem:[#allocation2 + $0x4f8] sm:$0xff] %vm2974_vm4, %v2881_v47  ;;  %v7778_v21 = vpop.f32.mrf.mxu1 }
 0x49e   : > { %v8630_v29 = vpop.f32.mrf.mxu3  ;;  %3734 = vst.msk [vmem:[#allocation2 + $0x4f8] sm:$0xff] %vm3683_vm5, %v3589_v30  ;;  %v7779_v35 = vadd.f32 %v13301_v7, %v7778_v21  ;;  %2896 = vrot.lane.b32.xlu2 %v14428_v19, %s9406_s23  ;;  %v6727_v26 = vld [vmem:[#allocation2 + $0x4e8] sm:$0xff]  ;;  %v3294_v19 = vsel %vm13377_vm6, %v14376_v23, 0.0 }
 0x49f   : > { %v8631_v41 = vadd.f32 %v13254_v61, %v8630_v29  ;;  %3733 = vst.msk [vmem:[#allocation2 + $0x4e0] sm:$0xff] %vm3683_vm5, %v3587_v39  ;;  %v7987_v56 = vpop.f32.mrf.mxu2  ;;  %v7306_v0 = vrot.slane %v6727_v26, 1 }
 0x4a0   : > { %v7988_v37 = vadd.f32 %v7987_v56, %v7779_v35  ;;  %v14444_v35 = vld [vmem:[#allocation85_spill] sm:$0xff] }
 0x4a1   : > { %v8838_v48 = vadd.f32 %v8774_v32, %v8631_v41  ;;  %v7307_v42 = vsel %vm7006_vm7, %v7300_v46, %v7306_v0 }
 0x4a2   : > { %v4689_v6 = vpop.permute.xlu2 %4688  ;;  %2898 = vrot.lane.b32.xlu1 %v14433_v16, %s9406_s23  ;;  %v8197_v58 = vadd.f32 %v8196_v2, %v7988_v37  ;;  %8022 = vmatmul.f32.gmra.mxu2 %v7307_v42  ;;  %v13392_v16 = vrot.slane %v3294_v19, 6 }
 0x4a3   : > { %4827 = vst.msk [vmem:[#allocation2 + $0x530] sm:$0xff] %vm2396_vm11, %v4689_v6  ;;  %v8902_v20 = vmax.f32 %v8838_v48, 0.0  ;;  %3604 = vrot.lane.b32.xlu0 %v14430_v18, %s9407_s9  ;;  %v5394_v3 = vpop.permute.xlu1 %5393  ;;  %v14442_v18 = vrot.slane %v14378_v45, 6  ;;  %v14443_v45 = vld [vmem:[#allocation113_spill] sm:$0xff]  ;;  %v8202_v48 = vpop.f32.mrf.mxu0 }
 0x4a4   : > { %v8314_v40 = vmax.f32 %v8197_v58, 0.0 }
 0x4a5   : > { %8966 = vst [vmem:[%s12468_s16 + $0xc0] sm:$0xff] %v8902_v20  ;;  %v6101_v24 = vpop.permute.xlu0 %6100  ;;  %v7781_v30 = vpop.f32.mrf.mxu1  ;;  %v13402_v53 = vsel %vm1492_vm8, %v14442_v18, %v13392_v16  ;;  %v13413_v43 = vld [vmem:[#allocation2 + $0x4f8] sm:$0xff]  ;;  %vm5545_vm8 = vcmask 779776  }
 0x4a6   : > { %6243 = vst.msk [vmem:[#allocation2 + $0x500] sm:$0xff] %vm3683_vm5, %v6101_v24  ;;  %9192 = vmatmul.msk.f32.gmra.mxu3 %vm1156_vm0, %v8314_v40  ;;  %5409 = vrot.lane.b32.xlu2 %v14441_v15, %s9406_s23  ;;  %v6726_v46 = vld [vmem:[#allocation2 + $0x4e0] sm:$0xff]  ;;  %v7782_v11 = vadd.f32 %v13301_v7, %v7781_v30  ;;  %v7310_v57 = vrot.slane %v13413_v43, 1 }
 0x4a7   : > { %v7304_v52 = vrot.slane %v6726_v46, 1 }
 0x4a9   : > { %v7305_v55 = vsel %vm7006_vm7, %v7298_v8, %v7304_v52  ;;  %v7311_v32 = vsel %vm7006_vm7, %v7304_v52, %v7310_v57  ;;  %v8777_v52 = vld [vmem:[%s9547_s20 + $0xd8] sm:$0xff] }
 0x4aa   : > { %v2885_v9 = vpop.permute.xlu2 %2884  ;;  %5411 = vrot.lane.b32.xlu1 %v13402_v53, %s9406_s23  ;;  %v8633_v36 = vpop.f32.mrf.mxu3  ;;  %7813 = vmatmul.f32.gmra.mxu1 %v7305_v55 }
 0x4ab   : > { %3026 = vst.msk [vmem:[#allocation2 + $0x528] sm:$0xff] %vm2974_vm4, %v2885_v9  ;;  %v8634_v54 = vadd.f32 %v13254_v61, %v8633_v36  ;;  %6118 = vrot.lane.b32.xlu0 %v14443_v45, %s9407_s9  ;;  %v3591_v51 = vpop.permute.xlu1 %3590  ;;  %v7990_v59 = vpop.f32.mrf.mxu2 }
 0x4ac   : > { %v7991_v8 = vadd.f32 %v7990_v59, %v7782_v11 }
 0x4ad   : > { %v8839_v12 = vadd.f32 %v8775_v22, %v8634_v54  ;;  %v4687_v5 = vpop.permute.xlu0 %4686  ;;  %v6730_v14 = vld [vmem:[#allocation2 + $0x500] sm:$0xff]  ;;  %v7784_v29 = vpop.f32.mrf.mxu1 }
 0x4ae   : > { %4826 = vst.msk [vmem:[#allocation2 + $0x518] sm:$0xff] %vm2396_vm11, %v4687_v5  ;;  %v7312_v4 = vrot.slane %v6730_v14, 1  ;;  %v8200_v60 = vadd.f32 %v8199_v28, %v7991_v8  ;;  %3606 = vrot.lane.b32.xlu2 %v14431_v33, %s9407_s9  ;;  %v8205_v54 = vpop.f32.mrf.mxu0 }
 0x4af   : > { %v8903_v34 = vmax.f32 %v8839_v12, 0.0  ;;  %5535 = vst.msk [vmem:[#allocation2 + $0x518] sm:$0xff] %vm2974_vm4, %v5394_v3 }
 0x4b0   : > { %6244 = vst.msk [vmem:[#allocation2 + $0x518] sm:$0xff] %vm3683_vm5, %v13362_v49  ;;  %v7313_v47 = vsel %vm7006_vm7, %v7306_v0, %v7312_v4  ;;  %v8315_v39 = vmax.f32 %v8200_v60, 0.0  ;;  %v7785_v49 = vadd.f32 %v13301_v7, %v7784_v29 }
 0x4b1   : > { %8967 = vst [vmem:[%s12468_s16 + $0xc8] sm:$0xff] %v8903_v34  ;;  %8025 = vmatmul.f32.gmra.mxu2 %v7313_v47  ;;  %v14446_v34 = vld [vmem:[#allocation125_spill] sm:$0xff] }
 0x4b2   : > { %v5398_v21 = vpop.permute.xlu2 %5397  ;;  %3608 = vrot.lane.b32.xlu1 %v14438_v17, %s9407_s9  ;;  %7816 = vmatmul.f32.gmra.mxu1 %v7311_v32 }
 0x4b3   : > { %4704 = vrot.lane.b32.xlu0 %v14444_v35, %s9405_s22  ;;  %9193 = vmatmul.msk.f32.gmra.mxu3 %vm1156_vm0, %v8315_v39  ;;  %v6105_v33 = vpop.permute.xlu1 %6104 }
 0x4b5   : > { %v2883_v41 = vpop.permute.xlu0 %2882  ;;  %v8636_v26 = vpop.f32.mrf.mxu3 }
 0x4b6   : > { %3025 = vst.msk [vmem:[#allocation2 + $0x510] sm:$0xff] %vm2974_vm4, %v2883_v41  ;;  %v7993_v56 = vpop.f32.mrf.mxu2  ;;  %v8637_v0 = vadd.f32 %v13254_v61, %v8636_v26  ;;  %6120 = vrot.lane.b32.xlu2 %v12884_v31, %s9407_s9 }
 0x4b7   : > { %3735 = vst.msk [vmem:[#allocation2 + $0x510] sm:$0xff] %vm3683_vm5, %v3591_v51  ;;  %v7994_v17 = vadd.f32 %v7993_v56, %v7785_v49  ;;  %v6733_v37 = vld [vmem:[#allocation2 + $0x518] sm:$0xff]  ;;  %v8208_v49 = vpop.f32.mrf.mxu0 }
 0x4b8   : > { %v8840_v6 = vadd.f32 %v8776_v1, %v8637_v0  ;;  %v7318_v2 = vrot.slane %v6733_v37, 1 }
 0x4b9   : > { %v8203_v42 = vadd.f32 %v8202_v48, %v7994_v17 }
 0x4ba   : > { %v3595_v19 = vpop.permute.xlu2 %3594  ;;  %v8904_v58 = vmax.f32 %v8840_v6, 0.0  ;;  %6122 = vrot.lane.b32.xlu1 %v12869_v63, %s9407_s9  ;;  %v7319_v20 = vsel %vm7006_vm7, %v7312_v4, %v7318_v2 }
 0x4bb   : > { %v8316_v3 = vmax.f32 %v8203_v42, 0.0  ;;  %2900 = vrot.lane.b32.xlu0 %v14436_v25, %s9406_s23  ;;  %8028 = vmatmul.f32.gmra.mxu2 %v7319_v20  ;;  %v14445_v25 = vld [vmem:[#allocation96_spill] sm:$0xff] }
 0x4bc   : > { %8968 = vst [vmem:[%s12468_s16 + $0xd0] sm:$0xff] %v8904_v58  ;;  %v4691_v31 = vpop.permute.xlu1 %4690 }
 0x4bd   : > { %4828 = vst.msk [vmem:[#allocation2 + $0x548] sm:$0xff] %vm2396_vm11, %v4691_v31  ;;  %9194 = vmatmul.msk.f32.gmra.mxu3 %vm1156_vm0, %v8316_v3  ;;  %v5396_v40 = vpop.permute.xlu0 %5395 }
 0x4be   : > { %5537 = vst.msk [vmem:[#allocation2 + $0x548] sm:$0xff] %vm2974_vm4, %v5398_v21  ;;  %v7787_v24 = vpop.f32.mrf.mxu1  ;;  %v6732_v46 = vld [vmem:[#allocation2 + $0x510] sm:$0xff]  ;;  %4706 = vrot.lane.b32.xlu2 %v14445_v25, %s9405_s22 }
 0x4bf   : > { %5536 = vst.msk [vmem:[#allocation2 + $0x530] sm:$0xff] %vm2974_vm4, %v5396_v40  ;;  %v7788_v63 = vadd.f32 %v13301_v7, %v7787_v24  ;;  %v8639_v30 = vpop.f32.mrf.mxu3  ;;  %v7316_v18 = vrot.slane %v6732_v46, 1  ;;  %v7996_v9 = vpop.f32.mrf.mxu2 }
 0x4c0   : > { %6245 = vst.msk [vmem:[#allocation2 + $0x530] sm:$0xff] %vm3683_vm5, %v6105_v33  ;;  %v8640_v55 = vadd.f32 %v13254_v61, %v8639_v30  ;;  %v8211_v24 = vpop.f32.mrf.mxu0 }
 0x4c1   : > { %v7997_v36 = vadd.f32 %v7996_v9, %v7788_v63  ;;  %v7317_v22 = vsel %vm7006_vm7, %v7310_v57, %v7316_v18  ;;  %v8778_v57 = vld [vmem:[%s9547_s20 + $0xe0] sm:$0xff] }
 0x4c2   : > { %v13454_v11 = vpop.permute.xlu2 %6108  ;;  %v8841_v45 = vadd.f32 %v8777_v52, %v8640_v55  ;;  %4708 = vrot.lane.b32.xlu1 %v14376_v23, %s9405_s22  ;;  %7819 = vmatmul.f32.gmra.mxu1 %v7317_v22 }
 0x4c3   : > { %v8206_v43 = vadd.f32 %v8205_v54, %v7997_v36  ;;  %5413 = vrot.lane.b32.xlu0 %v13392_v16, %s9406_s23  ;;  %v8780_v54 = vld [vmem:[%s9547_s20 + $0xf0] sm:$0xff] }
 0x4c4   : > { %v8905_v51 = vmax.f32 %v8841_v45, 0.0  ;;  %v2887_v59 = vpop.permute.xlu1 %2886 }
 0x4c5   : > { %v8317_v12 = vmax.f32 %v8206_v43, 0.0  ;;  %3027 = vst.msk [vmem:[#allocation2 + $0x540] sm:$0xff] %vm2974_vm4, %v2887_v59  ;;  %v3593_v8 = vpop.permute.xlu0 %3592 }
 0x4c6   : > { %8969 = vst [vmem:[%s12468_s16 + $0xd8] sm:$0xff] %v8905_v51  ;;  %2902 = vrot.lane.b32.xlu2 %v14437_v38, %s9406_s23  ;;  %v7790_v5 = vpop.f32.mrf.mxu1 }
 0x4c7   : > { %3737 = vst.msk [vmem:[#allocation2 + $0x540] sm:$0xff] %vm3683_vm5, %v3595_v19  ;;  %9195 = vmatmul.msk.f32.gmra.mxu3 %vm1156_vm0, %v8317_v12  ;;  %v6736_v23 = vld [vmem:[#allocation2 + $0x530] sm:$0xff]  ;;  %v7791_v38 = vadd.f32 %v13301_v7, %v7790_v5  ;;  %v8779_v19 = vld [vmem:[%s9547_s20 + $0xe8] sm:$0xff] }
 0x4c8   : > { %3736 = vst.msk [vmem:[#allocation2 + $0x528] sm:$0xff] %vm3683_vm5, %v3593_v8  ;;  %v7324_v14 = vrot.slane %v6736_v23, 1  ;;  %v8214_v23 = vpop.f32.mrf.mxu0 }
 0x4c9   : > { %v8642_v28 = vpop.f32.mrf.mxu3 }
 0x4ca   : > { %v4695_v4 = vpop.permute.xlu2 %4694  ;;  %2906 = vrot.lane.b32.xlu1 %v14446_v34, %s9406_s23  ;;  %v7325_v60 = vsel %vm7006_vm7, %v7318_v2, %v7324_v14  ;;  %v8643_v47 = vadd.f32 %v13254_v61, %v8642_v28 }
 0x4cb   : > { %4830 = vst.msk [vmem:[#allocation2 + $0x578] sm:$0xff] %vm2396_vm11, %v4695_v4  ;;  %8031 = vmatmul.f32.gmra.mxu2 %v7325_v60  ;;  %3610 = vrot.lane.b32.xlu0 %v14441_v15, %s9407_s9 }
 0x4cc   : > { %v8842_v39 = vadd.f32 %v8778_v57, %v8643_v47  ;;  %v5400_v21 = vpop.permute.xlu1 %5399  ;;  %v7999_v29 = vpop.f32.mrf.mxu2 }
 0x4cd   : > { %v8000_v32 = vadd.f32 %v7999_v29, %v7791_v38  ;;  %v6107_v33 = vpop.permute.xlu0 %6106 }
 0x4ce   : > { %v8906_v41 = vmax.f32 %v8842_v39, 0.0  ;;  %6246 = vst.msk [vmem:[#allocation2 + $0x548] sm:$0xff] %vm3683_vm5, %v6107_v33  ;;  %2904 = vrot.lane.b32.xlu2 %v14444_v35, %s9406_s23  ;;  %v7793_v15 = vpop.f32.mrf.mxu1  ;;  %v13486_v48 = vld [vmem:[#allocation2 + $0x540] sm:$0xff]  ;;  %v8781_v33 = vld [vmem:[%s9547_s20 + $0xf8] sm:$0xff] }
 0x4cf   : > { %v8209_v26 = vadd.f32 %v8208_v49, %v8000_v32  ;;  %v6735_v1 = vld [vmem:[#allocation2 + $0x528] sm:$0xff]  ;;  %v7794_v6 = vadd.f32 %v13301_v7, %v7793_v15  ;;  %v7328_v31 = vrot.slane %v13486_v48, 1 }
 0x4d0   : > { %8970 = vst [vmem:[%s12468_s16 + $0xe0] sm:$0xff] %v8906_v41  ;;  %v7322_v56 = vrot.slane %v6735_v1, 1  ;;  %v8217_v15 = vpop.f32.mrf.mxu0 }
 0x4d1   : > { %v8318_v0 = vmax.f32 %v8209_v26, 0.0 }
 0x4d2   : > { %v2891_v17 = vpop.permute.xlu2 %2890  ;;  %v7323_v37 = vsel %vm7006_vm7, %v7316_v18, %v7322_v56  ;;  %2908 = vrot.lane.b32.xlu1 %v14446_v34, %s9406_s23  ;;  %v7329_v18 = vsel %vm7006_vm7, %v7322_v56, %v7328_v31 }
 0x4d3   : > { %3029 = vst.msk [vmem:[#allocation2 + $0x570] sm:$0xff] %vm2974_vm4, %v2891_v17  ;;  %7822 = vmatmul.f32.gmra.mxu1 %v7323_v37  ;;  %3612 = vrot.lane.b32.xlu0 %v13402_v53, %s9407_s9 }
 0x4d4   : > { %9196 = vmatmul.msk.f32.gmra.mxu3 %vm1156_vm0, %v8318_v0  ;;  %v3597_v35 = vpop.permute.xlu1 %3596 }
 0x4d5   : > { %v4693_v2 = vpop.permute.xlu0 %4692  ;;  %v8645_v42 = vpop.f32.mrf.mxu3  ;;  %v6739_v58 = vld [vmem:[#allocation2 + $0x548] sm:$0xff] }
 0x4d6   : > { %4829 = vst.msk [vmem:[#allocation2 + $0x560] sm:$0xff] %vm2396_vm11, %v4693_v2  ;;  %v8002_v20 = vpop.f32.mrf.mxu2  ;;  %v8646_v3 = vadd.f32 %v13254_v61, %v8645_v42  ;;  %v7330_v53 = vrot.slane %v6739_v58, 1  ;;  %3614 = vrot.lane.b32.xlu2 %v13392_v16, %s9407_s9 }
 0x4d7   : > { %5538 = vst.msk [vmem:[#allocation2 + $0x560] sm:$0xff] %vm2974_vm4, %v5400_v21  ;;  %v8003_v40 = vadd.f32 %v8002_v20, %v7794_v6 }
 0x4d8   : > { %6247 = vst.msk [vmem:[#allocation2 + $0x560] sm:$0xff] %vm3683_vm5, %v13454_v11  ;;  %v8843_v46 = vadd.f32 %v8779_v19, %v8646_v3  ;;  %v7331_v63 = vsel %vm7006_vm7, %v7324_v14, %v7330_v53 }
 0x4d9   : > { %v8212_v30 = vadd.f32 %v8211_v24, %v8003_v40  ;;  %8034 = vmatmul.f32.gmra.mxu2 %v7331_v63  ;;  %v8782_v63 = vld [vmem:[%s9547_s20 + $0x100] sm:$0xff] }
 0x4da   : > { %v5404_v52 = vpop.permute.xlu2 %5403  ;;  %v8907_v25 = vmax.f32 %v8843_v46, 0.0 }
 0x4db   : > { %v8319_v9 = vmax.f32 %v8212_v30, 0.0  ;;  %7825 = vmatmul.f32.gmra.mxu1 %v7329_v18 }
 0x4dc   : > { %8971 = vst [vmem:[%s12468_s16 + $0xe8] sm:$0xff] %v8907_v25  ;;  %v6111_v55 = vpop.permute.xlu1 %6110  ;;  %v14447_v25 = vld [vmem:[#allocation120_spill] sm:$0xff] }
 0x4dd   : > { %9197 = vmatmul.msk.f32.gmra.mxu3 %vm1156_vm0, %v8319_v9  ;;  %v2889_v16 = vpop.permute.xlu0 %2888 }
 0x4de   : > { %3028 = vst.msk [vmem:[#allocation2 + $0x558] sm:$0xff] %vm2974_vm4, %v2889_v16  ;;  %v7796_v36 = vpop.f32.mrf.mxu1  ;;  %v8005_v43 = vpop.f32.mrf.mxu2 }
 0x4df   : > { %3738 = vst.msk [vmem:[#allocation2 + $0x558] sm:$0xff] %vm3683_vm5, %v3597_v35  ;;  %v7797_v22 = vadd.f32 %v13301_v7, %v7796_v36  ;;  %v8648_v11 = vpop.f32.mrf.mxu3  ;;  %v6742_v45 = vld [vmem:[#allocation2 + $0x560] sm:$0xff] }
 0x4e0   : > { %v8649_v51 = vadd.f32 %v13254_v61, %v8648_v11  ;;  %v7336_v59 = vrot.slane %v6742_v45, 1 }
 0x4e1   : > { %v8006_v12 = vadd.f32 %v8005_v43, %v7797_v22 }
 0x4e2   : > { %v3601_v8 = vpop.permute.xlu2 %3600  ;;  %v8844_v5 = vadd.f32 %v8780_v54, %v8649_v51  ;;  %v7337_v14 = vsel %vm7006_vm7, %v7330_v53, %v7336_v59 }
 0x4e3   : > { %v8215_v28 = vadd.f32 %v8214_v23, %v8006_v12  ;;  %8037 = vmatmul.f32.gmra.mxu2 %v7337_v14  ;;  %v8783_v23 = vld [vmem:[%s9547_s20 + $0x108] sm:$0xff] }
 0x4e4   : > { %v8908_v57 = vmax.f32 %v8844_v5, 0.0  ;;  %v4697_v4 = vpop.permute.xlu1 %4696 }
 0x4e5   : > { %v8320_v34 = vmax.f32 %v8215_v28, 0.0  ;;  %4831 = vst.msk [vmem:[#allocation2 + $0x590] sm:$0xff] %vm2396_vm11, %v4697_v4  ;;  %v5402_v60 = vpop.permute.xlu0 %5401 }
 0x4e6   : > { %8972 = vst [vmem:[%s12468_s16 + $0xf0] sm:$0xff] %v8908_v57  ;;  %v6741_v47 = vld [vmem:[#allocation2 + $0x558] sm:$0xff]  ;;  %v7799_v39 = vpop.f32.mrf.mxu1 }
 0x4e7   : > { %5540 = vst.msk [vmem:[#allocation2 + $0x590] sm:$0xff] %vm2974_vm4, %v5404_v52  ;;  %9198 = vmatmul.msk.f32.gmra.mxu3 %vm1156_vm0, %v8320_v34  ;;  %v7334_v38 = vrot.slane %v6741_v47, 1  ;;  %v7800_v49 = vadd.f32 %v13301_v7, %v7799_v39 }
 0x4e8   : > { %5539 = vst.msk [vmem:[#allocation2 + $0x578] sm:$0xff] %vm2974_vm4, %v5402_v60 }
 0x4e9   : > { %6248 = vst.msk [vmem:[#allocation2 + $0x578] sm:$0xff] %vm3683_vm5, %v6111_v55  ;;  %v7335_v21 = vsel %vm7006_vm7, %v7328_v31, %v7334_v38  ;;  %v8651_v32 = vpop.f32.mrf.mxu3 }
 0x4ea   : > { %v13516_v29 = vpop.permute.xlu2 %6114  ;;  %7828 = vmatmul.f32.gmra.mxu1 %v7335_v21  ;;  %v8652_v41 = vadd.f32 %v13254_v61, %v8651_v32 }
 0x4ec   : > { %v2893_v26 = vpop.permute.xlu1 %2892  ;;  %v8008_v1 = vpop.f32.mrf.mxu2  ;;  %v8845_v56 = vadd.f32 %v8781_v33, %v8652_v41 }
 0x4ed   : > { %3030 = vst.msk [vmem:[#allocation2 + $0x588] sm:$0xff] %vm2974_vm4, %v2893_v26  ;;  %v8009_v0 = vadd.f32 %v8008_v1, %v7800_v49  ;;  %v3599_v17 = vpop.permute.xlu0 %3598 }
 0x4ee   : > { %3740 = vst.msk [vmem:[#allocation2 + $0x588] sm:$0xff] %vm3683_vm5, %v3601_v8  ;;  %v8909_v37 = vmax.f32 %v8845_v56, 0.0  ;;  %v7802_v19 = vpop.f32.mrf.mxu1 }
 0x4ef   : > { %v8218_v48 = vadd.f32 %v8217_v15, %v8009_v0  ;;  %3739 = vst.msk [vmem:[#allocation2 + $0x570] sm:$0xff] %vm3683_vm5, %v3599_v17  ;;  %v7803_v3 = vadd.f32 %v13301_v7, %v7802_v19  ;;  %v8784_v0 = vld [vmem:[%s9547_s20 + $0x110] sm:$0xff] }
 0x4f0   : > { %v6745_v35 = vld [vmem:[#allocation2 + $0x578] sm:$0xff]  ;;  %8973 = vst [vmem:[%s12468_s16 + $0xf8] sm:$0xff] %v8909_v37 }
 0x4f1   : > { %v8321_v6 = vmax.f32 %v8218_v48, 0.0  ;;  %v7342_v2 = vrot.slane %v6745_v35, 1 }
 0x4f2   : > { %v4701_v42 = vpop.permute.xlu2 %4700 }
 0x4f3   : > { %4833 = vst.msk [vmem:[#allocation2 + $0x5c0] sm:$0xff] %vm2396_vm11, %v4701_v42  ;;  %v7343_v58 = vsel %vm7006_vm7, %v7336_v59, %v7342_v2  ;;  %9199 = vmatmul.msk.f32.gmra.mxu3 %vm1156_vm0, %v8321_v6 }
 0x4f4   : > { %8040 = vmatmul.f32.gmra.mxu2 %v7343_v58  ;;  %v5406_v20 = vpop.permute.xlu1 %5405  ;;  %v14449_v58 = vld [vmem:[#allocation88_spill] sm:$0xff] }
 0x4f5   : > { %v6113_v31 = vpop.permute.xlu0 %6112  ;;  %v8654_v46 = vpop.f32.mrf.mxu3  ;;  %v13535_v36 = vld [vmem:[#allocation2 + $0x588] sm:$0xff] }
 0x4f6   : > { %6249 = vst.msk [vmem:[#allocation2 + $0x590] sm:$0xff] %vm3683_vm5, %v6113_v31  ;;  %v8011_v53 = vpop.f32.mrf.mxu2  ;;  %v6744_v40 = vld [vmem:[#allocation2 + $0x570] sm:$0xff]  ;;  %v8655_v52 = vadd.f32 %v13254_v61, %v8654_v46  ;;  %v7346_v43 = vrot.slane %v13535_v36, 1 }
 0x4f7   : > { %v8012_v24 = vadd.f32 %v8011_v53, %v7803_v3  ;;  %v7340_v30 = vrot.slane %v6744_v40, 1 }
 0x4f8   : > { %v8846_v16 = vadd.f32 %v8782_v63, %v8655_v52  ;;  %v8785_v52 = vld [vmem:[%s9547_s20 + $0x118] sm:$0xff] }
 0x4f9   : > { %v8221_v18 = vadd.f32 %v14447_v25, %v8012_v24  ;;  %v7341_v9 = vsel %vm7006_vm7, %v7334_v38, %v7340_v30  ;;  %v7347_v4 = vsel %vm7006_vm7, %v7340_v30, %v7346_v43  ;;  %v14448_v38 = vld [vmem:[#allocation123_spill] sm:$0xff] }
 0x4fa   : > { %v2897_v55 = vpop.permute.xlu2 %2896  ;;  %7831 = vmatmul.f32.gmra.mxu1 %v7341_v9  ;;  %v8910_v11 = vmax.f32 %v8846_v16, 0.0 }
 0x4fb   : > { %3032 = vst.msk [vmem:[#allocation2 + $0x5b8] sm:$0xff] %vm2974_vm4, %v2897_v55  ;;  %v8322_v22 = vmax.f32 %v8221_v18, 0.0 }
 0x4fc   : > { %v3603_v54 = vpop.permute.xlu1 %3602  ;;  %8974 = vst [vmem:[%s12468_s16 + $0x100] sm:$0xff] %v8910_v11 }
 0x4fd   : > { %9200 = vmatmul.msk.f32.gmra.mxu3 %vm1156_vm0, %v8322_v22  ;;  %v4699_v45 = vpop.permute.xlu0 %4698  ;;  %v6748_v51 = vld [vmem:[#allocation2 + $0x590] sm:$0xff] }
 0x4fe   : > { %v7348_v59 = vrot.slane %v6748_v51, 1  ;;  %4832 = vst.msk [vmem:[#allocation2 + $0x5a8] sm:$0xff] %vm2396_vm11, %v4699_v45  ;;  %v7805_v12 = vpop.f32.mrf.mxu1  ;;  %v8657_v8 = vpop.f32.mrf.mxu3  ;;  %v14450_v51 = vld [vmem:[#allocation127_spill] sm:$0xff] }
 0x4ff   : > { %5541 = vst.msk [vmem:[#allocation2 + $0x5a8] sm:$0xff] %vm2974_vm4, %v5406_v20  ;;  %v7806_v5 = vadd.f32 %v13301_v7, %v7805_v12  ;;  %v8658_v14 = vadd.f32 %v13254_v61, %v8657_v8  ;;  %v8014_v57 = vpop.f32.mrf.mxu2 }
 0x500   : > { %v7349_v28 = vsel %vm7006_vm7, %v7342_v2, %v7348_v59  ;;  %6250 = vst.msk [vmem:[#allocation2 + $0x5a8] sm:$0xff] %vm3683_vm5, %v13516_v29 }
 0x501   : > { %8043 = vmatmul.f32.gmra.mxu2 %v7349_v28  ;;  %v8015_v60 = vadd.f32 %v8014_v57, %v7806_v5  ;;  %v8847_v47 = vadd.f32 %v8783_v23, %v8658_v14  ;;  %v8786_v14 = vld [vmem:[%s9547_s20 + $0x120] sm:$0xff] }
 0x502   : > { %v5410_v34 = vpop.permute.xlu2 %5409  ;;  %7834 = vmatmul.f32.gmra.mxu1 %v7347_v4  ;;  %v13581_v57 = vld [vmem:[%s13784_s6] ss:$0 sm:$0xff] }
 0x503   : > { %v8224_v39 = vadd.f32 %v14448_v38, %v8015_v60  ;;  %v8911_v21 = vmax.f32 %v8847_v47, 0.0 }
 0x504   : > { %v6117_v32 = vpop.permute.xlu1 %6116 }
 0x505   : > { %v2895_v33 = vpop.permute.xlu0 %2894  ;;  %v8323_v49 = vmax.f32 %v8224_v39, 0.0  ;;  %8975 = vst [vmem:[%s12468_s16 + $0x108] sm:$0xff] %v8911_v21 }
 0x506   : > { %3031 = vst.msk [vmem:[#allocation2 + $0x5a0] sm:$0xff] %vm2974_vm4, %v2895_v33  ;;  %v7808_v29 = vpop.f32.mrf.mxu1 }
 0x507   : > { %3741 = vst.msk [vmem:[#allocation2 + $0x5a0] sm:$0xff] %vm3683_vm5, %v3603_v54  ;;  %9201 = vmatmul.msk.f32.gmra.mxu3 %vm1156_vm0, %v8323_v49  ;;  %v6751_v41 = vld [vmem:[#allocation2 + $0x5a8] sm:$0xff]  ;;  %v7809_v17 = vadd.f32 %v13301_v7, %v7808_v29 }
 0x508   : > { %v7354_v26 = vrot.slane %v6751_v41, 1 }
 0x509   : > { %v8660_v56 = vpop.f32.mrf.mxu3 }
 0x50a   : > { %v3607_v1 = vpop.permute.xlu2 %3606  ;;  %v8661_v15 = vadd.f32 %v13254_v61, %v8660_v56  ;;  %v7355_v37 = vsel %vm7006_vm7, %v7348_v59, %v7354_v26 }
 0x50b   : > { %8046 = vmatmul.f32.gmra.mxu2 %v7355_v37  ;;  %v8787_v37 = vld [vmem:[%s9547_s20 + $0x128] sm:$0xff] }
 0x50c   : > { %v4703_v48 = vpop.permute.xlu1 %4702  ;;  %v8017_v35 = vpop.f32.mrf.mxu2  ;;  %v8848_v6 = vadd.f32 %v8784_v0, %v8661_v15 }
 0x50d   : > { %4834 = vst.msk [vmem:[#allocation2 + $0x5d8] sm:$0xff] %vm2396_vm11, %v4703_v48  ;;  %v8018_v2 = vadd.f32 %v8017_v35, %v7809_v17  ;;  %v5408_v42 = vpop.permute.xlu0 %5407 }
 0x50e   : > { %5543 = vst.msk [vmem:[#allocation2 + $0x5d8] sm:$0xff] %vm2974_vm4, %v5410_v34  ;;  %v8912_v19 = vmax.f32 %v8848_v6, 0.0  ;;  %v6750_v3 = vld [vmem:[#allocation2 + $0x5a0] sm:$0xff] }
 0x50f   : > { %v8227_v20 = vadd.f32 %v14449_v58, %v8018_v2  ;;  %5542 = vst.msk [vmem:[#allocation2 + $0x5c0] sm:$0xff] %vm2974_vm4, %v5408_v42  ;;  %v7352_v31 = vrot.slane %v6750_v3, 1  ;;  %v14451_v2 = vld [vmem:[#allocation129_spill] sm:$0xff] }
 0x510   : > { %6251 = vst.msk [vmem:[#allocation2 + $0x5c0] sm:$0xff] %vm3683_vm5, %v6117_v32 }
 0x511   : > { %8976 = vst [vmem:[%s12468_s16 + $0x110] sm:$0xff] %v8912_v19  ;;  %v8324_v53 = vmax.f32 %v8227_v20, 0.0  ;;  %v7353_v24 = vsel %vm7006_vm7, %v7346_v43, %v7352_v31 }
 0x512   : > { %v6121_v40 = vpop.permute.xlu2 %6120  ;;  %7837 = vmatmul.f32.gmra.mxu1 %v7353_v24 }
 0x513   : > { %9202 = vmatmul.msk.f32.gmra.mxu3 %vm1156_vm0, %v8324_v53 }
 0x514   : > { %v2899_v46 = vpop.permute.xlu1 %2898 }
 0x515   : > { %3033 = vst.msk [vmem:[#allocation2 + $0x5d0] sm:$0xff] %vm2974_vm4, %v2899_v46  ;;  %v3605_v63 = vpop.permute.xlu0 %3604  ;;  %v8663_v30 = vpop.f32.mrf.mxu3 }
 0x516   : > { %3743 = vst.msk [vmem:[#allocation2 + $0x5d0] sm:$0xff] %vm3683_vm5, %v3607_v1  ;;  %v8664_v25 = vadd.f32 %v13254_v61, %v8663_v30 }
 0x517   : > { %3742 = vst.msk [vmem:[#allocation2 + $0x5b8] sm:$0xff] %vm3683_vm5, %v3605_v63  ;;  %v7811_v18 = vpop.f32.mrf.mxu1  ;;  %v6754_v9 = vld [vmem:[#allocation2 + $0x5c0] sm:$0xff]  ;;  %v8020_v36 = vpop.f32.mrf.mxu2 }
 0x518   : > { %v7812_v55 = vadd.f32 %v13301_v7, %v7811_v18  ;;  %v7360_v16 = vrot.slane %v6754_v9, 1  ;;  %v8849_v22 = vadd.f32 %v8785_v52, %v8664_v25  ;;  %v14452_v9 = vld [vmem:[#allocation130_spill] sm:$0xff] }
 0x51a   : > { %v4707_v11 = vpop.permute.xlu2 %4706  ;;  %v8021_v54 = vadd.f32 %v8020_v36, %v7812_v55  ;;  %v7361_v45 = vsel %vm7006_vm7, %v7354_v26, %v7360_v16  ;;  %v8913_v43 = vmax.f32 %v8849_v22, 0.0  ;;  %v8788_v36 = vld [vmem:[%s9547_s20 + $0x130] sm:$0xff] }
 0x51b   : > { %4836 = vst.msk [vmem:[#allocation2 + $0x608] sm:$0xff] %vm2396_vm11, %v4707_v11  ;;  %8049 = vmatmul.f32.gmra.mxu2 %v7361_v45 }
 0x51c   : > { %v8230_v59 = vadd.f32 %v14450_v51, %v8021_v54  ;;  %v5412_v12 = vpop.permute.xlu1 %5411  ;;  %8977 = vst [vmem:[%s12468_s16 + $0x118] sm:$0xff] %v8913_v43 }
 0x51d   : > { %v6119_v61 = vpop.permute.xlu0 %6118  ;;  %v6756_v38 = vld [vmem:[#allocation2 + $0x5d0] sm:$0xff] }
 0x51e   : > { %v8325_v8 = vmax.f32 %v8230_v59, 0.0  ;;  %6252 = vst.msk [vmem:[#allocation2 + $0x5d8] sm:$0xff] %vm3683_vm5, %v6119_v61  ;;  %v6753_v23 = vld [vmem:[#allocation2 + $0x5b8] sm:$0xff]  ;;  %v8666_v5 = vpop.f32.mrf.mxu3  ;;  %v7364_v33 = vrot.slane %v6756_v38, 1 }
 0x51f   : > { %v7358_v28 = vrot.slane %v6753_v23, 1  ;;  %v8667_v4 = vadd.f32 %v13581_v57, %v8666_v5  ;;  %v13616_v5 = vld [vmem:[%s13782_s4] ss:$0 sm:$0xff] }
 0x520   : > { %9203 = vmatmul.msk.f32.gmra.mxu3 %vm1156_vm0, %v8325_v8 }
 0x521   : > { %v7359_v34 = vsel %vm7006_vm7, %v7352_v31, %v7358_v28  ;;  %v8850_v47 = vadd.f32 %v8786_v14, %v8667_v4  ;;  %v7365_v56 = vsel %vm7006_vm7, %v7358_v28, %v7364_v33  ;;  %v8789_v4 = vld [vmem:[%s9547_s20 + $0x138] sm:$0xff] }
 0x522   : > { %v2903_v60 = vpop.permute.xlu2 %2902  ;;  %7840 = vmatmul.f32.gmra.mxu1 %v7359_v34 }
 0x523   : > { %3035 = vst.msk [vmem:[#allocation2 + $0x600] sm:$0xff] %vm2974_vm4, %v2903_v60  ;;  %v8914_v39 = vmax.f32 %v8850_v47, 0.0 }
 0x524   : > { %v3609_v21 = vpop.permute.xlu1 %3608 }
 0x525   : > { %v4705_v32 = vpop.permute.xlu0 %4704  ;;  %v6757_v49 = vld [vmem:[#allocation2 + $0x5d8] sm:$0xff]  ;;  %8978 = vst [vmem:[%s12468_s16 + $0x120] sm:$0xff] %v8914_v39  ;;  %v8023_v17 = vpop.f32.mrf.mxu2 }
 0x526   : > { %v7366_v29 = vrot.slane %v6757_v49, 1  ;;  %4835 = vst.msk [vmem:[#allocation2 + $0x5f0] sm:$0xff] %vm2396_vm11, %v4705_v32 }
 0x527   : > { %5544 = vst.msk [vmem:[#allocation2 + $0x5f0] sm:$0xff] %vm2974_vm4, %v5412_v12  ;;  %v7814_v41 = vpop.f32.mrf.mxu1 }
 0x528   : > { %v7367_v26 = vsel %vm7006_vm7, %v7360_v16, %v7366_v29  ;;  %6253 = vst.msk [vmem:[#allocation2 + $0x5f0] sm:$0xff] %vm3683_vm5, %v6121_v40  ;;  %v7815_v1 = vadd.f32 %v13301_v7, %v7814_v41 }
 0x529   : > { %8052 = vmatmul.f32.gmra.mxu2 %v7367_v26  ;;  %v8669_v15 = vpop.f32.mrf.mxu3 }
 0x52a   : > { %v2905_v0 = vpop.permute.xlu2 %2904  ;;  %7843 = vmatmul.f32.gmra.mxu1 %v7365_v56  ;;  %v8024_v48 = vadd.f32 %v8023_v17, %v7815_v1  ;;  %v8670_v35 = vadd.f32 %v13581_v57, %v8669_v15 }
 0x52b   : > { %3036 = vst.msk [vmem:[#allocation2 + $0x618] sm:$0xff] %vm2974_vm4, %v2905_v0 }
 0x52c   : > { %v6123_v6 = vpop.permute.xlu1 %6122  ;;  %v8233_v42 = vadd.f32 %v14451_v2, %v8024_v48  ;;  %v8851_v19 = vadd.f32 %v8787_v37, %v8670_v35  ;;  %v8790_v37 = vld [vmem:[%s9547_s20 + $0x140] sm:$0xff]  ;;  %v6769_v35 = vld [vmem:[#allocation2 + $0x638] sm:$0x1] }
 0x52d   : > { %v2901_v58 = vpop.permute.xlu0 %2900 }
 0x52e   : > { %3034 = vst.msk [vmem:[#allocation2 + $0x5e8] sm:$0xff] %vm2974_vm4, %v2901_v58  ;;  %v8326_v20 = vmax.f32 %v8233_v42, 0.0  ;;  %v8915_v3 = vmax.f32 %v8851_v19, 0.0  ;;  %v7390_v58 = vrot.slane %v6769_v35, 1  ;;  %v14457_v35 = vld [vmem:[#allocation137_spill] sm:$0xff] }
 0x52f   : > { %3744 = vst.msk [vmem:[#allocation2 + $0x5e8] sm:$0xff] %vm3683_vm5, %v3609_v21  ;;  %v7817_v31 = vpop.f32.mrf.mxu1  ;;  %v6760_v53 = vld [vmem:[#allocation2 + $0x5f0] sm:$0xff]  ;;  %v14453_v21 = vld [vmem:[#allocation131_spill] sm:$0xff] }
 0x530   : > { %8979 = vst [vmem:[%s12468_s16 + $0x128] sm:$0xff] %v8915_v3  ;;  %9204 = vmatmul.msk.f32.gmra.mxu3 %vm1156_vm0, %v8326_v20  ;;  %v7372_v40 = vrot.slane %v6760_v53, 1  ;;  %v7818_v24 = vadd.f32 %v13301_v7, %v7817_v31 }
 0x532   : > { %v7373_v46 = vsel %vm7006_vm7, %v7366_v29, %v7372_v40  ;;  %v3615_v12 = vpop.permute.xlu2 %3614 }
 0x533   : > { %8055 = vmatmul.f32.gmra.mxu2 %v7373_v46  ;;  %v14454_v46 = vld [vmem:[#allocation132_spill] sm:$0xff] }
 0x534   : > { %v4709_v63 = vpop.permute.xlu1 %4708  ;;  %v8026_v30 = vpop.f32.mrf.mxu2 }
 0x535   : > { %4837 = vst.msk [vmem:[#allocation2 + $0x620] sm:$0xff] %vm2396_vm11, %v4709_v63  ;;  %v8027_v52 = vadd.f32 %v8026_v30, %v7818_v24  ;;  %v5414_v25 = vpop.permute.xlu0 %5413  ;;  %vm3747_vm11 = vcmask 1042176  }
 0x536   : > { %5546 = vst.msk [vmem:[#allocation2 + $0x608] sm:$0x3] %vm5545_vm8, %v5414_v25  ;;  %v6759_v18 = vld [vmem:[#allocation2 + $0x5e8] sm:$0xff]  ;;  %v8672_v16 = vpop.f32.mrf.mxu3 }
 0x537   : > { %v8236_v55 = vadd.f32 %v14452_v9, %v8027_v52  ;;  %6255 = vst.msk [vmem:[#allocation2 + $0x608] sm:$0x1] %vm6254_vm15, %v6123_v6  ;;  %v7370_v7 = vrot.slane %v6759_v18, 1  ;;  %v8673_v22 = vadd.f32 %v13581_v57, %v8672_v16  ;;  %v8791_v18 = vld [vmem:[%s9547_s20 + $0x148] sm:$0xff] }
 0x539   : > { %v8327_v11 = vmax.f32 %v8236_v55, 0.0  ;;  %v7371_v54 = vsel %vm7006_vm7, %v7364_v33, %v7370_v7  ;;  %v8852_v45 = vadd.f32 %v8788_v36, %v8673_v22 }
 0x53a   : > { %7846 = vmatmul.f32.gmra.mxu1 %v7371_v54 }
 0x53b   : > { %9205 = vmatmul.msk.f32.gmra.mxu3 %vm1156_vm0, %v8327_v11  ;;  %v8916_v43 = vmax.f32 %v8852_v45, 0.0 }
 0x53c   : > { %v2907_v51 = vpop.permute.xlu1 %2906  ;;  %v6766_v33 = vld [vmem:[#allocation2 + $0x620] sm:$0xff] }
 0x53d   : > { %3037 = vst.msk [vmem:[#allocation2 + $0x630] sm:$0xff] %vm2974_vm4, %v2907_v51  ;;  %v3611_v59 = vpop.permute.xlu0 %3610  ;;  %v7384_v1 = vrot.slane %v6766_v33, 1 }
 0x53e   : > { %8980 = vst [vmem:[%s12468_s16 + $0x130] sm:$0xff] %v8916_v43  ;;  %v6763_v61 = vld [vmem:[#allocation2 + $0x608] sm:$0xff]  ;;  %v8029_v34 = vpop.f32.mrf.mxu2  ;;  %v14455_v43 = vld [vmem:[#allocation134_spill] sm:$0xff] }
 0x53f   : > { %3748 = vst.msk [vmem:[#allocation2 + $0x630] sm:$0x3] %vm3747_vm11, %v3615_v12  ;;  %v7820_v8 = vpop.f32.mrf.mxu1  ;;  %v7378_v23 = vrot.slane %v6763_v61, 1  ;;  %v7391_v53 = vsel %vm7006_vm7, %v7384_v1, %v7390_v58  ;;  %v8792_v12 = vld [vmem:[%s9547_s20 + $0x150] sm:$0xff]  ;;  %v8795_v58 = vld [vmem:[%s9547_s20 + $0x168] sm:$0xff] }
 0x540   : > { %3745 = vst.msk [vmem:[#allocation2 + $0x600] sm:$0xff] %vm3683_vm5, %v3611_v59  ;;  %v7821_v14 = vadd.f32 %v13616_v5, %v7820_v8  ;;  %v8675_v28 = vpop.f32.mrf.mxu3 }
 0x541   : > { %v8676_v60 = vadd.f32 %v13581_v57, %v8675_v28  ;;  %v7379_v47 = vsel %vm7006_vm7, %v7372_v40, %v7378_v23  ;;  %v7385_v0 = vsel %vm7006_vm7, %v7378_v23, %v7384_v1 }
 0x542   : > { %v8030_v38 = vadd.f32 %v8029_v34, %v7821_v14  ;;  %8058 = vmatmul.f32.gmra.mxu2 %v7379_v47 }
 0x543   : > { %v8853_v39 = vadd.f32 %v8789_v4, %v8676_v60 }
 0x544   : > { %v8239_v32 = vadd.f32 %v14453_v21, %v8030_v38  ;;  %v8793_v38 = vld [vmem:[%s9547_s20 + $0x158] sm:$0xff]  ;;  %v14456_v21 = vld [vmem:[#allocation136_spill] sm:$0xff] }
 0x545   : > { %v8917_v49 = vmax.f32 %v8853_v39, 0.0  ;;  %v3613_v29 = vpop.permute.xlu0 %3612 }
 0x546   : > { %v8328_v41 = vmax.f32 %v8239_v32, 0.0  ;;  %3746 = vst.msk [vmem:[#allocation2 + $0x618] sm:$0xff] %vm3683_vm5, %v3613_v29  ;;  %v6768_v30 = vld [vmem:[#allocation2 + $0x630] sm:$0x1] }
 0x547   : > { %8981 = vst [vmem:[%s12468_s16 + $0x138] sm:$0xff] %v8917_v49  ;;  %v6762_v26 = vld [vmem:[#allocation2 + $0x600] sm:$0xff]  ;;  %v7388_v16 = vrot.slane %v6768_v30, 1 }
 0x548   : > { %9206 = vmatmul.msk.f32.gmra.mxu3 %vm1156_vm0, %v8328_v41  ;;  %v7376_v56 = vrot.slane %v6762_v26, 1  ;;  %v8794_v26 = vld [vmem:[%s9547_s20 + $0x160] sm:$0xff] }
 0x54a   : > { %v7377_v17 = vsel %vm7006_vm7, %v7370_v7, %v7376_v56  ;;  %8061 = vmatmul.f32.gmra.mxu2 %v7385_v0  ;;  %v8678_v15 = vpop.f32.mrf.mxu3 }
 0x54b   : > { %7849 = vmatmul.f32.gmra.mxu1 %v7377_v17  ;;  %v8679_v48 = vadd.f32 %v13581_v57, %v8678_v15 }
 0x54d   : > { %v8854_v6 = vadd.f32 %v8790_v37, %v8679_v48  ;;  %v6765_v2 = vld [vmem:[#allocation2 + $0x618] sm:$0xff] }
 0x54e   : > { %v7382_v42 = vrot.slane %v6765_v2, 1  ;;  %v8032_v40 = vpop.f32.mrf.mxu2 }
 0x54f   : > { %v8918_v19 = vmax.f32 %v8854_v6, 0.0 }
 0x550   : > { %v7823_v20 = vpop.f32.mrf.mxu1  ;;  %v7383_v3 = vsel %vm7006_vm7, %v7376_v56, %v7382_v42  ;;  %v7389_v7 = vsel %vm7006_vm7, %v7382_v42, %v7388_v16 }
 0x551   : > { %8982 = vst [vmem:[%s12468_s16 + $0x140] sm:$0xff] %v8918_v19  ;;  %v7824_v31 = vadd.f32 %v13616_v5, %v7823_v20 }
 0x552   : > { %8064 = vmatmul.f32.gmra.mxu2 %v7391_v53 }
 0x553   : > { %v8033_v24 = vadd.f32 %v8032_v40, %v7824_v31  ;;  %7852 = vmatmul.f32.gmra.mxu1 %v7383_v3 }
 0x555   : > { %v8242_v63 = vadd.f32 %v14454_v46, %v8033_v24  ;;  %v14458_v46 = vld [vmem:[#allocation140_spill] sm:$0xff] }
 0x557   : > { %v8329_v52 = vmax.f32 %v8242_v63, 0.0  ;;  %v8681_v25 = vpop.f32.mrf.mxu3 }
 0x558   : > { %v7826_v9 = vpop.f32.mrf.mxu1  ;;  %v8682_v55 = vadd.f32 %v13581_v57, %v8681_v25  ;;  %v8796_v25 = vld [vmem:[%s9547_s20 + $0x170] sm:$0xff] }
 0x559   : > { %9207 = vmatmul.msk.f32.gmra.mxu3 %vm1156_vm0, %v8329_v52  ;;  %v7827_v22 = vadd.f32 %v13616_v5, %v7826_v9 }
 0x55a   : > { %v8855_v36 = vadd.f32 %v8791_v18, %v8682_v55 }
 0x55b   : > { %7855 = vmatmul.f32.gmra.mxu1 %v7389_v7 }
 0x55c   : > { %v8919_v11 = vmax.f32 %v8855_v36, 0.0  ;;  %v8035_v54 = vpop.f32.mrf.mxu2 }
 0x55d   : > { %v8036_v45 = vadd.f32 %v8035_v54, %v7827_v22 }
 0x55e   : > { %8983 = vst [vmem:[%s12468_s16 + $0x148] sm:$0xff] %v8919_v11 }
 0x55f   : > { %v8245_v51 = vadd.f32 %v14455_v43, %v8036_v45  ;;  %v8797_v45 = vld [vmem:[%s9547_s20 + $0x178] sm:$0xff] }
 0x560   : > { %v8684_v59 = vpop.f32.mrf.mxu3 }
 0x561   : > { %v8330_v61 = vmax.f32 %v8245_v51, 0.0  ;;  %v8685_v8 = vadd.f32 %v13581_v57, %v8684_v59 }
 0x563   : > { %v8856_v23 = vadd.f32 %v8792_v12, %v8685_v8  ;;  %9208 = vmatmul.msk.f32.gmra.mxu3 %vm1156_vm0, %v8330_v61 }
 0x565   : > { %v8920_v14 = vmax.f32 %v8856_v23, 0.0 }
 0x566   : > { %v8038_v34 = vpop.f32.mrf.mxu2 }
 0x567   : > { %8984 = vst [vmem:[%s12468_s16 + $0x150] sm:$0xff] %v8920_v14  ;;  %v7829_v28 = vpop.f32.mrf.mxu1 }
 0x568   : > { %v7830_v4 = vadd.f32 %v13616_v5, %v7829_v28 }
 0x56a   : > { %v8039_v60 = vadd.f32 %v8038_v34, %v7830_v4  ;;  %v8687_v47 = vpop.f32.mrf.mxu3  ;;  %v8798_v4 = vld [vmem:[%s9547_s20 + $0x180] sm:$0xff] }
 0x56b   : > { %v8688_v39 = vadd.f32 %v13581_v57, %v8687_v47 }
 0x56c   : > { %v8248_v32 = vadd.f32 %v14456_v21, %v8039_v60 }
 0x56d   : > { %v8857_v33 = vadd.f32 %v8793_v38, %v8688_v39 }
 0x56e   : > { %v8331_v49 = vmax.f32 %v8248_v32, 0.0 }
 0x56f   : > { %v8921_v29 = vmax.f32 %v8857_v33, 0.0 }
 0x570   : > { %9209 = vmatmul.msk.f32.gmra.mxu3 %vm1156_vm0, %v8331_v49 }
 0x571   : > { %8985 = vst [vmem:[%s12468_s16 + $0x158] sm:$0xff] %v8921_v29 }
 0x576   : > { %v8690_v41 = vpop.f32.mrf.mxu3 }
 0x577   : > { %v7832_v1 = vpop.f32.mrf.mxu1  ;;  %v8691_v56 = vadd.f32 %v13581_v57, %v8690_v41  ;;  %v8041_v17 = vpop.f32.mrf.mxu2  ;;  %v8799_v41 = vld [vmem:[%s9547_s20 + $0x188] sm:$0xff] }
 0x578   : > { %v7833_v0 = vadd.f32 %v13616_v5, %v7832_v1 }
 0x579   : > { %v8858_v15 = vadd.f32 %v8794_v26, %v8691_v56 }
 0x57a   : > { %v8042_v37 = vadd.f32 %v8041_v17, %v7833_v0 }
 0x57b   : > { %v8922_v48 = vmax.f32 %v8858_v15, 0.0 }
 0x57c   : > { %v8251_v6 = vadd.f32 %v14457_v35, %v8042_v37 }
 0x57d   : > { %8986 = vst [vmem:[%s12468_s16 + $0x160] sm:$0xff] %v8922_v48 }
 0x57e   : > { %v8332_v2 = vmax.f32 %v8251_v6, 0.0  ;;  %v8800_v6 = vld [vmem:[%s9547_s20 + $0x190] sm:$0xff] }
 0x57f   : > { %v7835_v42 = vpop.f32.mrf.mxu1 }
 0x580   : > { %v8693_v19 = vpop.f32.mrf.mxu3  ;;  %9210 = vmatmul.msk.f32.gmra.mxu3 %vm1156_vm0, %v8332_v2  ;;  %v7836_v3 = vadd.f32 %v13616_v5, %v7835_v42 }
 0x581   : > { %v8694_v20 = vadd.f32 %v13581_v57, %v8693_v19 }
 0x583   : > { %v8859_v31 = vadd.f32 %v8795_v58, %v8694_v20 }
 0x584   : > { %v8044_v53 = vpop.f32.mrf.mxu2 }
 0x585   : > { %v8923_v40 = vmax.f32 %v8859_v31, 0.0  ;;  %v8045_v24 = vadd.f32 %v8044_v53, %v7836_v3 }
 0x587   : > { %8987 = vst [vmem:[%s12468_s16 + $0x168] sm:$0xff] %v8923_v40  ;;  %v8254_v63 = vadd.f32 %v14458_v46, %v8045_v24  ;;  %v8801_v40 = vld [vmem:[%s9547_s20 + $0x198] sm:$0xff] }
 0x589   : > { %v8333_v30 = vmax.f32 %v8254_v63, 0.0 }
 0x58a   : > { %v8696_v52 = vpop.f32.mrf.mxu3 }
 0x58b   : > { %9211 = vmatmul.msk.f32.gmra.mxu3 %vm1156_vm0, %v8333_v30  ;;  %v8697_v18 = vadd.f32 %v13581_v57, %v8696_v52 }
 0x58d   : > { %v8860_v9 = vadd.f32 %v8796_v25, %v8697_v18 }
 0x58e   : > { %v8047_v7 = vpop.f32.mrf.mxu2 }
 0x58f   : > { %v8924_v55 = vmax.f32 %v8860_v9, 0.0  ;;  %v7838_v16 = vpop.f32.mrf.mxu1 }
 0x590   : > { %v7839_v36 = vadd.f32 %v13616_v5, %v7838_v16 }
 0x591   : > { %8988 = vst [vmem:[%s12468_s16 + $0x170] sm:$0xff] %v8924_v55  ;;  %v14459_v55 = vld [vmem:[#allocation62_spill] sm:$0xff] }
 0x592   : > { %v8048_v22 = vadd.f32 %v8047_v7, %v7839_v36 }
 0x594   : > { %v8257_v11 = vadd.f32 %v12281_v62, %v8048_v22 }
 0x596   : > { %v8699_v54 = vpop.f32.mrf.mxu3  ;;  %v8334_v43 = vmax.f32 %v8257_v11, 0.0  ;;  %v9316_v11 = vpack.i.bf16 %v14351_v27, %v14351_v27 }
 0x597   : > { %v8700_v51 = vadd.f32 %v13581_v57, %v8699_v54 }
 0x598   : > { %9212 = vmatmul.msk.f32.gmra.mxu3 %vm1156_vm0, %v8334_v43  ;;  %v8802_v43 = vld [vmem:[%s9547_s20 + $0x1a0] sm:$0xff]  ;;  %9317 = vrot.lane.b32.xlu0 %v9316_v11, %s9406_s23  ;;  %s9224_s23 = sshll.u32 %s9471_s28, 9  ;;  %s9007_s28 = scalar_lea.sflag [#allocation4], %s270_s13 }
 0x599   : > { %v8861_v59 = vadd.f32 %v8797_v45, %v8700_v51  ;;  %v14460_v51 = vld [vmem:[#allocation72_spill] sm:$0xff]  ;;  %s9018_s8 = scalar_lea.hbm %s13785_s7, %s9224_s23 }
 0x59a   : > { %s9021_s17 = sshll.u32 %s9018_s8, 4  ;;  %s9022_s17 = int_to_ptr.hbm [resolvable:$true] %s9021_s17 }
 0x59b   : > { %v8925_v12 = vmax.f32 %v8861_v59, 0.0  ;;  %s9354_s18 = sshra.s32 %s9022_s17, 4  ;;  %s9355_s18 = int_to_ptr.hbm [resolvable:$true] %s9354_s18 }
 0x59c   : > { %s9356_s22 = scalar_lea.hbm %s9355_s18, 512  ;;  %p9361_p0 = scmp.lt.s32.totalorder %s9355_s18, %s13785_s7 }
 0x59d   : > { %8989 = vst [vmem:[%s12468_s16 + $0x178] sm:$0xff] %v8925_v12  ;;  %p9357_p11 = scmp.ne.s32.totalorder %s9355_s18, %s9356_s22  ;;  %p9362_p1 = scmp.lt.s32.totalorder %s9360_s15, %s9356_s22 }
 0x59e   : > { %v8050_v23 = vpop.f32.mrf.mxu2 }
 0x59f   : > { %v7841_v61 = vpop.f32.mrf.mxu1  ;;  %p9358_p12 = pnand %p9357_p11, %p9488_p5  ;;  %p9363_p2 = por %p9362_p1, %p9361_p0 }
 0x5a0   : > { %v7842_v8 = vadd.f32 %v13616_v5, %v7841_v61 }
 0x5a1   : > { %p9359_p13 = pneg %p9358_p12 }
 0x5a2   : > { %v8051_v14 = vadd.f32 %v8050_v23, %v7842_v8  ;;  %v8803_v23 = vld [vmem:[%s9547_s20 + $0x1a8] sm:$0xff] }
 0x5a3   : > { %v8702_v28 = vpop.f32.mrf.mxu3  ;;  %p9364_p3 = pnand %p9363_p2, %p9359_p13 }
 0x5a4   : > { %v8260_v62 = vadd.f32 %v12305_v13, %v8051_v14  ;;  %v8703_v34 = vadd.f32 %v13581_v57, %v8702_v28 }
 0x5a6   : > { %v8335_v60 = vmax.f32 %v8260_v62, 0.0  ;;  %v8862_v47 = vadd.f32 %v8798_v4, %v8703_v34  ;;  %v14461_v62 = vld [vmem:[#allocation7_spill] sm:$0xff] }
 0x5a7   : > { %v7844_v39 = vpop.f32.mrf.mxu1  ;;  %9322 = vrot.lane.b32.xlu2 %v14461_v62, %s9407_s9 }
 0x5a8   : > { %v8926_v38 = vmax.f32 %v8862_v47, 0.0  ;;  %9213 = vmatmul.msk.f32.gmra.mxu3 %vm1156_vm0, %v8335_v60  ;;  %v7845_v21 = vadd.f32 %v13616_v5, %v7844_v39  ;;  %v8804_v60 = vld [vmem:[%s9547_s20 + $0x1b0] sm:$0xff] }
 0x5aa   : > { %8990 = vst [vmem:[%s12468_s16 + $0x180] sm:$0xff] %v8926_v38 }
 0x5ac   : > { %v8053_v32 = vpop.f32.mrf.mxu2 }
 0x5ad   : > { %v8054_v33 = vadd.f32 %v8053_v32, %v7845_v21  ;;  %v8805_v32 = vld [vmem:[%s9547_s20 + $0x1b8] sm:$0xff] }
 0x5af   : > { %v8263_v49 = vadd.f32 %v12322_v10, %v8054_v33 }
 0x5b1   : > { %v8336_v29 = vmax.f32 %v8263_v49, 0.0 }
 0x5b3   : > { %9214 = vmatmul.msk.f32.gmra.mxu3 %vm1156_vm0, %v8336_v29  ;;  %v8705_v13 = vpop.f32.mrf.mxu3 }
 0x5b4   : > { %v8706_v26 = vadd.f32 %v13581_v57, %v8705_v13 }
 0x5b6   : > { %v8863_v1 = vadd.f32 %v8799_v41, %v8706_v26  ;;  %v8056_v15 = vpop.f32.mrf.mxu2  ;;  %v8806_v41 = vld [vmem:[%s9547_s20 + $0x1c0] sm:$0xff] }
 0x5b7   : > { %v7847_v56 = vpop.f32.mrf.mxu1 }
 0x5b8   : > { %v7848_v0 = vadd.f32 %v13616_v5, %v7847_v56  ;;  %v8927_v17 = vmax.f32 %v8863_v1, 0.0 }
 0x5ba   : > { %v8057_v37 = vadd.f32 %v8056_v15, %v7848_v0  ;;  %8991 = vst [vmem:[%s12468_s16 + $0x188] sm:$0xff] %v8927_v17  ;;  %v8807_v17 = vld [vmem:[%s9547_s20 + $0x1c8] sm:$0xff] }
 0x5bc   : > { %v8266_v10 = vadd.f32 %v12351_v44, %v8057_v37 }
 0x5be   : > { %v8337_v48 = vmax.f32 %v8266_v10, 0.0  ;;  %v8708_v35 = vpop.f32.mrf.mxu3 }
 0x5bf   : > { %v8709_v2 = vadd.f32 %v13581_v57, %v8708_v35  ;;  %v8808_v35 = vld [vmem:[%s9547_s20 + $0x1d0] sm:$0xff] }
 0x5c0   : > { %9215 = vmatmul.msk.f32.gmra.mxu3 %vm1156_vm0, %v8337_v48 }
 0x5c1   : > { %v8864_v42 = vadd.f32 %v8800_v6, %v8709_v2 }
 0x5c3   : > { %v8928_v19 = vmax.f32 %v8864_v42, 0.0 }
 0x5c5   : > { %8992 = vst [vmem:[%s12468_s16 + $0x190] sm:$0xff] %v8928_v19  ;;  %v8059_v58 = vpop.f32.mrf.mxu2 }
 0x5c8   : > { %v7850_v20 = vpop.f32.mrf.mxu1 }
 0x5c9   : > { %v7851_v3 = vadd.f32 %v13616_v5, %v7850_v20 }
 0x5cb   : > { %v8060_v31 = vadd.f32 %v8059_v58, %v7851_v3  ;;  %v8711_v53 = vpop.f32.mrf.mxu3  ;;  %v8809_v58 = vld [vmem:[%s9547_s20 + $0x1d8] sm:$0xff] }
 0x5cc   : > { %v8712_v44 = vadd.f32 %v13581_v57, %v8711_v53 }
 0x5cd   : > { %v8269_v24 = vadd.f32 %v12372_v50, %v8060_v31  ;;  %v8062_v52 = vpop.f32.mrf.mxu2 }
 0x5ce   : > { %v8865_v46 = vadd.f32 %v8801_v40, %v8712_v44  ;;  %v8810_v40 = vld [vmem:[%s9547_s20 + $0x1e0] sm:$0xff] }
 0x5cf   : > { %v8338_v63 = vmax.f32 %v8269_v24, 0.0 }
 0x5d0   : > { %v8929_v30 = vmax.f32 %v8865_v46, 0.0  ;;  %v7853_v25 = vpop.f32.mrf.mxu1 }
 0x5d1   : > { %v7854_v18 = vadd.f32 %v13616_v5, %v7853_v25  ;;  %9216 = vmatmul.msk.f32.gmra.mxu3 %vm1156_vm0, %v8338_v63  ;;  %v2909_v63 = vpop.permute.xlu1 %2908 }
 0x5d2   : > { %8993 = vst [vmem:[%s12468_s16 + $0x198] sm:$0xff] %v8929_v30 }
 0x5d3   : > { %v8063_v9 = vadd.f32 %v8062_v52, %v7854_v18  ;;  %v8811_v18 = vld [vmem:[%s9547_s20 + $0x1e8] sm:$0xff] }
 0x5d5   : > { %v8272_v16 = vadd.f32 %v14459_v55, %v8063_v9  ;;  %v8065_v50 = vpop.f32.mrf.mxu2 }
 0x5d7   : > { %v8339_v36 = vmax.f32 %v8272_v16, 0.0 }
 0x5d8   : > { %v7856_v7 = vpop.f32.mrf.mxu1 }
 0x5d9   : > { %v7857_v22 = vadd.f32 %v13616_v5, %v7856_v7  ;;  %9217 = vmatmul.msk.f32.gmra.mxu3 %vm1156_vm0, %v8339_v36  ;;  %v8812_v7 = vld [vmem:[%s9547_s20 + $0x1f0] sm:$0xff] }
 0x5db   : > { %v8066_v54 = vadd.f32 %v8065_v50, %v7857_v22 }
 0x5dc   : > { %v8714_v45 = vpop.f32.mrf.mxu3 }
 0x5dd   : > { %v8275_v59 = vadd.f32 %v14460_v51, %v8066_v54  ;;  %v8715_v12 = vadd.f32 %v13581_v57, %v8714_v45  ;;  %v8813_v45 = vld [vmem:[%s9547_s20 + $0x1f8] sm:$0xff] }
 0x5df   : > { %v8340_v61 = vmax.f32 %v8275_v59, 0.0  ;;  %v8866_v5 = vadd.f32 %v8802_v43, %v8715_v12 }
 0x5e1   : > { %v8930_v8 = vmax.f32 %v8866_v5, 0.0  ;;  %9218 = vmatmul.msk.f32.gmra.mxu3 %vm1156_vm0, %v8340_v61 }
 0x5e3   : > { %8994 = vst [vmem:[%s12468_s16 + $0x1a0] sm:$0xff] %v8930_v8 }
 0x5e6   : > { %v8717_v27 = vpop.f32.mrf.mxu3 }
 0x5e7   : > { %v8718_v14 = vadd.f32 %v13581_v57, %v8717_v27 }
 0x5e9   : > { %v8867_v28 = vadd.f32 %v8803_v23, %v8718_v14 }
 0x5eb   : > { %v8931_v4 = vmax.f32 %v8867_v28, 0.0 }
 0x5ed   : > { %8995 = vst [vmem:[%s12468_s16 + $0x1a8] sm:$0xff] %v8931_v4 }
 0x5f3   : > { %v8720_v34 = vpop.f32.mrf.mxu3 }
 0x5f4   : > { %v8721_v47 = vadd.f32 %v13581_v57, %v8720_v34 }
 0x5f6   : > { %v8868_v38 = vadd.f32 %v8804_v60, %v8721_v47 }
 0x5f8   : > { %v8932_v39 = vmax.f32 %v8868_v38, 0.0 }
 0x5fa   : > { %8996 = vst [vmem:[%s12468_s16 + $0x1b0] sm:$0xff] %v8932_v39 }
 0x601   : > { %v9323_v30 = vpop.permute.xlu2 %9322 }
 0x603   : > { %v8723_v21 = vpop.f32.mrf.mxu3 }
 0x604   : > { %v8724_v33 = vadd.f32 %v13581_v57, %v8723_v21 }
 0x606   : > { %v8869_v49 = vadd.f32 %v8805_v32, %v8724_v33 }
 0x608   : > { %v8933_v29 = vmax.f32 %v8869_v49, 0.0 }
 0x60a   : > { %8997 = vst [vmem:[%s12468_s16 + $0x1b8] sm:$0xff] %v8933_v29  ;;  %v9318_v52 = vpop.permute.xlu0 %9317 }
 0x60e   : > { %v8726_v13 = vpop.f32.mrf.mxu3 }
 0x60f   : > { %v8727_v26 = vadd.f32 %v13581_v57, %v8726_v13 }
 0x611   : > { %v8870_v1 = vadd.f32 %v8806_v41, %v8727_v26 }
 0x613   : > { %v8934_v56 = vmax.f32 %v8870_v1, 0.0 }
 0x615   : > { %8998 = vst [vmem:[%s12468_s16 + $0x1c0] sm:$0xff] %v8934_v56 }
 0x61b   : > { %v8729_v0 = vpop.f32.mrf.mxu3 }
 0x61c   : > { %v8730_v15 = vadd.f32 %v13581_v57, %v8729_v0 }
 0x61e   : > { %v8871_v37 = vadd.f32 %v8807_v17, %v8730_v15 }
 0x620   : > { %v8935_v10 = vmax.f32 %v8871_v37, 0.0 }
 0x622   : > { %8999 = vst [vmem:[%s12468_s16 + $0x1c8] sm:$0xff] %v8935_v10 }
 0x62b   : > { %v8732_v48 = vpop.f32.mrf.mxu3 }
 0x62c   : > { %v8733_v6 = vadd.f32 %v13581_v57, %v8732_v48 }
 0x62e   : > { %v8872_v2 = vadd.f32 %v8808_v35, %v8733_v6 }
 0x630   : > { %v8936_v42 = vmax.f32 %v8872_v2, 0.0 }
 0x632   : > { %9000 = vst [vmem:[%s12468_s16 + $0x1d0] sm:$0xff] %v8936_v42 }
 0x636   : > { %v8735_v19 = vpop.f32.mrf.mxu3 }
 0x637   : > { %v8736_v20 = vadd.f32 %v13581_v57, %v8735_v19 }
 0x639   : > { %v8873_v3 = vadd.f32 %v8809_v58, %v8736_v20 }
 0x63b   : > { %v8937_v31 = vmax.f32 %v8873_v3, 0.0 }
 0x63d   : > { %9001 = vst [vmem:[%s12468_s16 + $0x1d8] sm:$0xff] %v8937_v31 }
 0x643   : > { %v8738_v53 = vpop.f32.mrf.mxu3 }
 0x644   : > { %v8739_v44 = vadd.f32 %v13581_v57, %v8738_v53 }
 0x646   : > { %v8874_v24 = vadd.f32 %v8810_v40, %v8739_v44 }
 0x648   : > { %v8938_v46 = vmax.f32 %v8874_v24, 0.0 }
 0x64a   : > { %9002 = vst [vmem:[%s12468_s16 + $0x1e0] sm:$0xff] %v8938_v46 }
 0x654   : > { %v8741_v25 = vpop.f32.mrf.mxu3 }
 0x655   : > { %v8742_v9 = vadd.f32 %v13581_v57, %v8741_v25 }
 0x657   : > { %v8875_v55 = vadd.f32 %v8811_v18, %v8742_v9 }
 0x659   : > { %v8939_v16 = vmax.f32 %v8875_v55, 0.0 }
 0x65b   : > { %9003 = vst [vmem:[%s12468_s16 + $0x1e8] sm:$0xff] %v8939_v16 }
 0x65c   : > { %v8744_v36 = vpop.f32.mrf.mxu3 }
 0x65d   : > { %v8745_v22 = vadd.f32 %v13581_v57, %v8744_v36 }
 0x65f   : > { %v8876_v50 = vadd.f32 %v8812_v7, %v8745_v22 }
 0x661   : > { %v8940_v11 = vmax.f32 %v8876_v50, 0.0 }
 0x663   : > { %9004 = vst [vmem:[%s12468_s16 + $0x1f0] sm:$0xff] %v8940_v11 }
 0x664   : > { %v8747_v54 = vpop.f32.mrf.mxu3 }
 0x665   : > { %v8748_v43 = vadd.f32 %v13581_v57, %v8747_v54 }
 0x667   : > { %v8877_v51 = vadd.f32 %v8813_v45, %v8748_v43 }
 0x669   : > { %v8941_v59 = vmax.f32 %v8877_v51, 0.0 }
 0x66b   : > { %9005 = vst [vmem:[%s12468_s16 + $0x1f8] sm:$0xff] %v8941_v59 }
 0x66c   : > { %9367 = shalt.err (!%p9364_p3)
}
 0x66d   : > { %s9408_s13 = smov 128   ;;  %s9409_s16 = smov 8  }
 0x66e   : > { %9261 = dma.vmem_to_hbm [thread:$0]  (%p9488_p5), %s9020_s14, 8192, %s9022_s17, %s9007_s28, %s9408_s13, %s9408_s13, %s9409_s16  }
 0x66f PF: > { %p9267_p4 = scmp.ge.s32.totalorder %s9402_s27, 2  ;;  %s9036_s9 = sand.u32 1, %s9390_s24  }
 0x670   : > { %s9037_s29 = scalar_lea.sflag [#allocation4], %s9036_s9 }
 0x671   : > { %p9264_p7 = pnand %p9267_p4, %p9492_p6 }
 0x673   : > { %p9265_p8 = pneg %p9264_p7 }
 0x675   : > { %9385 = dma.done.wait (%p9265_p8), %s9037_s29, 8192  }
 0x676   : > { %9387 = vsyncadd (%p9265_p8), %s9037_s29, 4294959104  ;;  %p17_p9 = scmp.ge.s32.totalorder %s9475_s30, 4   ;;  %s14462_s24 = smov %s9394_s25 }
 0x677   : > { %s14463_s25 = smov %s9398_s26  ;;  %s14464_s26 = smov %s9486_s10 }
 0x678   : > { %s14465_s27 = smov %s9475_s30  ;;  %19 = sbr.rel (!%p17_p9) target bundleno = 3 (0x3), region = 83 }
 0x67d   :  { %9043 = vsyncpa [#allocation4], 1 }
 0x67e   :  { %9045 = vsyncpa [#allocation4 + $0x1], 1 }

</bundles_post_ra>
